<compile_context>
chip_gen: v6e
topology: v6e:2x2x1
jax: 0.10.0
libtpu: 0.0.40
codegen_flags: <defaults>
</compile_context>

<pallas_src>
import jax
import jax.numpy as jnp
from jax import lax
from jax.experimental import pallas as pl
from jax.experimental.pallas import tpu as pltpu

# ----------------------- config (mirrors cfg.model.*) -----------------------
CFG = dict(
    encoding=dict(use=True, num_freqs_coords=6, num_freqs_viewdir=4),
    use_fine_mlp=False,
    mlp=dict(hidden=64, viewdir_hidden=32),
    interval_sampler=dict(num_samples=32, near=2.0, far=6.0),
    volume_renderer=dict(white_background=False, radiance_noise_std=0.0),
)

H = CFG["mlp"]["hidden"]
HV = CFG["mlp"]["viewdir_hidden"]
ENC_XYZ_DIM = 3 * (1 + 2 * CFG["encoding"]["num_freqs_coords"])   # 39
ENC_DIR_DIM = 3 * (1 + 2 * CFG["encoding"]["num_freqs_viewdir"])  # 27

VMEM_LIMIT_BYTES = 32 * 1024 * 1024   # safe on v5e/v6e/v7x, above v5e's 16MiB default


def _choose_tile(n, cap, align):
    """Largest tile <= cap that divides n (aligned), else the full extent."""
    if n <= cap:
        return n
    t = (cap // align) * align
    while t >= align:
        if n % t == 0:
            return t
        t -= align
    return n  # fallback: single full tile (always legal)


# ------------------------------ Pallas kernels ------------------------------
def _encode_cm(x, num_freqs):
    """HighFreqEncoding on channel-major input x: (3, n) -> (3*(1+2K), n).

    Ordering matches [x, sin(2^0 x), cos(2^0 x), sin(2^1 x), ...].  Only one
    sin and one cos are evaluated per element; the higher frequencies come
    from the angle-doubling recurrence (sin 2a = 2 s c, cos 2a = 2 c^2 - 1),
    moving the work off the single EUP slot onto the VALUs.
    """
    feats = [x]
    s = jnp.sin(x)
    c = jnp.cos(x)
    for i in range(num_freqs):
        feats.append(s)
        feats.append(c)
        if i + 1 < num_freqs:
            s, c = 2.0 * s * c, 2.0 * c * c - 1.0
    return jnp.concatenate(feats, axis=0)


def nerf_mlp_kernel(pts_ref, dirs_ref,
                    w0, b0, w1, b1, w2h, w2x, b2, w3, b3,
                    wfs, bfs, wr1f, wr1d, br1, wr2, br2,
                    out_ref):
    """Positional encoding + full NeRF MLP for one channel-major tile.

    pts_ref/dirs_ref: (3, tile_n); out_ref: (4, tile_n) = [r, g, b, sigma] raw.
    Weights are stored transposed (fan_out, fan_in) in bf16; biases are
    (fan_out, 1) f32 added to the f32 MXU accumulator.
    """
    x_enc = _encode_cm(pts_ref[...], CFG["encoding"]["num_freqs_coords"])    # (39, n)
    d_enc = _encode_cm(dirs_ref[...], CFG["encoding"]["num_freqs_viewdir"])  # (27, n)

    def dot(w_ref, a):
        # bf16 x bf16 MXU matmul, f32 accumulation.
        return jnp.dot(w_ref[...], a.astype(jnp.bfloat16),
                       preferred_element_type=jnp.float32)

    h = jax.nn.relu(dot(w0, x_enc) + b0[...])
    h = jax.nn.relu(dot(w1, h) + b1[...])
    # skip connection via split weights (no lane/sublane concat)
    h = jax.nn.relu(dot(w2h, h) + dot(w2x, x_enc) + b2[...])
    h = jax.nn.relu(dot(w3, h) + b3[...])

    fs = dot(wfs, h) + bfs[...]            # fused [feature | sigma] head: (H+1, n)
    feat = fs[0:H, :]                      # (H, n)
    sigma = fs[H:H + 1, :]                 # (1, n) raw density (relu in renderer)

    hv = jax.nn.relu(dot(wr1f, feat) + dot(wr1d, d_enc) + br1[...])
    rgb = dot(wr2, hv) + br2[...]          # (3, n) raw rgb (sigmoid in renderer)

    out_ref[...] = jnp.concatenate([rgb, sigma], axis=0)   # lane-dense (4, n) store


def volume_render_kernel(rad_ref, depth_ref, dirs_ref, mask_ref,
                         rgb_ref, depth_map_ref, acc_ref, weights_ref):
    """Volume rendering for one tile of rays.

    rad_ref: (4, tile_r, S) channel-major raw radiance; mask_ref: (S, S)
    strictly-lower-triangular constant (hoisted out of the kernel).
    """
    depth = depth_ref[...]                            # (tile_r, S)
    dirs = dirs_ref[...]                              # (tile_r, 3)
    tr, S = depth.shape

    sigma = jax.nn.relu(rad_ref[3])                   # (tile_r, S)

    dists = jnp.concatenate(
        [depth[:, 1:] - depth[:, :-1],
         jnp.full((tr, 1), 1e10, jnp.float32)], axis=-1)
    dists = dists * jnp.sqrt(jnp.sum(dirs * dirs, axis=-1, keepdims=True))

    alpha = 1.0 - jnp.exp(-sigma * dists)             # (tile_r, S)

    # exclusive cumulative transmittance via the hoisted strict mask matmul
    log_t = jnp.log(1.0 - alpha + 1e-10)
    trans = jnp.exp(jnp.dot(log_t, mask_ref[...],
                            preferred_element_type=jnp.float32))
    weights = alpha * trans                           # (tile_r, S)

    rgb_cols = [jnp.sum(weights * jax.nn.sigmoid(rad_ref[c]),
                        axis=1, keepdims=True) for c in range(3)]
    rgb = jnp.concatenate(rgb_cols, axis=-1)          # (tile_r, 3)
    acc = jnp.sum(weights, axis=1, keepdims=True)     # (tile_r, 1)
    if CFG["volume_renderer"]["white_background"]:
        rgb = rgb + (1.0 - acc)
    # TODO(synk): radiance_noise_std > 0 would need pltpu.prng_* noise; cfg = 0.

    rgb_ref[...] = rgb
    depth_map_ref[...] = jnp.sum(weights * depth, axis=1, keepdims=True)
    acc_ref[...] = acc
    weights_ref[...] = weights


# ------------------------------ kernel wrappers ------------------------------
def run_nerf_mlp(pts_cm, dirs_cm, params):
    """pts_cm/dirs_cm: (3, N) f32 -> raw radiance (4, N) f32, channel-major."""
    N = pts_cm.shape[1]
    tile_n = _choose_tile(N, cap=4096, align=128)
    in_specs = ([pl.BlockSpec((3, tile_n), lambda i: (0, i)),
                 pl.BlockSpec((3, tile_n), lambda i: (0, i))]
                + [pl.BlockSpec(p.shape, lambda i: (0, 0)) for p in params])
    out_spec = pl.BlockSpec((4, tile_n), lambda i: (0, i))
    return pl.pallas_call(
        nerf_mlp_kernel,
        out_shape=jax.ShapeDtypeStruct((4, N), jnp.float32),
        grid_spec=pltpu.PrefetchScalarGridSpec(
            num_scalar_prefetch=0,
            grid=(N // tile_n,),
            in_specs=in_specs,
            out_specs=out_spec),
        compiler_params=pltpu.CompilerParams(
            dimension_semantics=("parallel",),
            vmem_limit_bytes=VMEM_LIMIT_BYTES),
    )(pts_cm, dirs_cm, *params)


def run_volume_renderer(radiance_cm, depth_values, ray_dirs, excl_mask):
    """radiance_cm: (4, R, S); depth_values: (R, S); ray_dirs: (R, 3)."""
    R, S = depth_values.shape
    tile_r = _choose_tile(R, cap=512, align=8)
    out_shape = (jax.ShapeDtypeStruct((R, 3), jnp.float32),   # rgb map
                 jax.ShapeDtypeStruct((R, 1), jnp.float32),   # depth map
                 jax.ShapeDtypeStruct((R, 1), jnp.float32),   # acc map
                 jax.ShapeDtypeStruct((R, S), jnp.float32))   # weights
    in_specs = [pl.BlockSpec((4, tile_r, S), lambda i: (0, i, 0)),
                pl.BlockSpec((tile_r, S), lambda i: (i, 0)),
                pl.BlockSpec((tile_r, 3), lambda i: (i, 0)),
                pl.BlockSpec((S, S), lambda i: (0, 0))]
    out_specs = (pl.BlockSpec((tile_r, 3), lambda i: (i, 0)),
                 pl.BlockSpec((tile_r, 1), lambda i: (i, 0)),
                 pl.BlockSpec((tile_r, 1), lambda i: (i, 0)),
                 pl.BlockSpec((tile_r, S), lambda i: (i, 0)))
    return pl.pallas_call(
        volume_render_kernel,
        out_shape=out_shape,
        grid_spec=pltpu.PrefetchScalarGridSpec(
            num_scalar_prefetch=0,
            grid=(R // tile_r,),
            in_specs=in_specs,
            out_specs=out_specs),
        compiler_params=pltpu.CompilerParams(
            dimension_semantics=("parallel",),
            vmem_limit_bytes=VMEM_LIMIT_BYTES),
    )(radiance_cm, depth_values, ray_dirs, excl_mask)


# ------------------------------ parameters -----------------------------------
def _linear(key, fan_in, fan_out):
    kw, kb = jax.random.split(key)
    bound = 1.0 / float(fan_in) ** 0.5                # PyTorch nn.Linear init
    w = jax.random.uniform(kw, (fan_in, fan_out), jnp.float32, -bound, bound)
    b = jax.random.uniform(kb, (fan_out,), jnp.float32, -bound, bound)
    return w, b


def init_params(key):
    """Init logically like PyTorch, then store transposed bf16 weights and
    (fan_out, 1) f32 biases in the layout the kernel consumes."""
    ks = jax.random.split(key, 8)
    w0, b0 = _linear(ks[0], ENC_XYZ_DIM, H)
    w1, b1 = _linear(ks[1], H, H)
    w2, b2 = _linear(ks[2], H + ENC_XYZ_DIM, H)       # skip layer
    w3, b3 = _linear(ks[3], H, H)
    wsig, bsig = _linear(ks[4], H, 1)
    wfeat, bfeat = _linear(ks[5], H, H)
    wr1, br1 = _linear(ks[6], H + ENC_DIR_DIM, HV)
    wr2, br2 = _linear(ks[7], HV, 3)

    def t(w):            # (fan_in, fan_out) -> (fan_out, fan_in) bf16
        return jnp.asarray(w.T, jnp.bfloat16)

    def col(b):          # (fan_out,) -> (fan_out, 1) f32
        return b.reshape(-1, 1)

    return (
        t(w0), col(b0),
        t(w1), col(b1),
        t(w2[:H]), t(w2[H:]), col(b2),                        # split skip weights
        t(w3), col(b3),
        jnp.concatenate([t(wfeat), t(wsig)], axis=0),         # fused (H+1, H) head
        jnp.concatenate([col(bfeat), col(bsig)], axis=0),     # (H+1, 1)
        t(wr1[:H]), t(wr1[H:]), col(br1),                     # split viewdir weights
        t(wr2), col(br2),
    )


# ------------------------------ forward pass ---------------------------------
def nerf_forward(rays, params):
    """Coarse NeRF forward.  rays: [num_rays, 8]."""
    origins, dirs = rays[:, 0:3], rays[:, 3:6]
    R = origins.shape[0]
    S = CFG["interval_sampler"]["num_samples"]
    near = CFG["interval_sampler"]["near"]
    far = CFG["interval_sampler"]["far"]

    # IntervalSampler(ray_count=R): deterministic (perturb=0) uniform depths.
    # The reference module calls the sampler with only ray_count, so it uses
    # the configured near/far, not the per-ray columns rays[:, 6:8].
    t = jnp.linspace(0.0, 1.0, S, dtype=jnp.float32)
    depth_values = jnp.broadcast_to(near * (1.0 - t) + far * t, (R, S))

    # intervals_to_ray_points + viewdir expansion, channel-major: (3, R*S)
    pts_cm = origins.T[:, :, None] + dirs.T[:, :, None] * depth_values[None]
    pts_cm = pts_cm.reshape(3, R * S)
    dirs_cm = jnp.broadcast_to(dirs.T[:, :, None], (3, R, S)).reshape(3, R * S)

    # encoding + MLP (Pallas kernel); output stays channel-major -> free reshape
    radiance = run_nerf_mlp(pts_cm, dirs_cm, params)          # (4, R*S)
    radiance = radiance.reshape(4, R, S)

    # strictly-lower-triangular mask for exclusive cumulative transmittance
    ii = jnp.arange(S, dtype=jnp.int32)[:, None]
    jj = jnp.arange(S, dtype=jnp.int32)[None, :]
    excl_mask = (ii < jj).astype(jnp.float32)

    # volume rendering (Pallas kernel)
    rgb_map, depth_map, acc_map, weights = run_volume_renderer(
        radiance, depth_values, dirs, excl_mask)

    coarse_bundle = dict(rgb=rgb_map,
                         depth=depth_map[:, 0],
                         acc=acc_map[:, 0],
                         weights=weights)
    # TODO(synk): fine branch (HierarchicalPDFSampler + mlp_fine) skipped,
    # matching cfg.model.use_fine_mlp = False in the reference module.
    return coarse_bundle, None


# ----------------------------------- main ------------------------------------
if __name__ == "__main__":
    key = jax.random.PRNGKey(0)
    k_rays, k_params = jax.random.split(key)

    num_rays = 64
    ko, kd = jax.random.split(k_rays)
    origins = jax.random.normal(ko, (num_rays, 3), jnp.float32)
    dirs = jax.random.normal(kd, (num_rays, 3), jnp.float32)
    dirs = dirs / jnp.linalg.norm(dirs, axis=-1, keepdims=True)
    near = jnp.full((num_rays, 1), CFG["interval_sampler"]["near"], jnp.float32)
    far = jnp.full((num_rays, 1), CFG["interval_sampler"]["far"], jnp.float32)
    rays = jnp.concatenate([origins, dirs, near, far], axis=-1)  # (64, 8)

    params = init_params(k_params)

    coarse_bundle, fine_bundle = nerf_forward(rays, params)
    jax.block_until_ready(coarse_bundle)

    S = CFG["interval_sampler"]["num_samples"]
    assert coarse_bundle["rgb"].shape == (num_rays, 3)
    assert coarse_bundle["depth"].shape == (num_rays,)
    assert coarse_bundle["acc"].shape == (num_rays,)
    assert coarse_bundle["weights"].shape == (num_rays, S)
    assert fine_bundle is None
    assert jnp.all(jnp.isfinite(coarse_bundle["rgb"]))
    assert jnp.all(jnp.isfinite(coarse_bundle["depth"]))
    assert jnp.all(jnp.isfinite(coarse_bundle["weights"]))
    assert jnp.all(coarse_bundle["weights"] >= 0.0)

    print("KERNEL_OK")
</pallas_src>

<mosaic_0001>
module attributes {stable_mosaic.version = 11 : i64} {
  func.func @nerf_mlp_kernel(%arg0: i32, %arg1: memref<3x2048xf32, #tpu.memory_space<vmem>>, %arg2: memref<3x2048xf32, #tpu.memory_space<vmem>>, %arg3: memref<64x39xbf16, #tpu.memory_space<vmem>>, %arg4: memref<64x1xf32, #tpu.memory_space<vmem>>, %arg5: memref<64x64xbf16, #tpu.memory_space<vmem>>, %arg6: memref<64x1xf32, #tpu.memory_space<vmem>>, %arg7: memref<64x64xbf16, #tpu.memory_space<vmem>>, %arg8: memref<64x39xbf16, #tpu.memory_space<vmem>>, %arg9: memref<64x1xf32, #tpu.memory_space<vmem>>, %arg10: memref<64x64xbf16, #tpu.memory_space<vmem>>, %arg11: memref<64x1xf32, #tpu.memory_space<vmem>>, %arg12: memref<65x64xbf16, #tpu.memory_space<vmem>>, %arg13: memref<65x1xf32, #tpu.memory_space<vmem>>, %arg14: memref<32x64xbf16, #tpu.memory_space<vmem>>, %arg15: memref<32x27xbf16, #tpu.memory_space<vmem>>, %arg16: memref<32x1xf32, #tpu.memory_space<vmem>>, %arg17: memref<3x32xbf16, #tpu.memory_space<vmem>>, %arg18: memref<3x1xf32, #tpu.memory_space<vmem>>, %arg19: memref<4x2048xf32, #tpu.memory_space<vmem>>) attributes {dimension_semantics = [#tpu.dimension_semantics<parallel>], iteration_bounds = array<i64: 1>, scalar_prefetch = 0 : i64, scratch_operands = 0 : i64, tpu.core_type = #tpu.core_type<tc>, window_params = [{transform_indices = @transform_0, window_bounds = array<i64: 3, 2048>}, {transform_indices = @transform_1, window_bounds = array<i64: 3, 2048>}, {pipeline_mode = #tpu.pipeline_mode<synchronous>, transform_indices = @transform_2, window_bounds = array<i64: 64, 39>}, {pipeline_mode = #tpu.pipeline_mode<synchronous>, transform_indices = @transform_3, window_bounds = array<i64: 64, 1>}, {pipeline_mode = #tpu.pipeline_mode<synchronous>, transform_indices = @transform_4, window_bounds = array<i64: 64, 64>}, {pipeline_mode = #tpu.pipeline_mode<synchronous>, transform_indices = @transform_5, window_bounds = array<i64: 64, 1>}, {pipeline_mode = #tpu.pipeline_mode<synchronous>, transform_indices = @transform_6, window_bounds = array<i64: 64, 64>}, {pipeline_mode = #tpu.pipeline_mode<synchronous>, transform_indices = @transform_7, window_bounds = array<i64: 64, 39>}, {pipeline_mode = #tpu.pipeline_mode<synchronous>, transform_indices = @transform_8, window_bounds = array<i64: 64, 1>}, {pipeline_mode = #tpu.pipeline_mode<synchronous>, transform_indices = @transform_9, window_bounds = array<i64: 64, 64>}, {pipeline_mode = #tpu.pipeline_mode<synchronous>, transform_indices = @transform_10, window_bounds = array<i64: 64, 1>}, {pipeline_mode = #tpu.pipeline_mode<synchronous>, transform_indices = @transform_11, window_bounds = array<i64: 65, 64>}, {pipeline_mode = #tpu.pipeline_mode<synchronous>, transform_indices = @transform_12, window_bounds = array<i64: 65, 1>}, {pipeline_mode = #tpu.pipeline_mode<synchronous>, transform_indices = @transform_13, window_bounds = array<i64: 32, 64>}, {pipeline_mode = #tpu.pipeline_mode<synchronous>, transform_indices = @transform_14, window_bounds = array<i64: 32, 27>}, {pipeline_mode = #tpu.pipeline_mode<synchronous>, transform_indices = @transform_15, window_bounds = array<i64: 32, 1>}, {pipeline_mode = #tpu.pipeline_mode<synchronous>, transform_indices = @transform_16, window_bounds = array<i64: 3, 32>}, {pipeline_mode = #tpu.pipeline_mode<synchronous>, transform_indices = @transform_17, window_bounds = array<i64: 3, 1>}, {transform_indices = @transform_18, window_bounds = array<i64: 4, 2048>}]} {
    %c0 = arith.constant 0 : index
    %c0_0 = arith.constant 0 : index
    %0 = vector.load %arg1[%c0, %c0_0] : memref<3x2048xf32, #tpu.memory_space<vmem>>, vector<3x2048xf32>
    %1 = math.sin %0 : vector<3x2048xf32>
    %2 = math.cos %0 : vector<3x2048xf32>
    %cst = arith.constant 2.000000e+00 : f32
    %3 = vector.broadcast %cst : f32 to vector<3x2048xf32>
    %4 = arith.mulf %3, %1 : vector<3x2048xf32>
    %5 = arith.mulf %4, %2 : vector<3x2048xf32>
    %cst_1 = arith.constant 2.000000e+00 : f32
    %6 = vector.broadcast %cst_1 : f32 to vector<3x2048xf32>
    %7 = arith.mulf %6, %2 : vector<3x2048xf32>
    %8 = arith.mulf %7, %2 : vector<3x2048xf32>
    %cst_2 = arith.constant 1.000000e+00 : f32
    %9 = vector.broadcast %cst_2 : f32 to vector<3x2048xf32>
    %10 = arith.subf %8, %9 : vector<3x2048xf32>
    %cst_3 = arith.constant 2.000000e+00 : f32
    %11 = vector.broadcast %cst_3 : f32 to vector<3x2048xf32>
    %12 = arith.mulf %11, %5 : vector<3x2048xf32>
    %13 = arith.mulf %12, %10 : vector<3x2048xf32>
    %cst_4 = arith.constant 2.000000e+00 : f32
    %14 = vector.broadcast %cst_4 : f32 to vector<3x2048xf32>
    %15 = arith.mulf %14, %10 : vector<3x2048xf32>
    %16 = arith.mulf %15, %10 : vector<3x2048xf32>
    %cst_5 = arith.constant 1.000000e+00 : f32
    %17 = vector.broadcast %cst_5 : f32 to vector<3x2048xf32>
    %18 = arith.subf %16, %17 : vector<3x2048xf32>
    %cst_6 = arith.constant 2.000000e+00 : f32
    %19 = vector.broadcast %cst_6 : f32 to vector<3x2048xf32>
    %20 = arith.mulf %19, %13 : vector<3x2048xf32>
    %21 = arith.mulf %20, %18 : vector<3x2048xf32>
    %cst_7 = arith.constant 2.000000e+00 : f32
    %22 = vector.broadcast %cst_7 : f32 to vector<3x2048xf32>
    %23 = arith.mulf %22, %18 : vector<3x2048xf32>
    %24 = arith.mulf %23, %18 : vector<3x2048xf32>
    %cst_8 = arith.constant 1.000000e+00 : f32
    %25 = vector.broadcast %cst_8 : f32 to vector<3x2048xf32>
    %26 = arith.subf %24, %25 : vector<3x2048xf32>
    %cst_9 = arith.constant 2.000000e+00 : f32
    %27 = vector.broadcast %cst_9 : f32 to vector<3x2048xf32>
    %28 = arith.mulf %27, %21 : vector<3x2048xf32>
    %29 = arith.mulf %28, %26 : vector<3x2048xf32>
    %cst_10 = arith.constant 2.000000e+00 : f32
    %30 = vector.broadcast %cst_10 : f32 to vector<3x2048xf32>
    %31 = arith.mulf %30, %26 : vector<3x2048xf32>
    %32 = arith.mulf %31, %26 : vector<3x2048xf32>
    %cst_11 = arith.constant 1.000000e+00 : f32
    %33 = vector.broadcast %cst_11 : f32 to vector<3x2048xf32>
    %34 = arith.subf %32, %33 : vector<3x2048xf32>
    %cst_12 = arith.constant 2.000000e+00 : f32
    %35 = vector.broadcast %cst_12 : f32 to vector<3x2048xf32>
    %36 = arith.mulf %35, %29 : vector<3x2048xf32>
    %37 = arith.mulf %36, %34 : vector<3x2048xf32>
    %cst_13 = arith.constant 2.000000e+00 : f32
    %38 = vector.broadcast %cst_13 : f32 to vector<3x2048xf32>
    %39 = arith.mulf %38, %34 : vector<3x2048xf32>
    %40 = arith.mulf %39, %34 : vector<3x2048xf32>
    %cst_14 = arith.constant 1.000000e+00 : f32
    %41 = vector.broadcast %cst_14 : f32 to vector<3x2048xf32>
    %42 = arith.subf %40, %41 : vector<3x2048xf32>
    %43 = tpu.concatenate %0, %1, %2, %5, %10, %13, %18, %21, %26, %29, %34, %37, %42 in 0 : vector<3x2048xf32>, vector<3x2048xf32>, vector<3x2048xf32>, vector<3x2048xf32>, vector<3x2048xf32>, vector<3x2048xf32>, vector<3x2048xf32>, vector<3x2048xf32>, vector<3x2048xf32>, vector<3x2048xf32>, vector<3x2048xf32>, vector<3x2048xf32>, vector<3x2048xf32> -> vector<39x2048xf32>
    %c0_15 = arith.constant 0 : index
    %c0_16 = arith.constant 0 : index
    %44 = vector.load %arg2[%c0_15, %c0_16] : memref<3x2048xf32, #tpu.memory_space<vmem>>, vector<3x2048xf32>
    %45 = math.sin %44 : vector<3x2048xf32>
    %46 = math.cos %44 : vector<3x2048xf32>
    %cst_17 = arith.constant 2.000000e+00 : f32
    %47 = vector.broadcast %cst_17 : f32 to vector<3x2048xf32>
    %48 = arith.mulf %47, %45 : vector<3x2048xf32>
    %49 = arith.mulf %48, %46 : vector<3x2048xf32>
    %cst_18 = arith.constant 2.000000e+00 : f32
    %50 = vector.broadcast %cst_18 : f32 to vector<3x2048xf32>
    %51 = arith.mulf %50, %46 : vector<3x2048xf32>
    %52 = arith.mulf %51, %46 : vector<3x2048xf32>
    %cst_19 = arith.constant 1.000000e+00 : f32
    %53 = vector.broadcast %cst_19 : f32 to vector<3x2048xf32>
    %54 = arith.subf %52, %53 : vector<3x2048xf32>
    %cst_20 = arith.constant 2.000000e+00 : f32
    %55 = vector.broadcast %cst_20 : f32 to vector<3x2048xf32>
    %56 = arith.mulf %55, %49 : vector<3x2048xf32>
    %57 = arith.mulf %56, %54 : vector<3x2048xf32>
    %cst_21 = arith.constant 2.000000e+00 : f32
    %58 = vector.broadcast %cst_21 : f32 to vector<3x2048xf32>
    %59 = arith.mulf %58, %54 : vector<3x2048xf32>
    %60 = arith.mulf %59, %54 : vector<3x2048xf32>
    %cst_22 = arith.constant 1.000000e+00 : f32
    %61 = vector.broadcast %cst_22 : f32 to vector<3x2048xf32>
    %62 = arith.subf %60, %61 : vector<3x2048xf32>
    %cst_23 = arith.constant 2.000000e+00 : f32
    %63 = vector.broadcast %cst_23 : f32 to vector<3x2048xf32>
    %64 = arith.mulf %63, %57 : vector<3x2048xf32>
    %65 = arith.mulf %64, %62 : vector<3x2048xf32>
    %cst_24 = arith.constant 2.000000e+00 : f32
    %66 = vector.broadcast %cst_24 : f32 to vector<3x2048xf32>
    %67 = arith.mulf %66, %62 : vector<3x2048xf32>
    %68 = arith.mulf %67, %62 : vector<3x2048xf32>
    %cst_25 = arith.constant 1.000000e+00 : f32
    %69 = vector.broadcast %cst_25 : f32 to vector<3x2048xf32>
    %70 = arith.subf %68, %69 : vector<3x2048xf32>
    %71 = tpu.concatenate %44, %45, %46, %49, %54, %57, %62, %65, %70 in 0 : vector<3x2048xf32>, vector<3x2048xf32>, vector<3x2048xf32>, vector<3x2048xf32>, vector<3x2048xf32>, vector<3x2048xf32>, vector<3x2048xf32>, vector<3x2048xf32>, vector<3x2048xf32> -> vector<27x2048xf32>
    %c0_26 = arith.constant 0 : index
    %c0_27 = arith.constant 0 : index
    %72 = vector.load %arg3[%c0_26, %c0_27] : memref<64x39xbf16, #tpu.memory_space<vmem>>, vector<64x39xbf16>
    %73 = arith.truncf %43 : vector<39x2048xf32> to vector<39x2048xbf16>
    %cst_28 = arith.constant dense<0.000000e+00> : vector<64x2048xf32>
    %74 = tpu.matmul %72, %73, %cst_28 {dimension_numbers = #tpu.dot_dimension_numbers<[1], [0], [0], [1], [0, 0, 1, 1], [], []>} : vector<64x39xbf16>, vector<39x2048xbf16>, vector<64x2048xf32> -> vector<64x2048xf32>
    %c0_29 = arith.constant 0 : index
    %c0_30 = arith.constant 0 : index
    %75 = vector.load %arg4[%c0_29, %c0_30] : memref<64x1xf32, #tpu.memory_space<vmem>>, vector<64x1xf32>
    %76 = vector.broadcast %75 : vector<64x1xf32> to vector<64x2048xf32>
    %77 = arith.addf %74, %76 : vector<64x2048xf32>
    %cst_31 = arith.constant 0.000000e+00 : f32
    %78 = vector.broadcast %cst_31 : f32 to vector<64x2048xf32>
    %79 = arith.maximumf %77, %78 : vector<64x2048xf32>
    %c0_32 = arith.constant 0 : index
    %c0_33 = arith.constant 0 : index
    %80 = vector.load %arg5[%c0_32, %c0_33] : memref<64x64xbf16, #tpu.memory_space<vmem>>, vector<64x64xbf16>
    %81 = arith.truncf %79 : vector<64x2048xf32> to vector<64x2048xbf16>
    %cst_34 = arith.constant dense<0.000000e+00> : vector<64x2048xf32>
    %82 = tpu.matmul %80, %81, %cst_34 {dimension_numbers = #tpu.dot_dimension_numbers<[1], [0], [0], [1], [0, 0, 1, 1], [], []>} : vector<64x64xbf16>, vector<64x2048xbf16>, vector<64x2048xf32> -> vector<64x2048xf32>
    %c0_35 = arith.constant 0 : index
    %c0_36 = arith.constant 0 : index
    %83 = vector.load %arg6[%c0_35, %c0_36] : memref<64x1xf32, #tpu.memory_space<vmem>>, vector<64x1xf32>
    %84 = vector.broadcast %83 : vector<64x1xf32> to vector<64x2048xf32>
    %85 = arith.addf %82, %84 : vector<64x2048xf32>
    %cst_37 = arith.constant 0.000000e+00 : f32
    %86 = vector.broadcast %cst_37 : f32 to vector<64x2048xf32>
    %87 = arith.maximumf %85, %86 : vector<64x2048xf32>
    %c0_38 = arith.constant 0 : index
    %c0_39 = arith.constant 0 : index
    %88 = vector.load %arg7[%c0_38, %c0_39] : memref<64x64xbf16, #tpu.memory_space<vmem>>, vector<64x64xbf16>
    %89 = arith.truncf %87 : vector<64x2048xf32> to vector<64x2048xbf16>
    %cst_40 = arith.constant dense<0.000000e+00> : vector<64x2048xf32>
    %90 = tpu.matmul %88, %89, %cst_40 {dimension_numbers = #tpu.dot_dimension_numbers<[1], [0], [0], [1], [0, 0, 1, 1], [], []>} : vector<64x64xbf16>, vector<64x2048xbf16>, vector<64x2048xf32> -> vector<64x2048xf32>
    %c0_41 = arith.constant 0 : index
    %c0_42 = arith.constant 0 : index
    %91 = vector.load %arg8[%c0_41, %c0_42] : memref<64x39xbf16, #tpu.memory_space<vmem>>, vector<64x39xbf16>
    %92 = arith.truncf %43 : vector<39x2048xf32> to vector<39x2048xbf16>
    %cst_43 = arith.constant dense<0.000000e+00> : vector<64x2048xf32>
    %93 = tpu.matmul %91, %92, %cst_43 {dimension_numbers = #tpu.dot_dimension_numbers<[1], [0], [0], [1], [0, 0, 1, 1], [], []>} : vector<64x39xbf16>, vector<39x2048xbf16>, vector<64x2048xf32> -> vector<64x2048xf32>
    %94 = arith.addf %90, %93 : vector<64x2048xf32>
    %c0_44 = arith.constant 0 : index
    %c0_45 = arith.constant 0 : index
    %95 = vector.load %arg9[%c0_44, %c0_45] : memref<64x1xf32, #tpu.memory_space<vmem>>, vector<64x1xf32>
    %96 = vector.broadcast %95 : vector<64x1xf32> to vector<64x2048xf32>
    %97 = arith.addf %94, %96 : vector<64x2048xf32>
    %cst_46 = arith.constant 0.000000e+00 : f32
    %98 = vector.broadcast %cst_46 : f32 to vector<64x2048xf32>
    %99 = arith.maximumf %97, %98 : vector<64x2048xf32>
    %c0_47 = arith.constant 0 : index
    %c0_48 = arith.constant 0 : index
    %100 = vector.load %arg10[%c0_47, %c0_48] : memref<64x64xbf16, #tpu.memory_space<vmem>>, vector<64x64xbf16>
    %101 = arith.truncf %99 : vector<64x2048xf32> to vector<64x2048xbf16>
    %cst_49 = arith.constant dense<0.000000e+00> : vector<64x2048xf32>
    %102 = tpu.matmul %100, %101, %cst_49 {dimension_numbers = #tpu.dot_dimension_numbers<[1], [0], [0], [1], [0, 0, 1, 1], [], []>} : vector<64x64xbf16>, vector<64x2048xbf16>, vector<64x2048xf32> -> vector<64x2048xf32>
    %c0_50 = arith.constant 0 : index
    %c0_51 = arith.constant 0 : index
    %103 = vector.load %arg11[%c0_50, %c0_51] : memref<64x1xf32, #tpu.memory_space<vmem>>, vector<64x1xf32>
    %104 = vector.broadcast %103 : vector<64x1xf32> to vector<64x2048xf32>
    %105 = arith.addf %102, %104 : vector<64x2048xf32>
    %cst_52 = arith.constant 0.000000e+00 : f32
    %106 = vector.broadcast %cst_52 : f32 to vector<64x2048xf32>
    %107 = arith.maximumf %105, %106 : vector<64x2048xf32>
    %c0_53 = arith.constant 0 : index
    %c0_54 = arith.constant 0 : index
    %108 = vector.load %arg12[%c0_53, %c0_54] : memref<65x64xbf16, #tpu.memory_space<vmem>>, vector<65x64xbf16>
    %109 = arith.truncf %107 : vector<64x2048xf32> to vector<64x2048xbf16>
    %cst_55 = arith.constant dense<0.000000e+00> : vector<65x2048xf32>
    %110 = tpu.matmul %108, %109, %cst_55 {dimension_numbers = #tpu.dot_dimension_numbers<[1], [0], [0], [1], [0, 0, 1, 1], [], []>} : vector<65x64xbf16>, vector<64x2048xbf16>, vector<65x2048xf32> -> vector<65x2048xf32>
    %c0_56 = arith.constant 0 : index
    %c0_57 = arith.constant 0 : index
    %111 = vector.load %arg13[%c0_56, %c0_57] : memref<65x1xf32, #tpu.memory_space<vmem>>, vector<65x1xf32>
    %112 = vector.broadcast %111 : vector<65x1xf32> to vector<65x2048xf32>
    %113 = arith.addf %110, %112 : vector<65x2048xf32>
    %114 = vector.extract_strided_slice %113 {offsets = [0, 0], sizes = [64, 2048], strides = [1, 1]} : vector<65x2048xf32> to vector<64x2048xf32>
    %115 = vector.extract_strided_slice %113 {offsets = [64, 0], sizes = [1, 2048], strides = [1, 1]} : vector<65x2048xf32> to vector<1x2048xf32>
    %c0_58 = arith.constant 0 : index
    %c0_59 = arith.constant 0 : index
    %116 = vector.load %arg14[%c0_58, %c0_59] : memref<32x64xbf16, #tpu.memory_space<vmem>>, vector<32x64xbf16>
    %117 = arith.truncf %114 : vector<64x2048xf32> to vector<64x2048xbf16>
    %cst_60 = arith.constant dense<0.000000e+00> : vector<32x2048xf32>
    %118 = tpu.matmul %116, %117, %cst_60 {dimension_numbers = #tpu.dot_dimension_numbers<[1], [0], [0], [1], [0, 0, 1, 1], [], []>} : vector<32x64xbf16>, vector<64x2048xbf16>, vector<32x2048xf32> -> vector<32x2048xf32>
    %c0_61 = arith.constant 0 : index
    %c0_62 = arith.constant 0 : index
    %119 = vector.load %arg15[%c0_61, %c0_62] : memref<32x27xbf16, #tpu.memory_space<vmem>>, vector<32x27xbf16>
    %120 = arith.truncf %71 : vector<27x2048xf32> to vector<27x2048xbf16>
    %cst_63 = arith.constant dense<0.000000e+00> : vector<32x2048xf32>
    %121 = tpu.matmul %119, %120, %cst_63 {dimension_numbers = #tpu.dot_dimension_numbers<[1], [0], [0], [1], [0, 0, 1, 1], [], []>} : vector<32x27xbf16>, vector<27x2048xbf16>, vector<32x2048xf32> -> vector<32x2048xf32>
    %122 = arith.addf %118, %121 : vector<32x2048xf32>
    %c0_64 = arith.constant 0 : index
    %c0_65 = arith.constant 0 : index
    %123 = vector.load %arg16[%c0_64, %c0_65] : memref<32x1xf32, #tpu.memory_space<vmem>>, vector<32x1xf32>
    %124 = vector.broadcast %123 : vector<32x1xf32> to vector<32x2048xf32>
    %125 = arith.addf %122, %124 : vector<32x2048xf32>
    %cst_66 = arith.constant 0.000000e+00 : f32
    %126 = vector.broadcast %cst_66 : f32 to vector<32x2048xf32>
    %127 = arith.maximumf %125, %126 : vector<32x2048xf32>
    %c0_67 = arith.constant 0 : index
    %c0_68 = arith.constant 0 : index
    %128 = vector.load %arg17[%c0_67, %c0_68] : memref<3x32xbf16, #tpu.memory_space<vmem>>, vector<3x32xbf16>
    %129 = arith.truncf %127 : vector<32x2048xf32> to vector<32x2048xbf16>
    %cst_69 = arith.constant dense<0.000000e+00> : vector<3x2048xf32>
    %130 = tpu.matmul %128, %129, %cst_69 {dimension_numbers = #tpu.dot_dimension_numbers<[1], [0], [0], [1], [0, 0, 1, 1], [], []>} : vector<3x32xbf16>, vector<32x2048xbf16>, vector<3x2048xf32> -> vector<3x2048xf32>
    %c0_70 = arith.constant 0 : index
    %c0_71 = arith.constant 0 : index
    %131 = vector.load %arg18[%c0_70, %c0_71] : memref<3x1xf32, #tpu.memory_space<vmem>>, vector<3x1xf32>
    %132 = vector.broadcast %131 : vector<3x1xf32> to vector<3x2048xf32>
    %133 = arith.addf %130, %132 : vector<3x2048xf32>
    %134 = tpu.concatenate %133, %115 in 0 : vector<3x2048xf32>, vector<1x2048xf32> -> vector<4x2048xf32>
    %c0_72 = arith.constant 0 : index
    %c0_73 = arith.constant 0 : index
    %135 = vector.load %arg19[%c0_72, %c0_73] : memref<4x2048xf32, #tpu.memory_space<vmem>>, vector<4x2048xf32>
    tpu.vector_store %arg19[%c0_72, %c0_73], %134 {strides = array<i32>} : memref<4x2048xf32, #tpu.memory_space<vmem>>, vector<4x2048xf32>,
    return
  }
  func.func @transform_0(%arg0: i32) -> (i32, i32) {
    %c0_i32 = arith.constant 0 : i32
    %c0_i32_0 = arith.constant 0 : i32
    return %c0_i32, %arg0 : i32, i32
  }
  func.func @transform_1(%arg0: i32) -> (i32, i32) {
    %c0_i32 = arith.constant 0 : i32
    %c0_i32_0 = arith.constant 0 : i32
    return %c0_i32, %arg0 : i32, i32
  }
  func.func @transform_2(%arg0: i32) -> (i32, i32) {
    %c0_i32 = arith.constant 0 : i32
    %c0_i32_0 = arith.constant 0 : i32
    %c0_i32_1 = arith.constant 0 : i32
    return %c0_i32, %c0_i32_0 : i32, i32
  }
  func.func @transform_3(%arg0: i32) -> (i32, i32) {
    %c0_i32 = arith.constant 0 : i32
    %c0_i32_0 = arith.constant 0 : i32
    %c0_i32_1 = arith.constant 0 : i32
    return %c0_i32, %c0_i32_0 : i32, i32
  }
  func.func @transform_4(%arg0: i32) -> (i32, i32) {
    %c0_i32 = arith.constant 0 : i32
    %c0_i32_0 = arith.constant 0 : i32
    %c0_i32_1 = arith.constant 0 : i32
    return %c0_i32, %c0_i32_0 : i32, i32
  }
  func.func @transform_5(%arg0: i32) -> (i32, i32) {
    %c0_i32 = arith.constant 0 : i32
    %c0_i32_0 = arith.constant 0 : i32
    %c0_i32_1 = arith.constant 0 : i32
    return %c0_i32, %c0_i32_0 : i32, i32
  }
  func.func @transform_6(%arg0: i32) -> (i32, i32) {
    %c0_i32 = arith.constant 0 : i32
    %c0_i32_0 = arith.constant 0 : i32
    %c0_i32_1 = arith.constant 0 : i32
    return %c0_i32, %c0_i32_0 : i32, i32
  }
  func.func @transform_7(%arg0: i32) -> (i32, i32) {
    %c0_i32 = arith.constant 0 : i32
    %c0_i32_0 = arith.constant 0 : i32
    %c0_i32_1 = arith.constant 0 : i32
    return %c0_i32, %c0_i32_0 : i32, i32
  }
  func.func @transform_8(%arg0: i32) -> (i32, i32) {
    %c0_i32 = arith.constant 0 : i32
    %c0_i32_0 = arith.constant 0 : i32
    %c0_i32_1 = arith.constant 0 : i32
    return %c0_i32, %c0_i32_0 : i32, i32
  }
  func.func @transform_9(%arg0: i32) -> (i32, i32) {
    %c0_i32 = arith.constant 0 : i32
    %c0_i32_0 = arith.constant 0 : i32
    %c0_i32_1 = arith.constant 0 : i32
    return %c0_i32, %c0_i32_0 : i32, i32
  }
  func.func @transform_10(%arg0: i32) -> (i32, i32) {
    %c0_i32 = arith.constant 0 : i32
    %c0_i32_0 = arith.constant 0 : i32
    %c0_i32_1 = arith.constant 0 : i32
    return %c0_i32, %c0_i32_0 : i32, i32
  }
  func.func @transform_11(%arg0: i32) -> (i32, i32) {
    %c0_i32 = arith.constant 0 : i32
    %c0_i32_0 = arith.constant 0 : i32
    %c0_i32_1 = arith.constant 0 : i32
    return %c0_i32, %c0_i32_0 : i32, i32
  }
  func.func @transform_12(%arg0: i32) -> (i32, i32) {
    %c0_i32 = arith.constant 0 : i32
    %c0_i32_0 = arith.constant 0 : i32
    %c0_i32_1 = arith.constant 0 : i32
    return %c0_i32, %c0_i32_0 : i32, i32
  }
  func.func @transform_13(%arg0: i32) -> (i32, i32) {
    %c0_i32 = arith.constant 0 : i32
    %c0_i32_0 = arith.constant 0 : i32
    %c0_i32_1 = arith.constant 0 : i32
    return %c0_i32, %c0_i32_0 : i32, i32
  }
  func.func @transform_14(%arg0: i32) -> (i32, i32) {
    %c0_i32 = arith.constant 0 : i32
    %c0_i32_0 = arith.constant 0 : i32
    %c0_i32_1 = arith.constant 0 : i32
    return %c0_i32, %c0_i32_0 : i32, i32
  }
  func.func @transform_15(%arg0: i32) -> (i32, i32) {
    %c0_i32 = arith.constant 0 : i32
    %c0_i32_0 = arith.constant 0 : i32
    %c0_i32_1 = arith.constant 0 : i32
    return %c0_i32, %c0_i32_0 : i32, i32
  }
  func.func @transform_16(%arg0: i32) -> (i32, i32) {
    %c0_i32 = arith.constant 0 : i32
    %c0_i32_0 = arith.constant 0 : i32
    %c0_i32_1 = arith.constant 0 : i32
    return %c0_i32, %c0_i32_0 : i32, i32
  }
  func.func @transform_17(%arg0: i32) -> (i32, i32) {
    %c0_i32 = arith.constant 0 : i32
    %c0_i32_0 = arith.constant 0 : i32
    %c0_i32_1 = arith.constant 0 : i32
    return %c0_i32, %c0_i32_0 : i32, i32
  }
  func.func @transform_18(%arg0: i32) -> (i32, i32) {
    %c0_i32 = arith.constant 0 : i32
    %c0_i32_0 = arith.constant 0 : i32
    return %c0_i32, %arg0 : i32, i32
  }
}

</mosaic_0001>

<bundles_post_ra>
// kernel: tpu_custom_call.1
= control target key start
LH: loop header
LB: loop body
LE: loop exit
PB: predicated region body
PF: predicated region fallthrough
CT: control target
= control target key end

     0   :  { %s19968_s0 = inlined_call_operand.vmem [shape: f32[3,2048], index: 0, kind: input, shape index: {}]   ;;  %s19969_s1 = inlined_call_operand.vmem [shape: f32[3,2048], index: 1, kind: input, shape index: {}]   ;;  %s19970_s2 = inlined_call_operand.vmem [shape: bf16[64,39], index: 2, kind: input, shape index: {}]   ;;  %s19971_s3 = inlined_call_operand.vmem [shape: f32[64,1], index: 3, kind: input, shape index: {}]   ;;  %s19972_s4 = inlined_call_operand.vmem [shape: bf16[64,64], index: 4, kind: input, shape index: {}]   ;;  %s19973_s5 = inlined_call_operand.vmem [shape: f32[64,1], index: 5, kind: input, shape index: {}]   ;;  %s19974_s6 = inlined_call_operand.vmem [shape: bf16[64,64], index: 6, kind: input, shape index: {}]   ;;  %s19975_s7 = inlined_call_operand.vmem [shape: bf16[64,39], index: 7, kind: input, shape index: {}]   ;;  %s19976_s8 = inlined_call_operand.vmem [shape: f32[64,1], index: 8, kind: input, shape index: {}]   ;;  %s19977_s9 = inlined_call_operand.vmem [shape: bf16[64,64], index: 9, kind: input, shape index: {}]   ;;  %s19978_s10 = inlined_call_operand.vmem [shape: f32[64,1], index: 10, kind: input, shape index: {}]   ;;  %s19979_s11 = inlined_call_operand.vmem [shape: bf16[65,64], index: 11, kind: input, shape index: {}]   ;;  %s19980_s12 = inlined_call_operand.vmem [shape: f32[65,1], index: 12, kind: input, shape index: {}]   ;;  %s19981_s13 = inlined_call_operand.vmem [shape: bf16[32,64], index: 13, kind: input, shape index: {}]   ;;  %s19982_s14 = inlined_call_operand.vmem [shape: bf16[32,27], index: 14, kind: input, shape index: {}]   ;;  %s19983_s15 = inlined_call_operand.vmem [shape: f32[32,1], index: 15, kind: input, shape index: {}]   ;;  %s19984_s16 = inlined_call_operand.vmem [shape: bf16[3,32], index: 16, kind: input, shape index: {}]   ;;  %s19985_s17 = inlined_call_operand.vmem [shape: f32[3,1], index: 17, kind: input, shape index: {}]   ;;  %s19986_s18 = inlined_call_operand.hbm [shape: f32[4,2048], index: 18, kind: output, shape index: {}]  }
   0x1   :  { %20143 = sst [smem:[#allocation103_spill]] %s19968_s0 }
   0x2   :  { %20144 = sst [smem:[#allocation104_spill]] %s19969_s1 }
   0x3   :  { %20145 = sst [smem:[#allocation105_spill]] %s19970_s2 }
   0x4   :  { %s20146_s29 = sld [smem:[#allocation103_spill]]  ;;  %v20002_v21 = vmov 683565275   ;;  %v20000_v23 = vmov 2475754826   ;;  %v4954_v44 = vld [vmem:[%s19971_s3 + $0x30] sm:$0xff] }
   0x5   :  { %v19998_v25 = vmov 2131351028   ;;  %v19996_v27 = vmov 2102212464   ;;  %v19994_v29 = vmov 920167782  }
   0x6   :  { %v19992_v36 = vmov 1326507024   ;;  %v20005_v49 = vmov 0   ;;  %vm2453_vm13 = vcmask 1042432  }
   0x7   :  { %5111 = vmatprep.mubr.bf16.mxu0 %v20005_v49  ;;  %5184 = vmatprep.mubr.bf16.mxu1 %v20005_v49 }
   0x8   :  { %12159 = vset.pattern.permute.xlu0 %v20005_v49  ;;  %12160 = vset.pattern.permute.xlu1 %v20005_v49 }
   0x9   :  { %4988 = vperm.xlu0 %12159, %v4954_v44  }
   0xa   :  { %v12436_v0 = vld [vmem:[%s20146_s29] sm:$0x77]  ;;  %v12445_v5 = vld [vmem:[%s20146_s29 + $0x8] sm:$0x77] }
   0xb   :  { %v69_v1 = vand.u32 2147483647, %v12436_v0  ;;  %v72_v2 = vand.u32 2139095040, %v12436_v0  ;;  %v173_v7 = vand.u32 2147483647, %v12445_v5  ;;  %v176_v8 = vand.u32 2139095040, %v12445_v5 }
   0xc   :  { %vm71_vm12 = vcmp.lt.s32.totalorder %v12436_v0, 0 }
   0xd   :  { %v73_v3 = vshrl.u32 %v72_v2, 23  ;;  %v76_v4 = vand.u32 8388607, %v69_v1  ;;  %v177_v11 = vshrl.u32 %v176_v8, 23  ;;  %v180_v12 = vand.u32 8388607, %v173_v7 }
   0xe   :  { %vm12578_vm15 = vcmp.le.f32.partialorder %v69_v1, 0.7853982 }
   0xf   :  { %v11625_v6 = vadd.s32 4294967169, %v73_v3  ;;  %v77_v10 = vor.u32 8388608, %v76_v4  ;;  %v11629_v14 = vadd.s32 4294967169, %v177_v11  ;;  %v181_v18 = vor.u32 8388608, %v180_v12  ;;  %v4955_v12 = vld [vmem:[%s19971_s3 + $0x38] sm:$0xff] }
  0x10   :  { %4993 = vperm.xlu0 %12159, %v4955_v12  }
  0x11   :  { %v79_v9 = vadd.s32 1, %v11625_v6  ;;  %v12451_v17 = vshll.u32 %v77_v10, 8  ;;  %v183_v19 = vadd.s32 1, %v11629_v14  ;;  %v12486_v61 = vshll.u32 %v181_v18, 8  ;;  %v4953_v18 = vld [vmem:[%s19971_s3 + $0x28] sm:$0xff] }
  0x13   :  { %vm80_vm0 = vcmp.gt.s32.totalorder %v79_v9, 0  ;;  %vm184_vm5 = vcmp.gt.s32.totalorder %v183_v19, 0 }
  0x14   :  { %v81_v13 = vsel %vm80_vm0, %v79_v9, 0  ;;  %v185_v43 = vsel %vm184_vm5, %v183_v19, 0  ;;  %vm175_vm0 = vcmp.lt.s32.totalorder %v12445_v5, 0 }
  0x15   :  { %v82_v15 = vshrl.u32 %v81_v13, 5  ;;  %v83_v16 = vand.u32 31, %v81_v13  ;;  %v12476_v53 = vshrl.u32 %v185_v43, 5  ;;  %v187_v57 = vand.u32 31, %v185_v43  ;;  %v4952_v13 = vld [vmem:[%s19971_s3 + $0x20] sm:$0xff] }
  0x16   :  { %4978 = vperm.xlu1 %12160, %v4952_v13  }
  0x17   :  { %v84_v20 = vsub.s32 32, %v83_v16  ;;  %v86_v22 = vshll.u32 %v20002_v21, %v83_v16  ;;  %v89_v24 = vshll.u32 %v20000_v23, %v83_v16  ;;  %v92_v26 = vshll.u32 %v19998_v25, %v83_v16 }
  0x18   :  { %v95_v28 = vshll.u32 %v19996_v27, %v83_v16  ;;  %v98_v30 = vshll.u32 %v19994_v29, %v83_v16  ;;  %vm101_vm1 = vcmp.lt.s32.totalorder %v82_v15, 1  ;;  %vm102_vm2 = vcmp.lt.s32.totalorder %v82_v15, 2 }
  0x19   :  { %v85_v31 = vshrl.u32 %v20002_v21, %v84_v20  ;;  %v87_v32 = vshrl.u32 %v20000_v23, %v84_v20  ;;  %v90_v33 = vshrl.u32 %v19998_v25, %v84_v20  ;;  %v93_v34 = vshrl.u32 %v19996_v27, %v84_v20 }
  0x1a   :  { %v96_v35 = vshrl.u32 %v19994_v29, %v84_v20  ;;  %v99_v37 = vshrl.u32 %v19992_v36, %v84_v20  ;;  %vm103_vm3 = vcmp.lt.s32.totalorder %v82_v15, 3  ;;  %vm104_vm4 = vcmp.lt.s32.totalorder %v82_v15, 4  ;;  %4983 = vperm.xlu1 %12160, %v4953_v18  }
  0x1b   :  { %v88_v38 = vor.u32 %v87_v32, %v86_v22  ;;  %v91_v39 = vor.u32 %v90_v33, %v89_v24  ;;  %v94_v40 = vor.u32 %v93_v34, %v92_v26  ;;  %v188_v4 = vsub.s32 32, %v187_v57  ;;  %v4950_v22 = vld [vmem:[%s19971_s3 + $0x10] sm:$0xff] }
  0x1c   :  { %v97_v41 = vor.u32 %v96_v35, %v95_v28  ;;  %v100_v42 = vor.u32 %v99_v37, %v98_v30  ;;  %v190_v6 = vshll.u32 %v20002_v21, %v187_v57  ;;  %v193_v8 = vshll.u32 %v20000_v23, %v187_v57  ;;  %4968 = vperm.xlu0 %12159, %v4950_v22  }
  0x1d   :  { %v105_v45 = vsel %vm101_vm1, %v85_v31, %v88_v38  ;;  %v106_v46 = vsel %vm104_vm4, %v94_v40, 2102212464  ;;  %v109_v47 = vsel %vm101_vm1, %v88_v38, %v91_v39  ;;  %v113_v48 = vsel %vm101_vm1, %v91_v39, %v94_v40  ;;  %v12533_v38 = vld [vmem:[%s20146_s29 + $0x10] sm:$0x77] }
  0x1e   :  { %v107_v50 = vsel %vm103_vm3, %v91_v39, %v106_v46  ;;  %v110_v51 = vsel %vm104_vm4, %v97_v41, 920167782  ;;  %v114_v52 = vsel %vm104_vm4, %v100_v42, 1326507024  ;;  %v196_v9 = vshll.u32 %v19998_v25, %v187_v57 }
  0x1f   :  { %v108_v54 = vsel %vm102_vm2, %v105_v45, %v107_v50  ;;  %v111_v55 = vsel %vm103_vm3, %v94_v40, %v110_v51  ;;  %v115_v56 = vsel %vm103_vm3, %v97_v41, %v114_v52  ;;  %v199_v10 = vshll.u32 %v19996_v27, %v187_v57 }
  0x20   :  { %v112_v58 = vsel %vm102_vm2, %v109_v47, %v111_v55  ;;  %v116_v59 = vsel %vm102_vm2, %v113_v48, %v115_v56  ;;  %v124_v60 = vmul.u32 %v12451_v17, %v108_v54  ;;  %v202_v11 = vshll.u32 %v19994_v29, %v187_v57 }
  0x21   :  { %v12489_v62 = vmul.u32.u64.low %v12451_v17, %v116_v59  ;;  %v12490_v63 = vmul.u32.u64.high %v12451_v17, %v116_v59, %v12489_v62  ;;  %v12493_v2 = vmul.u32.u64.low %v12451_v17, %v112_v58  ;;  %v12494_v3 = vmul.u32.u64.high %v12451_v17, %v112_v58, %v12493_v2 }
  0x22   :  { %vm205_vm6 = vcmp.lt.s32.totalorder %v12476_v53, 1  ;;  %vm206_vm7 = vcmp.lt.s32.totalorder %v12476_v53, 2  ;;  %v189_v14 = vshrl.u32 %v20002_v21, %v188_v4  ;;  %v191_v15 = vshrl.u32 %v20000_v23, %v188_v4 }
  0x23   :  { %v194_v16 = vshrl.u32 %v19998_v25, %v188_v4  ;;  %v197_v17 = vshrl.u32 %v19996_v27, %v188_v4  ;;  %vm126_vm8 = vc.u32 %v12490_v63, %v12493_v2  ;;  %v127_v19 = vadd.s32 1, %v12494_v3 }
  0x24   :  { %v200_v20 = vshrl.u32 %v19994_v29, %v188_v4  ;;  %v192_v24 = vor.u32 %v191_v15, %v190_v6  ;;  %v203_v30 = vshrl.u32 %v19992_v36, %v188_v4  ;;  %vm207_vm9 = vcmp.lt.s32.totalorder %v12476_v53, 3  ;;  %v12566_v4 = vld [vmem:[%s20146_s29 + $0x18] sm:$0x77] }
  0x25   :  { %v195_v26 = vor.u32 %v194_v16, %v193_v8  ;;  %v198_v28 = vor.u32 %v197_v17, %v196_v9  ;;  %v128_v31 = vsel %vm126_vm8, %v127_v19, %v12494_v3  ;;  %vm208_vm10 = vcmp.lt.s32.totalorder %v12476_v53, 4 }
  0x26   :  { %v201_v32 = vor.u32 %v200_v20, %v199_v10  ;;  %v129_v33 = vadd.s32 %v128_v31, %v124_v60  ;;  %v204_v34 = vor.u32 %v203_v30, %v202_v11  ;;  %v209_v35 = vsel %vm205_vm6, %v189_v14, %v192_v24 }
  0x27   :  { %v210_v37 = vsel %vm208_vm10, %v198_v28, 2102212464  ;;  %v213_v40 = vsel %vm205_vm6, %v192_v24, %v195_v26  ;;  %v217_v42 = vsel %vm205_vm6, %v195_v26, %v198_v28  ;;  %v280_v57 = vand.u32 2139095040, %v12533_v38 }
  0x28   :  { %v211_v39 = vsel %vm207_vm9, %v195_v26, %v210_v37  ;;  %v214_v41 = vsel %vm208_vm10, %v201_v32, 920167782  ;;  %v130_v43 = vadd.s32 536870912, %v129_v33  ;;  %v218_v45 = vsel %vm208_vm10, %v204_v34, 1326507024 }
  0x29   :  { %v215_v44 = vsel %vm207_vm9, %v198_v28, %v214_v41  ;;  %v212_v46 = vsel %vm206_vm7, %v209_v35, %v211_v39  ;;  %v219_v48 = vsel %vm207_vm9, %v201_v32, %v218_v45  ;;  %v281_v60 = vshrl.u32 %v280_v57, 23 }
  0x2a   :  { %v216_v47 = vsel %vm206_vm7, %v213_v40, %v215_v44  ;;  %v131_v50 = vshrl.u32 %v130_v43, 30  ;;  %v220_v51 = vsel %vm206_vm7, %v217_v42, %v219_v48  ;;  %v228_v59 = vmul.u32 %v12486_v61, %v212_v46 }
  0x2b   :  { %v12552_v52 = vmul.u32.u64.low %v12486_v61, %v216_v47  ;;  %v12553_v54 = vmul.u32.u64.high %v12486_v61, %v216_v47, %v12552_v52  ;;  %v12556_v55 = vmul.u32.u64.low %v12486_v61, %v220_v51  ;;  %v12557_v56 = vmul.u32.u64.high %v12486_v61, %v220_v51, %v12556_v55 }
  0x2c   :  { %v132_v58 = vshll.u32 %v131_v50, 30  ;;  %v20004_v53 = vand.u32 2147483647, %v12533_v38  ;;  %v11633_v6 = vadd.s32 4294967169, %v281_v60  ;;  %v155_v9 = vsub.s32 4, %v131_v50 }
  0x2d   :  { %v231_v3 = vadd.s32 1, %v12553_v54  ;;  %vm230_vm11 = vc.u32 %v12557_v56, %v12552_v52  ;;  %v384_v12 = vand.u32 2139095040, %v12566_v4  ;;  %v19990_v26 = vmov 65535  }
  0x2e   :  { %v133_v62 = vsub.s32 %v129_v33, %v132_v58  ;;  %v287_v61 = vadd.s32 1, %v11633_v6  ;;  %v284_v15 = vand.u32 8388607, %v20004_v53  ;;  %v156_v17 = vsel %vm71_vm12, %v155_v9, %v131_v50 }
  0x2f   :  { %v232_v10 = vsel %vm230_vm11, %v231_v3, %v12553_v54  ;;  %v385_v22 = vshrl.u32 %v384_v12, 23  ;;  %v12584_v28 = vsel %vm2453_vm13, 4294967295, %v19990_v26  ;;  %v19991_v31 = vand.u32 2147483647, %v12566_v4 }
  0x30   :  { %v135_v8 = vsub.s32 0, %v133_v62  ;;  %v233_v11 = vadd.s32 %v232_v10, %v228_v59  ;;  %vm288_vm14 = vcmp.gt.s32.totalorder %v287_v61, 0  ;;  %v158_v32 = vsel %vm12578_vm15, 0, %v156_v17 }
  0x31   :  { %v289_v20 = vsel %vm288_vm14, %v287_v61, 0  ;;  %v285_v33 = vor.u32 8388608, %v284_v15  ;;  %v125_v34 = vadd.s32 %v12493_v2, %v12490_v63  ;;  %v229_v39 = vadd.s32 %v12552_v52, %v12557_v56 }
  0x32   :  { %v11626_v13 = vmin.u32 %v135_v8, %v133_v62  ;;  %v234_v14 = vadd.s32 536870912, %v233_v11  ;;  %v291_v30 = vand.u32 31, %v289_v20  ;;  %v11637_v41 = vadd.s32 4294967169, %v385_v22 }
  0x34   :  { %v137_v16 = vclz %v11626_v13  ;;  %v235_v19 = vshrl.u32 %v234_v14, 30  ;;  %v292_v35 = vsub.s32 32, %v291_v30 }
  0x36   :  { %v11627_v24 = vadd.s32 4294967294, %v137_v16  ;;  %v236_v1 = vshll.u32 %v235_v19, 30 }
  0x38   :  { %vm11628_vm1 = vcmp.lt.s32.totalorder %v11627_v24, 0  ;;  %v12593_v40 = vsub.s32 %v233_v11, %v236_v1 }
  0x39   :  { %v140_v37 = vsel %vm11628_vm1, 0, %v11627_v24 }
  0x3a   :  { %23 = vsyncpa [#allocation3], 0  ;;  %v141_v42 = vsub.s32 32, %v140_v37  ;;  %v142_v43 = vshll.u32 %v133_v62, %v140_v37  ;;  %v145_v44 = vsub.s32 4294967266, %v140_v37  ;;  %v12595_v45 = vadd.s32 3, %v158_v32  ;;  %s20159_s0 = sld [smem:[#allocation105_spill]] }
  0x3b   :  { %v239_v46 = vsub.s32 0, %v12593_v40  ;;  %v259_v47 = vsub.s32 4, %v235_v19  ;;  %v294_v48 = vshll.u32 %v20002_v21, %v291_v30  ;;  %v297_v63 = vshll.u32 %v20000_v23, %v291_v30 }
  0x3c   :  { %v143_v2 = vshrl.u32 %v125_v34, %v141_v42  ;;  %v146_v50 = vadd.s32 127, %v145_v44  ;;  %v295_v51 = vshrl.u32 %v20000_v23, %v292_v35  ;;  %v298_v52 = vshrl.u32 %v19998_v25, %v292_v35 }
  0x3d   :  { %v12602_v54 = vand.u32 3, %v158_v32  ;;  %v11630_v55 = vmin.u32 %v239_v46, %v12593_v40  ;;  %v12605_v56 = vshll.u32 %v285_v33, 8  ;;  %v391_v57 = vadd.s32 1, %v11637_v41 }
  0x3e   :  { %v144_v58 = vor.u32 %v143_v2, %v142_v43  ;;  %v147_v59 = vshll.u32 %v146_v50, 23  ;;  %v290_v60 = vshrl.u32 %v289_v20, 5  ;;  %v300_v62 = vshll.u32 %v19998_v25, %v291_v30 }
  0x3f   :  { %v241_v3 = vclz %v11630_v55  ;;  %v260_v6 = vsel %vm175_vm0, %v259_v47, %v235_v19  ;;  %v293_v8 = vshrl.u32 %v20002_v21, %v292_v35  ;;  %v296_v9 = vor.u32 %v295_v51, %v294_v48 }
  0x40   :  { %v148_v10 = vor.u32 4788187, %v147_v59  ;;  %v151_v11 = vcvt.s32.f32 %v144_v58  ;;  %v299_v61 = vor.u32 %v298_v52, %v297_v63  ;;  %v301_v12 = vshrl.u32 %v19996_v27, %v292_v35 }
  0x41   :  { %v11631_v13 = vadd.s32 4294967294, %v241_v3  ;;  %v303_v14 = vshll.u32 %v19996_v27, %v291_v30  ;;  %v304_v15 = vshrl.u32 %v19994_v29, %v292_v35  ;;  %v306_v16 = vshll.u32 %v19994_v29, %v291_v30 }
  0x42   :  { %vm392_vm2 = vcmp.gt.s32.totalorder %v391_v57, 0  ;;  %v149_v17 = vand.u32 2147483647, %v148_v10  ;;  %v302_v20 = vor.u32 %v301_v12, %v300_v62  ;;  %v307_v19 = vshrl.u32 %v19992_v36, %v292_v35 }
  0x43   :  { %vm309_vm3 = vcmp.lt.s32.totalorder %v290_v60, 1  ;;  %vm11632_vm4 = vcmp.lt.s32.totalorder %v11631_v13, 0  ;;  %v305_v22 = vor.u32 %v304_v15, %v303_v14  ;;  %vm310_vm5 = vcmp.lt.s32.totalorder %v290_v60, 2 }
  0x44   :  { %vm311_vm6 = vcmp.lt.s32.totalorder %v290_v60, 3  ;;  %v152_v24 = vmul.f32 %v151_v11, %v149_v17  ;;  %v244_v32 = vsel %vm11632_vm4, 0, %v11631_v13  ;;  %v308_v1 = vor.u32 %v307_v19, %v306_v16 }
  0x45   :  { %vm312_vm7 = vcmp.lt.s32.totalorder %v290_v60, 4  ;;  %v245_v33 = vsub.s32 32, %v244_v32  ;;  %v246_v34 = vshll.u32 %v12593_v40, %v244_v32  ;;  %v249_v37 = vsub.s32 4294967266, %v244_v32 }
  0x46   :  { %v313_v30 = vsel %vm309_vm3, %v293_v8, %v296_v9  ;;  %v153_v41 = vxor.u32 2147483648, %v152_v24  ;;  %v314_v42 = vsel %vm312_vm7, %v302_v20, 2102212464  ;;  %v317_v35 = vsel %vm309_vm3, %v296_v9, %v299_v61 }
  0x47   :  { %v318_v43 = vsel %vm312_vm7, %v305_v22, 920167782  ;;  %v247_v44 = vshrl.u32 %v229_v39, %v245_v33  ;;  %v250_v46 = vadd.s32 127, %v249_v37  ;;  %v315_v47 = vsel %vm311_vm6, %v299_v61, %v314_v42 }
  0x48   :  { %v319_v48 = vsel %vm311_vm6, %v302_v20, %v318_v43  ;;  %v154_v63 = vsel %vm71_vm12, %v153_v41, %v152_v24  ;;  %v316_v40 = vsel %vm310_vm5, %v313_v30, %v315_v47  ;;  %v321_v50 = vsel %vm309_vm3, %v299_v61, %v302_v20 }
  0x49   :  { %v320_v2 = vsel %vm310_vm5, %v317_v35, %v319_v48  ;;  %v157_v51 = vsel %vm12578_vm15, %v12436_v0, %v154_v63  ;;  %v248_v52 = vor.u32 %v247_v44, %v246_v34  ;;  %v251_v39 = vshll.u32 %v250_v46, 23  ;;  %v12695_v46 = vld [vmem:[%s20146_s29 + $0x20] sm:$0x77] }
  0x4a   :  { %v322_v55 = vsel %vm312_vm7, %v308_v1, 1326507024  ;;  %12206 = vcosq.f32 %v157_v51  ;;  %v12634_v59 = vmul.u32.u64.low %v12605_v56, %v320_v2  ;;  %v12635_v62 = vmul.u32.u64.high %v12605_v56, %v320_v2, %v12634_v59 }
  0x4b   :  { %v323_v58 = vsel %vm311_vm6, %v305_v22, %v322_v55  ;;  %12208 = vsinq.f32 %v157_v51  ;;  %v252_v3 = vor.u32 4788187, %v251_v39  ;;  %v255_v8 = vcvt.s32.f32 %v248_v52 }
  0x4c   :  { %v324_v9 = vsel %vm310_vm5, %v321_v50, %v323_v58  ;;  %v388_v11 = vand.u32 8388607, %v19991_v31  ;;  %v393_v61 = vsel %vm392_vm2, %v391_v57, 0  ;;  %vm20011_vm8 = vcmask 1043456  }
  0x4d   :  { %v12639_v10 = vmul.u32.u64.low %v12605_v56, %v324_v9  ;;  %v12640_v18 = vmul.u32.u64.high %v12605_v56, %v324_v9, %v12639_v10  ;;  %vm12647_vm9 = vcmp.le.f32.partialorder %v173_v7, 0.7853982  ;;  %v253_v13 = vand.u32 2147483647, %v252_v3 }
  0x4e   :  { %v395_v14 = vand.u32 31, %v393_v61  ;;  %v12652_v60 = vand.u32 3, %v12595_v45  ;;  %v262_v15 = vsel %vm12647_vm9, 0, %v260_v6  ;;  %v332_v16 = vmul.u32 %v12605_v56, %v316_v40 }
  0x4f   :  { %v335_v17 = vadd.s32 1, %v12635_v62  ;;  %v12660_v57 = vsel %vm20011_vm8, %v12584_v28, 0  ;;  %v256_v7 = vmul.f32 %v255_v8, %v253_v13  ;;  %v266_v20 = vadd.s32 3, %v262_v15 }
  0x50   :  { %v1933_v19 = vcombine.high %v12436_v0, %v12436_v0  ;;  %vm996_vm10 = vcmp.eq.s32.totalorder %v12602_v54, 0  ;;  %v1934_v45 = vcombine.high %v12445_v5, %v12445_v5  ;;  %vm334_vm11 = vc.u32 %v12640_v18, %v12634_v59 }
  0x51   :  { %v389_v6 = vor.u32 8388608, %v388_v11  ;;  %vm995_vm12 = vcmp.lt.s32.totalorder %v12602_v54, 2  ;;  %vm999_vm14 = vcmp.eq.s32.totalorder %v12602_v54, 2  ;;  %v257_v56 = vxor.u32 2147483648, %v256_v7 }
  0x52   :  { %v336_v28 = vsel %vm334_vm11, %v335_v17, %v12635_v62  ;;  %v396_v22 = vsub.s32 32, %v395_v14  ;;  %vm161_vm15 = vweird.f32 %v12436_v0  ;;  %vm164_vm1 = vcmp.lt.s32.totalorder %v12652_v60, 2 }
  0x53   :  { %vm165_vm2 = vcmp.eq.s32.totalorder %v12652_v60, 0  ;;  %vm168_vm3 = vcmp.eq.s32.totalorder %v12652_v60, 2  ;;  %v337_v24 = vadd.s32 %v336_v28, %v332_v16  ;;  %v258_v32 = vsel %vm175_vm0, %v257_v56, %v256_v7 }
  0x54   :  { %v12677_v1 = vand.u32 3, %v266_v20  ;;  %v12679_v33 = vand.u32 3, %v262_v15  ;;  %v12681_v34 = vshrl.u32 %v393_v61, 5  ;;  %v261_v37 = vsel %vm12647_vm9, %v12445_v5, %v258_v32 }
  0x55   :  { %v338_v30 = vadd.s32 536870912, %v337_v24  ;;  %v398_v41 = vshll.u32 %v20002_v21, %v395_v14  ;;  %v12687_v42 = vshll.u32 %v389_v6, 8  ;;  %12210 = vcosq.f32 %v261_v37 }
  0x56   :  { %v399_v35 = vshrl.u32 %v20000_v23, %v396_v22  ;;  %v401_v43 = vshll.u32 %v20000_v23, %v395_v14  ;;  %v402_v44 = vshrl.u32 %v19998_v25, %v396_v22  ;;  %12212 = vsinq.f32 %v261_v37 }
  0x57   :  { %v12697_v47 = vshrl.u32 %v338_v30, 30  ;;  %v404_v48 = vshll.u32 %v19998_v25, %v395_v14  ;;  %v405_v63 = vshrl.u32 %v19996_v27, %v396_v22  ;;  %v12207_v40 = vpop.eup %12206  ;;  %v407_v2 = vshll.u32 %v19996_v27, %v395_v14 }
  0x58   :  { %v408_v50 = vshrl.u32 %v19994_v29, %v396_v22  ;;  %v12704_v51 = vshll.u32 %v19994_v29, %v395_v14  ;;  %v12707_v52 = vshrl.u32 %v19992_v36, %v396_v22  ;;  %v12209_v39 = vpop.eup %12208  ;;  %v169_v55 = vxor.u32 2147483648, %v12207_v40 }
  0x59   :  { %v12710_v58 = vadd.s32 %v12634_v59, %v12640_v18  ;;  %v340_v62 = vshll.u32 %v12697_v47, 30  ;;  %v166_v8 = vxor.u32 2147483648, %v12209_v39  ;;  %v397_v9 = vshrl.u32 %v20002_v21, %v396_v22 }
  0x5a   :  { %v400_v10 = vor.u32 %v399_v35, %v398_v41  ;;  %v403_v11 = vor.u32 %v402_v44, %v401_v43  ;;  %v170_v61 = vsel %vm168_vm3, %v169_v55, %v12209_v39  ;;  %v1001_v12 = vsel %vm999_vm14, %v169_v55, %v12209_v39 }
  0x5b   :  { %vm272_vm0 = vcmp.eq.s32.totalorder %v12677_v1, 2  ;;  %vm1102_vm4 = vcmp.eq.s32.totalorder %v12679_v33, 2  ;;  %v12721_v59 = vsub.s32 %v337_v24, %v340_v62  ;;  %v406_v18 = vor.u32 %v405_v63, %v404_v48 }
  0x5c   :  { %v167_v13 = vsel %vm165_vm2, %v12207_v40, %v166_v8  ;;  %v998_v14 = vsel %vm996_vm10, %v12207_v40, %v166_v8  ;;  %vm269_vm5 = vcmp.eq.s32.totalorder %v12677_v1, 0  ;;  %vm1099_vm6 = vcmp.eq.s32.totalorder %v12679_v33, 0 }
  0x5d   :  { %v12729_v15 = vor.u32 %v408_v50, %v407_v2  ;;  %v171_v17 = vsel %vm164_vm1, %v167_v13, %v170_v61  ;;  %v1002_v7 = vsel %vm995_vm12, %v998_v14, %v1001_v12  ;;  %vm268_vm7 = vcmp.lt.s32.totalorder %v12677_v1, 2 }
  0x5e   :  { %vm1098_vm9 = vcmp.lt.s32.totalorder %v12679_v33, 2  ;;  %vm413_vm10 = vcmp.lt.s32.totalorder %v12681_v34, 1  ;;  %vm416_vm11 = vcmp.lt.s32.totalorder %v12681_v34, 4  ;;  %v172_v20 = vsel %vm161_vm15, nan, %v171_v17 }
  0x5f   :  { %v12745_v6 = vsel %vm161_vm15, nan, %v1002_v7  ;;  %vm265_vm14 = vweird.f32 %v12445_v5  ;;  %v343_v54 = vsub.s32 0, %v12721_v59  ;;  %vm415_vm12 = vcmp.lt.s32.totalorder %v12681_v34, 3  ;;  %v5864_v5 = vld [vmem:[%s19973_s5 + $0x8] sm:$0xff] }
  0x60   :  { %v1725_v60 = vmul.f32 2.0, %v172_v20  ;;  %v1741_v56 = vmul.f32 2.0, %v12745_v6  ;;  %vm20012_vm1 = vcmask 1045504   ;;  %v1957_v28 = vcombine.high %v172_v20, %v172_v20 }
  0x61   :  { %v418_v22 = vsel %vm416_vm11, %v406_v18, 2102212464  ;;  %v2005_v24 = vcombine.high %v12745_v6, %v12745_v6  ;;  %v1965_v32 = vrot.slane %v172_v20, 5  ;;  %v12757_v37 = vsel %vm413_vm10, %v397_v9, %v400_v10 }
  0x62   :  { %v422_v30 = vsel %vm416_vm11, %v12729_v15, 920167782  ;;  %v12763_v41 = vmul.f32 %v1725_v60, %v12745_v6  ;;  %v1749_v35 = vmul.f32 %v1741_v56, %v12745_v6  ;;  %vm20013_vm15 = vcmask 1040384   ;;  %v12211_v50 = vpop.eup %12210 }
  0x63   :  { %v1966_v43 = vrot.slane %v1957_v28, 5  ;;  %v12768_v44 = vsel %vm413_vm10, %v400_v10, %v403_v11  ;;  %v12771_v48 = vmin.u32 %v343_v54, %v12721_v59  ;;  %v12776_v40 = vsel %vm415_vm12, %v403_v11, %v418_v22  ;;  %v12213_v9 = vpop.eup %12212 }
  0x64   :  { %v12780_v2 = vsel %vm413_vm10, %v403_v11, %v406_v18  ;;  %v12782_v39 = vadd.f32 -1.0, %v1749_v35  ;;  %v1765_v55 = vmul.f32 2.0, %v12763_v41  ;;  %v2053_v62 = vcombine.high %v12763_v41, %v12763_v41 }
  0x65   :  { %v12789_v8 = vsel %vm415_vm12, %v406_v18, %v422_v30  ;;  %v273_v10 = vxor.u32 2147483648, %v12211_v50  ;;  %vm20009_vm2 = vcmask 1041408   ;;  %v2014_v61 = vrot.slane %v2005_v24, 2 }
  0x66   :  { %v2013_v12 = vrot.slane %v12745_v6, 2  ;;  %v2454_v11 = vsel %vm2453_vm13, %v12436_v0, %v1965_v32  ;;  %v12795_v13 = vmul.f32 %v12782_v39, %v1765_v55  ;;  %v1781_v14 = vmul.f32 2.0, %v12782_v39 }
  0x67   :  { %v270_v17 = vxor.u32 2147483648, %v12213_v9  ;;  %v2455_v18 = vsel %vm2453_vm13, %v1933_v19, %v1966_v43  ;;  %v274_v7 = vsel %vm272_vm0, %v273_v10, %v12213_v9  ;;  %v1104_v20 = vsel %vm1102_vm4, %v273_v10, %v12213_v9 }
  0x68   :  { %v2062_v6 = vrot.slane %v2053_v62, 7  ;;  %vm20010_vm3 = vcmask 1046528   ;;  %v1789_v60 = vmul.f32 %v12782_v39, %v1781_v14  ;;  %v1805_v56 = vmul.f32 2.0, %v12795_v13 }
  0x69   :  { %vm20008_vm10 = vcmask 1044480   ;;  %v271_v0 = vsel %vm269_vm5, %v12211_v50, %v270_v17  ;;  %v1101_v19 = vsel %vm1099_vm6, %v12211_v50, %v270_v17  ;;  %v2125_v24 = vcombine.high %v12795_v13, %v12795_v13 }
  0x6a   :  { %v275_v28 = vsel %vm268_vm7, %v271_v0, %v274_v7  ;;  %v1105_v22 = vsel %vm1098_vm9, %v1101_v19, %v1104_v20  ;;  %v12820_v32 = vsel %vm20012_vm1, %v2455_v18, %v2014_v61  ;;  %v11697_v30 = vadd.f32 -1.0, %v1789_v60 }
  0x6b   :  { %v12824_v35 = vsel %vm265_vm14, nan, %v275_v28  ;;  %v12828_v43 = vsel %vm265_vm14, nan, %v1105_v22  ;;  %v2061_v1 = vrot.slane %v12763_v41, 7  ;;  %v20007_v55 = vrot.slane %v12795_v13, 1 }
  0x6c   :  { %v1726_v33 = vmul.f32 2.0, %v12824_v35  ;;  %v1742_v50 = vmul.f32 2.0, %v12828_v43  ;;  %v2489_v62 = vsel %vm20013_vm15, %v2014_v61, %v2062_v6  ;;  %v1813_v9 = vmul.f32 %v11697_v30, %v1805_v56 }
  0x6d   :  { %v1821_v10 = vmul.f32 2.0, %v11697_v30  ;;  %v2173_v14 = vcombine.high %v11697_v30, %v11697_v30  ;;  %v2181_v17 = vrot.slane %v11697_v30, 6  ;;  %v2134_v20 = vrot.slane %v2125_v24, 1 }
  0x6e   :  { %v12836_v18 = vmul.f32 %v1726_v33, %v12828_v43  ;;  %v1750_v7 = vmul.f32 %v1742_v50, %v12828_v43  ;;  %v12840_v41 = vsel %vm20012_vm1, %v2454_v11, %v2013_v12  ;;  %v1845_v0 = vmul.f32 2.0, %v1813_v9 }
  0x6f   :  { %v1829_v60 = vmul.f32 %v11697_v30, %v1821_v10  ;;  %v2182_v19 = vrot.slane %v2173_v14, 6  ;;  %v2221_v28 = vcombine.high %v1813_v9, %v1813_v9  ;;  %v2229_v6 = vrot.slane %v1813_v9, 3 }
  0x70   :  { %v12842_v22 = vadd.f32 -1.0, %v1750_v7  ;;  %v1766_v61 = vmul.f32 2.0, %v12836_v18  ;;  %v2506_v56 = vsel %vm20011_vm8, %v2489_v62, %v12782_v39  ;;  %v2539_v24 = vsel %vm20009_vm2, %v20007_v55, %v2181_v17 }
  0x71   :  { %v11705_v33 = vadd.f32 -1.0, %v1829_v60  ;;  %v1958_v11 = vcombine.high %v12824_v35, %v12824_v35  ;;  %v2230_v9 = vrot.slane %v2221_v28, 3  ;;  %v12859_v14 = vsel %vm20013_vm15, %v2013_v12, %v2061_v1 }
  0x72   :  { %v12855_v50 = vmul.f32 %v12842_v22, %v1766_v61  ;;  %v1782_v10 = vmul.f32 2.0, %v12842_v22  ;;  %v2540_v60 = vsel %vm20009_vm2, %v2134_v20, %v2182_v19  ;;  %v12863_v17 = vsel %vm20010_vm3, %v2506_v56, %v2134_v20  ;;  %v4951_v20 = vld [vmem:[%s19971_s3 + $0x18] sm:$0xff]  ;;  %v4948_v19 = vld [vmem:[%s19971_s3] sm:$0xff] }
  0x73   :  { %v1853_v62 = vmul.f32 %v11705_v33, %v1845_v0  ;;  %v1861_v7 = vmul.f32 2.0, %v11705_v33  ;;  %v12870_v36 = vsel %vm20008_vm10, %v2539_v24, %v2229_v6  ;;  %v12872_v0 = vrot.slane %v1958_v11, 5  ;;  %4973 = vperm.xlu1 %12160, %v4951_v20   ;;  %4958 = vperm.xlu0 %12159, %v4948_v19  }
  0x74   :  { %v1790_v26 = vmul.f32 %v12842_v22, %v1782_v10  ;;  %v1806_v31 = vmul.f32 2.0, %v12855_v50  ;;  %v2126_v61 = vcombine.high %v12855_v50, %v12855_v50  ;;  %v2269_v10 = vcombine.high %v11705_v33, %v11705_v33 }
  0x75   :  { %v1869_v28 = vmul.f32 %v11705_v33, %v1861_v7  ;;  %v1885_v12 = vmul.f32 2.0, %v1853_v62  ;;  %v2293_v1 = vcombine.high %v1853_v62, %v1853_v62  ;;  %v2557_v29 = vsel %vm20008_vm10, %v2540_v60, %v2230_v9  ;;  %v4949_v60 = vld [vmem:[%s19971_s3 + $0x8] sm:$0xff] }
  0x76   :  { %v12880_v56 = vadd.f32 -1.0, %v1790_v26  ;;  %v2135_v6 = vrot.slane %v12855_v50, 1  ;;  %v12884_v7 = vrot.slane %v2126_v61, 1  ;;  %v2301_v27 = vrot.slane %v1853_v62, 5  ;;  %v5869_v61 = vld [vmem:[%s19973_s5 + $0x30] sm:$0xff] }
  0x77   :  { %v11713_v24 = vadd.f32 -1.0, %v1869_v28  ;;  %v2302_v11 = vrot.slane %v2293_v1, 5  ;;  %v2006_v9 = vcombine.high %v12828_v43, %v12828_v43  ;;  %4963 = vperm.xlu1 %12160, %v4949_v60   ;;  %5903 = vperm.xlu0 %12159, %v5869_v61   ;;  %vm414_vm0 = vcmp.lt.s32.totalorder %v12681_v34, 2 }
  0x78   :  { %v12887_v25 = vmul.f32 %v12880_v56, %v1806_v31  ;;  %v1822_v23 = vmul.f32 2.0, %v12880_v56  ;;  %v2174_v26 = vcombine.high %v12880_v56, %v12880_v56  ;;  %v2183_v55 = vrot.slane %v12880_v56, 6 }
  0x79   :  { %v1893_v62 = vmul.f32 %v11713_v24, %v1885_v12  ;;  %v1901_v28 = vmul.f32 2.0, %v11713_v24  ;;  %v2341_v31 = vcombine.high %v11713_v24, %v11713_v24  ;;  %v2349_v1 = vrot.slane %v11713_v24, 2 }
  0x7a   :  { %v1830_v20 = vmul.f32 %v12880_v56, %v1822_v23  ;;  %v1846_v19 = vmul.f32 2.0, %v12887_v25  ;;  %v2573_v21 = vsel %vm2453_vm13, %v2269_v10, %v2302_v11  ;;  %v2184_v53 = vrot.slane %v2174_v26, 6  ;;  %v5870_v10 = vld [vmem:[%s19973_s5 + $0x38] sm:$0xff] }
  0x7b   :  { %v1909_v63 = vmul.f32 %v11713_v24, %v1901_v28  ;;  %v2350_v3 = vrot.slane %v2341_v31, 2  ;;  %v2389_v49 = vcombine.high %v1893_v62, %v1893_v62  ;;  %v2397_v16 = vrot.slane %v1893_v62, 7  ;;  %v5867_v24 = vld [vmem:[%s19973_s5 + $0x20] sm:$0xff]  ;;  %5908 = vperm.xlu1 %12160, %v5870_v10  }
  0x7c   :  { %v12903_v54 = vadd.f32 -1.0, %v1830_v20  ;;  %v2572_v12 = vsel %vm2453_vm13, %v11705_v33, %v2301_v27  ;;  %v2054_v23 = vcombine.high %v12836_v18, %v12836_v18  ;;  %v2222_v27 = vcombine.high %v12887_v25, %v12887_v25  ;;  %5893 = vperm.xlu0 %12159, %v5867_v24  }
  0x7d   :  { %v11721_v11 = vadd.f32 -1.0, %v1909_v63  ;;  %v2398_v26 = vrot.slane %v2389_v49, 7  ;;  %v2589_v60 = vsel %vm20012_vm1, %v2573_v21, %v2350_v3  ;;  %v2604_v61 = vsel %vm20013_vm15, %v2349_v1, %v2397_v16  ;;  %v5868_v16 = vld [vmem:[%s19973_s5 + $0x28] sm:$0xff] }
  0x7e   :  { %v1854_v33 = vmul.f32 %v12903_v54, %v1846_v19  ;;  %v1862_v56 = vmul.f32 2.0, %v12903_v54  ;;  %v2542_v62 = vsel %vm20009_vm2, %v12884_v7, %v2184_v53  ;;  %v12924_v49 = vpack.c.bf16 %v2589_v60, %v2557_v29  ;;  %v5865_v53 = vld [vmem:[%s19973_s5 + $0x10] sm:$0xff] }
  0x7f   :  { %v2605_v28 = vsel %vm20013_vm15, %v2350_v3, %v2398_v26  ;;  %v2437_v63 = vcombine.low %v11721_v11, %v11721_v11  ;;  %v2588_v21 = vsel %vm20012_vm1, %v2572_v12, %v2349_v1  ;;  %v2232_v10 = vrot.slane %v2222_v27, 3  ;;  %5898 = vperm.xlu1 %12160, %v5868_v16   ;;  %v5866_v27 = vld [vmem:[%s19973_s5 + $0x18] sm:$0xff] }
  0x80   :  { %20151 = vst [vmem:[#allocation5_spill] sm:$0xff] %v12924_v49  ;;  %v2621_v31 = vsel %vm20011_vm8, %v2605_v28, %v11721_v11  ;;  %v1870_v20 = vmul.f32 %v12903_v54, %v1862_v56  ;;  %v1886_v19 = vmul.f32 2.0, %v1854_v33  ;;  %v2294_v30 = vcombine.high %v1854_v33, %v1854_v33  ;;  %5883 = vperm.xlu0 %12159, %v5865_v53  }
  0x81   :  { %v4933_v3 = vpack.c.bf16 %v2621_v31, %v2621_v31  ;;  %v2620_v29 = vsel %vm20011_vm8, %v2604_v61, %v2437_v63  ;;  %v2270_v1 = vcombine.high %v12903_v54, %v12903_v54  ;;  %v12939_v11 = vpack.c.bf16 %v2588_v21, %v12870_v36 }
  0x82   :  { %v11714_v12 = vadd.f32 -1.0, %v1870_v20  ;;  %v4932_v24 = vpack.c.bf16 %v2620_v29, %v2620_v29  ;;  %v2303_v26 = vrot.slane %v1854_v33, 5  ;;  %v2304_v56 = vrot.slane %v2294_v30, 5 }
  0x83   :  { %20152 = vst [vmem:[#allocation6_spill] sm:$0xff] %v12939_v11  ;;  %v12942_v60 = vand.u32 %v12660_v57, %v4933_v3  ;;  %v2016_v28 = vrot.slane %v2006_v9, 2  ;;  %v2064_v31 = vrot.slane %v2054_v23, 7  ;;  %v2231_v33 = vrot.slane %v12887_v25, 3  ;;  %v5863_v23 = vld [vmem:[%s19973_s5] sm:$0xff]  ;;  %5888 = vperm.xlu1 %12160, %v5866_v27  }
  0x84   :  { %v1894_v61 = vmul.f32 %v11714_v12, %v1886_v19  ;;  %v1902_v63 = vmul.f32 2.0, %v11714_v12  ;;  %v2342_v20 = vcombine.high %v11714_v12, %v11714_v12  ;;  %v12948_v29 = vand.u32 %v12660_v57, %v4932_v24  ;;  %5873 = vperm.xlu0 %12159, %v5863_v23  }
  0x85   :  { %20153 = vst [vmem:[#allocation7_spill] sm:$0xff] %v12942_v60  ;;  %5089 = vmatprep.subr.bf16.mxu0 %v12942_v60  ;;  %v2351_v36 = vrot.slane %v11714_v12, 2  ;;  %v2541_v30 = vsel %vm20009_vm2, %v2135_v6, %v2183_v55  ;;  %v2574_v9 = vsel %vm2453_vm13, %v12903_v54, %v2303_v26  ;;  %vm5016_vm4 = vcmask 318464  }
  0x86   :  { %20154 = vst [vmem:[#allocation8_spill] sm:$0xff] %v12948_v29  ;;  %v1910_v21 = vmul.f32 %v11714_v12, %v1902_v63  ;;  %v2352_v19 = vrot.slane %v2342_v20, 2  ;;  %v2390_v16 = vcombine.high %v1894_v61, %v1894_v61  ;;  %5090 = vmatpush1.bf16.msra.mxu0 %v12948_v29  ;;  %v2399_v53 = vrot.slane %v1894_v61, 7 }
  0x87   :  { %5091 = vmatprep.subr.bf16.mxu0 %v12924_v49  ;;  %v12965_v25 = vpack.c.bf16 %v12863_v17, %v12820_v32  ;;  %v2457_v54 = vsel %vm2453_vm13, %v1934_v45, %v12872_v0  ;;  %v2491_v55 = vsel %vm20013_vm15, %v2016_v28, %v2064_v31  ;;  %v20156_v3 = vcombine.low %v12782_v39, %v12782_v39 }
  0x88   :  { %v11722_v24 = vadd.f32 -1.0, %v1910_v21  ;;  %v2400_v26 = vrot.slane %v2390_v16, 7  ;;  %v2559_v27 = vsel %vm20008_vm10, %v2542_v62, %v2232_v10  ;;  %v2575_v32 = vsel %vm2453_vm13, %v2270_v1, %v2304_v56  ;;  %v7974_v62 = vld [vmem:[%s19976_s8 + $0x30] sm:$0xff]  ;;  %5878 = vperm.xlu1 %12160, %v5864_v5  }
  0x89   :  { %20155 = vst [vmem:[#allocation9_spill] sm:$0xff] %v12965_v25  ;;  %v2505_v12 = vsel %vm20011_vm8, %v12859_v14, %v20156_v3  ;;  %v2606_v45 = vsel %vm20013_vm15, %v2351_v36, %v2399_v53  ;;  %v2558_v17 = vsel %vm20008_vm10, %v2541_v30, %v2231_v33  ;;  %v2590_v39 = vsel %vm20012_vm1, %v2574_v9, %v2351_v36  ;;  %v7975_v9 = vld [vmem:[%s19976_s8 + $0x38] sm:$0xff] }
  0x8a   :  { %v20157_v0 = vrot.slane %v12795_v13, 1  ;;  %v2607_v10 = vsel %vm20013_vm15, %v2352_v19, %v2400_v26  ;;  %v2438_v1 = vcombine.low %v11722_v24, %v11722_v24  ;;  %5092 = vmatpush1.bf16.msra.mxu0 %v12939_v11  ;;  %v2508_v56 = vsel %vm20011_vm8, %v2491_v55, %v12842_v22  ;;  %8008 = vperm.xlu0 %12159, %v7974_v62  }
  0x8b   :  { %v2623_v61 = vsel %vm20011_vm8, %v2607_v10, %v11722_v24  ;;  %v2591_v13 = vsel %vm20012_vm1, %v2575_v32, %v2352_v19  ;;  %5093 = vmatprep.subr.bf16.mxu0 %v12965_v25  ;;  %v1967_v63 = vrot.slane %v12824_v35, 5  ;;  %v2015_v20 = vrot.slane %v12828_v43, 2  ;;  %v13017_v43 = vld [vmem:[%s20159_s0] sm:$0xff]  }
  0x8c   :  { %v2522_v14 = vsel %vm20010_vm3, %v2505_v12, %v20157_v0  ;;  %v4935_v36 = vpack.c.bf16 %v2623_v61, %v2623_v61  ;;  %v2622_v33 = vsel %vm20011_vm8, %v2606_v45, %v2438_v1  ;;  %v2063_v30 = vrot.slane %v12836_v18, 7  ;;  %8013 = vperm.xlu1 %12160, %v7975_v9  }
  0x8d   :  { %v12997_v31 = vpack.c.bf16 %v2522_v14, %v12840_v41  ;;  %v2102_v41 = vcombine.low %v12842_v22, %v12842_v22  ;;  %v4934_v23 = vpack.c.bf16 %v2622_v33, %v2622_v33  ;;  %v2474_v21 = vsel %vm20012_vm1, %v2457_v54, %v2016_v28  ;;  %v7972_v22 = vld [vmem:[%s19976_s8 + $0x20] sm:$0xff] }
  0x8e   :  { %v2525_v35 = vsel %vm20010_vm3, %v2508_v56, %v12884_v7  ;;  %v20160_v18 = vclz %v12771_v48  ;;  %v13025_v16 = vand.u32 %v12660_v57, %v4935_v36  ;;  %v13027_v53 = vpack.c.bf16 %v2591_v13, %v2559_v27  ;;  %v12270_v7 = vld [vmem:[%s20146_s29 + $0x8] sm:$0x77]  ;;  %7998 = vperm.xlu0 %12159, %v7972_v22  }
  0x8f   :  { %20158 = vst [vmem:[#allocation10_spill] sm:$0xff] %v12997_v31  ;;  %5094 = vmatpush1.bf16.msra.mxu0 %v12997_v31  ;;  %v2456_v28 = vsel %vm2453_vm13, %v12270_v7, %v1967_v63  ;;  %v2490_v48 = vsel %vm20013_vm15, %v2015_v20, %v2063_v30  ;;  %v13036_v54 = vand.u32 %v12660_v57, %v4934_v23  ;;  %v20169_v34 = vand.u32 2139095040, %v12695_v46 }
  0x90   :  { %v11635_v19 = vadd.s32 4294967294, %v20160_v18  ;;  %20161 = vst [vmem:[#allocation11_spill] sm:$0xff] %v13025_v16  ;;  %20162 = vst [vmem:[#allocation12_spill] sm:$0xff] %v13027_v53  ;;  %v2507_v55 = vsel %vm20011_vm8, %v2490_v48, %v2102_v41  ;;  %v20164_v3 = vor.u32 %v12707_v52, %v12704_v51  ;;  %5162 = vmatprep.subr.bf16.mxu1 %v13025_v16  ;;  %v7973_v51 = vld [vmem:[%s19976_s8 + $0x28] sm:$0xff]  ;;  %vm279_vm6 = vcmp.lt.s32.totalorder %v12533_v38, 0  ;;  %v13130_v48 = vld [vmem:[%s20159_s0 + $0x10] sm:$0xff]  }
  0x91   :  { %20163 = vst [vmem:[#allocation13_spill] sm:$0xff] %v13036_v54  ;;  %v13045_v24 = vpack.c.bf16 %v2590_v39, %v2558_v17  ;;  %v13047_v26 = vpack.c.bf16 %v2525_v35, %v2474_v21  ;;  %v424_v32 = vsel %vm414_vm0, %v12768_v44, %v12789_v8  ;;  %5163 = vmatpush1.bf16.msra.mxu1 %v13036_v54  ;;  %v7970_v44 = vld [vmem:[%s19976_s8 + $0x10] sm:$0xff]  ;;  %v20167_v39 = vmov 0  }
  0x92   :  { %vm11636_vm5 = vcmp.lt.s32.totalorder %v11635_v19, 0  ;;  %v426_v12 = vsel %vm416_vm11, %v20164_v3, 1326507024  ;;  %v2473_v52 = vsel %vm20012_vm1, %v2456_v28, %v2015_v20  ;;  %11821 = vmatmul.mubr.msk.bf16.vlgmr.msra.gmra.mxu0 %vm5016_vm4, %v13017_v43  ;;  %5164 = vmatprep.subr.bf16.mxu1 %v13027_v53  ;;  %v2524_v8 = vsel %vm20010_vm3, %v2507_v55, %v2135_v6 }
  0x93   :  { %20165 = vst [vmem:[#allocation14_spill] sm:$0xff] %v13045_v24  ;;  %20166 = vst [vmem:[#allocation15_spill] sm:$0xff] %v13047_v26  ;;  %v348_v27 = vsel %vm11636_vm5, 0, %v11635_v19  ;;  %5121 = vmatprep.mubr.bf16.mxu0 %v20167_v39  ;;  %v427_v0 = vsel %vm415_vm12, %v12729_v15, %v426_v12  ;;  %v420_v50 = vsel %vm414_vm0, %v12757_v37, %v12776_v40  ;;  %8003 = vperm.xlu1 %12160, %v7973_v51   ;;  %v20178_v41 = vmov 920167782  }
  0x94   :  { %v349_v5 = vsub.s32 32, %v348_v27  ;;  %v350_v45 = vshll.u32 %v12721_v59, %v348_v27  ;;  %v353_v17 = vsub.s32 4294967266, %v348_v27  ;;  %v428_v6 = vsel %vm414_vm0, %v12780_v2, %v427_v0  ;;  %7988 = vperm.xlu0 %12159, %v7970_v44  }
  0x95   :  { %v13073_v14 = vmul.u32.u64.low %v12687_v42, %v424_v32  ;;  %v13074_v59 = vmul.u32.u64.high %v12687_v42, %v424_v32, %v13073_v14  ;;  %v13086_v15 = vmul.u32.u64.low %v12687_v42, %v428_v6  ;;  %v13087_v1 = vmul.u32.u64.high %v12687_v42, %v428_v6, %v13086_v15  ;;  %5165 = vmatpush1.bf16.msra.mxu1 %v13045_v24 }
  0x96   :  { %v351_v62 = vshrl.u32 %v12710_v58, %v349_v5  ;;  %v354_v10 = vadd.s32 127, %v353_v17  ;;  %v13090_v56 = vpack.c.bf16 %v2524_v8, %v2473_v52  ;;  %v13095_v58 = vld [vmem:[%s20159_s0 + $0x8] sm:$0xff]   ;;  %v489_v2 = vshrl.u32 %v20169_v34, 23  ;;  %5166 = vmatprep.subr.bf16.mxu1 %v13047_v26 }
  0x97   :  { %v436_v61 = vmul.u32 %v12687_v42, %v420_v50  ;;  %v439_v13 = vadd.s32 1, %v13074_v59  ;;  %v20170_v36 = vsub.s32 4, %v12697_v47  ;;  %vm438_vm7 = vc.u32 %v13087_v1, %v13073_v14  ;;  %v13162_v15 = vld [vmem:[%s20146_s29 + $0x28] sm:$0x77] }
  0x98   :  { %20168 = vst [vmem:[#allocation16_spill] sm:$0xff] %v13090_v56  ;;  %v352_v37 = vor.u32 %v351_v62, %v350_v45  ;;  %v355_v40 = vshll.u32 %v354_v10, 23  ;;  %v11641_v30 = vadd.s32 4294967169, %v489_v2  ;;  %v20171_v42 = vand.u32 2147483647, %v12533_v38 }
  0x99   :  { %v364_v33 = vsel %vm279_vm6, %v20170_v36, %v12697_v47  ;;  %5167 = vmatpush1.bf16.msra.mxu1 %v13090_v56  ;;  %v440_v23 = vsel %vm438_vm7, %v439_v13, %v13074_v59  ;;  %v20015_v18 = vand.u32 2147483647, %v12695_v46  ;;  %v13145_v45 = vld [vmem:[%s20146_s29 + $0x10] sm:$0x77]  ;;  %v20174_v38 = vmov 683565275  }
  0x9a   :  { %v356_v63 = vor.u32 4788187, %v355_v40  ;;  %v359_v20 = vcvt.s32.f32 %v352_v37  ;;  %11822 = vmatmul.mubr.msk.bf16.gmra.mxu0 %vm5016_vm4, %v13095_v58  ;;  %vm13115_vm9 = vcmp.le.f32.partialorder %v20171_v42, 0.7853982  ;;  %v495_v21 = vadd.s32 1, %v11641_v30  ;;  %v13179_v30 = vld [vmem:[%s20159_s0 + $0x18] sm:$0xff]  }
  0x9b   :  { %5131 = vmatprep.mubr.bf16.mxu0 %v20167_v39  ;;  %v366_v47 = vsel %vm13115_vm9, 0, %v364_v33  ;;  %v441_v35 = vadd.s32 %v440_v23, %v436_v61  ;;  %v492_v27 = vand.u32 8388607, %v20015_v18  ;;  %v20175_v59 = vmov 2475754826  }
  0x9c   :  { %v357_v9 = vand.u32 2147483647, %v356_v63  ;;  %v370_v22 = vadd.s32 3, %v366_v47  ;;  %vm496_vm11 = vcmp.gt.s32.totalorder %v495_v21, 0  ;;  %11825 = vmatmul.mubr.msk.bf16.vlgmr.msra.gmra.mxu1 %vm5016_vm4, %v13017_v43  ;;  %v13140_v52 = vand.u32 3, %v366_v47 }
  0x9d   :  { %v442_v7 = vadd.s32 536870912, %v441_v35  ;;  %v497_v28 = vsel %vm496_vm11, %v495_v21, 0  ;;  %5194 = vmatprep.mubr.bf16.mxu1 %v20167_v39  ;;  %v20176_v50 = vmov 2131351028   ;;  %v20177_v34 = vmov 2102212464  }
  0x9e   :  { %v360_v19 = vmul.f32 %v359_v20, %v357_v9  ;;  %v499_v3 = vand.u32 31, %v497_v28  ;;  %v13138_v51 = vand.u32 3, %v370_v22  ;;  %v13151_v8 = vshrl.u32 %v497_v28, 5 }
  0x9f   :  { %v13132_v12 = vshrl.u32 %v442_v7, 30  ;;  %v493_v61 = vor.u32 8388608, %v492_v27  ;;  %v20014_v36 = vand.u32 2147483647, %v13162_v15  ;;  %v592_v33 = vand.u32 2139095040, %v13162_v15 }
  0xa0   :  { %v361_v55 = vxor.u32 2147483648, %v360_v19  ;;  %v500_v5 = vsub.s32 32, %v499_v3  ;;  %v502_v0 = vshll.u32 %v20174_v38, %v499_v3  ;;  %v505_v10 = vshll.u32 %v20175_v59, %v499_v3 }
  0xa1   :  { %v444_v44 = vshll.u32 %v13132_v12, 30  ;;  %v508_v40 = vshll.u32 %v20176_v50, %v499_v3  ;;  %v511_v13 = vshll.u32 %v20177_v34, %v499_v3  ;;  %v514_v23 = vshll.u32 %v20178_v41, %v499_v3 }
  0xa2   :  { %v362_v32 = vsel %vm279_vm6, %v361_v55, %v360_v19  ;;  %11823 = vmatmul.mubr.msk.bf16.gmra.mxu0 %vm5016_vm4, %v13130_v48  ;;  %v503_v62 = vshrl.u32 %v20175_v59, %v500_v5  ;;  %v506_v6 = vshrl.u32 %v20176_v50, %v500_v5  ;;  %v509_v2 = vshrl.u32 %v20177_v34, %v500_v5 }
  0xa3   :  { %v365_v17 = vsel %vm13115_vm9, %v13145_v45, %v362_v32  ;;  %v13164_v37 = vsub.s32 %v441_v35, %v444_v44  ;;  %5141 = vmatprep.mubr.bf16.mxu0 %v20167_v39  ;;  %v512_v9 = vshrl.u32 %v20178_v41, %v500_v5  ;;  %v20179_v21 = vmov 1326507024   ;;  %v13187_v35 = vld [vmem:[%s20146_s29 + $0x30] sm:$0x77] }
  0xa4   :  { %12214 = vcosq.f32 %v365_v17  ;;  %11826 = vmatmul.mubr.msk.bf16.gmra.mxu1 %vm5016_vm4, %v13095_v58  ;;  %v504_v20 = vor.u32 %v503_v62, %v502_v0  ;;  %v507_v42 = vor.u32 %v506_v6, %v505_v10  ;;  %v515_v47 = vshrl.u32 %v20179_v21, %v500_v5 }
  0xa5   :  { %12216 = vsinq.f32 %v365_v17  ;;  %v447_v63 = vsub.s32 0, %v13164_v37  ;;  %5204 = vmatprep.mubr.bf16.mxu1 %v20167_v39  ;;  %vm376_vm14 = vcmp.eq.s32.totalorder %v13138_v51, 2  ;;  %vm1205_vm12 = vcmp.eq.s32.totalorder %v13140_v52, 2 }
  0xa6   :  { %v437_v19 = vadd.s32 %v13073_v14, %v13087_v1  ;;  %v510_v7 = vor.u32 %v509_v2, %v508_v40  ;;  %vm517_vm0 = vcmp.lt.s32.totalorder %v13151_v8, 1  ;;  %vm373_vm5 = vcmp.eq.s32.totalorder %v13138_v51, 0  ;;  %v13205_v14 = vld [vmem:[%s20146_s29 + $0x18] sm:$0x77] }
  0xa7   :  { %v11638_v22 = vmin.u32 %v447_v63, %v13164_v37  ;;  %vm1202_vm6 = vcmp.eq.s32.totalorder %v13140_v52, 0  ;;  %v501_v28 = vshrl.u32 %v20174_v38, %v500_v5  ;;  %v513_v55 = vor.u32 %v512_v9, %v511_v13 }
  0xa8   :  { %v516_v3 = vor.u32 %v515_v47, %v514_v23  ;;  %v13198_v27 = vshll.u32 %v493_v61, 8  ;;  %vm372_vm7 = vcmp.lt.s32.totalorder %v13138_v51, 2  ;;  %vm1201_vm9 = vcmp.lt.s32.totalorder %v13140_v52, 2 }
  0xa9   :  { %vm383_vm11 = vcmp.lt.s32.totalorder %v13205_v14, 0  ;;  %v449_v1 = vclz %v11638_v22  ;;  %v593_v32 = vshrl.u32 %v592_v33, 23  ;;  %v13210_v5 = vand.u32 8388607, %v20014_v36 }
  0xaa   :  { %v696_v17 = vand.u32 2139095040, %v13187_v35  ;;  %vm369_vm10 = vweird.f32 %v13145_v45  ;;  %11824 = vmatmul.mubr.msk.bf16.gmra.mxu0 %vm5016_vm4, %v13179_v30  ;;  %vm518_vm2 = vcmp.lt.s32.totalorder %v13151_v8, 2  ;;  %vm519_vm3 = vcmp.lt.s32.totalorder %v13151_v8, 3 }
  0xab   :  { %vm520_vm8 = vcmp.lt.s32.totalorder %v13151_v8, 4  ;;  %v525_v44 = vsel %vm517_vm0, %v504_v20, %v507_v42  ;;  %v11639_v0 = vadd.s32 4294967294, %v449_v1  ;;  %5257 = vmatprep.mubr.bf16.mxu0 %v20167_v39  ;;  %v529_v6 = vsel %vm517_vm0, %v507_v42, %v510_v7 }
  0xac   :  { %v522_v62 = vsel %vm520_vm8, %v510_v7, 2102212464  ;;  %v526_v10 = vsel %vm520_vm8, %v513_v55, 920167782  ;;  %v467_v40 = vsub.s32 4, %v13132_v12  ;;  %v521_v2 = vsel %vm517_vm0, %v501_v28, %v504_v20  ;;  %11827 = vmatmul.mubr.msk.bf16.gmra.mxu1 %vm5016_vm4, %v13130_v48 }
  0xad   :  { %v527_v61 = vsel %vm519_vm3, %v510_v7, %v526_v10  ;;  %v530_v13 = vsel %vm520_vm8, %v516_v3, 1326507024  ;;  %v20180_v63 = vand.u32 2147483647, %v12566_v4  ;;  %vm11640_vm15 = vcmp.lt.s32.totalorder %v11639_v0, 0  ;;  %5214 = vmatprep.mubr.bf16.mxu1 %v20167_v39 }
  0xae   :  { %v523_v9 = vsel %vm519_vm3, %v507_v42, %v522_v62  ;;  %v528_v20 = vsel %vm518_vm2, %v525_v44, %v527_v61  ;;  %v531_v23 = vsel %vm519_vm3, %v513_v55, %v530_v13  ;;  %v452_v47 = vsel %vm11640_vm15, 0, %v11639_v0 }
  0xaf   :  { %vm13233_vm1 = vcmp.le.f32.partialorder %v20180_v63, 0.7853982  ;;  %v532_v4 = vsel %vm518_vm2, %v529_v6, %v531_v23  ;;  %v13247_v22 = vmul.u32.u64.low %v13198_v27, %v528_v20  ;;  %v13248_v7 = vmul.u32.u64.high %v13198_v27, %v528_v20, %v13247_v22 }
  0xb0   :  { %v453_v3 = vsub.s32 32, %v452_v47  ;;  %v454_v42 = vshll.u32 %v13164_v37, %v452_v47  ;;  %v457_v1 = vsub.s32 4294967266, %v452_v47  ;;  %v597_v44 = vor.u32 8388608, %v13210_v5 }
  0xb1   :  { %v12215_v28 = vpop.eup %12214  ;;  %v13254_v0 = vmul.u32.u64.low %v13198_v27, %v532_v4  ;;  %v13255_v10 = vmul.u32.u64.high %v13198_v27, %v532_v4, %v13254_v0  ;;  %v11645_v61 = vadd.s32 4294967169, %v593_v32  ;;  %v524_v20 = vsel %vm518_vm2, %v521_v2, %v523_v9 }
  0xb2   :  { %v12217_v62 = vpop.eup %12216  ;;  %v377_v55 = vxor.u32 2147483648, %v12215_v28  ;;  %v455_v13 = vshrl.u32 %v437_v19, %v453_v3  ;;  %v458_v63 = vadd.s32 127, %v457_v1  ;;  %v468_v5 = vsel %vm383_vm11, %v467_v40, %v13132_v12 }
  0xb3   :  { %v374_v6 = vxor.u32 2147483648, %v12217_v62  ;;  %v543_v47 = vadd.s32 1, %v13248_v7  ;;  %v540_v3 = vmul.u32 %v13198_v27, %v524_v20  ;;  %vm542_vm8 = vc.u32 %v13255_v10, %v13247_v22 }
  0xb4   :  { %v378_v23 = vsel %vm376_vm14, %v377_v55, %v12217_v62  ;;  %v1207_v37 = vsel %vm1205_vm12, %v377_v55, %v12217_v62  ;;  %v456_v8 = vor.u32 %v455_v13, %v454_v42  ;;  %v459_v2 = vshll.u32 %v458_v63, 23  ;;  %11828 = vmatmul.mubr.msk.bf16.gmra.mxu1 %vm5016_vm4, %v13179_v30 }
  0xb5   :  { %v375_v32 = vsel %vm373_vm5, %v12215_v28, %v374_v6  ;;  %v1204_v19 = vsel %vm1202_vm6, %v12215_v28, %v374_v6  ;;  %v470_v27 = vsel %vm13233_vm1, 0, %v468_v5  ;;  %5330 = vmatprep.mubr.bf16.mxu1 %v20167_v39  ;;  %v697_v1 = vshrl.u32 %v696_v17, 23 }
  0xb6   :  { %v379_v9 = vsel %vm372_vm7, %v375_v32, %v378_v23  ;;  %v1208_v4 = vsel %vm1201_vm9, %v1204_v19, %v1207_v37  ;;  %v460_v28 = vor.u32 4788187, %v459_v2  ;;  %v463_v42 = vcvt.s32.f32 %v456_v8 }
  0xb7   :  { %v380_v12 = vsel %vm369_vm10, nan, %v379_v9  ;;  %v13282_v40 = vsel %vm369_vm10, nan, %v1208_v4  ;;  %v474_v55 = vadd.s32 3, %v470_v27  ;;  %v544_v0 = vsel %vm542_vm8, %v543_v47, %v13248_v7 }
  0xb8   :  { %v1727_v51 = vmul.f32 2.0, %v380_v12  ;;  %v1743_v52 = vmul.f32 2.0, %v13282_v40  ;;  %v461_v62 = vand.u32 2147483647, %v460_v28  ;;  %v599_v6 = vadd.s32 1, %v11645_v61 }
  0xb9   :  { %v1935_v20 = vcombine.high %v13145_v45, %v13145_v45  ;;  %v1959_v23 = vcombine.high %v380_v12, %v380_v12  ;;  %v545_v32 = vadd.s32 %v544_v0, %v540_v3  ;;  %v13297_v19 = vshll.u32 %v597_v44, 8 }
  0xba   :  { %v1735_v13 = vmul.f32 %v1727_v51, %v13282_v40  ;;  %v1751_v63 = vmul.f32 %v1743_v52, %v13282_v40  ;;  %v464_v37 = vmul.f32 %v463_v42, %v461_v62  ;;  %v13299_v2 = vand.u32 3, %v470_v27 }
  0xbb   :  { %v13301_v7 = vadd.s32 4294967169, %v697_v1  ;;  %v13303_v47 = vand.u32 3, %v474_v55  ;;  %v2007_v9 = vcombine.high %v13282_v40, %v13282_v40  ;;  %vm600_vm15 = vcmp.gt.s32.totalorder %v599_v6, 0 }
  0xbc   :  { %v11691_v17 = vadd.f32 -1.0, %v1751_v63  ;;  %v1767_v8 = vmul.f32 2.0, %v1735_v13  ;;  %v465_v61 = vxor.u32 2147483648, %v464_v37  ;;  %v1970_v42 = vrot.slane %v1959_v23, 5 }
  0xbd   :  { %v2055_v3 = vcombine.high %v1735_v13, %v1735_v13  ;;  %v2017_v51 = vrot.slane %v13282_v40, 2  ;;  %v2065_v52 = vrot.slane %v1735_v13, 7  ;;  %v546_v27 = vadd.s32 536870912, %v545_v32 }
  0xbe   :  { %v13307_v4 = vmul.f32 %v11691_v17, %v1767_v8  ;;  %v1783_v28 = vmul.f32 2.0, %v11691_v17  ;;  %v466_v44 = vsel %vm383_vm11, %v465_v61, %v464_v37  ;;  %v601_v0 = vsel %vm600_vm15, %v599_v6, 0 }
  0xbf   :  { %v469_v55 = vsel %vm13233_vm1, %v13205_v14, %v466_v44  ;;  %v2018_v63 = vrot.slane %v2007_v9, 2  ;;  %v1969_v8 = vrot.slane %v380_v12, 5  ;;  %v13316_v23 = vshrl.u32 %v601_v0, 5 }
  0xc0   :  { %v1791_v1 = vmul.f32 %v11691_v17, %v1783_v28  ;;  %v1807_v62 = vmul.f32 2.0, %v13307_v4  ;;  %12218 = vcosq.f32 %v469_v55  ;;  %v2066_v37 = vrot.slane %v2055_v3, 7 }
  0xc1   :  { %12220 = vsinq.f32 %v469_v55  ;;  %v2459_v40 = vsel %vm2453_vm13, %v1935_v20, %v1970_v42  ;;  %v2103_v13 = vcombine.low %v11691_v17, %v11691_v17  ;;  %vm20183_vm2 = vcmask 1040384  }
  0xc2   :  { %v11699_v36 = vadd.f32 -1.0, %v1791_v1  ;;  %v2492_v61 = vsel %vm20183_vm2, %v2017_v51, %v2065_v52  ;;  %v13322_v28 = vadd.s32 %v13247_v22, %v13255_v10  ;;  %v547_v33 = vshrl.u32 %v546_v27, 30  ;;  %vm20185_vm12 = vmmov %vm20183_vm2 }
  0xc3   :  { %v2127_v12 = vcombine.high %v13307_v4, %v13307_v4  ;;  %vm487_vm1 = vcmp.lt.s32.totalorder %v12695_v46, 0  ;;  %vm20184_vm3 = vcmask 1045504   ;;  %v2458_v20 = vsel %vm2453_vm13, %v13145_v45, %v1969_v8 }
  0xc4   :  { %v1815_v44 = vmul.f32 %v11699_v36, %v1807_v62  ;;  %v1823_v6 = vmul.f32 2.0, %v11699_v36  ;;  %v2175_v9 = vcombine.high %v11699_v36, %v11699_v36  ;;  %v13328_v3 = vsel %vm20184_vm3, %v2459_v40, %v2018_v63  ;;  %vm20187_vm9 = vmmov %vm20184_vm3 }
  0xc5   :  { %v548_v42 = vshll.u32 %v547_v33, 30  ;;  %v13332_v52 = vand.u32 31, %v601_v0  ;;  %vm480_vm10 = vcmp.eq.s32.totalorder %v13303_v47, 2  ;;  %vm1308_vm14 = vcmp.eq.s32.totalorder %v13299_v2, 2 }
  0xc6   :  { %v1831_v22 = vmul.f32 %v11699_v36, %v1823_v6  ;;  %v1847_v10 = vmul.f32 2.0, %v1815_v44  ;;  %v2137_v27 = vrot.slane %v13307_v4, 1  ;;  %v2493_v1 = vsel %vm20185_vm12, %v2018_v63, %v2066_v37 }
  0xc7   :  { %vm477_vm0 = vcmp.eq.s32.totalorder %v13303_v47, 0  ;;  %v2223_v62 = vcombine.high %v1815_v44, %v1815_v44  ;;  %v2185_v55 = vrot.slane %v11699_v36, 6  ;;  %vm20186_vm5 = vcmask 1043456  }
  0xc8   :  { %v2509_v40 = vsel %vm20186_vm5, %v2492_v61, %v2103_v13  ;;  %v13340_v45 = vsub.s32 %v545_v32, %v548_v42  ;;  %v11707_v0 = vadd.f32 -1.0, %v1831_v22  ;;  %vm476_vm6 = vcmp.lt.s32.totalorder %v13303_v47, 2  ;;  %vm20188_vm8 = vmmov %vm20186_vm5 }
  0xc9   :  { %vm1305_vm7 = vcmp.eq.s32.totalorder %v13299_v2, 0  ;;  %v2138_v8 = vrot.slane %v2127_v12, 1  ;;  %v2186_v6 = vrot.slane %v2175_v9, 6  ;;  %v13345_v5 = vsel %vm20187_vm9, %v2458_v20, %v2017_v51 }
  0xca   :  { %vm1304_vm11 = vcmp.lt.s32.totalorder %v13299_v2, 2  ;;  %v2510_v4 = vsel %vm20188_vm8, %v2493_v1, %v11691_v17  ;;  %v551_v36 = vsub.s32 0, %v13340_v45  ;;  %v571_v63 = vsub.s32 4, %v547_v33 }
  0xcb   :  { %v13351_v32 = vsub.s32 32, %v13332_v52  ;;  %v1855_v37 = vmul.f32 %v11707_v0, %v1847_v10  ;;  %v1863_v13 = vmul.f32 2.0, %v11707_v0  ;;  %vm473_vm15 = vweird.f32 %v13205_v14 }
  0xcc   :  { %v2233_v61 = vrot.slane %v1815_v44, 3  ;;  %vm20189_vm2 = vcmask 1046528   ;;  %v2234_v51 = vrot.slane %v2223_v62, 3  ;;  %vm20190_vm3 = vcmask 1041408  }
  0xcd   :  { %v13355_v12 = vsel %vm20189_vm2, %v2509_v40, %v2137_v27  ;;  %v2543_v9 = vsel %vm20190_vm3, %v2137_v27, %v2185_v55  ;;  %v11642_v20 = vmin.u32 %v551_v36, %v13340_v45  ;;  %v13361_v17 = vshrl.u32 %v20174_v38, %v13351_v32  ;;  %vm20191_vm12 = vmmov %vm20190_vm3  ;;  %v12219_v55 = vpop.eup %12218 }
  0xce   :  { %v1871_v42 = vmul.f32 %v11707_v0, %v1863_v13  ;;  %v1887_v22 = vmul.f32 2.0, %v1855_v37  ;;  %v2295_v1 = vcombine.high %v1855_v37, %v1855_v37  ;;  %v2544_v10 = vsel %vm20191_vm12, %v2138_v8, %v2186_v6  ;;  %vm20192_vm5 = vmmov %vm20189_vm2 }
  0xcf   :  { %v2305_v18 = vrot.slane %v1855_v37, 5  ;;  %v13365_v44 = vsel %vm20192_vm5, %v2510_v4, %v2138_v8  ;;  %v572_v62 = vsel %vm487_vm1, %v571_v63, %v547_v33  ;;  %v13371_v27 = vshll.u32 %v20174_v38, %v13332_v52  ;;  %v12221_v37 = vpop.eup %12220 }
  0xd0   :  { %v11715_v40 = vadd.f32 -1.0, %v1871_v42  ;;  %v2271_v36 = vcombine.high %v11707_v0, %v11707_v0  ;;  %vm20193_vm9 = vcmask 1044480   ;;  %v13378_v6 = vshrl.u32 %v20175_v59, %v13351_v32 }
  0xd1   :  { %v13374_v13 = vsel %vm20193_vm9, %v2543_v9, %v2233_v61  ;;  %v481_v8 = vxor.u32 2147483648, %v12219_v55  ;;  %v2306_v4 = vrot.slane %v2295_v1, 5  ;;  %vm20194_vm8 = vmmov %vm20193_vm9  ;;  %v553_v33 = vclz %v11642_v20 }
  0xd2   :  { %v2561_v56 = vsel %vm20194_vm8, %v2544_v10, %v2234_v51  ;;  %v1895_v63 = vmul.f32 %v11715_v40, %v1887_v22  ;;  %v1903_v26 = vmul.f32 2.0, %v11715_v40  ;;  %v2343_v24 = vcombine.high %v11715_v40, %v11715_v40 }
  0xd3   :  { %v478_v53 = vxor.u32 2147483648, %v12221_v37  ;;  %v482_v42 = vsel %vm480_vm10, %v481_v8, %v12221_v37  ;;  %v1310_v61 = vsel %vm1308_vm14, %v481_v8, %v12221_v37  ;;  %v2353_v9 = vrot.slane %v11715_v40, 2 }
  0xd4   :  { %v2576_v54 = vsel %vm2453_vm13, %v11707_v0, %v2305_v18  ;;  %v1911_v16 = vmul.f32 %v11715_v40, %v1903_v26  ;;  %v2354_v31 = vrot.slane %v2343_v24, 2  ;;  %v2391_v25 = vcombine.high %v1895_v63, %v1895_v63 }
  0xd5   :  { %v479_v51 = vsel %vm477_vm0, %v12219_v55, %v478_v53  ;;  %v20195_v20 = vand.u32 2147483647, %v12695_v46  ;;  %v1307_v10 = vsel %vm1305_vm7, %v12219_v55, %v478_v53  ;;  %v2401_v37 = vrot.slane %v1895_v63, 7 }
  0xd6   :  { %v483_v1 = vsel %vm476_vm6, %v479_v51, %v482_v42  ;;  %v2577_v26 = vsel %vm2453_vm13, %v2271_v36, %v2306_v4  ;;  %v11723_v24 = vadd.f32 -1.0, %v1911_v16  ;;  %v2402_v18 = vrot.slane %v2391_v25, 7 }
  0xd7   :  { %vm13390_vm2 = vcmp.le.f32.partialorder %v20195_v20, 0.7853982  ;;  %v13401_v0 = vsel %vm473_vm15, nan, %v483_v1  ;;  %v1311_v40 = vsel %vm1304_vm11, %v1307_v10, %v1310_v61  ;;  %vm20198_vm10 = vcmask 1040384  }
  0xd8   :  { %v13407_v8 = vsel %vm473_vm15, nan, %v1311_v40  ;;  %v1728_v47 = vmul.f32 2.0, %v13401_v0  ;;  %v2608_v53 = vsel %vm20198_vm10, %v2353_v9, %v2401_v37  ;;  %v11643_v55 = vadd.s32 4294967294, %v553_v33  ;;  %vm20199_vm14 = vmmov %vm20198_vm10 }
  0xd9   :  { %v2439_v63 = vcombine.low %v11723_v24, %v11723_v24  ;;  %v2609_v16 = vsel %vm20199_vm14, %v2354_v31, %v2402_v18  ;;  %v1744_v25 = vmul.f32 2.0, %v13407_v8  ;;  %vm20200_vm0 = vcmask 1045504   ;;  %vm20211_vm3 = vmmov %vm20198_vm10 }
  0xda   :  { %v2592_v36 = vsel %vm20200_vm0, %v2576_v54, %v2353_v9  ;;  %vm20201_vm6 = vcmask 1043456   ;;  %v13416_v2 = vmul.f32 %v1728_v47, %v13407_v8  ;;  %vm20202_vm7 = vmmov %vm20200_vm0  ;;  %v1960_v61 = vcombine.high %v13401_v0, %v13401_v0 }
  0xdb   :  { %v2625_v4 = vsel %vm20201_vm6, %v2609_v16, %v11723_v24  ;;  %v2593_v42 = vsel %vm20202_vm7, %v2577_v26, %v2354_v31  ;;  %v1752_v33 = vmul.f32 %v1744_v25, %v13407_v8  ;;  %vm20203_vm11 = vmmov %vm20201_vm6  ;;  %v2008_v1 = vcombine.high %v13407_v8, %v13407_v8  ;;  %v7971_v16 = vld [vmem:[%s19976_s8 + $0x18] sm:$0xff] }
  0xdc   :  { %v4937_v51 = vpack.c.bf16 %v2625_v4, %v2625_v4  ;;  %v2624_v20 = vsel %vm20203_vm11, %v2608_v53, %v2439_v63  ;;  %v1768_v54 = vmul.f32 2.0, %v13416_v2  ;;  %v1972_v10 = vrot.slane %v1960_v61, 5  ;;  %7993 = vperm.xlu1 %12160, %v7971_v16   ;;  %vm20212_vm12 = vmmov %vm20200_vm0 }
  0xdd   :  { %v4936_v9 = vpack.c.bf16 %v2624_v20, %v2624_v20  ;;  %v2056_v37 = vcombine.high %v13416_v2, %v13416_v2  ;;  %v13431_v26 = vadd.f32 -1.0, %v1752_v33  ;;  %v13433_v24 = vpack.c.bf16 %v2593_v42, %v2561_v56  ;;  %v7968_v56 = vld [vmem:[%s19976_s8] sm:$0xff]  ;;  %v7969_v33 = vld [vmem:[%s19976_s8 + $0x8] sm:$0xff]  ;;  %vm20213_vm5 = vmmov %vm20201_vm6 }
  0xde   :  { %v13429_v31 = vand.u32 %v12660_v57, %v4937_v51  ;;  %v2020_v18 = vrot.slane %v2008_v1, 2  ;;  %v13440_v53 = vpack.c.bf16 %v13355_v12, %v13345_v5  ;;  %v13444_v63 = vsel %vm13390_vm2, 0, %v572_v62  ;;  %7978 = vperm.xlu0 %12159, %v7968_v56   ;;  %vm20214_vm9 = vmmov %vm20211_vm3 }
  0xdf   :  { %20205 = vst [vmem:[#allocation18_spill] sm:$0xff] %v13433_v24  ;;  %v13436_v40 = vand.u32 %v12660_v57, %v4936_v9  ;;  %v2068_v47 = vrot.slane %v2056_v37, 7  ;;  %v13454_v25 = vmul.f32 %v13431_v26, %v1768_v54  ;;  %v1784_v5 = vmul.f32 2.0, %v13431_v26  ;;  %vm20218_vm14 = vmmov %vm20213_vm5 }
  0xe0   :  { %20204 = vst [vmem:[#allocation17_spill] sm:$0xff] %v13429_v31  ;;  %20207 = vst [vmem:[#allocation20_spill] sm:$0xff] %v13440_v53  ;;  %5235 = vmatprep.subr.bf16.mxu0 %v13429_v31  ;;  %v13459_v12 = vpack.c.bf16 %v13365_v44, %v13328_v3  ;;  %v13462_v62 = vadd.s32 3, %v13444_v63  ;;  %v13466_v4 = vpack.c.bf16 %v2592_v36, %v13374_v13  ;;  %vm11644_vm15 = vcmp.lt.s32.totalorder %v11643_v55, 0 }
  0xe1   :  { %20206 = vst [vmem:[#allocation19_spill] sm:$0xff] %v13436_v40  ;;  %5236 = vmatpush1.bf16.msra.mxu0 %v13436_v40  ;;  %v20210_v42 = vcombine.high %v13205_v14, %v13205_v14  ;;  %v13474_v51 = vor.u32 %v13378_v6, %v13371_v27  ;;  %v1792_v3 = vmul.f32 %v13431_v26, %v1784_v5  ;;  %v1808_v44 = vmul.f32 2.0, %v13454_v25  ;;  %v8350_v27 = vld [vmem:[%s19978_s10 + $0x30] sm:$0xff] }
  0xe2   :  { %20208 = vst [vmem:[#allocation21_spill] sm:$0xff] %v13459_v12  ;;  %20209 = vst [vmem:[#allocation22_spill] sm:$0xff] %v13466_v4  ;;  %5237 = vmatprep.subr.bf16.mxu0 %v13433_v24  ;;  %v2495_v13 = vsel %vm20211_vm3, %v2020_v18, %v2068_v47  ;;  %v1971_v36 = vrot.slane %v13401_v0, 5  ;;  %v2128_v6 = vcombine.high %v13454_v25, %v13454_v25  ;;  %v20027_v20 = vrot.slane %v13407_v8, 2 }
  0xe3   :  { %v2461_v61 = vsel %vm2453_vm13, %v20210_v42, %v1972_v10  ;;  %v2067_v1 = vrot.slane %v13416_v2, 7  ;;  %v556_v54 = vsel %vm11644_vm15, 0, %v11643_v55  ;;  %v11700_v9 = vadd.f32 -1.0, %v1792_v3  ;;  %7983 = vperm.xlu1 %12160, %v7969_v33   ;;  %8384 = vperm.xlu0 %12159, %v8350_v27   ;;  %v8348_v3 = vld [vmem:[%s19978_s10 + $0x20] sm:$0xff]  ;;  %vm20222_vm15 = vmmov %vm20212_vm12 }
  0xe4   :  { %v13492_v10 = vsel %vm20212_vm12, %v2461_v61, %v2020_v18  ;;  %v2104_v0 = vcombine.low %v13431_v26, %v13431_v26  ;;  %v557_v37 = vsub.s32 32, %v556_v54  ;;  %v2512_v16 = vsel %vm20213_vm5, %v2495_v13, %v13431_v26  ;;  %v8351_v61 = vld [vmem:[%s19978_s10 + $0x38] sm:$0xff] }
  0xe5   :  { %5238 = vmatpush1.bf16.msra.mxu0 %v13466_v4  ;;  %v558_v56 = vshll.u32 %v13340_v45, %v556_v54  ;;  %v561_v2 = vsub.s32 4294967266, %v556_v54  ;;  %v1816_v55 = vmul.f32 %v11700_v9, %v1808_v44  ;;  %v1824_v5 = vmul.f32 2.0, %v11700_v9 }
  0xe6   :  { %v2176_v18 = vcombine.high %v11700_v9, %v11700_v9  ;;  %v2187_v42 = vrot.slane %v11700_v9, 6  ;;  %5239 = vmatprep.subr.bf16.mxu0 %v13459_v12  ;;  %v2140_v33 = vrot.slane %v2128_v6, 1  ;;  %v2494_v45 = vsel %vm20214_vm9, %v20027_v20, %v2067_v1 }
  0xe7   :  { %v559_v26 = vshrl.u32 %v13322_v28, %v557_v37  ;;  %v562_v44 = vadd.s32 127, %v561_v2  ;;  %v1832_v13 = vmul.f32 %v11700_v9, %v1824_v5  ;;  %v1848_v27 = vmul.f32 2.0, %v1816_v55  ;;  %8389 = vperm.xlu1 %12160, %v8351_v61   ;;  %8374 = vperm.xlu0 %12159, %v8348_v3  }
  0xe8   :  { %v2188_v54 = vrot.slane %v2176_v18, 6  ;;  %v2224_v47 = vcombine.high %v1816_v55, %v1816_v55  ;;  %v2235_v12 = vrot.slane %v1816_v55, 3  ;;  %v20215_v4 = vrot.slane %v13454_v25, 1  ;;  %v8346_v55 = vld [vmem:[%s19978_s10 + $0x10] sm:$0xff] }
  0xe9   :  { %vm20216_vm8 = vcmask 1041408   ;;  %5240 = vmatpush1.bf16.msra.mxu0 %v13440_v53  ;;  %v13518_v6 = vsel %vm2453_vm13, %v13205_v14, %v1971_v36  ;;  %v560_v1 = vor.u32 %v559_v26, %v558_v56  ;;  %v11708_v28 = vadd.f32 -1.0, %v1832_v13 }
  0xea   :  { %v2545_v24 = vsel %vm20216_vm8, %v20215_v4, %v2187_v42  ;;  %vm20217_vm10 = vcmask 1046528   ;;  %v13524_v37 = vsel %vm20218_vm14, %v2494_v45, %v2104_v0  ;;  %v563_v2 = vshll.u32 %v562_v44, 23  ;;  %v8349_v4 = vld [vmem:[%s19978_s10 + $0x28] sm:$0xff]  ;;  %vm20219_vm0 = vmmov %vm20216_vm8  ;;  %v8344_v44 = vld [vmem:[%s19978_s10] sm:$0xff] }
  0xeb   :  { %v13521_v9 = vsel %vm20217_vm10, %v2512_v16, %v2140_v33  ;;  %v2236_v14 = vrot.slane %v2224_v47, 3  ;;  %v2546_v36 = vsel %vm20219_vm0, %v2140_v33, %v2188_v54  ;;  %vm20220_vm6 = vcmask 1044480   ;;  %8379 = vperm.xlu1 %12160, %v8349_v4   ;;  %8364 = vperm.xlu0 %12159, %v8346_v55   ;;  %vm20224_vm8 = vmmov %vm20214_vm9 }
  0xec   :  { %v13534_v56 = vsel %vm20220_vm6, %v2545_v24, %v2235_v12  ;;  %v567_v16 = vcvt.s32.f32 %v560_v1  ;;  %v1856_v5 = vmul.f32 %v11708_v28, %v1848_v27  ;;  %v1864_v18 = vmul.f32 2.0, %v11708_v28  ;;  %11829 = vmatmul.mubr.msk.bf16.vlgmr.msra.gmra.mxu0 %vm5016_vm4, %v13017_v43  ;;  %v8347_v43 = vld [vmem:[%s19978_s10 + $0x18] sm:$0xff]  ;;  %vm20221_vm7 = vmmov %vm20220_vm6 }
  0xed   :  { %v609_v0 = vshll.u32 %v20175_v59, %v13332_v52  ;;  %v610_v42 = vshrl.u32 %v20176_v50, %v13351_v32  ;;  %v2272_v61 = vcombine.high %v11708_v28, %v11708_v28  ;;  %5267 = vmatprep.mubr.bf16.mxu0 %v20167_v39  ;;  %v564_v47 = vor.u32 4788187, %v563_v2  ;;  %vm20225_vm10 = vmmov %vm20218_vm14 }
  0xee   :  { %v612_v24 = vshll.u32 %v20176_v50, %v13332_v52  ;;  %v613_v12 = vshrl.u32 %v20177_v34, %v13351_v32  ;;  %v1872_v3 = vmul.f32 %v11708_v28, %v1864_v18  ;;  %v1888_v33 = vmul.f32 2.0, %v1856_v5 }
  0xef   :  { %v2296_v45 = vcombine.high %v1856_v5, %v1856_v5  ;;  %v2307_v26 = vrot.slane %v1856_v5, 5  ;;  %v2563_v13 = vsel %vm20221_vm7, %v2546_v36, %v2236_v14  ;;  %v565_v27 = vand.u32 2147483647, %v564_v47  ;;  %8369 = vperm.xlu1 %12160, %v8347_v43   ;;  %8354 = vperm.xlu0 %12159, %v8344_v44   ;;  %v8345_v36 = vld [vmem:[%s19978_s10 + $0x8] sm:$0xff] }
  0xf0   :  { %v615_v54 = vshll.u32 %v20177_v34, %v13332_v52  ;;  %v616_v1 = vshrl.u32 %v20178_v41, %v13351_v32  ;;  %v11716_v2 = vadd.f32 -1.0, %v1872_v3  ;;  %v611_v55 = vor.u32 %v610_v42, %v609_v0 }
  0xf1   :  { %v2308_v4 = vrot.slane %v2296_v45, 5  ;;  %v614_v18 = vor.u32 %v613_v12, %v612_v24  ;;  %v2578_v5 = vsel %vm2453_vm13, %v11708_v28, %v2307_v26  ;;  %v568_v20 = vmul.f32 %v567_v16, %v565_v27  ;;  %v9215_v28 = vld [vmem:[%s19980_s12 + $0x30] sm:$0xff] }
  0xf2   :  { %v618_v53 = vshll.u32 %v20178_v41, %v13332_v52  ;;  %v619_v14 = vshrl.u32 %v20179_v21, %v13351_v32  ;;  %v1896_v47 = vmul.f32 %v11716_v2, %v1888_v33  ;;  %v1904_v3 = vmul.f32 2.0, %v11716_v2 }
  0xf3   :  { %v2344_v45 = vcombine.high %v11716_v2, %v11716_v2  ;;  %v617_v0 = vor.u32 %v616_v1, %v615_v54  ;;  %v2355_v16 = vrot.slane %v11716_v2, 2  ;;  %v2579_v42 = vsel %vm2453_vm13, %v2272_v61, %v2308_v4  ;;  %8359 = vperm.xlu1 %12160, %v8345_v36   ;;  %9250 = vperm.xlu0 %12159, %v9215_v28   ;;  %v9216_v61 = vld [vmem:[%s19980_s12 + $0x38] sm:$0xff] }
  0xf4   :  { %v569_v52 = vxor.u32 2147483648, %v568_v20  ;;  %vm621_vm11 = vcmp.lt.s32.totalorder %v13316_v23, 1  ;;  %v1912_v32 = vmul.f32 %v11716_v2, %v1904_v3  ;;  %v2392_v12 = vcombine.high %v1896_v47, %v1896_v47  ;;  %11830 = vmatmul.mubr.msk.bf16.gmra.mxu0 %vm5016_vm4, %v13095_v58  ;;  %v9213_v58 = vld [vmem:[%s19980_s12 + $0x20] sm:$0xff] }
  0xf5   :  { %v2356_v24 = vrot.slane %v2344_v45, 2  ;;  %v2403_v43 = vrot.slane %v1896_v47, 7  ;;  %v2594_v33 = vsel %vm20222_vm15, %v2578_v5, %v2355_v16  ;;  %5277 = vmatprep.mubr.bf16.mxu0 %v20167_v39  ;;  %v620_v44 = vor.u32 %v619_v14, %v618_v53 }
  0xf6   :  { %v570_v26 = vsel %vm487_vm1, %v569_v52, %v568_v20  ;;  %vm622_vm3 = vcmp.lt.s32.totalorder %v13316_v23, 2  ;;  %v11724_v27 = vadd.f32 -1.0, %v1912_v32  ;;  %v2404_v54 = vrot.slane %v2392_v12, 7  ;;  %vm20223_vm1 = vmmov %vm20222_vm15  ;;  %v13591_v20 = vld [vmem:[%s20146_s29 + $0x20] sm:$0x77] }
  0xf7   :  { %vm623_vm12 = vcmp.lt.s32.totalorder %v13316_v23, 3  ;;  %vm624_vm5 = vcmp.lt.s32.totalorder %v13316_v23, 4  ;;  %v2610_v46 = vsel %vm20214_vm9, %v2355_v16, %v2403_v43  ;;  %v2595_v53 = vsel %vm20223_vm1, %v2579_v42, %v2356_v24  ;;  %9255 = vperm.xlu1 %12160, %v9216_v61   ;;  %9240 = vperm.xlu0 %12159, %v9213_v58   ;;  %v9214_v16 = vld [vmem:[%s19980_s12 + $0x28] sm:$0xff]  ;;  %vm20232_vm14 = vmmov %vm20223_vm1 }
  0xf8   :  { %v573_v1 = vsel %vm13390_vm2, %v13591_v20, %v570_v26  ;;  %v625_v2 = vsel %vm621_vm11, %v13361_v17, %v13474_v51  ;;  %v2440_v4 = vcombine.low %v11724_v27, %v11724_v27  ;;  %v2611_v5 = vsel %vm20224_vm8, %v2356_v24, %v2404_v54  ;;  %vm20226_vm2 = vmmov %vm20225_vm10 }
  0xf9   :  { %12222 = vcosq.f32 %v573_v1  ;;  %v626_v14 = vsel %vm624_vm5, %v614_v18, 2102212464  ;;  %v2627_v36 = vsel %vm20225_vm10, %v2611_v5, %v11724_v27  ;;  %v629_v47 = vsel %vm621_vm11, %v13474_v51, %v611_v55 }
  0xfa   :  { %12224 = vsinq.f32 %v573_v1  ;;  %v627_v22 = vsel %vm623_vm12, %v611_v55, %v626_v14  ;;  %v4939_v17 = vpack.c.bf16 %v2627_v36, %v2627_v36  ;;  %v2626_v3 = vsel %vm20226_vm2, %v2610_v46, %v2440_v4 }
  0xfb   :  { %v13610_v45 = vpack.c.bf16 %v2595_v53, %v2563_v13  ;;  %v630_v28 = vsel %vm624_vm5, %v617_v0, 920167782  ;;  %v4938_v42 = vpack.c.bf16 %v2626_v3, %v2626_v3  ;;  %v633_v51 = vsel %vm621_vm11, %v611_v55, %v614_v18  ;;  %v9211_v13 = vld [vmem:[%s19980_s12 + $0x10] sm:$0xff]  ;;  %9245 = vperm.xlu1 %12160, %v9214_v16  }
  0xfc   :  { %v631_v52 = vsel %vm623_vm12, %v614_v18, %v630_v28  ;;  %v634_v32 = vsel %vm624_vm5, %v620_v44, 1326507024  ;;  %v13627_v24 = vand.u32 %v12660_v57, %v4939_v17  ;;  %11831 = vmatmul.mubr.msk.bf16.gmra.mxu0 %vm5016_vm4, %v13130_v48  ;;  %v628_v12 = vsel %vm622_vm3, %v625_v2, %v627_v22  ;;  %9230 = vperm.xlu0 %12159, %v9211_v13  }
  0xfd   :  { %20227 = vst [vmem:[#allocation23_spill] sm:$0xff] %v13610_v45  ;;  %v632_v43 = vsel %vm622_vm3, %v629_v47, %v631_v52  ;;  %v635_v55 = vsel %vm623_vm12, %v617_v0, %v634_v32  ;;  %v13638_v18 = vand.u32 %v12660_v57, %v4938_v42  ;;  %5287 = vmatprep.mubr.bf16.mxu0 %v20167_v39  ;;  %v20231_v0 = vrot.slane %v13407_v8, 2  ;;  %v13703_v52 = vld [vmem:[%s20159_s0] sm:$0xff]  }
  0xfe   :  { %20228 = vst [vmem:[#allocation24_spill] sm:$0xff] %v13627_v24  ;;  %v636_v26 = vsel %vm622_vm3, %v633_v51, %v635_v55  ;;  %v13643_v44 = vmul.u32.u64.low %v13297_v19, %v632_v43  ;;  %v13644_v61 = vmul.u32.u64.high %v13297_v19, %v632_v43, %v13643_v44  ;;  %5308 = vmatprep.subr.bf16.mxu1 %v13627_v24  ;;  %v13655_v23 = vpack.c.bf16 %v2594_v33, %v13534_v56 }
  0xff   :  { %20229 = vst [vmem:[#allocation25_spill] sm:$0xff] %v13638_v18  ;;  %v13650_v48 = vmul.u32.u64.low %v13297_v19, %v636_v26  ;;  %v13651_v27 = vmul.u32.u64.high %v13297_v19, %v636_v26, %v13650_v48  ;;  %5309 = vmatpush1.bf16.msra.mxu1 %v13638_v18  ;;  %v2477_v54 = vsel %vm20232_vm14, %v13518_v6, %v20231_v0  ;;  %v20029_v58 = vand.u32 2147483647, %v13187_v35  ;;  %v13676_v6 = vld [vmem:[%s20146_s29 + $0x38] sm:$0x77] }
 0x100   :  { %20230 = vst [vmem:[#allocation26_spill] sm:$0xff] %v13655_v23  ;;  %5310 = vmatprep.subr.bf16.mxu1 %v13610_v45  ;;  %v13665_v46 = vpack.c.bf16 %v13521_v9, %v13492_v10  ;;  %v20234_v53 = vrot.slane %v13454_v25, 1  ;;  %vm20235_vm0 = vcmask 1046528   ;;  %v644_v56 = vmul.u32 %v13297_v19, %v628_v12 }
 0x101   :  { %v703_v8 = vadd.s32 1, %v13301_v7  ;;  %v579_v33 = vand.u32 3, %v13462_v62  ;;  %v1406_v2 = vand.u32 3, %v13444_v63  ;;  %v647_v10 = vadd.s32 1, %v13644_v61 }
 0x102   :  { %20233 = vst [vmem:[#allocation27_spill] sm:$0xff] %v13665_v46  ;;  %v2528_v1 = vsel %vm20235_vm0, %v13524_v37, %v20234_v53  ;;  %vm646_vm6 = vc.u32 %v13651_v27, %v13643_v44  ;;  %v800_v7 = vand.u32 2139095040, %v13676_v6  ;;  %v700_v63 = vand.u32 8388607, %v20029_v58 }
 0x103   :  { %5311 = vmatpush1.bf16.msra.mxu1 %v13655_v23  ;;  %v13684_v25 = vpack.c.bf16 %v2528_v1, %v2477_v54  ;;  %v648_v19 = vsel %vm646_vm6, %v647_v10, %v13644_v61  ;;  %vm704_vm7 = vcmp.gt.s32.totalorder %v703_v8, 0  ;;  %vm577_vm11 = vweird.f32 %v13591_v20 }
 0x104   :  { %5312 = vmatprep.subr.bf16.mxu1 %v13665_v46  ;;  %v649_v9 = vadd.s32 %v648_v19, %v644_v56  ;;  %11832 = vmatmul.mubr.msk.bf16.gmra.mxu0 %vm5016_vm4, %v13179_v30  ;;  %vm584_vm15 = vcmp.eq.s32.totalorder %v579_v33, 2  ;;  %vm1408_vm3 = vcmp.eq.s32.totalorder %v1406_v2, 0  ;;  %vm1411_vm12 = vcmp.eq.s32.totalorder %v1406_v2, 2 }
 0x105   :  { %20236 = vst [vmem:[#allocation28_spill] sm:$0xff] %v13684_v25  ;;  %5403 = vmatprep.mubr.bf16.mxu0 %v20167_v39  ;;  %vm581_vm5 = vcmp.eq.s32.totalorder %v579_v33, 0  ;;  %v705_v14 = vsel %vm704_vm7, %v703_v8, 0  ;;  %vm580_vm9 = vcmp.lt.s32.totalorder %v579_v33, 2  ;;  %vm1407_vm1 = vcmp.lt.s32.totalorder %v1406_v2, 2 }
 0x106   :  { %v12223_v62 = vpop.eup %12222  ;;  %v650_v5 = vadd.s32 536870912, %v649_v9  ;;  %v801_v36 = vshrl.u32 %v800_v7, 23  ;;  %v701_v3 = vor.u32 8388608, %v700_v63  ;;  %v13698_v42 = vand.u32 31, %v705_v14 }
 0x107   :  { %v12225_v37 = vpop.eup %12224  ;;  %v585_v4 = vxor.u32 2147483648, %v12223_v62  ;;  %5313 = vmatpush1.bf16.msra.mxu1 %v13684_v25  ;;  %vm591_vm8 = vcmp.lt.s32.totalorder %v13162_v15, 0  ;;  %v20237_v55 = vand.u32 2147483647, %v13162_v15  ;;  %v1937_v61 = vcombine.high %v13591_v20, %v13591_v20 }
 0x108   :  { %v582_v30 = vxor.u32 2147483648, %v12225_v37  ;;  %v651_v17 = vshrl.u32 %v650_v5, 30  ;;  %v11653_v48 = vadd.s32 4294967169, %v801_v36  ;;  %v13729_v1 = vshll.u32 %v701_v3, 8  ;;  %v13772_v3 = vld [vmem:[%s20159_s0 + $0x8] sm:$0xff]  }
 0x109   :  { %v586_v22 = vsel %vm584_vm15, %v585_v4, %v12225_v37  ;;  %v1413_v47 = vsel %vm1411_vm12, %v585_v4, %v12225_v37  ;;  %vm13719_vm10 = vcmp.le.f32.partialorder %v20237_v55, 0.7853982  ;;  %v645_v56 = vadd.s32 %v13643_v44, %v13651_v27 }
 0x10a   :  { %v583_v28 = vsel %vm581_vm5, %v12223_v62, %v582_v30  ;;  %v1410_v16 = vsel %vm1408_vm3, %v12223_v62, %v582_v30  ;;  %11833 = vmatmul.mubr.msk.bf16.vlgmr.msra.gmra.mxu1 %vm5016_vm4, %v13703_v52  ;;  %v652_v13 = vshll.u32 %v651_v17, 30  ;;  %v675_v8 = vsub.s32 4, %v651_v17 }
 0x10b   :  { %v587_v51 = vsel %vm580_vm9, %v583_v28, %v586_v22  ;;  %v1414_v32 = vsel %vm1407_vm1, %v1410_v16, %v1413_v47  ;;  %5340 = vmatprep.mubr.bf16.mxu1 %v20167_v39  ;;  %v13733_v33 = vshrl.u32 %v705_v14, 5  ;;  %v13736_v2 = vsub.s32 32, %v13698_v42 }
 0x10c   :  { %v13711_v12 = vsel %vm577_vm11, nan, %v587_v51  ;;  %v13715_v43 = vsel %vm577_vm11, nan, %v1414_v32  ;;  %v13727_v53 = vsub.s32 %v649_v9, %v652_v13  ;;  %v710_v44 = vshll.u32 %v20174_v38, %v13698_v42 }
 0x10d   :  { %v1729_v0 = vmul.f32 2.0, %v13711_v12  ;;  %v1745_v54 = vmul.f32 2.0, %v13715_v43  ;;  %v1961_v9 = vcombine.high %v13711_v12, %v13711_v12  ;;  %v2009_v63 = vcombine.high %v13715_v43, %v13715_v43 }
 0x10e   :  { %v655_v7 = vsub.s32 0, %v13727_v53  ;;  %v713_v27 = vshll.u32 %v20175_v59, %v13698_v42  ;;  %v13751_v62 = vadd.s32 1, %v11653_v48  ;;  %v13759_v14 = vshll.u32 %v20176_v50, %v13698_v42 }
 0x10f   :  { %v13739_v10 = vmul.f32 %v1729_v0, %v13715_v43  ;;  %v1753_v19 = vmul.f32 %v1745_v54, %v13715_v43  ;;  %v676_v30 = vsel %vm591_vm8, %v675_v8, %v651_v17  ;;  %v711_v22 = vshrl.u32 %v20175_v59, %v13736_v2 }
 0x110   :  { %v11646_v5 = vmin.u32 %v655_v7, %v13727_v53  ;;  %v714_v47 = vshrl.u32 %v20176_v50, %v13736_v2  ;;  %v1974_v51 = vrot.slane %v1961_v9, 5  ;;  %v2022_v32 = vrot.slane %v2009_v63, 2 }
 0x111   :  { %v13753_v37 = vadd.f32 -1.0, %v1753_v19  ;;  %v1769_v4 = vmul.f32 2.0, %v13739_v10  ;;  %v2057_v36 = vcombine.high %v13739_v10, %v13739_v10  ;;  %v13783_v55 = vshrl.u32 %v20174_v38, %v13736_v2 }
 0x112   :  { %11834 = vmatmul.mubr.msk.bf16.gmra.mxu1 %vm5016_vm4, %v13772_v3  ;;  %v657_v16 = vclz %v11646_v5  ;;  %v13787_v48 = vshll.u32 %v20177_v34, %v13698_v42  ;;  %v13793_v19 = vsel %vm13719_vm10, 0, %v676_v30  ;;  %v1973_v9 = vrot.slane %v13711_v12, 5 }
 0x113   :  { %v13777_v28 = vmul.f32 %v13753_v37, %v1769_v4  ;;  %v1785_v17 = vmul.f32 2.0, %v13753_v37  ;;  %5350 = vmatprep.mubr.bf16.mxu1 %v20167_v39  ;;  %v2070_v13 = vrot.slane %v2057_v36, 7  ;;  %v13796_v7 = vadd.s32 3, %v13793_v19 }
 0x114   :  { %v11647_v8 = vadd.s32 4294967294, %v657_v16  ;;  %v13799_v63 = vor.u32 %v711_v22, %v710_v44  ;;  %v13801_v4 = vor.u32 %v714_v47, %v713_v27  ;;  %v2463_v36 = vsel %vm2453_vm13, %v1937_v61, %v1974_v51  ;;  %v13814_v51 = vld [vmem:[%s20159_s0 + $0x10] sm:$0xff]  }
 0x115   :  { %v1793_v0 = vmul.f32 %v13753_v37, %v1785_v17  ;;  %v1809_v54 = vmul.f32 2.0, %v13777_v28  ;;  %v2129_v30 = vcombine.high %v13777_v28, %v13777_v28  ;;  %vm20240_vm14 = vcmask 1040384  }
 0x116   :  { %vm11648_vm2 = vcmp.lt.s32.totalorder %v11647_v8, 0  ;;  %v2497_v25 = vsel %vm20240_vm14, %v2022_v32, %v2070_v13  ;;  %v2069_v61 = vrot.slane %v13739_v10, 7  ;;  %vm20241_vm0 = vcmask 1045504   ;;  %vm20244_vm7 = vmmov %vm20240_vm14 }
 0x117   :  { %v11701_v5 = vadd.f32 -1.0, %v1793_v0  ;;  %v660_v16 = vsel %vm11648_vm2, 0, %v11647_v8  ;;  %v13820_v23 = vsel %vm20241_vm0, %v2463_v36, %v2022_v32  ;;  %vm20242_vm6 = vcmask 1043456   ;;  %vm20252_vm2 = vmmov %vm20241_vm0 }
 0x118   :  { %v661_v44 = vsub.s32 32, %v660_v16  ;;  %v662_v27 = vshll.u32 %v13727_v53, %v660_v16  ;;  %v665_v22 = vsub.s32 4294967266, %v660_v16  ;;  %v2142_v53 = vrot.slane %v2129_v30, 1  ;;  %vm20251_vm9 = vmmov %vm20242_vm6 }
 0x119   :  { %v1817_v46 = vmul.f32 %v11701_v5, %v1809_v54  ;;  %v1825_v12 = vmul.f32 2.0, %v11701_v5  ;;  %v2177_v47 = vcombine.high %v11701_v5, %v11701_v5  ;;  %v2189_v0 = vrot.slane %v11701_v5, 6 }
 0x11a   :  { %11835 = vmatmul.mubr.msk.bf16.gmra.mxu1 %vm5016_vm4, %v13814_v51  ;;  %v663_v54 = vshrl.u32 %v645_v56, %v661_v44  ;;  %v666_v17 = vadd.s32 127, %v665_v22  ;;  %v2514_v18 = vsel %vm20242_vm6, %v2497_v25, %v13753_v37  ;;  %v2105_v24 = vcombine.low %v13753_v37, %v13753_v37  ;;  %vm20254_vm6 = vmmov %vm20244_vm7 }
 0x11b   :  { %v1833_v8 = vmul.f32 %v11701_v5, %v1825_v12  ;;  %v1849_v13 = vmul.f32 2.0, %v1817_v46  ;;  %v2225_v58 = vcombine.high %v1817_v46, %v1817_v46  ;;  %5360 = vmatprep.mubr.bf16.mxu1 %v20167_v39  ;;  %v2190_v16 = vrot.slane %v2177_v47, 6 }
 0x11c   :  { %v664_v45 = vor.u32 %v663_v54, %v662_v27  ;;  %v667_v5 = vshll.u32 %v666_v17, 23  ;;  %v2237_v12 = vrot.slane %v1817_v46, 3  ;;  %v13828_v56 = vsel %vm2453_vm13, %v13591_v20, %v1973_v9 }
 0x11d   :  { %v11709_v10 = vadd.f32 -1.0, %v1833_v8  ;;  %v20243_v30 = vrot.slane %v13715_v43, 2  ;;  %v2238_v22 = vrot.slane %v2225_v58, 3  ;;  %v20245_v27 = vrot.slane %v13777_v28, 1 }
 0x11e   :  { %vm20246_vm11 = vcmask 1041408   ;;  %v668_v47 = vor.u32 4788187, %v667_v5  ;;  %v671_v8 = vcvt.s32.f32 %v664_v45  ;;  %vm20248_vm3 = vcmask 1046528  }
 0x11f   :  { %v2496_v44 = vsel %vm20244_vm7, %v20243_v30, %v2069_v61  ;;  %v1857_v32 = vmul.f32 %v11709_v10, %v1849_v13  ;;  %v1865_v36 = vmul.f32 2.0, %v11709_v10  ;;  %v2547_v25 = vsel %vm20246_vm11, %v20245_v27, %v2189_v0  ;;  %vm20247_vm15 = vmmov %vm20246_vm11 }
 0x120   :  { %v2548_v37 = vsel %vm20247_vm15, %v2142_v53, %v2190_v16  ;;  %v13838_v46 = vsel %vm20248_vm3, %v2514_v18, %v2142_v53  ;;  %v717_v61 = vshrl.u32 %v20177_v34, %v13736_v2  ;;  %v669_v13 = vand.u32 2147483647, %v668_v47  ;;  %v13850_v18 = vld [vmem:[%s20159_s0 + $0x18] sm:$0xff]   ;;  %vm20255_vm11 = vmmov %vm20251_vm9 }
 0x121   :  { %v1873_v20 = vmul.f32 %v11709_v10, %v1865_v36  ;;  %v1889_v9 = vmul.f32 2.0, %v1857_v32  ;;  %v2297_v17 = vcombine.high %v1857_v32, %v1857_v32  ;;  %v2309_v54 = vrot.slane %v1857_v32, 5  ;;  %vm20256_vm15 = vmmov %vm20252_vm2 }
 0x122   :  { %vm20249_vm12 = vcmask 1044480   ;;  %v720_v0 = vshrl.u32 %v20178_v41, %v13736_v2  ;;  %11836 = vmatmul.mubr.msk.bf16.gmra.mxu1 %vm5016_vm4, %v13850_v18  ;;  %v2273_v53 = vcombine.high %v11709_v10, %v11709_v10  ;;  %v13856_v5 = vsel %vm20251_vm9, %v2496_v44, %v2105_v24 }
 0x123   :  { %v13843_v58 = vsel %vm20249_vm12, %v2547_v25, %v2237_v12  ;;  %v11717_v45 = vadd.f32 -1.0, %v1873_v20  ;;  %vm20250_vm5 = vmmov %vm20249_vm12  ;;  %v672_v12 = vmul.f32 %v671_v8, %v669_v13  ;;  %v2310_v30 = vrot.slane %v2297_v17, 5  ;;  %5476 = vmatprep.mubr.bf16.mxu1 %v20167_v39 }
 0x124   :  { %v2565_v16 = vsel %vm20250_vm5, %v2548_v37, %v2238_v22  ;;  %v722_v32 = vshll.u32 %v20178_v41, %v13698_v42  ;;  %v723_v36 = vshrl.u32 %v20179_v21, %v13736_v2  ;;  %v718_v20 = vor.u32 %v717_v61, %v13759_v14  ;;  %vm20264_vm12 = vmmov %vm20252_vm2 }
 0x125   :  { %v1897_v27 = vmul.f32 %v11717_v45, %v1889_v9  ;;  %v1905_v25 = vmul.f32 2.0, %v11717_v45  ;;  %v2345_v47 = vcombine.high %v11717_v45, %v11717_v45  ;;  %v673_v40 = vxor.u32 2147483648, %v672_v12 }
 0x126   :  { %v2357_v22 = vrot.slane %v11717_v45, 2  ;;  %v2580_v24 = vsel %vm2453_vm13, %v11709_v10, %v2309_v54  ;;  %v721_v44 = vor.u32 %v720_v0, %v13787_v48  ;;  %v2581_v2 = vsel %vm2453_vm13, %v2273_v53, %v2310_v30  ;;  %v13873_v10 = vld [vmem:[%s20146_s29 + $0x28] sm:$0x77] }
 0x127   :  { %v1913_v8 = vmul.f32 %v11717_v45, %v1905_v25  ;;  %v2358_v37 = vrot.slane %v2345_v47, 2  ;;  %v2393_v17 = vcombine.high %v1897_v27, %v1897_v27  ;;  %v2405_v13 = vrot.slane %v1897_v27, 7 }
 0x128   :  { %v674_v42 = vsel %vm591_vm8, %v673_v40, %v672_v12  ;;  %v724_v9 = vor.u32 %v723_v36, %v722_v32  ;;  %vm725_vm1 = vcmp.lt.s32.totalorder %v13733_v33, 1  ;;  %v2596_v61 = vsel %vm20252_vm2, %v2580_v24, %v2357_v22  ;;  %vm20253_vm8 = vmmov %vm20244_vm7 }
 0x129   :  { %v11725_v31 = vadd.f32 -1.0, %v1913_v8  ;;  %v2406_v14 = vrot.slane %v2393_v17, 7  ;;  %v677_v48 = vsel %vm13719_vm10, %v13873_v10, %v674_v42  ;;  %v2612_v15 = vsel %vm20253_vm8, %v2357_v22, %v2405_v13  ;;  %vm20257_vm10 = vmmov %vm20251_vm9 }
 0x12a   :  { %12226 = vcosq.f32 %v677_v48  ;;  %vm726_vm14 = vcmp.lt.s32.totalorder %v13733_v33, 2  ;;  %vm728_vm0 = vcmp.lt.s32.totalorder %v13733_v33, 4  ;;  %vm727_vm7 = vcmp.lt.s32.totalorder %v13733_v33, 3 }
 0x12b   :  { %v2441_v40 = vcombine.low %v11725_v31, %v11725_v31  ;;  %v2613_v54 = vsel %vm20254_vm6, %v2358_v37, %v2406_v14  ;;  %12228 = vsinq.f32 %v677_v48  ;;  %v2597_v26 = vsel %vm20256_vm15, %v2581_v2, %v2358_v37 }
 0x12c   :  { %v2629_v0 = vsel %vm20255_vm11, %v2613_v54, %v11725_v31  ;;  %v730_v45 = vsel %vm728_vm0, %v718_v20, 2102212464  ;;  %v733_v53 = vsel %vm725_vm1, %v13799_v63, %v13801_v4  ;;  %v729_v32 = vsel %vm725_vm1, %v13783_v55, %v13799_v63 }
 0x12d   :  { %v4941_v12 = vpack.c.bf16 %v2629_v0, %v2629_v0  ;;  %v2628_v30 = vsel %vm20257_vm10, %v2612_v15, %v2441_v40  ;;  %v734_v31 = vsel %vm728_vm0, %v721_v44, 920167782  ;;  %v731_v27 = vsel %vm727_vm7, %v13801_v4, %v730_v45 }
 0x12e   :  { %v4940_v36 = vpack.c.bf16 %v2628_v30, %v2628_v30  ;;  %v735_v25 = vsel %vm727_vm7, %v718_v20, %v734_v31  ;;  %v737_v47 = vsel %vm725_vm1, %v13801_v4, %v718_v20  ;;  %v13910_v24 = vpack.c.bf16 %v2597_v26, %v2565_v16 }
 0x12f   :  { %v13908_v22 = vand.u32 %v12660_v57, %v4941_v12  ;;  %v736_v55 = vsel %vm726_vm14, %v733_v53, %v735_v25  ;;  %v738_v63 = vsel %vm728_vm0, %v724_v9, 1326507024  ;;  %v1509_v16 = vand.u32 3, %v13793_v19 }
 0x130   :  { %20259 = vst [vmem:[#allocation30_spill] sm:$0xff] %v13910_v24  ;;  %v13917_v8 = vand.u32 %v12660_v57, %v4940_v36  ;;  %v739_v37 = vsel %vm727_vm7, %v721_v44, %v738_v63  ;;  %v13922_v17 = vmul.u32.u64.low %v13729_v1, %v736_v55  ;;  %v13923_v4 = vmul.u32.u64.high %v13729_v1, %v736_v55, %v13922_v17 }
 0x131   :  { %20258 = vst [vmem:[#allocation29_spill] sm:$0xff] %v13908_v22  ;;  %5381 = vmatprep.subr.bf16.mxu0 %v13908_v22  ;;  %v732_v20 = vsel %vm726_vm14, %v729_v32, %v731_v27  ;;  %v740_v13 = vsel %vm726_vm14, %v737_v47, %v739_v37  ;;  %v20038_v42 = vand.u32 2147483647, %v13676_v6  ;;  %v13935_v44 = vpack.c.bf16 %v2596_v61, %v13843_v58 }
 0x132   :  { %20260 = vst [vmem:[#allocation31_spill] sm:$0xff] %v13917_v8  ;;  %5382 = vmatpush1.bf16.msra.mxu0 %v13917_v8  ;;  %v13938_v2 = vmul.u32.u64.low %v13729_v1, %v740_v13  ;;  %v13939_v9 = vmul.u32.u64.high %v13729_v1, %v740_v13, %v13938_v2  ;;  %vm808_vm3 = vcmp.gt.s32.totalorder %v13751_v62, 0  ;;  %v683_v19 = vand.u32 3, %v13796_v7 }
 0x133   :  { %20261 = vst [vmem:[#allocation32_spill] sm:$0xff] %v13935_v44  ;;  %5383 = vmatprep.subr.bf16.mxu0 %v13910_v24  ;;  %v13946_v33 = vpack.c.bf16 %v13838_v46, %v13820_v23  ;;  %v20263_v14 = vrot.slane %v13715_v43, 2  ;;  %v20265_v48 = vrot.slane %v13777_v28, 1  ;;  %vm20266_vm5 = vcmask 1046528  }
 0x134   :  { %v748_v15 = vmul.u32 %v13729_v1, %v732_v20  ;;  %v751_v7 = vadd.s32 1, %v13923_v4  ;;  %v809_v40 = vsel %vm808_vm3, %v13751_v62, 0  ;;  %vm750_vm9 = vc.u32 %v13939_v9, %v13922_v17 }
 0x135   :  { %20262 = vst [vmem:[#allocation33_spill] sm:$0xff] %v13946_v33  ;;  %v2479_v58 = vsel %vm20264_vm12, %v13828_v56, %v20263_v14  ;;  %v2530_v61 = vsel %vm20266_vm5, %v13856_v5, %v20265_v48  ;;  %v804_v43 = vand.u32 8388607, %v20038_v42  ;;  %vm688_vm1 = vcmp.eq.s32.totalorder %v683_v19, 2 }
 0x136   :  { %5384 = vmatpush1.bf16.msra.mxu0 %v13935_v44  ;;  %v13960_v23 = vpack.c.bf16 %v2530_v61, %v2479_v58  ;;  %vm1511_vm2 = vcmp.eq.s32.totalorder %v1509_v16, 0  ;;  %vm1514_vm8 = vcmp.eq.s32.totalorder %v1509_v16, 2  ;;  %v752_v1 = vsel %vm750_vm9, %v751_v7, %v13923_v4  ;;  %v14002_v58 = vld [vmem:[%s20146_s29 + $0x30] sm:$0x77] }
 0x137   :  { %v12227_v28 = vpop.eup %12226  ;;  %5385 = vmatprep.subr.bf16.mxu0 %v13946_v33  ;;  %vm685_vm14 = vcmp.eq.s32.totalorder %v683_v19, 0  ;;  %v753_v46 = vadd.s32 %v752_v1, %v748_v15  ;;  %v811_v5 = vand.u32 31, %v809_v40  ;;  %vm681_vm0 = vweird.f32 %v13873_v10 }
 0x138   :  { %20267 = vst [vmem:[#allocation34_spill] sm:$0xff] %v13960_v23  ;;  %v12229_v56 = vpop.eup %12228  ;;  %v689_v62 = vxor.u32 2147483648, %v12227_v28  ;;  %vm684_vm6 = vcmp.lt.s32.totalorder %v683_v19, 2  ;;  %vm1510_vm7 = vcmp.lt.s32.totalorder %v1509_v16, 2  ;;  %v805_v53 = vor.u32 8388608, %v804_v43 }
 0x139   :  { %v686_v54 = vxor.u32 2147483648, %v12229_v56  ;;  %v754_v45 = vadd.s32 536870912, %v753_v46  ;;  %v812_v27 = vsub.s32 32, %v811_v5  ;;  %v1938_v37 = vcombine.high %v13873_v10, %v13873_v10 }
 0x13a   :  { %v690_v0 = vsel %vm688_vm1, %v689_v62, %v12229_v56  ;;  %v1516_v26 = vsel %vm1514_vm8, %v689_v62, %v12229_v56  ;;  %5386 = vmatpush1.bf16.msra.mxu0 %v13960_v23  ;;  %v13988_v4 = vshll.u32 %v805_v53, 8  ;;  %v13991_v20 = vshrl.u32 %v809_v40, 5 }
 0x13b   :  { %v687_v12 = vsel %vm685_vm14, %v12227_v28, %v686_v54  ;;  %v1513_v30 = vsel %vm1511_vm2, %v12227_v28, %v686_v54  ;;  %v13971_v36 = vshrl.u32 %v754_v45, 30  ;;  %v814_v13 = vshll.u32 %v20174_v38, %v811_v5 }
 0x13c   :  { %v691_v32 = vsel %vm684_vm6, %v687_v12, %v690_v0  ;;  %v1517_v31 = vsel %vm1510_vm7, %v1513_v30, %v1516_v26  ;;  %v817_v2 = vshll.u32 %v20175_v59, %v811_v5  ;;  %vm695_vm11 = vcmp.lt.s32.totalorder %v14002_v58, 0 }
 0x13d   :  { %v13975_v25 = vsel %vm681_vm0, nan, %v691_v32  ;;  %v13979_v47 = vsel %vm681_vm0, nan, %v1517_v31  ;;  %11837 = vmatmul.mubr.msk.bf16.vlgmr.msra.gmra.mxu0 %vm5016_vm4, %v13703_v52  ;;  %v756_v16 = vshll.u32 %v13971_v36, 30  ;;  %v815_v48 = vshrl.u32 %v20175_v59, %v812_v27 }
 0x13e   :  { %v1730_v55 = vmul.f32 2.0, %v13975_v25  ;;  %v1746_v63 = vmul.f32 2.0, %v13979_v47  ;;  %5413 = vmatprep.mubr.bf16.mxu0 %v20167_v39  ;;  %v820_v61 = vshll.u32 %v20176_v50, %v811_v5  ;;  %v14009_v15 = vadd.s32 %v13922_v17, %v13939_v9  ;;  %v9212_v17 = vld [vmem:[%s19980_s12 + $0x18] sm:$0xff]  ;;  %v9209_v9 = vld [vmem:[%s19980_s12] sm:$0xff] }
 0x13f   :  { %v14011_v7 = vsub.s32 %v753_v46, %v756_v16  ;;  %v823_v40 = vshll.u32 %v20177_v34, %v811_v5  ;;  %v14015_v43 = vshll.u32 %v20178_v41, %v811_v5  ;;  %v818_v56 = vshrl.u32 %v20176_v50, %v812_v27  ;;  %9235 = vperm.xlu1 %12160, %v9212_v17  }
 0x140   :  { %v13996_v19 = vmul.f32 %v1730_v55, %v13979_v47  ;;  %v1754_v14 = vmul.f32 %v1746_v63, %v13979_v47  ;;  %v821_v62 = vshrl.u32 %v20177_v34, %v812_v27  ;;  %v1962_v46 = vcombine.high %v13975_v25, %v13975_v25  ;;  %9220 = vperm.xlu0 %12159, %v9209_v9   ;;  %v9210_v63 = vld [vmem:[%s19980_s12 + $0x8] sm:$0xff] }
 0x141   :  { %v759_v5 = vsub.s32 0, %v14011_v7  ;;  %v824_v54 = vshrl.u32 %v20178_v41, %v812_v27  ;;  %v14033_v0 = vshrl.u32 %v20179_v21, %v812_v27  ;;  %v813_v53 = vshrl.u32 %v20174_v38, %v812_v27  ;;  %v10986_v27 = vld [vmem:[%s19983_s15 + $0x10] sm:$0xff] }
 0x142   :  { %v14017_v28 = vadd.f32 -1.0, %v1754_v14  ;;  %v1770_v1 = vmul.f32 2.0, %v13996_v19  ;;  %v14040_v12 = vor.u32 %v815_v48, %v814_v13  ;;  %v2010_v30 = vcombine.high %v13979_v47, %v13979_v47 }
 0x143   :  { %v1975_v32 = vrot.slane %v13975_v25, 5  ;;  %v11650_v31 = vmin.u32 %v759_v5, %v14011_v7  ;;  %v779_v55 = vsub.s32 4, %v13971_v36  ;;  %v14058_v25 = vor.u32 %v818_v56, %v817_v2  ;;  %9225 = vperm.xlu1 %12160, %v9210_v63  }
 0x144   :  { %v14036_v26 = vmul.f32 %v14017_v28, %v1770_v1  ;;  %v1786_v45 = vmul.f32 2.0, %v14017_v28  ;;  %v14060_v14 = vor.u32 %v821_v62, %v820_v61  ;;  %v1976_v48 = vrot.slane %v1962_v46, 5  ;;  %11000 = vperm.xlu0 %12159, %v10986_v27   ;;  %v10987_v62 = vld [vmem:[%s19983_s15 + $0x18] sm:$0xff]  ;;  %v10984_v46 = vld [vmem:[%s19983_s15] sm:$0xff] }
 0x145   :  { %11838 = vmatmul.mubr.msk.bf16.gmra.mxu0 %vm5016_vm4, %v13772_v3  ;;  %v761_v1 = vclz %v11650_v31  ;;  %v14062_v17 = vor.u32 %v824_v54, %v823_v40  ;;  %v20040_v42 = vrot.slane %v13979_v47, 2  ;;  %vm829_vm15 = vcmp.lt.s32.totalorder %v13991_v20, 1 }
 0x146   :  { %v1794_v16 = vmul.f32 %v14017_v28, %v1786_v45  ;;  %v1810_v13 = vmul.f32 2.0, %v14036_v26  ;;  %5423 = vmatprep.mubr.bf16.mxu0 %v20167_v39  ;;  %v2058_v45 = vcombine.high %v13996_v19, %v13996_v19  ;;  %v14070_v2 = vrot.slane %v2010_v30, 2 }
 0x147   :  { %v14074_v61 = vsel %vm2453_vm13, %v13873_v10, %v1975_v32  ;;  %v11651_v40 = vadd.s32 4294967294, %v761_v1  ;;  %v14079_v56 = vsel %vm695_vm11, %v779_v55, %v13971_v36  ;;  %v2130_v32 = vcombine.high %v14036_v26, %v14036_v26  ;;  %11005 = vperm.xlu1 %12160, %v10987_v62  }
 0x148   :  { %v11702_v5 = vadd.f32 -1.0, %v1794_v16  ;;  %v14093_v36 = vsel %vm2453_vm13, %v1938_v37, %v1976_v48  ;;  %v2071_v55 = vrot.slane %v13996_v19, 7  ;;  %vm832_vm3 = vcmp.lt.s32.totalorder %v13991_v20, 4  ;;  %10990 = vperm.xlu0 %12159, %v10984_v46   ;;  %v10985_v19 = vld [vmem:[%s19983_s15 + $0x8] sm:$0xff]  ;;  %v9217_v48 = vld [vmem:[%s19980_s12 + $0x40] sm:$0x1] }
 0x149   :  { %vm11652_vm10 = vcmp.lt.s32.totalorder %v11651_v40, 0  ;;  %v2072_v16 = vrot.slane %v2058_v45, 7  ;;  %vm831_vm12 = vcmp.lt.s32.totalorder %v13991_v20, 3  ;;  %v14109_v62 = vrot.slane %v2130_v32, 1 }
 0x14a   :  { %v1818_v54 = vmul.f32 %v11702_v5, %v1810_v13  ;;  %v1826_v30 = vmul.f32 2.0, %v11702_v5  ;;  %v2178_v31 = vcombine.high %v11702_v5, %v11702_v5  ;;  %v2191_v10 = vrot.slane %v11702_v5, 6 }
 0x14b   :  { %v764_v37 = vsel %vm11652_vm10, 0, %v11651_v40  ;;  %vm20268_vm5 = vcmask 1040384   ;;  %v833_v9 = vsel %vm829_vm15, %v813_v53, %v14040_v12  ;;  %10995 = vperm.xlu1 %12160, %v10985_v19   ;;  %vm20271_vm1 = vcmask 1041408  }
 0x14c   :  { %v1834_v63 = vmul.f32 %v11702_v5, %v1826_v30  ;;  %v1850_v27 = vmul.f32 2.0, %v1818_v54  ;;  %v2226_v1 = vcombine.high %v1818_v54, %v1818_v54  ;;  %v2192_v46 = vrot.slane %v2178_v31, 6  ;;  %9260 = vperm.xlu0 %12159, %v9217_v48   ;;  %vm20269_vm9 = vmmov %vm20268_vm5 }
 0x14d   :  { %11839 = vmatmul.mubr.msk.bf16.gmra.mxu0 %vm5016_vm4, %v13814_v51  ;;  %v765_v30 = vsub.s32 32, %v764_v37  ;;  %v14115_v5 = vsel %vm20268_vm5, %v20040_v42, %v2071_v55  ;;  %v766_v40 = vshll.u32 %v14011_v7, %v764_v37  ;;  %v769_v13 = vsub.s32 4294967266, %v764_v37  ;;  %v11169_v55 = vld [vmem:[%s19985_s17] sm:$0x7]  ;;  %vm20272_vm2 = vmmov %vm20271_vm1 }
 0x14e   :  { %v11710_v45 = vadd.f32 -1.0, %v1834_v63  ;;  %5433 = vmatprep.mubr.bf16.mxu0 %v20167_v39  ;;  %v2239_v31 = vrot.slane %v1818_v54, 3  ;;  %v2499_v21 = vsel %vm20269_vm9, %v14070_v2, %v2072_v16  ;;  %v2240_v42 = vrot.slane %v2226_v1, 3  ;;  %vm20280_vm10 = vmmov %vm20268_vm5 }
 0x14f   :  { %v20270_v7 = vrot.slane %v14036_v26, 1  ;;  %v767_v50 = vshrl.u32 %v14009_v15, %v765_v30  ;;  %v770_v53 = vadd.s32 127, %v769_v13  ;;  %v2550_v54 = vsel %vm20272_vm2, %v14109_v62, %v2192_v46  ;;  %11172 = vperm.xlu1 %12160, %v11169_v55  }
 0x150   :  { %v1858_v32 = vmul.f32 %v11710_v45, %v1850_v27  ;;  %v1866_v63 = vmul.f32 2.0, %v11710_v45  ;;  %vm830_vm8 = vcmp.lt.s32.totalorder %v13991_v20, 2  ;;  %v2274_v16 = vcombine.high %v11710_v45, %v11710_v45 }
 0x151   :  { %v2549_v37 = vsel %vm20271_vm1, %v20270_v7, %v2191_v10  ;;  %v20273_v41 = vand.u32 2147483647, %v13187_v35  ;;  %v768_v34 = vor.u32 %v767_v50, %v766_v40  ;;  %v771_v10 = vshll.u32 %v770_v53, 23 }
 0x152   :  { %v1874_v19 = vmul.f32 %v11710_v45, %v1866_v63  ;;  %v1890_v48 = vmul.f32 2.0, %v1858_v32  ;;  %v2298_v27 = vcombine.high %v1858_v32, %v1858_v32  ;;  %v834_v15 = vsel %vm832_vm3, %v14060_v14, 2102212464 }
 0x153   :  { %vm14135_vm14 = vcmp.le.f32.partialorder %v20273_v41, 0.7853982  ;;  %vm20276_vm0 = vcmask 1044480   ;;  %vm20277_vm6 = vcmask 1043456   ;;  %v2311_v41 = vrot.slane %v1858_v32, 5 }
 0x154   :  { %v11718_v13 = vadd.f32 -1.0, %v1874_v19  ;;  %v2312_v30 = vrot.slane %v2298_v27, 5  ;;  %v2566_v46 = vsel %vm20276_vm0, %v2549_v37, %v2239_v31  ;;  %v2516_v63 = vsel %vm20277_vm6, %v2499_v21, %v14017_v28  ;;  %vm20278_vm7 = vmmov %vm20276_vm0 }
 0x155   :  { %v2567_v35 = vsel %vm20278_vm7, %v2550_v54, %v2240_v42  ;;  %v772_v7 = vor.u32 4788187, %v771_v10  ;;  %v775_v59 = vcvt.s32.f32 %v768_v34  ;;  %11840 = vmatmul.mubr.msk.bf16.gmra.mxu0 %vm5016_vm4, %v13850_v18  ;;  %v835_v55 = vsel %vm831_vm12, %v14058_v25, %v834_v15  ;;  %vm20284_vm1 = vmmov %vm20277_vm6 }
 0x156   :  { %v1898_v50 = vmul.f32 %v11718_v13, %v1890_v48  ;;  %v1906_v40 = vmul.f32 2.0, %v11718_v13  ;;  %v2346_v53 = vcombine.high %v11718_v13, %v11718_v13  ;;  %5549 = vmatprep.mubr.bf16.mxu0 %v20167_v39  ;;  %v2359_v31 = vrot.slane %v11718_v13, 2  ;;  %vm20292_vm2 = vmmov %vm20284_vm1 }
 0x157   :  { %v2583_v21 = vsel %vm2453_vm13, %v2274_v16, %v2312_v30  ;;  %v773_v37 = vand.u32 2147483647, %v772_v7  ;;  %v838_v34 = vsel %vm832_vm3, %v14062_v17, 920167782  ;;  %v2582_v27 = vsel %vm2453_vm13, %v11710_v45, %v2311_v41 }
 0x158   :  { %v1914_v42 = vmul.f32 %v11718_v13, %v1906_v40  ;;  %v2360_v32 = vrot.slane %v2346_v53, 2  ;;  %v2394_v19 = vcombine.high %v1898_v50, %v1898_v50  ;;  %v2407_v48 = vrot.slane %v1898_v50, 7 }
 0x159   :  { %v776_v54 = vmul.f32 %v775_v59, %v773_v37  ;;  %v837_v10 = vsel %vm829_vm15, %v14040_v12, %v14058_v25  ;;  %v20279_v16 = vor.u32 %v14033_v0, %v14015_v43  ;;  %v839_v13 = vsel %vm831_vm12, %v14060_v14, %v838_v34 }
 0x15a   :  { %v11726_v30 = vadd.f32 -1.0, %v1914_v42  ;;  %v2408_v7 = vrot.slane %v2394_v19, 7  ;;  %v841_v59 = vsel %vm829_vm15, %v14058_v25, %v14060_v14  ;;  %v2614_v45 = vsel %vm20280_vm10, %v2359_v31, %v2407_v48  ;;  %vm20285_vm15 = vmmov %vm20284_vm1 }
 0x15b   :  { %v842_v15 = vsel %vm832_vm3, %v20279_v16, 1326507024  ;;  %vm20281_vm5 = vcmask 1045504   ;;  %v777_v41 = vxor.u32 2147483648, %v776_v54  ;;  %v836_v43 = vsel %vm830_vm8, %v833_v9, %v835_v55  ;;  %vm20282_vm3 = vmmov %vm20269_vm9 }
 0x15c   :  { %v2599_v12 = vsel %vm20281_vm5, %v2583_v21, %v2360_v32  ;;  %v2442_v0 = vcombine.low %v11726_v30, %v11726_v30  ;;  %v2615_v50 = vsel %vm20282_vm3, %v2360_v32, %v2408_v7  ;;  %vm20283_vm9 = vmmov %vm20281_vm5  ;;  %v843_v53 = vsel %vm831_vm12, %v14062_v17, %v842_v15 }
 0x15d   :  { %v2598_v40 = vsel %vm20283_vm9, %v2582_v27, %v2359_v31  ;;  %v2631_v37 = vsel %vm20284_vm1, %v2615_v50, %v11726_v30  ;;  %v778_v25 = vsel %vm695_vm11, %v777_v41, %v776_v54  ;;  %v840_v14 = vsel %vm830_vm8, %v837_v10, %v839_v13  ;;  %vm20289_vm11 = vmmov %vm20281_vm5 }
 0x15e   :  { %v844_v9 = vsel %vm830_vm8, %v841_v59, %v843_v53  ;;  %v4943_v55 = vpack.c.bf16 %v2631_v37, %v2631_v37  ;;  %v2630_v21 = vsel %vm20285_vm15, %v2614_v45, %v2442_v0  ;;  %v14190_v34 = vpack.c.bf16 %v2599_v12, %v2567_v35  ;;  %vm20294_vm8 = vmmov %vm20281_vm5  ;;  %v14246_v59 = vpop.f32.mrf.mxu0 }
 0x15f   :  { %v781_v17 = vsel %vm14135_vm14, %v14002_v58, %v778_v25  ;;  %v4942_v31 = vpack.c.bf16 %v2630_v21, %v2630_v21  ;;  %v14196_v42 = vmul.u32.u64.low %v13988_v4, %v844_v9  ;;  %v14197_v32 = vmul.u32.u64.high %v13988_v4, %v844_v9, %v14196_v42 }
 0x160   :  { %20286 = vst [vmem:[#allocation35_spill] sm:$0xff] %v14190_v34  ;;  %12230 = vcosq.f32 %v781_v17  ;;  %v14200_v19 = vand.u32 %v12660_v57, %v4943_v55  ;;  %v14203_v20 = vmul.u32.u64.low %v13988_v4, %v840_v14  ;;  %v14204_v48 = vmul.u32.u64.high %v13988_v4, %v840_v14, %v14203_v20  ;;  %v14251_v12 = vpop.f32.mrf.mxu0 }
 0x161   :  { %12232 = vsinq.f32 %v781_v17  ;;  %v14208_v35 = vand.u32 %v12660_v57, %v4942_v31  ;;  %v2482_v27 = vsel %vm20289_vm11, %v14093_v36, %v14070_v2  ;;  %vm20290_vm12 = vcmask 1046528  }
 0x162   :  { %20287 = vst [vmem:[#allocation36_spill] sm:$0xff] %v14200_v19  ;;  %v2533_v54 = vsel %vm20290_vm12, %v2516_v63, %v14109_v62  ;;  %v20291_v10 = vcombine.low %v14017_v28, %v14017_v28  ;;  %5454 = vmatprep.subr.bf16.mxu1 %v14200_v19  ;;  %v20293_v15 = vrot.slane %v13979_v47, 2  ;;  %v14226_v7 = vpack.c.bf16 %v2598_v40, %v2566_v46  ;;  %vm20298_vm6 = vmmov %vm20290_vm12  ;;  %v14258_v9 = vpop.f32.mrf.mxu0 }
 0x163   :  { %20288 = vst [vmem:[#allocation37_spill] sm:$0xff] %v14208_v35  ;;  %5455 = vmatpush1.bf16.msra.mxu1 %v14208_v35  ;;  %v782_v2 = vsel %vm14135_vm14, 0, %v14079_v56  ;;  %v852_v28 = vmul.u32 %v13988_v4, %v836_v43  ;;  %vm854_vm0 = vc.u32 %v14197_v32, %v14203_v20  ;;  %v14235_v36 = vpack.c.bf16 %v2533_v54, %v2482_v27 }
 0x164   :  { %v2515_v16 = vsel %vm20292_vm2, %v14115_v5, %v20291_v10  ;;  %v2481_v30 = vsel %vm20294_vm8, %v14074_v61, %v20293_v15  ;;  %20295 = vst [vmem:[#allocation38_spill] sm:$0xff] %v14226_v7  ;;  %5456 = vmatprep.subr.bf16.mxu1 %v14190_v34  ;;  %v20297_v47 = vrot.slane %v14036_v26, 1  ;;  %v786_v62 = vadd.s32 3, %v782_v2  ;;  %v14266_v54 = vpop.f32.mrf.mxu0 }
 0x165   :  { %20296 = vst [vmem:[#allocation39_spill] sm:$0xff] %v14235_v36  ;;  %v855_v5 = vadd.s32 1, %v14204_v48  ;;  %v1612_v63 = vand.u32 3, %v782_v2  ;;  %vm785_vm1 = vweird.f32 %v14002_v58  ;;  %vm799_vm11 = vcmp.lt.s32.totalorder %v13676_v6, 0 }
 0x166   :  { %v2532_v61 = vsel %vm20298_vm6, %v2515_v16, %v20297_v47  ;;  %v787_v1 = vand.u32 3, %v786_v62  ;;  %v14278_v47 = vpop.f32.mrf.mxu0  ;;  %vm20304_vm2 = vcmask 1041408   ;;  %vm20305_vm8 = vcmask 1040384  }
 0x167   :  { %v856_v46 = vsel %vm854_vm0, %v855_v5, %v14204_v48  ;;  %5457 = vmatpush1.bf16.msra.mxu1 %v14226_v7  ;;  %v14243_v56 = vpack.c.bf16 %v2532_v61, %v2481_v30  ;;  %vm1617_vm7 = vcmp.eq.s32.totalorder %v1612_v63, 2  ;;  %vm1614_vm5 = vcmp.eq.s32.totalorder %v1612_v63, 0  ;;  %vm20306_vm0 = vmmov %vm20305_vm8 }
 0x168   :  { %v857_v4 = vadd.s32 %v856_v46, %v852_v28  ;;  %5458 = vmatprep.subr.bf16.mxu1 %v14235_v36  ;;  %vm792_vm14 = vcmp.eq.s32.totalorder %v787_v1, 2  ;;  %vm789_vm10 = vcmp.eq.s32.totalorder %v787_v1, 0  ;;  %vm788_vm3 = vcmp.lt.s32.totalorder %v787_v1, 2  ;;  %vm20307_vm6 = vmmov %vm20306_vm0 }
 0x169   :  { %20299 = vst [vmem:[#allocation40_spill] sm:$0xff] %v14243_v56  ;;  %vm1613_vm9 = vcmp.lt.s32.totalorder %v1612_v63, 2  ;;  %v853_v5 = vadd.s32 %v14203_v20, %v14197_v32 }
 0x16a   :  { %v858_v13 = vadd.s32 536870912, %v857_v4 }
 0x16b   :  { %5459 = vmatpush1.bf16.msra.mxu1 %v14243_v56 }
 0x16c   :  { %v14249_v26 = vshrl.u32 %v858_v13, 30 }
 0x16d   :  { %v12231_v45 = vpop.eup %12230 }
 0x16e   :  { %v12233_v41 = vpop.eup %12232  ;;  %v793_v43 = vxor.u32 2147483648, %v12231_v45  ;;  %v860_v0 = vshll.u32 %v14249_v26, 30  ;;  %11841 = vmatmul.mubr.msk.bf16.vlgmr.msra.gmra.mxu1 %vm5016_vm4, %v13703_v52 }
 0x16f   :  { %v790_v50 = vxor.u32 2147483648, %v12233_v41  ;;  %5486 = vmatprep.mubr.bf16.mxu1 %v20167_v39 }
 0x170   :  { %v794_v40 = vsel %vm792_vm14, %v793_v43, %v12233_v41  ;;  %v1619_v53 = vsel %vm1617_vm7, %v793_v43, %v12233_v41  ;;  %v861_v37 = vsub.s32 %v857_v4, %v860_v0  ;;  %vm20308_vm14 = vmmov %vm20304_vm2  ;;  %vm20309_vm7 = vcmask 1043456  }
 0x171   :  { %v791_v25 = vsel %vm789_vm10, %v12231_v45, %v790_v50  ;;  %v1616_v14 = vsel %vm1614_vm5, %v12231_v45, %v790_v50  ;;  %v14288_v45 = vpop.f32.mrf.mxu0  ;;  %vm20310_vm10 = vcmask 1044480   ;;  %vm20311_vm5 = vcmask 1045504  }
 0x172   :  { %v795_v55 = vsel %vm788_vm3, %v791_v25, %v794_v40  ;;  %v1620_v21 = vsel %vm1613_vm9, %v1616_v14, %v1619_v53  ;;  %v863_v17 = vsub.s32 0, %v861_v37  ;;  %v883_v40 = vsub.s32 4, %v14249_v26  ;;  %vm20312_vm3 = vmmov %vm20309_vm7 }
 0x173   :  { %v14260_v31 = vsel %vm785_vm1, nan, %v795_v55  ;;  %v14262_v52 = vsel %vm785_vm1, nan, %v1620_v21  ;;  %v14302_v25 = vpop.f32.mrf.mxu0  ;;  %vm20313_vm9 = vmmov %vm20312_vm3 }
 0x174   :  { %v1731_v42 = vmul.f32 2.0, %v14260_v31  ;;  %v1747_v48 = vmul.f32 2.0, %v14262_v52  ;;  %v11654_v27 = vmin.u32 %v863_v17, %v861_v37  ;;  %v14307_v17 = vpop.f32.mrf.mxu1  ;;  %vm20315_vm1 = vmmov %vm20306_vm0 }
 0x175   :  { %20300 = vst [vmem:[#allocation41_spill] sm:$0xff] %v14307_v17 }
 0x176   :  { %v14269_v10 = vmul.f32 %v1731_v42, %v14262_v52  ;;  %v1755_v16 = vmul.f32 %v1747_v48, %v14262_v52  ;;  %v865_v15 = vclz %v11654_v27  ;;  %11842 = vmatmul.mubr.msk.bf16.gmra.mxu1 %vm5016_vm4, %v13772_v3  ;;  %v20301_v48 = vand.u32 2147483647, %v13676_v6 }
 0x177   :  { %5496 = vmatprep.mubr.bf16.mxu1 %v20167_v39 }
 0x178   :  { %v14275_v30 = vadd.f32 -1.0, %v1755_v16  ;;  %v1771_v2 = vmul.f32 2.0, %v14269_v10  ;;  %v11655_v28 = vadd.s32 4294967294, %v865_v15  ;;  %vm14313_vm12 = vcmp.le.f32.partialorder %v20301_v48, 0.7853982 }
 0x179   :  { %v884_v16 = vsel %vm799_vm11, %v883_v40, %v14249_v26  ;;  %v1939_v15 = vcombine.high %v14002_v58, %v14002_v58  ;;  %v2073_v35 = vrot.slane %v14269_v10, 7 }
 0x17a   :  { %v14281_v61 = vmul.f32 %v14275_v30, %v1771_v2  ;;  %v1787_v62 = vmul.f32 2.0, %v14275_v30  ;;  %vm11656_vm15 = vcmp.lt.s32.totalorder %v11655_v28, 0 }
 0x17b   :  { %v868_v46 = vsel %vm11656_vm15, 0, %v11655_v28  ;;  %vm20316_vm15 = vmmov %vm20311_vm5 }
 0x17c   :  { %v1795_v3 = vmul.f32 %v14275_v30, %v1787_v62  ;;  %v1811_v4 = vmul.f32 2.0, %v14281_v61  ;;  %v869_v1 = vsub.s32 32, %v868_v46  ;;  %v870_v63 = vshll.u32 %v861_v37, %v868_v46 }
 0x17d   :  { %v873_v13 = vsub.s32 4294967266, %v868_v46  ;;  %v1963_v37 = vcombine.high %v14260_v31, %v14260_v31  ;;  %v2011_v62 = vcombine.high %v14262_v52, %v14262_v52  ;;  %v14326_v46 = vpop.f32.mrf.mxu0  ;;  %v2131_v26 = vcombine.high %v14281_v61, %v14281_v61 }
 0x17e   :  { %v14290_v41 = vadd.f32 -1.0, %v1795_v3  ;;  %v871_v43 = vshrl.u32 %v853_v5, %v869_v1  ;;  %11843 = vmatmul.mubr.msk.bf16.gmra.mxu1 %vm5016_vm4, %v13814_v51  ;;  %v2059_v5 = vcombine.high %v14269_v10, %v14269_v10 }
 0x17f   :  { %v874_v0 = vadd.s32 127, %v873_v13  ;;  %5506 = vmatprep.mubr.bf16.mxu1 %v20167_v39  ;;  %v1978_v28 = vrot.slane %v1963_v37, 5  ;;  %v14338_v13 = vsel %vm14313_vm12, 0, %v884_v16  ;;  %v2026_v37 = vrot.slane %v2011_v62, 2 }
 0x180   :  { %v14295_v32 = vmul.f32 %v14290_v41, %v1811_v4  ;;  %v1827_v20 = vmul.f32 2.0, %v14290_v41  ;;  %v872_v50 = vor.u32 %v871_v43, %v870_v63  ;;  %v2179_v1 = vcombine.high %v14290_v41, %v14290_v41  ;;  %v14342_v43 = vpop.f32.mrf.mxu1 }
 0x181   :  { %v875_v53 = vshll.u32 %v874_v0, 23  ;;  %v2074_v16 = vrot.slane %v2059_v5, 7 }
 0x182   :  { %v1835_v14 = vmul.f32 %v14290_v41, %v1827_v20  ;;  %v1851_v51 = vmul.f32 2.0, %v14295_v32  ;;  %v879_v21 = vcvt.s32.f32 %v872_v50  ;;  %v890_v50 = vadd.s32 3, %v14338_v13  ;;  %v14360_v56 = vpop.f32.mrf.mxu1 }
 0x183   :  { %v876_v55 = vor.u32 4788187, %v875_v53  ;;  %v2194_v48 = vrot.slane %v2179_v1, 6  ;;  %v2145_v1 = vrot.slane %v14281_v61, 1 }
 0x184   :  { %v14309_v42 = vadd.f32 -1.0, %v1835_v14  ;;  %v2467_v14 = vsel %vm2453_vm13, %v1939_v15, %v1978_v28  ;;  %v14376_v27 = vpop.f32.mrf.mxu1 }
 0x185   :  { %v877_v2 = vand.u32 2147483647, %v876_v55 }
 0x186   :  { %v14329_v3 = vmul.f32 %v14309_v42, %v1851_v51  ;;  %v1867_v4 = vmul.f32 2.0, %v14309_v42  ;;  %11844 = vmatmul.mubr.msk.bf16.gmra.mxu1 %vm5016_vm4, %v13850_v18  ;;  %v14352_v18 = vpop.f32.mrf.mxu0  ;;  %v2275_v38 = vcombine.high %v14309_v42, %v14309_v42 }
 0x187   :  { %v880_v63 = vmul.f32 %v879_v21, %v877_v2  ;;  %5622 = vmatprep.mubr.bf16.mxu1 %v20167_v39  ;;  %v2146_v21 = vrot.slane %v2131_v26, 1  ;;  %v14365_v26 = vld [vmem:[%s20146_s29 + $0x38] sm:$0x77] }
 0x188   :  { %v1875_v0 = vmul.f32 %v14309_v42, %v1867_v4  ;;  %v1891_v20 = vmul.f32 2.0, %v14329_v3  ;;  %v2299_v40 = vcombine.high %v14329_v3, %v14329_v3  ;;  %v2227_v4 = vcombine.high %v14295_v32, %v14295_v32 }
 0x189   :  { %v881_v53 = vxor.u32 2147483648, %v880_v63  ;;  %v2313_v34 = vrot.slane %v14329_v3, 5  ;;  %v2552_v61 = vsel %vm20304_vm2, %v2146_v21, %v2194_v48  ;;  %vm20322_vm2 = vcmask 1046528  }
 0x18a   :  { %v11719_v55 = vadd.f32 -1.0, %v1875_v0  ;;  %v2314_v62 = vrot.slane %v2299_v40, 5  ;;  %v14372_v0 = vpop.f32.mrf.mxu0  ;;  %v2242_v7 = vrot.slane %v2227_v4, 3  ;;  %v2107_v4 = vcombine.low %v14275_v30, %v14275_v30 }
 0x18b   :  { %v882_v2 = vsel %vm799_vm11, %v881_v53, %v880_v63  ;;  %v2193_v63 = vrot.slane %v14290_v41, 6  ;;  %vm20319_vm11 = vmmov %vm20310_vm10 }
 0x18c   :  { %v1899_v15 = vmul.f32 %v11719_v55, %v1891_v20  ;;  %v1907_v28 = vmul.f32 2.0, %v11719_v55  ;;  %v2347_v51 = vcombine.high %v11719_v55, %v11719_v55  ;;  %v885_v6 = vsel %vm14313_vm12, %v14365_v26, %v882_v2  ;;  %v14385_v3 = vpop.f32.mrf.mxu0  ;;  %vm20320_vm12 = vmmov %vm20311_vm5 }
 0x18d   :  { %12234 = vcosq.f32 %v885_v6  ;;  %v2361_v5 = vrot.slane %v11719_v55, 2  ;;  %v2585_v41 = vsel %vm2453_vm13, %v2275_v38, %v2314_v62  ;;  %v2551_v48 = vsel %vm20308_vm14, %v2145_v1, %v2193_v63  ;;  %v14395_v62 = vpop.f32.mrf.mxu1  ;;  %vm20327_vm14 = vmmov %vm20311_vm5 }
 0x18e   :  { %v1915_v20 = vmul.f32 %v11719_v55, %v1907_v28  ;;  %v2362_v40 = vrot.slane %v2347_v51, 2  ;;  %v2395_v53 = vcombine.high %v1899_v15, %v1899_v15  ;;  %12236 = vsinq.f32 %v885_v6 }
 0x18f   :  { %v2409_v36 = vrot.slane %v1899_v15, 7  ;;  %v2501_v51 = vsel %vm20306_vm0, %v2026_v37, %v2074_v16  ;;  %v1977_v55 = vrot.slane %v14260_v31, 5  ;;  %v2241_v28 = vrot.slane %v14295_v32, 3 }
 0x190   :  { %v11727_v2 = vadd.f32 -1.0, %v1915_v20  ;;  %v2410_v19 = vrot.slane %v2395_v53, 7  ;;  %v2601_v16 = vsel %vm20311_vm5, %v2585_v41, %v2362_v40  ;;  %v2584_v31 = vsel %vm2453_vm13, %v14309_v42, %v2313_v34 }
 0x191   :  { %v2616_v23 = vsel %vm20305_vm8, %v2361_v5, %v2409_v36  ;;  %v2569_v36 = vsel %vm20310_vm10, %v2552_v61, %v2242_v7  ;;  %v20314_v32 = vrot.slane %v14262_v52, 2  ;;  %v891_v53 = vand.u32 3, %v890_v50  ;;  %v14405_v61 = vpop.f32.mrf.mxu0  ;;  %vm20323_vm8 = vmmov %vm20312_vm3 }
 0x192   :  { %v2443_v10 = vcombine.low %v11727_v2, %v11727_v2  ;;  %v2617_v15 = vsel %vm20307_vm6, %v2362_v40, %v2410_v19  ;;  %v2518_v19 = vsel %vm20313_vm9, %v2501_v51, %v14275_v30  ;;  %v1715_v7 = vand.u32 3, %v14338_v13  ;;  %v14426_v51 = vpop.permute.xlu1 %4978 }
 0x193   :  { %v2633_v38 = vsel %vm20309_vm7, %v2617_v15, %v11727_v2  ;;  %v2500_v63 = vsel %vm20315_vm1, %v20314_v32, %v2073_v35  ;;  %v2484_v40 = vsel %vm20316_vm15, %v2467_v14, %v2026_v37  ;;  %v14410_v42 = vpack.c.bf16 %v2601_v16, %v2569_v36  ;;  %v14421_v37 = vpop.permute.xlu0 %4988  ;;  %v14423_v14 = vpop.f32.mrf.mxu1  ;;  %vm20328_vm7 = vmmov %vm20322_vm2 }
 0x194   :  { %v4945_v6 = vpack.c.bf16 %v2633_v38, %v2633_v38  ;;  %v2632_v20 = vsel %vm20312_vm3, %v2616_v23, %v2443_v10  ;;  %v2568_v23 = vsel %vm20319_vm11, %v2551_v48, %v2241_v28  ;;  %v2600_v30 = vsel %vm20320_vm12, %v2584_v31, %v2361_v5  ;;  %v5143_v10 = vpop.f32.mrf.mxu0 }
 0x195   :  { %v4944_v2 = vpack.c.bf16 %v2632_v20, %v2632_v20  ;;  %20318 = vst [vmem:[#allocation43_spill] sm:$0xff] %v14410_v42  ;;  %v2535_v35 = vsel %vm20322_vm2, %v2518_v19, %v2146_v21  ;;  %v2466_v13 = vsel %vm2453_vm13, %v14002_v58, %v1977_v55  ;;  %v2517_v50 = vsel %vm20323_vm8, %v2500_v63, %v2107_v4  ;;  %v14438_v38 = vpop.f32.mrf.mxu1 }
 0x196   :  { %v14408_v34 = vand.u32 %v12660_v57, %v4945_v6  ;;  %vm1720_vm0 = vcmp.eq.s32.totalorder %v1715_v7, 2  ;;  %v14429_v5 = vpack.c.bf16 %v2600_v30, %v2568_v23  ;;  %vm896_vm6 = vcmp.eq.s32.totalorder %v891_v53, 2 }
 0x197   :  { %v14415_v41 = vand.u32 %v12660_v57, %v4944_v2  ;;  %v14432_v58 = vpack.c.bf16 %v2535_v35, %v2484_v40  ;;  %v20326_v55 = vmov %v20314_v32  ;;  %v2534_v15 = vsel %vm20328_vm7, %v2517_v50, %v2145_v1  ;;  %v14445_v6 = vpop.permute.xlu0 %4993  ;;  %v5145_v1 = vpop.f32.mrf.mxu0 }
 0x198   :  { %20317 = vst [vmem:[#allocation42_spill] sm:$0xff] %v14408_v34  ;;  %5527 = vmatprep.subr.bf16.mxu0 %v14408_v34  ;;  %20324 = vst [vmem:[#allocation45_spill] sm:$0xff] %v14429_v5  ;;  %v2483_v4 = vsel %vm20327_vm14, %v2466_v13, %v20326_v55  ;;  %vm893_vm10 = vcmp.eq.s32.totalorder %v891_v53, 0  ;;  %vm1717_vm5 = vcmp.eq.s32.totalorder %v1715_v7, 0  ;;  %vm892_vm3 = vcmp.lt.s32.totalorder %v891_v53, 2  ;;  %v14448_v32 = vpop.permute.xlu1 %4983  ;;  %v14450_v2 = vpop.f32.mrf.mxu1 }
 0x199   :  { %20321 = vst [vmem:[#allocation44_spill] sm:$0xff] %v14415_v41  ;;  %5528 = vmatpush1.bf16.msra.mxu0 %v14415_v41  ;;  %20325 = vst [vmem:[#allocation46_spill] sm:$0xff] %v14432_v58  ;;  %vm1716_vm9 = vcmp.lt.s32.totalorder %v1715_v7, 2  ;;  %vm889_vm1 = vweird.f32 %v14365_v26  ;;  %v14443_v52 = vpack.c.bf16 %v2534_v15, %v2483_v4  ;;  %v5147_v35 = vpop.f32.mrf.mxu0  ;;  %v14470_v4 = vld [vmem:[%s20159_s0] sm:$0xff]   ;;  %vm20095_vm15 = vcmask 523264  }
 0x19a   :  { %v12235_v21 = vpop.eup %12234  ;;  %5529 = vmatprep.subr.bf16.mxu0 %v14410_v42  ;;  %v14465_v55 = vpop.f32.mrf.mxu1  ;;  %vm20337_vm11 = vcmask 1041408   ;;  %vm20338_vm12 = vcmask 1040384   ;;  %vm20344_vm14 = vcmask 1044480   ;;  %vm20345_vm7 = vcmask 1045504  }
 0x19b   :  { %v12237_v28 = vpop.eup %12236  ;;  %v897_v48 = vxor.u32 2147483648, %v12235_v21  ;;  %20329 = vst [vmem:[#allocation47_spill] sm:$0xff] %v14443_v52  ;;  %vm20340_vm2 = vmmov %vm20338_vm12 }
 0x19c   :  { %v894_v36 = vxor.u32 2147483648, %v12237_v28  ;;  %v14474_v15 = vpop.permute.xlu1 %4973  ;;  %vm20341_vm8 = vmmov %vm20340_vm2 }
 0x19d   :  { %v898_v16 = vsel %vm896_vm6, %v897_v48, %v12237_v28  ;;  %v1722_v31 = vsel %vm1720_vm0, %v897_v48, %v12237_v28  ;;  %5530 = vmatpush1.bf16.msra.mxu0 %v14429_v5  ;;  %v5128_v33 = vadd.f32 %v14302_v25, %v14474_v15  ;;  %vm20342_vm0 = vmmov %vm20337_vm11  ;;  %vm20343_vm6 = vcmask 1043456  }
 0x19e   :  { %v895_v20 = vsel %vm893_vm10, %v12235_v21, %v894_v36  ;;  %v1719_v19 = vsel %vm1717_vm5, %v12235_v21, %v894_v36  ;;  %5531 = vmatprep.subr.bf16.mxu0 %v14432_v58  ;;  %v14463_v21 = vpop.permute.xlu0 %4968  ;;  %v5149_v36 = vpop.f32.mrf.mxu0  ;;  %vm20346_vm10 = vmmov %vm20343_vm6 }
 0x19f   :  { %v899_v63 = vsel %vm892_vm3, %v895_v20, %v898_v16  ;;  %v1723_v53 = vsel %vm1716_vm9, %v1719_v19, %v1722_v31  ;;  %v14484_v20 = vpop.f32.mrf.mxu1  ;;  %v5148_v19 = vadd.f32 %v5147_v35, %v14445_v6  ;;  %v5138_v35 = vadd.f32 %v14385_v3, %v14448_v32  ;;  %vm20347_vm5 = vmmov %vm20343_vm6 }
 0x1a0   :  { %v14452_v40 = vsel %vm889_vm1, nan, %v899_v63  ;;  %v14454_v7 = vsel %vm889_vm1, nan, %v1723_v53  ;;  %v5140_v63 = vadd.f32 %v14405_v61, %v14448_v32  ;;  %v5146_v53 = vadd.f32 %v5145_v1, %v14421_v37  ;;  %v14498_v5 = vpop.permute.xlu1 %4963  ;;  %vm20348_vm3 = vmmov %vm20340_vm2 }
 0x1a1   :  { %v1732_v23 = vmul.f32 2.0, %v14452_v40  ;;  %v1748_v30 = vmul.f32 2.0, %v14454_v7  ;;  %5532 = vmatpush1.bf16.msra.mxu0 %v14443_v52  ;;  %v5136_v1 = vadd.f32 %v14372_v0, %v14426_v51  ;;  %v14516_v58 = vpop.f32.mrf.mxu1  ;;  %v5775_v42 = vmax.f32 %v5148_v19, 0.0  ;;  %vm20350_vm9 = vmmov %vm20344_vm14 }
 0x1a2   :  { %v14493_v52 = vpop.permute.xlu0 %4958  ;;  %v5134_v0 = vadd.f32 %v14352_v18, %v14426_v51  ;;  %v5744_v3 = vmax.f32 %v5140_v63, 0.0  ;;  %v5126_v19 = vadd.f32 %v14288_v45, %v14463_v21  ;;  %v5743_v24 = vmax.f32 %v5138_v35, 0.0  ;;  %vm20351_vm1 = vmmov %vm20345_vm7 }
 0x1a3   :  { %v14460_v13 = vmul.f32 %v1732_v23, %v14454_v7  ;;  %v1756_v50 = vmul.f32 %v1748_v30, %v14454_v7  ;;  %v5150_v23 = vadd.f32 %v5149_v36, %v14445_v6  ;;  %v14502_v61 = vadd.f32 %v14246_v59, %v14493_v52  ;;  %v14521_v59 = vld [vmem:[%s20159_s0 + $0x8] sm:$0xff]   ;;  %v14542_v8 = vpop.f32.mrf.mxu1 }
 0x1a4   :  { %11845 = vmatmul.mubr.msk.bf16.vlgmr.msra.gmra.mxu0 %vm5016_vm4, %v14470_v4  ;;  %20330 = vst [vmem:[#allocation48_spill] sm:$0xff] %v14521_v59  ;;  %v5728_v44 = vmax.f32 %v5136_v1, 0.0  ;;  %v5120_v45 = vadd.f32 %v14266_v54, %v14498_v5  ;;  %v5727_v25 = vmax.f32 %v5134_v0, 0.0  ;;  %v5696_v54 = vmax.f32 %v5126_v19, 0.0 }
 0x1a5   :  { %v14476_v28 = vadd.f32 -1.0, %v1756_v50  ;;  %v1772_v48 = vmul.f32 2.0, %v14460_v13  ;;  %5559 = vmatprep.mubr.bf16.mxu0 %v20167_v39  ;;  %v2060_v49 = vcombine.high %v14460_v13, %v14460_v13 }
 0x1a6   :  { %v5832_v35 = vpack.c.bf16 %v5744_v3, %v5728_v44  ;;  %v5680_v3 = vmax.f32 %v5120_v45, 0.0 }
 0x1a7   :  { %v14481_v16 = vmul.f32 %v14476_v28, %v1772_v48  ;;  %v1788_v31 = vmul.f32 2.0, %v14476_v28  ;;  %v5144_v48 = vadd.f32 %v5143_v10, %v14421_v37  ;;  %v14512_v10 = vadd.f32 %v14258_v9, %v14498_v5 }
 0x1a8   :  { %v5760_v9 = vmax.f32 %v5146_v53, 0.0  ;;  %v2076_v45 = vrot.slane %v2060_v49, 7  ;;  %v14619_v49 = vld [vmem:[%s20159_s0 + $0x18] sm:$0xff]  }
 0x1a9   :  { %v1796_v30 = vmul.f32 %v14476_v28, %v1788_v31  ;;  %v1812_v50 = vmul.f32 2.0, %v14481_v16  ;;  %v5130_v31 = vadd.f32 %v14326_v46, %v14474_v15  ;;  %v5759_v34 = vmax.f32 %v5144_v48, 0.0  ;;  %20336 = vst [vmem:[#allocation54_spill] sm:$0xff] %v14619_v49 }
 0x1ab   :  { %v14508_v36 = vadd.f32 -1.0, %v1796_v30  ;;  %v5776_v30 = vmax.f32 %v5150_v23, 0.0  ;;  %v5847_v22 = vpack.c.bf16 %v5775_v42, %v5759_v34  ;;  %v5712_v48 = vmax.f32 %v5130_v31, 0.0 }
 0x1ac   :  { %11846 = vmatmul.mubr.msk.bf16.gmra.mxu0 %vm5016_vm4, %v14521_v59  ;;  %v14536_v18 = vpop.f32.mrf.mxu0  ;;  %v1964_v34 = vcombine.high %v14452_v40, %v14452_v40  ;;  %v5711_v42 = vmax.f32 %v5128_v33, 0.0  ;;  %v5831_v31 = vpack.c.bf16 %v5743_v24, %v5727_v25  ;;  %v14573_v24 = vld [vmem:[%s20159_s0 + $0x10] sm:$0xff]  }
 0x1ad   :  { %v14528_v41 = vmul.f32 %v14508_v36, %v1812_v50  ;;  %v1828_v46 = vmul.f32 2.0, %v14508_v36  ;;  %5569 = vmatprep.mubr.bf16.mxu0 %v20167_v39  ;;  %20331 = vst [vmem:[#allocation49_spill] sm:$0xff] %v14536_v18  ;;  %v5848_v63 = vpack.c.bf16 %v5776_v30, %v5760_v9  ;;  %v5124_v50 = vadd.f32 %v14278_v47, %v14463_v21 }
 0x1ae   :  { %v14546_v1 = vpop.f32.mrf.mxu0  ;;  %v5663_v30 = vmax.f32 %v14502_v61, 0.0  ;;  %v5679_v47 = vmax.f32 %v14512_v10, 0.0  ;;  %v14566_v10 = vpop.f32.mrf.mxu1  ;;  %v2180_v33 = vcombine.high %v14508_v36, %v14508_v36  ;;  %20334 = vst [vmem:[#allocation52_spill] sm:$0xff] %v14573_v24 }
 0x1af   :  { %v1836_v53 = vmul.f32 %v14508_v36, %v1828_v46  ;;  %v1852_v23 = vmul.f32 2.0, %v14528_v41  ;;  %20332 = vst [vmem:[#allocation50_spill] sm:$0xff] %v14546_v1  ;;  %5952 = vmatprep.subr.bf16.mxu0 %v5848_v63  ;;  %v5116_v46 = vadd.f32 %v14251_v12, %v14493_v52  ;;  %v2132_v12 = vcombine.high %v14481_v16, %v14481_v16 }
 0x1b0   :  { %5953 = vmatpush1.bf16.msra.mxu0 %v5847_v22  ;;  %v14556_v0 = vpop.f32.mrf.mxu0  ;;  %v2012_v22 = vcombine.high %v14454_v7, %v14454_v7  ;;  %v5695_v19 = vmax.f32 %v5124_v50, 0.0  ;;  %v5799_v50 = vpack.c.bf16 %v5679_v47, %v5663_v30  ;;  %v14595_v18 = vpop.f32.mrf.mxu1 }
 0x1b1   :  { %v14548_v9 = vadd.f32 -1.0, %v1836_v53  ;;  %20333 = vst [vmem:[#allocation51_spill] sm:$0xff] %v14556_v0  ;;  %5954 = vmatprep.subr.bf16.mxu0 %v5832_v35  ;;  %v5816_v53 = vpack.c.bf16 %v5712_v48, %v5696_v54  ;;  %v5664_v11 = vmax.f32 %v5116_v46, 0.0  ;;  %v14591_v54 = vrot.slane %v2132_v12, 1 }
 0x1b2   :  { %v14577_v63 = vpop.f32.mrf.mxu0  ;;  %v5815_v29 = vpack.c.bf16 %v5711_v42, %v5695_v19  ;;  %v2196_v46 = vrot.slane %v2180_v33, 6  ;;  %v5220_v1 = vpop.f32.mrf.mxu1 }
 0x1b3   :  { %v14559_v44 = vmul.f32 %v14548_v9, %v1852_v23  ;;  %v1868_v61 = vmul.f32 2.0, %v14548_v9  ;;  %v2276_v30 = vcombine.high %v14548_v9, %v14548_v9  ;;  %v5800_v42 = vpack.c.bf16 %v5680_v3, %v5664_v11 }
 0x1b4   :  { %11847 = vmatmul.mubr.msk.bf16.gmra.mxu0 %vm5016_vm4, %v14573_v24  ;;  %v14587_v60 = vpop.f32.mrf.mxu0  ;;  %v14593_v24 = vrot.slane %v2012_v22, 2 }
 0x1b5   :  { %v1876_v23 = vmul.f32 %v14548_v9, %v1868_v61  ;;  %v1892_v25 = vmul.f32 2.0, %v14559_v44  ;;  %v2300_v35 = vcombine.high %v14559_v44, %v14559_v44  ;;  %5579 = vmatprep.mubr.bf16.mxu0 %v20167_v39  ;;  %5955 = vmatpush1.bf16.msra.mxu0 %v5831_v31  ;;  %20335 = vst [vmem:[#allocation53_spill] sm:$0xff] %v14587_v60  ;;  %v1980_v61 = vrot.slane %v1964_v34, 5 }
 0x1b6   :  { %5956 = vmatprep.subr.bf16.mxu0 %v5816_v53  ;;  %v2228_v31 = vcombine.high %v14528_v41, %v14528_v41  ;;  %v14601_v47 = vpop.f32.mrf.mxu0  ;;  %v2147_v53 = vrot.slane %v14481_v16, 1  ;;  %v2075_v60 = vrot.slane %v14460_v13, 7  ;;  %v20339_v13 = vcombine.high %v14365_v26, %v14365_v26 }
 0x1b7   :  { %v14589_v48 = vadd.f32 -1.0, %v1876_v23  ;;  %v2316_v22 = vrot.slane %v2300_v35, 5  ;;  %v2195_v23 = vrot.slane %v14508_v36, 6  ;;  %v2027_v35 = vrot.slane %v14454_v7, 2 }
 0x1b8   :  { %v14610_v59 = vpop.f32.mrf.mxu0  ;;  %v2244_v17 = vrot.slane %v2228_v31, 3  ;;  %v2554_v31 = vsel %vm20337_vm11, %v14591_v54, %v2196_v46  ;;  %vm20352_vm11 = vmmov %vm20351_vm1  ;;  %v14711_v16 = vadd.f32 %v14360_v56, %v14498_v5  ;;  %v5209_v56 = vadd.f32 %v14484_v20, %v14426_v51 }
 0x1b9   :  { %v1900_v19 = vmul.f32 %v14589_v48, %v1892_v25  ;;  %v1908_v12 = vmul.f32 2.0, %v14589_v48  ;;  %v2348_v34 = vcombine.high %v14589_v48, %v14589_v48  ;;  %5957 = vmatpush1.bf16.msra.mxu0 %v5815_v29  ;;  %v2363_v33 = vrot.slane %v14589_v48, 2 }
 0x1ba   :  { %5958 = vmatprep.subr.bf16.mxu0 %v5800_v42  ;;  %v2315_v29 = vrot.slane %v14559_v44, 5  ;;  %v14623_v36 = vpop.f32.mrf.mxu0  ;;  %v2587_v44 = vsel %vm2453_vm13, %v2276_v30, %v2316_v22  ;;  %v2243_v30 = vrot.slane %v14528_v41, 3  ;;  %v5222_v22 = vpop.f32.mrf.mxu1  ;;  %v14655_v41 = vld [vmem:[%s19972_s4] sm:$0xff]  }
 0x1bb   :  { %v1916_v11 = vmul.f32 %v14589_v48, %v1908_v12  ;;  %v2364_v3 = vrot.slane %v2348_v34, 2  ;;  %v2396_v25 = vcombine.high %v1900_v19, %v1900_v19  ;;  %v2411_v0 = vrot.slane %v1900_v19, 7 }
 0x1bc   :  { %11848 = vmatmul.mubr.msk.bf16.gmra.mxu0 %vm5016_vm4, %v14619_v49  ;;  %v2469_v19 = vsel %vm2453_vm13, %v20339_v13, %v1980_v61  ;;  %v2503_v12 = vsel %vm20340_vm2, %v14593_v24, %v2076_v45  ;;  %v2108_v34 = vcombine.low %v14476_v28, %v14476_v28  ;;  %v2586_v13 = vsel %vm2453_vm13, %v14548_v9, %v2315_v29  ;;  %vm20354_vm2 = vmmov %vm20347_vm5 }
 0x1bd   :  { %v11728_v48 = vadd.f32 -1.0, %v1916_v11  ;;  %v2412_v42 = vrot.slane %v2396_v25, 7  ;;  %5959 = vmatpush1.bf16.msra.mxu0 %v5799_v50  ;;  %5976 = vmatprep.mubr.bf16.mxu0 %v20167_v39  ;;  %v2618_v7 = vsel %vm20338_vm12, %v2363_v33, %v2411_v0  ;;  %v14638_v11 = vpop.f32.mrf.mxu0  ;;  %v2553_v0 = vsel %vm20342_vm0, %v2147_v53, %v2195_v23 }
 0x1be   :  { %v2571_v25 = vsel %vm20344_vm14, %v2554_v31, %v2244_v17  ;;  %v2603_v45 = vsel %vm20345_vm7, %v2587_v44, %v2364_v3  ;;  %v2502_v17 = vsel %vm20348_vm3, %v2027_v35, %v2075_v60  ;;  %v5223_v29 = vadd.f32 %v5222_v22, %v14445_v6  ;;  %vm20650_vm14 = vmmov %vm20350_vm9 }
 0x1bf   :  { %v2444_v46 = vcombine.low %v11728_v48, %v11728_v48  ;;  %v2619_v50 = vsel %vm20341_vm8, %v2364_v3, %v2412_v42  ;;  %v14650_v49 = vpop.f32.mrf.mxu0  ;;  %v20349_v3 = vrot.slane %v14452_v40, 5  ;;  %v2486_v40 = vsel %vm20352_vm11, %v2469_v19, %v14593_v24  ;;  %vm20355_vm8 = vmmov %vm20351_vm1 }
 0x1c0   :  { %v2635_v61 = vsel %vm20343_vm6, %v2619_v50, %v11728_v48  ;;  %v2520_v48 = vsel %vm20347_vm5, %v2503_v12, %v14476_v28  ;;  %v2602_v28 = vsel %vm20351_vm1, %v2586_v13, %v2363_v33  ;;  %vm20353_vm12 = vcmask 1046528  }
 0x1c1   :  { %v4947_v42 = vpack.c.bf16 %v2635_v61, %v2635_v61  ;;  %v2634_v23 = vsel %vm20346_vm10, %v2618_v7, %v2444_v46  ;;  %v2468_v9 = vsel %vm2453_vm13, %v14365_v26, %v20349_v3  ;;  %v5283_v44 = vpop.f32.mrf.mxu0  ;;  %v14669_v61 = vpack.c.bf16 %v2603_v45, %v2571_v25  ;;  %vm20356_vm0 = vmmov %vm20353_vm12  ;;  %v14707_v45 = vld [vmem:[%s19972_s4 + $0x8] sm:$0xff]  }
 0x1c2   :  { %v4946_v31 = vpack.c.bf16 %v2634_v23, %v2634_v23  ;;  %v2570_v7 = vsel %vm20350_vm9, %v2553_v0, %v2243_v30  ;;  %v2537_v26 = vsel %vm20353_vm12, %v2520_v48, %v14591_v54  ;;  %v2519_v12 = vsel %vm20354_vm2, %v2502_v17, %v2108_v34 }
 0x1c3   :  { %v14667_v50 = vand.u32 %v12660_v57, %v4947_v42  ;;  %v5285_v46 = vpop.f32.mrf.mxu0  ;;  %v5219_v33 = vadd.f32 %v14595_v18, %v14421_v37  ;;  %v14691_v54 = vpack.c.bf16 %v2537_v26, %v2486_v40  ;;  %v2485_v19 = vsel %vm20355_vm8, %v2468_v9, %v2027_v35 }
 0x1c4   :  { %v14674_v60 = vand.u32 %v12660_v57, %v4946_v31  ;;  %11857 = vmatmul.mubr.msk.bf16.vlgmr.msra.gmra.mxu0 %vm20095_vm15, %v14655_v41  ;;  %v14688_v57 = vpack.c.bf16 %v2602_v28, %v2570_v7  ;;  %v2536_v34 = vsel %vm20356_vm0, %v2519_v12, %v2147_v53  ;;  %v5778_v30 = vmax.f32 %v5223_v29, 0.0 }
 0x1c5   :  { %5600 = vmatprep.subr.bf16.mxu1 %v14667_v50  ;;  %5986 = vmatprep.mubr.bf16.mxu0 %v20167_v39  ;;  %v5289_v24 = vpop.f32.mrf.mxu0  ;;  %v14699_v18 = vadd.f32 %v14342_v43, %v14493_v52  ;;  %v5213_v0 = vadd.f32 %v14542_v8, %v14448_v32  ;;  %v5221_v22 = vadd.f32 %v5220_v1, %v14445_v6  ;;  %v5762_v8 = vmax.f32 %v5219_v33, 0.0 }
 0x1c6   :  { %5601 = vmatpush1.bf16.msra.mxu1 %v14674_v60  ;;  %v14715_v53 = vadd.f32 %v14376_v27, %v14498_v5  ;;  %v14719_v43 = vadd.f32 %v14395_v62, %v14463_v21  ;;  %v14722_v1 = vpack.c.bf16 %v2536_v34, %v2485_v19  ;;  %v14726_v35 = vadd.f32 %v14450_v2, %v14474_v15 }
 0x1c7   :  { %5602 = vmatprep.subr.bf16.mxu1 %v14669_v61  ;;  %v5291_v25 = vpop.f32.mrf.mxu0  ;;  %v5217_v27 = vadd.f32 %v14566_v10, %v14421_v37  ;;  %v5199_v62 = vadd.f32 %v14423_v14, %v14463_v21  ;;  %v5850_v42 = vpack.c.bf16 %v5778_v30, %v5762_v8  ;;  %v5211_v2 = vadd.f32 %v14516_v58, %v14448_v32 }
 0x1c8   :  { %v5292_v23 = vadd.f32 %v5291_v25, %v14421_v37  ;;  %v5746_v17 = vmax.f32 %v5213_v0, 0.0  ;;  %v5777_v31 = vmax.f32 %v5221_v22, 0.0  ;;  %v5286_v10 = vadd.f32 %v5285_v46, %v14448_v32  ;;  %v14765_v22 = vld [vmem:[%s19972_s4 + $0x10] sm:$0xff]  }
 0x1c9   :  { %v5293_v13 = vpop.f32.mrf.mxu0  ;;  %v14746_v14 = vadd.f32 %v14438_v38, %v14474_v15  ;;  %v5207_v9 = vadd.f32 %v14465_v55, %v14426_v51  ;;  %v5290_v29 = vadd.f32 %v5289_v24, %v14421_v37  ;;  %v5714_v7 = vmax.f32 %v14726_v35, 0.0 }
 0x1ca   :  { %5603 = vmatpush1.bf16.msra.mxu1 %v14688_v57  ;;  %v5294_v48 = vadd.f32 %v5293_v13, %v14445_v6  ;;  %v14739_v20 = vpop.f32.mrf.mxu1  ;;  %v5730_v28 = vmax.f32 %v5209_v56, 0.0  ;;  %v5761_v40 = vmax.f32 %v5217_v27, 0.0  ;;  %v5282_v38 = vadd.f32 %v14650_v49, %v14426_v51 }
 0x1cb   :  { %5604 = vmatprep.subr.bf16.mxu1 %v14691_v54  ;;  %v5295_v3 = vpop.f32.mrf.mxu0  ;;  %v5284_v55 = vadd.f32 %v5283_v44, %v14448_v32  ;;  %v5764_v12 = vmax.f32 %v5292_v23, 0.0  ;;  %v5745_v24 = vmax.f32 %v5211_v2, 0.0  ;;  %v5748_v0 = vmax.f32 %v5286_v10, 0.0 }
 0x1cc   :  { %11858 = vmatmul.mubr.msk.bf16.gmra.mxu0 %vm20095_vm15, %v14707_v45  ;;  %v5296_v58 = vadd.f32 %v5295_v3, %v14445_v6  ;;  %v14755_v26 = vpop.f32.mrf.mxu1  ;;  %v5779_v46 = vmax.f32 %v5294_v48, 0.0  ;;  %v5849_v19 = vpack.c.bf16 %v5777_v31, %v5761_v40  ;;  %v5834_v30 = vpack.c.bf16 %v5746_v17, %v5730_v28 }
 0x1cd   :  { %5996 = vmatprep.mubr.bf16.mxu0 %v20167_v39  ;;  %v5276_v49 = vadd.f32 %v14623_v36, %v14474_v15  ;;  %v5280_v44 = vadd.f32 %v14638_v11, %v14426_v51  ;;  %v5763_v25 = vmax.f32 %v5290_v29, 0.0  ;;  %v5682_v35 = vmax.f32 %v14715_v53, 0.0 }
 0x1ce   :  { %5605 = vmatpush1.bf16.msra.mxu1 %v14722_v1  ;;  %v5780_v33 = vmax.f32 %v5296_v58, 0.0  ;;  %v14760_v34 = vpop.f32.mrf.mxu1  ;;  %v5698_v56 = vmax.f32 %v5199_v62, 0.0  ;;  %v5729_v27 = vmax.f32 %v5207_v9, 0.0  ;;  %v5274_v36 = vadd.f32 %v14610_v59, %v14474_v15  ;;  %v20359_v58 = vld [vmem:[#allocation50_spill] sm:$0xff] }
 0x1cf   :  { %6025 = vmatprep.subr.bf16.mxu1 %v5850_v42  ;;  %v5732_v42 = vmax.f32 %v5282_v38, 0.0  ;;  %v5747_v11 = vmax.f32 %v5284_v55, 0.0  ;;  %v5851_v23 = vpack.c.bf16 %v5779_v46, %v5763_v25  ;;  %v5713_v48 = vmax.f32 %v14746_v14, 0.0  ;;  %v20358_v14 = vld [vmem:[#allocation41_spill] sm:$0xff] }
 0x1d0   :  { %v5852_v8 = vpack.c.bf16 %v5780_v33, %v5764_v12  ;;  %v14775_v13 = vpop.f32.mrf.mxu1  ;;  %v5833_v2 = vpack.c.bf16 %v5745_v24, %v5729_v27  ;;  %v5266_v53 = vadd.f32 %v14577_v63, %v14498_v5  ;;  %v5818_v10 = vpack.c.bf16 %v5714_v7, %v5698_v56  ;;  %v20360_v7 = vld [vmem:[#allocation51_spill] sm:$0xff] }
 0x1d1   :  { %11849 = vmatmul.mubr.msk.bf16.vlgmr.msra.gmra.mxu1 %vm5016_vm4, %v14470_v4  ;;  %v5272_v4 = vadd.f32 %v14601_v47, %v14463_v21  ;;  %v5836_v17 = vpack.c.bf16 %v5748_v0, %v5732_v42  ;;  %v20357_v47 = vld [vmem:[#allocation53_spill] sm:$0xff]  ;;  %v5716_v59 = vmax.f32 %v5276_v49, 0.0  ;;  %v5731_v3 = vmax.f32 %v5280_v44, 0.0 }
 0x1d2   :  { %5632 = vmatprep.mubr.bf16.mxu1 %v20167_v39  ;;  %6026 = vmatpush1.bf16.msra.mxu1 %v5849_v19  ;;  %v14784_v62 = vpop.f32.mrf.mxu1  ;;  %v5270_v31 = vadd.f32 %v20357_v47, %v14463_v21  ;;  %v5187_v9 = vadd.f32 %v20358_v14, %v14493_v52  ;;  %v5666_v63 = vmax.f32 %v14699_v18, 0.0  ;;  %v5697_v29 = vmax.f32 %v14719_v43, 0.0  ;;  %v14805_v43 = vld [vmem:[%s19972_s4 + $0x18] sm:$0xff]   ;;  %v20362_v0 = vld [vmem:[#allocation49_spill] sm:$0xff] }
 0x1d3   :  { %6027 = vmatprep.subr.bf16.mxu1 %v5834_v30  ;;  %6098 = vmatprep.subr.bf16.mxu0 %v5852_v8  ;;  %v5262_v28 = vadd.f32 %v20359_v58, %v14493_v52  ;;  %v5264_v38 = vadd.f32 %v20360_v7, %v14498_v5  ;;  %v5700_v55 = vmax.f32 %v5272_v4, 0.0  ;;  %v5715_v12 = vmax.f32 %v5274_v36, 0.0  ;;  %v20361_v30 = vld [vmem:[#allocation48_spill] sm:$0xff] }
 0x1d4   :  { %11859 = vmatmul.mubr.msk.bf16.gmra.mxu0 %vm20095_vm15, %v14765_v22  ;;  %v14797_v40 = vpop.f32.mrf.mxu1  ;;  %v5835_v46 = vpack.c.bf16 %v5747_v11, %v5731_v3  ;;  %v5681_v33 = vmax.f32 %v14711_v16, 0.0  ;;  %v5817_v24 = vpack.c.bf16 %v5713_v48, %v5697_v29  ;;  %v5684_v18 = vmax.f32 %v5266_v53, 0.0  ;;  %v20364_v3 = vld [vmem:[#allocation54_spill] sm:$0xff] }
 0x1d5   :  { %6099 = vmatpush1.bf16.msra.mxu0 %v5851_v23  ;;  %6006 = vmatprep.mubr.bf16.mxu0 %v20167_v39  ;;  %v5260_v49 = vadd.f32 %v20362_v0, %v14493_v52  ;;  %v5699_v44 = vmax.f32 %v5270_v31, 0.0  ;;  %v5802_v25 = vpack.c.bf16 %v5682_v35, %v5666_v63  ;;  %v5820_v8 = vpack.c.bf16 %v5716_v59, %v5700_v55 }
 0x1d6   :  { %6028 = vmatpush1.bf16.msra.mxu1 %v5833_v2  ;;  %6100 = vmatprep.subr.bf16.mxu0 %v5836_v17  ;;  %v5346_v19 = vpop.f32.mrf.mxu1  ;;  %v5665_v16 = vmax.f32 %v5187_v9, 0.0  ;;  %v5668_v56 = vmax.f32 %v5262_v28, 0.0  ;;  %v5683_v42 = vmax.f32 %v5264_v38, 0.0  ;;  %v20363_v17 = vld [vmem:[#allocation52_spill] sm:$0xff]  ;;  %v5345_v0 = vadd.f32 %v14797_v40, %v14463_v21 }
 0x1d7   :  { %6029 = vmatprep.subr.bf16.mxu1 %v5818_v10  ;;  %v5819_v4 = vpack.c.bf16 %v5715_v12, %v5699_v44  ;;  %v5667_v48 = vmax.f32 %v5260_v49, 0.0  ;;  %v5335_v40 = vadd.f32 %v14755_v26, %v14493_v52 }
 0x1d8   :  { %v5348_v27 = vpop.f32.mrf.mxu1  ;;  %v5801_v36 = vpack.c.bf16 %v5681_v33, %v5665_v16  ;;  %v5804_v23 = vpack.c.bf16 %v5684_v18, %v5668_v56  ;;  %v5339_v56 = vadd.f32 %v14775_v13, %v14498_v5  ;;  %v5337_v13 = vadd.f32 %v14760_v34, %v14498_v5 }
 0x1d9   :  { %11850 = vmatmul.mubr.msk.bf16.gmra.mxu1 %vm5016_vm4, %v20361_v30  ;;  %6101 = vmatpush1.bf16.msra.mxu0 %v5835_v46  ;;  %v5803_v2 = vpack.c.bf16 %v5683_v42, %v5667_v48  ;;  %v5349_v12 = vadd.f32 %v5348_v27, %v14474_v15  ;;  %v5670_v26 = vmax.f32 %v5335_v40, 0.0 }
 0x1da   :  { %5642 = vmatprep.mubr.bf16.mxu1 %v20167_v39  ;;  %6030 = vmatpush1.bf16.msra.mxu1 %v5817_v24  ;;  %v5352_v11 = vpop.f32.mrf.mxu1  ;;  %v5686_v48 = vmax.f32 %v5339_v56, 0.0 }
 0x1db   :  { %6031 = vmatprep.subr.bf16.mxu1 %v5802_v25  ;;  %6102 = vmatprep.subr.bf16.mxu0 %v5820_v8  ;;  %v5353_v18 = vadd.f32 %v5352_v11, %v14426_v51  ;;  %v5347_v25 = vadd.f32 %v5346_v19, %v14474_v15  ;;  %v5718_v27 = vmax.f32 %v5349_v12, 0.0  ;;  %v5702_v19 = vmax.f32 %v5345_v0, 0.0 }
 0x1dc   :  { %11860 = vmatmul.mubr.msk.bf16.gmra.mxu0 %vm20095_vm15, %v14805_v43  ;;  %v5354_v35 = vpop.f32.mrf.mxu1  ;;  %v5806_v34 = vpack.c.bf16 %v5686_v48, %v5670_v26 }
 0x1dd   :  { %6103 = vmatpush1.bf16.msra.mxu0 %v5819_v4  ;;  %6122 = vmatprep.mubr.bf16.mxu0 %v20167_v39  ;;  %v5355_v28 = vadd.f32 %v5354_v35, %v14426_v51  ;;  %v5343_v4 = vadd.f32 %v14784_v62, %v14463_v21  ;;  %v5717_v11 = vmax.f32 %v5347_v25, 0.0  ;;  %v5822_v35 = vpack.c.bf16 %v5718_v27, %v5702_v19 }
 0x1de   :  { %6032 = vmatpush1.bf16.msra.mxu1 %v5801_v36  ;;  %6104 = vmatprep.subr.bf16.mxu0 %v5804_v23  ;;  %v5356_v53 = vpop.f32.mrf.mxu1  ;;  %v5733_v36 = vmax.f32 %v5353_v18, 0.0  ;;  %v5333_v62 = vadd.f32 %v14739_v20, %v14493_v52 }
 0x1df   :  { %v5357_v38 = vadd.f32 %v5356_v53, %v14448_v32  ;;  %v5734_v49 = vmax.f32 %v5355_v28, 0.0  ;;  %v5685_v53 = vmax.f32 %v5337_v13, 0.0 }
 0x1e0   :  { %v5358_v47 = vpop.f32.mrf.mxu1 }
 0x1e1   :  { %11851 = vmatmul.mubr.msk.bf16.gmra.mxu1 %vm5016_vm4, %v20363_v17  ;;  %6105 = vmatpush1.bf16.msra.mxu0 %v5803_v2  ;;  %v5359_v14 = vadd.f32 %v5358_v47, %v14448_v32  ;;  %v5749_v8 = vmax.f32 %v5357_v38, 0.0  ;;  %v5701_v2 = vmax.f32 %v5343_v4, 0.0  ;;  %v5669_v47 = vmax.f32 %v5333_v62, 0.0 }
 0x1e2   :  { %5652 = vmatprep.mubr.bf16.mxu1 %v20167_v39  ;;  %v5362_v31 = vpop.f32.mrf.mxu1 }
 0x1e3   :  { %v5363_v29 = vadd.f32 %v5362_v31, %v14421_v37  ;;  %v5750_v46 = vmax.f32 %v5359_v14, 0.0  ;;  %v5837_v23 = vpack.c.bf16 %v5749_v8, %v5733_v36  ;;  %v5821_v17 = vpack.c.bf16 %v5717_v11, %v5701_v2 }
 0x1e4   :  { %11865 = vmatmul.mubr.msk.bf16.vlgmr.msra.gmra.mxu0 %vm20095_vm15, %v14655_v41  ;;  %v5364_v10 = vpop.f32.mrf.mxu1  ;;  %v5805_v31 = vpack.c.bf16 %v5685_v53, %v5669_v47 }
 0x1e5   :  { %6132 = vmatprep.mubr.bf16.mxu0 %v20167_v39  ;;  %v5365_v9 = vadd.f32 %v5364_v10, %v14421_v37  ;;  %v5765_v30 = vmax.f32 %v5363_v29, 0.0  ;;  %v5838_v42 = vpack.c.bf16 %v5750_v46, %v5734_v49 }
 0x1e6   :  { %v5366_v59 = vpop.f32.mrf.mxu1 }
 0x1e7   :  { %v5367_v63 = vadd.f32 %v5366_v59, %v14445_v6  ;;  %v5766_v33 = vmax.f32 %v5365_v9, 0.0 }
 0x1e8   :  { %v5368_v58 = vpop.f32.mrf.mxu1 }
 0x1e9   :  { %11852 = vmatmul.mubr.msk.bf16.gmra.mxu1 %vm5016_vm4, %v20364_v3  ;;  %v5369_v7 = vadd.f32 %v5368_v58, %v14445_v6  ;;  %v5781_v55 = vmax.f32 %v5367_v63, 0.0 }
 0x1ea   :  { %6049 = vmatprep.mubr.bf16.mxu1 %v20167_v39 }
 0x1eb   :  { %v5782_v24 = vmax.f32 %v5369_v7, 0.0  ;;  %v5853_v16 = vpack.c.bf16 %v5781_v55, %v5765_v30 }
 0x1ec   :  { %11866 = vmatmul.mubr.msk.bf16.gmra.mxu0 %vm20095_vm15, %v14707_v45 }
 0x1ed   :  { %6142 = vmatprep.mubr.bf16.mxu0 %v20167_v39  ;;  %v5854_v44 = vpack.c.bf16 %v5782_v24, %v5766_v33 }
 0x1ef   :  { %6171 = vmatprep.subr.bf16.mxu1 %v5854_v44 }
 0x1f1   :  { %11861 = vmatmul.mubr.msk.bf16.vlgmr.msra.gmra.mxu1 %vm20095_vm15, %v14655_v41 }
 0x1f2   :  { %6059 = vmatprep.mubr.bf16.mxu1 %v20167_v39  ;;  %6172 = vmatpush1.bf16.msra.mxu1 %v5853_v16 }
 0x1f3   :  { %6173 = vmatprep.subr.bf16.mxu1 %v5838_v42 }
 0x1f4   :  { %11867 = vmatmul.mubr.msk.bf16.gmra.mxu0 %vm20095_vm15, %v14765_v22 }
 0x1f5   :  { %6152 = vmatprep.mubr.bf16.mxu0 %v20167_v39 }
 0x1f6   :  { %6174 = vmatpush1.bf16.msra.mxu1 %v5837_v23 }
 0x1f7   :  { %6175 = vmatprep.subr.bf16.mxu1 %v5822_v35 }
 0x1f9   :  { %11862 = vmatmul.mubr.msk.bf16.gmra.mxu1 %vm20095_vm15, %v14707_v45 }
 0x1fa   :  { %6069 = vmatprep.mubr.bf16.mxu1 %v20167_v39  ;;  %6176 = vmatpush1.bf16.msra.mxu1 %v5821_v17 }
 0x1fb   :  { %6177 = vmatprep.subr.bf16.mxu1 %v5806_v34 }
 0x1fc   :  { %11868 = vmatmul.mubr.msk.bf16.gmra.mxu0 %vm20095_vm15, %v14805_v43 }
 0x1fd   :  { %6268 = vmatprep.mubr.bf16.mxu0 %v20167_v39  ;;  %v5405_v20 = vpop.f32.mrf.mxu0 }
 0x1fe   :  { %6178 = vmatpush1.bf16.msra.mxu1 %v5805_v31 }
 0x1ff   :  { %v5407_v10 = vpop.f32.mrf.mxu0 }
 0x200   :  { %v5408_v17 = vadd.f32 %v5407_v10, %v14493_v52 }
 0x201   :  { %11863 = vmatmul.mubr.msk.bf16.gmra.mxu1 %vm20095_vm15, %v14765_v22  ;;  %v5409_v59 = vpop.f32.mrf.mxu0 }
 0x202   :  { %6079 = vmatprep.mubr.bf16.mxu1 %v20167_v39  ;;  %v5410_v47 = vadd.f32 %v5409_v59, %v14498_v5 }
 0x203   :  { %v5411_v3 = vpop.f32.mrf.mxu0 }
 0x204   :  { %v5412_v35 = vadd.f32 %v5411_v3, %v14498_v5 }
 0x205   :  { %v5415_v14 = vpop.f32.mrf.mxu0 }
 0x206   :  { %v5416_v26 = vadd.f32 %v5415_v14, %v14463_v21  ;;  %v5687_v14 = vmax.f32 %v5410_v47, 0.0 }
 0x207   :  { %v5417_v9 = vpop.f32.mrf.mxu0 }
 0x208   :  { %v5418_v40 = vadd.f32 %v5417_v9, %v14463_v21  ;;  %v5703_v3 = vmax.f32 %v5416_v26, 0.0 }
 0x209   :  { %11864 = vmatmul.mubr.msk.bf16.gmra.mxu1 %vm20095_vm15, %v14805_v43  ;;  %v5419_v63 = vpop.f32.mrf.mxu0 }
 0x20a   :  { %6195 = vmatprep.mubr.bf16.mxu1 %v20167_v39  ;;  %v5420_v11 = vadd.f32 %v5419_v63, %v14474_v15  ;;  %v5704_v34 = vmax.f32 %v5418_v40, 0.0  ;;  %v5688_v63 = vmax.f32 %v5412_v35, 0.0 }
 0x20b   :  { %v5421_v29 = vpop.f32.mrf.mxu0 }
 0x20c   :  { %v5422_v16 = vadd.f32 %v5421_v29, %v14474_v15  ;;  %v5719_v31 = vmax.f32 %v5420_v11, 0.0 }
 0x20d   :  { %v5425_v58 = vpop.f32.mrf.mxu0 }
 0x20e   :  { %v5426_v4 = vadd.f32 %v5425_v58, %v14426_v51  ;;  %v5720_v62 = vmax.f32 %v5422_v16, 0.0  ;;  %v5406_v58 = vadd.f32 %v5405_v20, %v14493_v52 }
 0x20f   :  { %v5427_v28 = vpop.f32.mrf.mxu0 }
 0x210   :  { %v5428_v49 = vadd.f32 %v5427_v28, %v14426_v51  ;;  %v5735_v53 = vmax.f32 %v5426_v4, 0.0  ;;  %v5824_v29 = vpack.c.bf16 %v5720_v62, %v5704_v34  ;;  %v5672_v28 = vmax.f32 %v5408_v17, 0.0 }
 0x211   :  { %11869 = vmatmul.mubr.msk.bf16.vlgmr.msra.gmra.mxu1 %vm20095_vm15, %v14655_v41  ;;  %v5429_v7 = vpop.f32.mrf.mxu0 }
 0x212   :  { %6205 = vmatprep.mubr.bf16.mxu1 %v20167_v39  ;;  %v5430_v25 = vadd.f32 %v5429_v7, %v14448_v32  ;;  %v5736_v19 = vmax.f32 %v5428_v49, 0.0  ;;  %v5823_v7 = vpack.c.bf16 %v5719_v31, %v5703_v3  ;;  %v5808_v10 = vpack.c.bf16 %v5688_v63, %v5672_v28 }
 0x213   :  { %v5431_v38 = vpop.f32.mrf.mxu0 }
 0x214   :  { %v5432_v33 = vadd.f32 %v5431_v38, %v14448_v32  ;;  %v5751_v23 = vmax.f32 %v5430_v25, 0.0  ;;  %v5671_v38 = vmax.f32 %v5406_v58, 0.0 }
 0x215   :  { %v5435_v55 = vpop.f32.mrf.mxu0 }
 0x216   :  { %v5436_v30 = vadd.f32 %v5435_v55, %v14421_v37  ;;  %v5752_v56 = vmax.f32 %v5432_v33, 0.0  ;;  %v5839_v9 = vpack.c.bf16 %v5751_v23, %v5735_v53  ;;  %v5807_v59 = vpack.c.bf16 %v5687_v14, %v5671_v38 }
 0x217   :  { %v5437_v12 = vpop.f32.mrf.mxu0 }
 0x218   :  { %v5438_v24 = vadd.f32 %v5437_v12, %v14421_v37  ;;  %v5767_v36 = vmax.f32 %v5436_v30, 0.0  ;;  %v5840_v2 = vpack.c.bf16 %v5752_v56, %v5736_v19 }
 0x219   :  { %11870 = vmatmul.mubr.msk.bf16.gmra.mxu1 %vm20095_vm15, %v14707_v45  ;;  %v5439_v46 = vpop.f32.mrf.mxu0 }
 0x21a   :  { %6215 = vmatprep.mubr.bf16.mxu1 %v20167_v39  ;;  %v5440_v18 = vadd.f32 %v5439_v46, %v14445_v6  ;;  %v5768_v27 = vmax.f32 %v5438_v24, 0.0 }
 0x21b   :  { %v5441_v0 = vpop.f32.mrf.mxu0 }
 0x21c   :  { %v5442_v44 = vadd.f32 %v5441_v0, %v14445_v6  ;;  %v5783_v8 = vmax.f32 %v5440_v18, 0.0 }
 0x21e   :  { %v5784_v42 = vmax.f32 %v5442_v44, 0.0  ;;  %v5855_v48 = vpack.c.bf16 %v5783_v8, %v5767_v36 }
 0x220   :  { %v5856_v13 = vpack.c.bf16 %v5784_v42, %v5768_v27 }
 0x221   :  { %11871 = vmatmul.mubr.msk.bf16.gmra.mxu1 %vm20095_vm15, %v14765_v22 }
 0x222   :  { %6225 = vmatprep.mubr.bf16.mxu1 %v20167_v39  ;;  %6244 = vmatprep.subr.bf16.mxu0 %v5856_v13 }
 0x223   :  { %6245 = vmatpush1.bf16.msra.mxu0 %v5855_v48 }
 0x224   :  { %6246 = vmatprep.subr.bf16.mxu0 %v5840_v2 }
 0x227   :  { %6247 = vmatpush1.bf16.msra.mxu0 %v5839_v9 }
 0x228   :  { %6248 = vmatprep.subr.bf16.mxu0 %v5824_v29 }
 0x229   :  { %11872 = vmatmul.mubr.msk.bf16.gmra.mxu1 %vm20095_vm15, %v14805_v43 }
 0x22a   :  { %6341 = vmatprep.mubr.bf16.mxu1 %v20167_v39 }
 0x22b   :  { %6249 = vmatpush1.bf16.msra.mxu0 %v5823_v7 }
 0x22c   :  { %6250 = vmatprep.subr.bf16.mxu0 %v5808_v10 }
 0x22e   :  { %v5478_v55 = vpop.f32.mrf.mxu1 }
 0x22f   :  { %6251 = vmatpush1.bf16.msra.mxu0 %v5807_v59 }
 0x230   :  { %v5480_v12 = vpop.f32.mrf.mxu1 }
 0x231   :  { %v5481_v7 = vadd.f32 %v5480_v12, %v14493_v52 }
 0x232   :  { %v5482_v20 = vpop.f32.mrf.mxu1  ;;  %11873 = vmatmul.mubr.msk.bf16.vlgmr.msra.gmra.mxu0 %vm20095_vm15, %v14655_v41 }
 0x233   :  { %6278 = vmatprep.mubr.bf16.mxu0 %v20167_v39  ;;  %v5483_v38 = vadd.f32 %v5482_v20, %v14498_v5 }
 0x234   :  { %v5484_v46 = vpop.f32.mrf.mxu1 }
 0x235   :  { %v5485_v29 = vadd.f32 %v5484_v46, %v14498_v5 }
 0x236   :  { %v5488_v33 = vpop.f32.mrf.mxu1 }
 0x237   :  { %v5489_v28 = vadd.f32 %v5488_v33, %v14463_v21 }
 0x238   :  { %v5490_v24 = vpop.f32.mrf.mxu1 }
 0x239   :  { %v5491_v17 = vadd.f32 %v5490_v24, %v14463_v21  ;;  %v5705_v46 = vmax.f32 %v5489_v28, 0.0 }
 0x23a   :  { %v5492_v18 = vpop.f32.mrf.mxu1  ;;  %11874 = vmatmul.mubr.msk.bf16.gmra.mxu0 %vm20095_vm15, %v14707_v45 }
 0x23b   :  { %6288 = vmatprep.mubr.bf16.mxu0 %v20167_v39  ;;  %v5493_v31 = vadd.f32 %v5492_v18, %v14474_v15  ;;  %v5706_v10 = vmax.f32 %v5491_v17, 0.0  ;;  %v5690_v18 = vmax.f32 %v5485_v29, 0.0 }
 0x23c   :  { %v5494_v30 = vpop.f32.mrf.mxu1 }
 0x23d   :  { %v5495_v48 = vadd.f32 %v5494_v30, %v14474_v15  ;;  %v5721_v59 = vmax.f32 %v5493_v31, 0.0 }
 0x23e   :  { %v5498_v0 = vpop.f32.mrf.mxu1 }
 0x23f   :  { %v5499_v26 = vadd.f32 %v5498_v0, %v14426_v51  ;;  %v5722_v58 = vmax.f32 %v5495_v48, 0.0  ;;  %v5479_v0 = vadd.f32 %v5478_v55, %v14493_v52  ;;  %v5825_v33 = vpack.c.bf16 %v5721_v59, %v5705_v46 }
 0x240   :  { %v5500_v49 = vpop.f32.mrf.mxu1 }
 0x241   :  { %v5501_v19 = vadd.f32 %v5500_v49, %v14426_v51  ;;  %v5737_v14 = vmax.f32 %v5499_v26, 0.0  ;;  %v5826_v30 = vpack.c.bf16 %v5722_v58, %v5706_v10  ;;  %v5674_v49 = vmax.f32 %v5481_v7, 0.0 }
 0x242   :  { %v5502_v44 = vpop.f32.mrf.mxu1  ;;  %11875 = vmatmul.mubr.msk.bf16.gmra.mxu0 %vm20095_vm15, %v14765_v22 }
 0x243   :  { %6298 = vmatprep.mubr.bf16.mxu0 %v20167_v39  ;;  %v5503_v11 = vadd.f32 %v5502_v44, %v14448_v32  ;;  %v5738_v34 = vmax.f32 %v5501_v19, 0.0  ;;  %v5689_v44 = vmax.f32 %v5483_v38, 0.0 }
 0x244   :  { %v5504_v25 = vpop.f32.mrf.mxu1 }
 0x245   :  { %v5505_v27 = vadd.f32 %v5504_v25, %v14448_v32  ;;  %v5753_v9 = vmax.f32 %v5503_v11, 0.0  ;;  %v5810_v25 = vpack.c.bf16 %v5690_v18, %v5674_v49 }
 0x246   :  { %v5508_v8 = vpop.f32.mrf.mxu1 }
 0x247   :  { %v5509_v36 = vadd.f32 %v5508_v8, %v14421_v37  ;;  %v5754_v35 = vmax.f32 %v5505_v27, 0.0  ;;  %v5841_v24 = vpack.c.bf16 %v5753_v9, %v5737_v14  ;;  %v5673_v8 = vmax.f32 %v5479_v0, 0.0 }
 0x248   :  { %v5510_v16 = vpop.f32.mrf.mxu1 }
 0x249   :  { %v5511_v42 = vadd.f32 %v5510_v16, %v14421_v37  ;;  %v5769_v53 = vmax.f32 %v5509_v36, 0.0  ;;  %v5842_v3 = vpack.c.bf16 %v5754_v35, %v5738_v34  ;;  %v5809_v12 = vpack.c.bf16 %v5689_v44, %v5673_v8 }
 0x24a   :  { %v5512_v56 = vpop.f32.mrf.mxu1  ;;  %11876 = vmatmul.mubr.msk.bf16.gmra.mxu0 %vm20095_vm15, %v14805_v43 }
 0x24b   :  { %v5513_v4 = vadd.f32 %v5512_v56, %v14445_v6  ;;  %6414 = vmatprep.mubr.bf16.mxu0 %v20167_v39  ;;  %v5770_v62 = vmax.f32 %v5511_v42, 0.0 }
 0x24c   :  { %v5514_v40 = vpop.f32.mrf.mxu1 }
 0x24d   :  { %v5515_v13 = vadd.f32 %v5514_v40, %v14445_v6  ;;  %v5785_v23 = vmax.f32 %v5513_v4, 0.0 }
 0x24f   :  { %v5786_v2 = vmax.f32 %v5515_v13, 0.0  ;;  %v5857_v63 = vpack.c.bf16 %v5785_v23, %v5769_v53 }
 0x251   :  { %v5858_v47 = vpack.c.bf16 %v5786_v2, %v5770_v62 }
 0x253   :  { %6317 = vmatprep.subr.bf16.mxu1 %v5858_v47 }
 0x254   :  { %6318 = vmatpush1.bf16.msra.mxu1 %v5857_v63 }
 0x255   :  { %6319 = vmatprep.subr.bf16.mxu1 %v5842_v3 }
 0x258   :  { %6320 = vmatpush1.bf16.msra.mxu1 %v5841_v24 }
 0x259   :  { %6321 = vmatprep.subr.bf16.mxu1 %v5826_v30 }
 0x25c   :  { %6322 = vmatpush1.bf16.msra.mxu1 %v5825_v33 }
 0x25d   :  { %6323 = vmatprep.subr.bf16.mxu1 %v5810_v25 }
 0x260   :  { %6324 = vmatpush1.bf16.msra.mxu1 %v5809_v12 }
 0x263   :  { %11877 = vmatmul.mubr.msk.bf16.vlgmr.msra.gmra.mxu1 %vm20095_vm15, %v14655_v41 }
 0x264   :  { %v5551_v16 = vpop.f32.mrf.mxu0  ;;  %6351 = vmatprep.mubr.bf16.mxu1 %v20167_v39 }
 0x266   :  { %v5553_v20 = vpop.f32.mrf.mxu0 }
 0x267   :  { %v5554_v33 = vadd.f32 %v5553_v20, %v14493_v52 }
 0x268   :  { %v5555_v55 = vpop.f32.mrf.mxu0 }
 0x269   :  { %v5556_v8 = vadd.f32 %v5555_v55, %v14498_v5 }
 0x26a   :  { %v5557_v56 = vpop.f32.mrf.mxu0 }
 0x26b   :  { %11878 = vmatmul.mubr.msk.bf16.gmra.mxu1 %vm20095_vm15, %v14707_v45  ;;  %v5558_v30 = vadd.f32 %v5557_v56, %v14498_v5 }
 0x26c   :  { %v5561_v27 = vpop.f32.mrf.mxu0  ;;  %6361 = vmatprep.mubr.bf16.mxu1 %v20167_v39 }
 0x26d   :  { %v5562_v49 = vadd.f32 %v5561_v27, %v14463_v21 }
 0x26e   :  { %v5563_v42 = vpop.f32.mrf.mxu0 }
 0x26f   :  { %v5564_v7 = vadd.f32 %v5563_v42, %v14463_v21  ;;  %v5707_v56 = vmax.f32 %v5562_v49, 0.0 }
 0x270   :  { %v5565_v4 = vpop.f32.mrf.mxu0 }
 0x271   :  { %v5566_v59 = vadd.f32 %v5565_v4, %v14474_v15  ;;  %v5708_v25 = vmax.f32 %v5564_v7, 0.0  ;;  %v5692_v4 = vmax.f32 %v5558_v30, 0.0 }
 0x272   :  { %v5567_v36 = vpop.f32.mrf.mxu0 }
 0x273   :  { %11879 = vmatmul.mubr.msk.bf16.gmra.mxu1 %vm20095_vm15, %v14765_v22  ;;  %v5568_v63 = vadd.f32 %v5567_v36, %v14474_v15  ;;  %v5723_v12 = vmax.f32 %v5566_v59, 0.0 }
 0x274   :  { %v5571_v40 = vpop.f32.mrf.mxu0  ;;  %6371 = vmatprep.mubr.bf16.mxu1 %v20167_v39 }
 0x275   :  { %v5572_v28 = vadd.f32 %v5571_v40, %v14426_v51  ;;  %v5724_v0 = vmax.f32 %v5568_v63, 0.0  ;;  %v5552_v40 = vadd.f32 %v5551_v16, %v14493_v52  ;;  %v5827_v27 = vpack.c.bf16 %v5723_v12, %v5707_v56  ;;  %v20365_v16 = vld [vmem:[#allocation7_spill] sm:$0xff] }
 0x276   :  { %v5573_v19 = vpop.f32.mrf.mxu0 }
 0x277   :  { %v5574_v34 = vadd.f32 %v5573_v19, %v14426_v51  ;;  %v5739_v44 = vmax.f32 %v5572_v28, 0.0  ;;  %v5828_v36 = vpack.c.bf16 %v5724_v0, %v5708_v25  ;;  %v5676_v19 = vmax.f32 %v5554_v33, 0.0 }
 0x278   :  { %v5575_v13 = vpop.f32.mrf.mxu0  ;;  %v5675_v20 = vmax.f32 %v5552_v40, 0.0 }
 0x279   :  { %v5576_v31 = vadd.f32 %v5575_v13, %v14448_v32  ;;  %v5740_v10 = vmax.f32 %v5574_v34, 0.0  ;;  %v5691_v13 = vmax.f32 %v5556_v8, 0.0 }
 0x27a   :  { %v5577_v11 = vpop.f32.mrf.mxu0 }
 0x27b   :  { %11880 = vmatmul.mubr.msk.bf16.gmra.mxu1 %vm20095_vm15, %v14805_v43  ;;  %v5578_v62 = vadd.f32 %v5577_v11, %v14448_v32  ;;  %v5755_v24 = vmax.f32 %v5576_v31, 0.0  ;;  %v5811_v55 = vpack.c.bf16 %v5691_v13, %v5675_v20 }
 0x27c   :  { %v5581_v23 = vpop.f32.mrf.mxu0  ;;  %6487 = vmatprep.mubr.bf16.mxu1 %v20167_v39 }
 0x27d   :  { %v5582_v53 = vadd.f32 %v5581_v23, %v14421_v37  ;;  %v5756_v29 = vmax.f32 %v5578_v62, 0.0  ;;  %v5843_v42 = vpack.c.bf16 %v5755_v24, %v5739_v44  ;;  %v5812_v23 = vpack.c.bf16 %v5692_v4, %v5676_v19 }
 0x27e   :  { %v5583_v48 = vpop.f32.mrf.mxu0 }
 0x27f   :  { %v5584_v2 = vadd.f32 %v5583_v48, %v14421_v37  ;;  %v5771_v14 = vmax.f32 %v5582_v53, 0.0  ;;  %v5844_v46 = vpack.c.bf16 %v5756_v29, %v5740_v10 }
 0x280   :  { %v5585_v35 = vpop.f32.mrf.mxu0 }
 0x281   :  { %v5586_v26 = vadd.f32 %v5585_v35, %v14445_v6  ;;  %v5772_v58 = vmax.f32 %v5584_v2, 0.0 }
 0x282   :  { %v5587_v17 = vpop.f32.mrf.mxu0 }
 0x283   :  { %v5588_v47 = vadd.f32 %v5587_v17, %v14445_v6  ;;  %v5787_v9 = vmax.f32 %v5586_v26, 0.0  ;;  %v20366_v26 = vld [vmem:[#allocation8_spill] sm:$0xff]  ;;  %v20367_v17 = vld [vmem:[#allocation5_spill] sm:$0xff] }
 0x284   :  { %v14971_v29 = vpop.f32.mrf.mxu0 }
 0x285   :  { %v5788_v3 = vmax.f32 %v5588_v47, 0.0  ;;  %v5859_v18 = vpack.c.bf16 %v5787_v9, %v5771_v14  ;;  %v20368_v47 = vld [vmem:[#allocation6_spill] sm:$0xff]  ;;  %v20369_v9 = vld [vmem:[#allocation9_spill] sm:$0xff] }
 0x286   :  { %v14974_v14 = vpop.f32.mrf.mxu0 }
 0x287   :  { %v5860_v38 = vpack.c.bf16 %v5788_v3, %v5772_v58  ;;  %v20371_v3 = vld [vmem:[#allocation17_spill] sm:$0xff] }
 0x288   :  { %v14976_v10 = vpop.f32.mrf.mxu0 }
 0x289   :  { %6390 = vmatprep.subr.bf16.mxu0 %v5860_v38 }
 0x28a   :  { %6391 = vmatpush1.bf16.msra.mxu0 %v5859_v18 }
 0x28b   :  { %6392 = vmatprep.subr.bf16.mxu0 %v5844_v46 }
 0x28e   :  { %6393 = vmatpush1.bf16.msra.mxu0 %v5843_v42 }
 0x28f   :  { %6394 = vmatprep.subr.bf16.mxu0 %v5828_v36 }
 0x291   :  { %v14951_v11 = vpop.f32.mrf.mxu1 }
 0x292   :  { %6395 = vmatpush1.bf16.msra.mxu0 %v5827_v27 }
 0x293   :  { %v14953_v48 = vpop.f32.mrf.mxu1  ;;  %6396 = vmatprep.subr.bf16.mxu0 %v5812_v23 }
 0x295   :  { %v14955_v35 = vpop.f32.mrf.mxu1 }
 0x296   :  { %6397 = vmatpush1.bf16.msra.mxu0 %v5811_v55 }
 0x297   :  { %v5630_v62 = vpop.f32.mrf.mxu1  ;;  %6778 = vmatprep.subr.bf16.mxu0 %v20365_v16 }
 0x299   :  { %v14958_v2 = vpop.f32.mrf.mxu1  ;;  %11881 = vmatmul.mubr.msk.bf16.vlgmr.msra.gmra.mxu0 %vm20095_vm15, %v14655_v41  ;;  %v20370_v41 = vld [vmem:[#allocation10_spill] sm:$0xff] }
 0x29a   :  { %6424 = vmatprep.mubr.bf16.mxu0 %v20167_v39  ;;  %6779 = vmatpush1.bf16.msra.mxu0 %v20366_v26 }
 0x29b   :  { %v5636_v53 = vpop.f32.mrf.mxu1  ;;  %6780 = vmatprep.subr.bf16.mxu0 %v20367_v17 }
 0x29d   :  { %v5638_v34 = vpop.f32.mrf.mxu1 }
 0x29e   :  { %6781 = vmatpush1.bf16.msra.mxu0 %v20368_v47  ;;  %v5639_v26 = vadd.f32 %v5638_v34, %v14474_v15 }
 0x29f   :  { %v5640_v31 = vpop.f32.mrf.mxu1  ;;  %6782 = vmatprep.subr.bf16.mxu0 %v20369_v9 }
 0x2a0   :  { %v5641_v40 = vadd.f32 %v5640_v31, %v14474_v15  ;;  %v15014_v31 = vld [vmem:[%s19975_s7] sm:$0xff]  }
 0x2a1   :  { %v5644_v63 = vpop.f32.mrf.mxu1  ;;  %11882 = vmatmul.mubr.msk.bf16.gmra.mxu0 %vm20095_vm15, %v14707_v45  ;;  %v14981_v45 = vpop.f32.mrf.mxu0 }
 0x2a2   :  { %6434 = vmatprep.mubr.bf16.mxu0 %v20167_v39  ;;  %6783 = vmatpush1.bf16.msra.mxu0 %v20370_v41 }
 0x2a3   :  { %v5646_v58 = vpop.f32.mrf.mxu1  ;;  %6924 = vmatprep.subr.bf16.mxu0 %v20371_v3  ;;  %v14983_v24 = vpop.f32.mrf.mxu0  ;;  %v5627_v3 = vadd.f32 %v14953_v48, %v14493_v52 }
 0x2a4   :  { %v5647_v25 = vadd.f32 %v5646_v58, %v14426_v51  ;;  %v5635_v58 = vadd.f32 %v14958_v2, %v14463_v21 }
 0x2a5   :  { %v5648_v28 = vpop.f32.mrf.mxu1  ;;  %v14988_v49 = vpop.f32.mrf.mxu0 }
 0x2a6   :  { %v5649_v42 = vadd.f32 %v5648_v28, %v14448_v32  ;;  %v5742_v20 = vmax.f32 %v5647_v25, 0.0 }
 0x2a7   :  { %v5650_v7 = vpop.f32.mrf.mxu1  ;;  %v14993_v12 = vpop.f32.mrf.mxu0 }
 0x2a8   :  { %v5651_v30 = vadd.f32 %v5650_v7, %v14448_v32  ;;  %v5637_v32 = vadd.f32 %v5636_v53, %v14463_v21  ;;  %v5757_v17 = vmax.f32 %v5649_v42, 0.0 }
 0x2a9   :  { %v5654_v38 = vpop.f32.mrf.mxu1  ;;  %11883 = vmatmul.mubr.msk.bf16.gmra.mxu0 %vm20095_vm15, %v14765_v22  ;;  %v15002_v13 = vpop.f32.mrf.mxu0 }
 0x2aa   :  { %6444 = vmatprep.mubr.bf16.mxu0 %v20167_v39  ;;  %v5655_v44 = vadd.f32 %v5654_v38, %v14421_v37  ;;  %v5758_v56 = vmax.f32 %v5651_v30, 0.0  ;;  %v5710_v28 = vmax.f32 %v5637_v32, 0.0  ;;  %v5725_v38 = vmax.f32 %v5639_v26, 0.0  ;;  %v20377_v30 = vld [vmem:[#allocation19_spill] sm:$0xff] }
 0x2ab   :  { %v5656_v59 = vpop.f32.mrf.mxu1  ;;  %v15008_v16 = vpop.f32.mrf.mxu0 }
 0x2ac   :  { %v5657_v0 = vadd.f32 %v5656_v59, %v14421_v37  ;;  %v5773_v27 = vmax.f32 %v5655_v44, 0.0  ;;  %v5846_v53 = vpack.c.bf16 %v5758_v56, %v5742_v20  ;;  %v20381_v56 = vld [vmem:[#allocation21_spill] sm:$0xff] }
 0x2ad   :  { %v5658_v18 = vpop.f32.mrf.mxu1  ;;  %v15019_v41 = vpop.f32.mrf.mxu0  ;;  %v20384_v20 = vld [vmem:[#allocation29_spill] sm:$0xff] }
 0x2ae   :  { %v5659_v46 = vadd.f32 %v5658_v18, %v14445_v6  ;;  %v5774_v19 = vmax.f32 %v5657_v0, 0.0  ;;  %v5625_v0 = vadd.f32 %v14951_v11, %v14493_v52 }
 0x2af   :  { %v5660_v33 = vpop.f32.mrf.mxu1  ;;  %v15027_v7 = vpop.f32.mrf.mxu0 }
 0x2b0   :  { %v5661_v8 = vadd.f32 %v5660_v33, %v14445_v6  ;;  %v5789_v4 = vmax.f32 %v5659_v46, 0.0  ;;  %v5645_v6 = vadd.f32 %v5644_v63, %v14426_v51  ;;  %v5631_v51 = vadd.f32 %v5630_v62, %v14498_v5 }
 0x2b1   :  { %11884 = vmatmul.mubr.msk.bf16.gmra.mxu0 %vm20095_vm15, %v14805_v43  ;;  %v14998_v36 = vpop.f32.mrf.mxu1  ;;  %v5726_v63 = vmax.f32 %v5641_v40, 0.0  ;;  %v5629_v62 = vadd.f32 %v14955_v35, %v14498_v5  ;;  %v15037_v48 = vpop.f32.mrf.mxu0  ;;  %v5709_v46 = vmax.f32 %v5635_v58, 0.0  ;;  %v20378_v5 = vld [vmem:[#allocation18_spill] sm:$0xff]  ;;  %v5678_v35 = vmax.f32 %v5627_v3, 0.0  ;;  %v20388_v58 = vld [vmem:[#allocation12_spill] sm:$0xff] }
 0x2b2   :  { %20372 = vst [vmem:[#allocation53_spill] sm:$0xff] %v14998_v36  ;;  %v5790_v37 = vmax.f32 %v5661_v8, 0.0  ;;  %6800 = vmatprep.mubr.bf16.mxu0 %v20167_v39  ;;  %v5861_v47 = vpack.c.bf16 %v5789_v4, %v5773_v27  ;;  %v5741_v15 = vmax.f32 %v5645_v6, 0.0  ;;  %v5694_v2 = vmax.f32 %v5631_v51, 0.0  ;;  %v15047_v8 = vld [vmem:[%s19975_s7 + $0x8] sm:$0xff]   ;;  %v20383_v27 = vld [vmem:[#allocation20_spill] sm:$0xff] }
 0x2b3   :  { %v15005_v23 = vpop.f32.mrf.mxu1  ;;  %v5830_v18 = vpack.c.bf16 %v5726_v63, %v5710_v28  ;;  %v15042_v44 = vpop.f32.mrf.mxu0  ;;  %v5693_v33 = vmax.f32 %v5629_v62, 0.0  ;;  %v5829_v25 = vpack.c.bf16 %v5725_v38, %v5709_v46  ;;  %v20380_v40 = vld [vmem:[#allocation22_spill] sm:$0xff]  ;;  %v5677_v11 = vmax.f32 %v5625_v0, 0.0  ;;  %v12285_v51 = vld [vmem:[%s19972_s4] sm:$0xff]   ;;  %v20391_v38 = vld [vmem:[#allocation15_spill] sm:$0xff] }
 0x2b4   :  { %20373 = vst [vmem:[#allocation41_spill] sm:$0xff] %v15005_v23  ;;  %v5862_v55 = vpack.c.bf16 %v5790_v37, %v5774_v19  ;;  %v5845_v59 = vpack.c.bf16 %v5757_v17, %v5741_v15  ;;  %v5814_v4 = vpack.c.bf16 %v5694_v2, %v5678_v35  ;;  %v15072_v17 = vld [vmem:[%s19975_s7 + $0x10] sm:$0xff]   ;;  %v20390_v62 = vld [vmem:[#allocation14_spill] sm:$0xff]  ;;  %v20392_v0 = vld [vmem:[#allocation16_spill] sm:$0xff] }
 0x2b5   :  { %v15016_v9 = vpop.f32.mrf.mxu1  ;;  %v15052_v52 = vpop.f32.mrf.mxu0  ;;  %v5813_v37 = vpack.c.bf16 %v5693_v33, %v5677_v11  ;;  %v20393_v46 = vld [vmem:[#allocation24_spill] sm:$0xff]  ;;  %v20394_v11 = vld [vmem:[#allocation31_spill] sm:$0xff] }
 0x2b6   :  { %20374 = vst [vmem:[#allocation50_spill] sm:$0xff] %v15016_v9  ;;  %6463 = vmatprep.subr.bf16.mxu1 %v5862_v55  ;;  %v20385_v55 = vld [vmem:[#allocation11_spill] sm:$0xff]  ;;  %v20411_v36 = vld [vmem:[#allocation44_spill] sm:$0xff] }
 0x2b7   :  { %6464 = vmatpush1.bf16.msra.mxu1 %v5861_v47  ;;  %v15023_v34 = vpop.f32.mrf.mxu1  ;;  %v15055_v19 = vpop.f32.mrf.mxu0  ;;  %v20412_v9 = vld [vmem:[#allocation43_spill] sm:$0xff] }
 0x2b8   :  { %20375 = vst [vmem:[#allocation51_spill] sm:$0xff] %v15023_v34  ;;  %6465 = vmatprep.subr.bf16.mxu1 %v5846_v53  ;;  %v20387_v53 = vld [vmem:[#allocation13_spill] sm:$0xff] }
 0x2b9   :  { %11893 = vmatmul.mubr.msk.bf16.vlgmr.msra.gmra.mxu0 %vm5016_vm4, %v15014_v31  ;;  %v15033_v21 = vpop.f32.mrf.mxu1  ;;  %v15063_v32 = vpop.f32.mrf.mxu0 }
 0x2ba   :  { %20376 = vst [vmem:[#allocation48_spill] sm:$0xff] %v15033_v21  ;;  %6810 = vmatprep.mubr.bf16.mxu0 %v20167_v39  ;;  %6925 = vmatpush1.bf16.msra.mxu0 %v20377_v30  ;;  %v12286_v30 = vld [vmem:[%s19972_s4 + $0x8] sm:$0xff]   ;;  %s20645_s4 = sld [smem:[#allocation104_spill]] }
 0x2bb   :  { %6466 = vmatpush1.bf16.msra.mxu1 %v5845_v59  ;;  %6926 = vmatprep.subr.bf16.mxu0 %v20378_v5  ;;  %v15049_v42 = vpop.f32.mrf.mxu1  ;;  %v15067_v26 = vpop.f32.mrf.mxu0  ;;  %v15099_v59 = vld [vmem:[%s19975_s7 + $0x18] sm:$0xff]  }
 0x2bc   :  { %6467 = vmatprep.subr.bf16.mxu1 %v5830_v18  ;;  %20379 = vst [vmem:[#allocation49_spill] sm:$0xff] %v15049_v42 }
 0x2bd   :  { %v15059_v6 = vpop.f32.mrf.mxu1  ;;  %v15080_v63 = vpop.f32.mrf.mxu0 }
 0x2be   :  { %6927 = vmatpush1.bf16.msra.mxu0 %v20380_v40  ;;  %20382 = vst [vmem:[#allocation52_spill] sm:$0xff] %v15059_v6 }
 0x2bf   :  { %6468 = vmatpush1.bf16.msra.mxu1 %v5829_v25  ;;  %6928 = vmatprep.subr.bf16.mxu0 %v20381_v56  ;;  %v15074_v47 = vpop.f32.mrf.mxu1  ;;  %v15085_v15 = vpop.f32.mrf.mxu0  ;;  %v20395_v56 = vld [vmem:[#allocation30_spill] sm:$0xff] }
 0x2c0   :  { %6469 = vmatprep.subr.bf16.mxu1 %v5814_v4  ;;  %20386 = vst [vmem:[#allocation54_spill] sm:$0xff] %v15074_v47 }
 0x2c1   :  { %11894 = vmatmul.mubr.msk.bf16.gmra.mxu0 %vm5016_vm4, %v15047_v8  ;;  %v15089_v3 = vpop.f32.mrf.mxu1  ;;  %v15092_v28 = vpop.f32.mrf.mxu0 }
 0x2c2   :  { %6820 = vmatprep.mubr.bf16.mxu0 %v20167_v39  ;;  %6929 = vmatpush1.bf16.msra.mxu0 %v20383_v27  ;;  %20389 = vst [vmem:[#allocation7_spill] sm:$0xff] %v15089_v3 }
 0x2c3   :  { %6470 = vmatpush1.bf16.msra.mxu1 %v5813_v37  ;;  %7070 = vmatprep.subr.bf16.mxu0 %v20384_v20  ;;  %v15101_v2 = vpop.f32.mrf.mxu1  ;;  %v15103_v18 = vpop.f32.mrf.mxu0  ;;  %v20397_v20 = vld [vmem:[#allocation33_spill] sm:$0xff] }
 0x2c4   :  { %6851 = vmatprep.subr.bf16.mxu1 %v20385_v55 }
 0x2c5   :  { %v15114_v5 = vpop.f32.mrf.mxu1  ;;  %v15116_v35 = vpop.f32.mrf.mxu0 }
 0x2c6   :  { %11885 = vmatmul.mubr.msk.bf16.vlgmr.msra.gmra.mxu1 %vm20095_vm15, %v12285_v51 }
 0x2c7   :  { %6497 = vmatprep.mubr.bf16.mxu1 %v20167_v39  ;;  %6852 = vmatpush1.bf16.msra.mxu1 %v20387_v53  ;;  %v15119_v33 = vpop.f32.mrf.mxu1  ;;  %v15121_v25 = vpop.f32.mrf.mxu0  ;;  %v20398_v53 = vld [vmem:[#allocation34_spill] sm:$0xff] }
 0x2c8   :  { %6853 = vmatprep.subr.bf16.mxu1 %v20388_v58  ;;  %v20399_v58 = vld [vmem:[#allocation42_spill] sm:$0xff] }
 0x2c9   :  { %11895 = vmatmul.mubr.msk.bf16.gmra.mxu0 %vm5016_vm4, %v15072_v17  ;;  %v15128_v4 = vpop.f32.mrf.mxu1  ;;  %v15130_v40 = vpop.f32.mrf.mxu0 }
 0x2ca   :  { %6830 = vmatprep.mubr.bf16.mxu0 %v20167_v39 }
 0x2cb   :  { %6854 = vmatpush1.bf16.msra.mxu1 %v20390_v62  ;;  %v15135_v37 = vpop.f32.mrf.mxu1  ;;  %v15137_v27 = vpop.f32.mrf.mxu0 }
 0x2cc   :  { %6855 = vmatprep.subr.bf16.mxu1 %v20391_v38  ;;  %v20400_v38 = vld [vmem:[#allocation25_spill] sm:$0xff] }
 0x2cd   :  { %v15146_v55 = vpop.f32.mrf.mxu1  ;;  %v15148_v51 = vpop.f32.mrf.mxu0 }
 0x2ce   :  { %11886 = vmatmul.mubr.msk.bf16.gmra.mxu1 %vm20095_vm15, %v12286_v30  ;;  %v20401_v30 = vld [vmem:[#allocation23_spill] sm:$0xff] }
 0x2cf   :  { %6507 = vmatprep.mubr.bf16.mxu1 %v20167_v39  ;;  %6856 = vmatpush1.bf16.msra.mxu1 %v20392_v0  ;;  %v15155_v62 = vpop.f32.mrf.mxu0 }
 0x2d0   :  { %6997 = vmatprep.subr.bf16.mxu1 %v20393_v46 }
 0x2d1   :  { %11896 = vmatmul.mubr.msk.bf16.gmra.mxu0 %vm5016_vm4, %v15099_v59  ;;  %v15166_v46 = vpop.f32.mrf.mxu0 }
 0x2d2   :  { %6946 = vmatprep.mubr.bf16.mxu0 %v20167_v39 }
 0x2d6   :  { %11887 = vmatmul.mubr.msk.bf16.gmra.mxu1 %vm20095_vm15, %v14765_v22  ;;  %v20396_v22 = vld [vmem:[#allocation32_spill] sm:$0xff] }
 0x2d7   :  { %6517 = vmatprep.mubr.bf16.mxu1 %v20167_v39 }
 0x2d9   :  { %11901 = vmatmul.mubr.msk.bf16.vlgmr.msra.gmra.mxu0 %vm5016_vm4, %v15014_v31 }
 0x2da   :  { %6956 = vmatprep.mubr.bf16.mxu0 %v20167_v39  ;;  %7071 = vmatpush1.bf16.msra.mxu0 %v20394_v11  ;;  %v20403_v11 = vld [vmem:[#allocation26_spill] sm:$0xff] }
 0x2db   :  { %7072 = vmatprep.subr.bf16.mxu0 %v20395_v56  ;;  %v20404_v56 = vld [vmem:[#allocation27_spill] sm:$0xff] }
 0x2de   :  { %11888 = vmatmul.mubr.msk.bf16.gmra.mxu1 %vm20095_vm15, %v14805_v43  ;;  %7073 = vmatpush1.bf16.msra.mxu0 %v20396_v22  ;;  %v15153_v43 = vpop.f32.mrf.mxu1 }
 0x2df   :  { %6873 = vmatprep.mubr.bf16.mxu1 %v20167_v39  ;;  %7074 = vmatprep.subr.bf16.mxu0 %v20397_v20  ;;  %v15173_v20 = vpop.f32.mrf.mxu0 }
 0x2e0   :  { %v15164_v0 = vpop.f32.mrf.mxu1 }
 0x2e1   :  { %11902 = vmatmul.mubr.msk.bf16.gmra.mxu0 %vm5016_vm4, %v15047_v8  ;;  %20402 = vst [vmem:[#allocation8_spill] sm:$0xff] %v15164_v0  ;;  %v15191_v0 = vpop.permute.xlu1 %5908 }
 0x2e2   :  { %6966 = vmatprep.mubr.bf16.mxu0 %v20167_v39  ;;  %7075 = vmatpush1.bf16.msra.mxu0 %v20398_v53  ;;  %v15171_v22 = vpop.f32.mrf.mxu1  ;;  %v20406_v53 = vld [vmem:[#allocation28_spill] sm:$0xff] }
 0x2e3   :  { %7216 = vmatprep.subr.bf16.mxu0 %v20399_v58  ;;  %20405 = vst [vmem:[#allocation5_spill] sm:$0xff] %v15171_v22  ;;  %v20407_v58 = vld [vmem:[#allocation36_spill] sm:$0xff] }
 0x2e6   :  { %11897 = vmatmul.mubr.msk.bf16.vlgmr.msra.gmra.mxu1 %vm5016_vm4, %v15014_v31 }
 0x2e7   :  { %6883 = vmatprep.mubr.bf16.mxu1 %v20167_v39  ;;  %6998 = vmatpush1.bf16.msra.mxu1 %v20400_v38  ;;  %v15182_v38 = vpop.f32.mrf.mxu1 }
 0x2e8   :  { %6999 = vmatprep.subr.bf16.mxu1 %v20401_v30  ;;  %20408 = vst [vmem:[#allocation6_spill] sm:$0xff] %v15182_v38  ;;  %v15184_v30 = vpop.f32.mrf.mxu0 }
 0x2e9   :  { %11903 = vmatmul.mubr.msk.bf16.gmra.mxu0 %vm5016_vm4, %v15072_v17 }
 0x2ea   :  { %6976 = vmatprep.mubr.bf16.mxu0 %v20167_v39 }
 0x2eb   :  { %7000 = vmatpush1.bf16.msra.mxu1 %v20403_v11  ;;  %v15187_v11 = vpop.f32.mrf.mxu1 }
 0x2ec   :  { %7001 = vmatprep.subr.bf16.mxu1 %v20404_v56  ;;  %20409 = vst [vmem:[#allocation9_spill] sm:$0xff] %v15187_v11  ;;  %v15189_v56 = vpop.f32.mrf.mxu0 }
 0x2ed   :  { %v15204_v22 = vpop.f32.mrf.mxu1 }
 0x2ee   :  { %11898 = vmatmul.mubr.msk.bf16.gmra.mxu1 %vm5016_vm4, %v15047_v8  ;;  %20410 = vst [vmem:[#allocation10_spill] sm:$0xff] %v15204_v22  ;;  %v15206_v11 = vpop.f32.mrf.mxu0  ;;  %v20416_v22 = vld [vmem:[#allocation46_spill] sm:$0xff] }
 0x2ef   :  { %6893 = vmatprep.mubr.bf16.mxu1 %v20167_v39  ;;  %7002 = vmatpush1.bf16.msra.mxu1 %v20406_v53  ;;  %v6015_v53 = vadd.f32 %v15063_v32, %v15191_v0  ;;  %v15211_v21 = vpop.f32.mrf.mxu1 }
 0x2f0   :  { %7143 = vmatprep.subr.bf16.mxu1 %v20407_v58  ;;  %v15198_v58 = vpop.permute.xlu0 %5903  ;;  %20413 = vst [vmem:[#allocation17_spill] sm:$0xff] %v15211_v21  ;;  %v20427_v21 = vld [vmem:[#allocation39_spill] sm:$0xff] }
 0x2f1   :  { %11904 = vmatmul.mubr.msk.bf16.gmra.mxu0 %vm5016_vm4, %v15099_v59  ;;  %v6011_v38 = vadd.f32 %v15052_v52, %v15198_v58  ;;  %v6641_v23 = vmax.f32 %v6015_v53, 0.0  ;;  %v20415_v52 = vld [vmem:[#allocation45_spill] sm:$0xff] }
 0x2f2   :  { %7092 = vmatprep.mubr.bf16.mxu0 %v20167_v39  ;;  %v15213_v34 = vpop.f32.mrf.mxu0 }
 0x2f3   :  { %v6625_v32 = vmax.f32 %v6011_v38, 0.0  ;;  %20414 = vst [vmem:[#allocation19_spill] sm:$0xff] %v15213_v34  ;;  %v20419_v38 = vld [vmem:[#allocation47_spill] sm:$0xff] }
 0x2f5   :  { %v6713_v6 = vpack.c.bf16 %v6641_v23, %v6625_v32  ;;  %v20422_v23 = vld [vmem:[#allocation37_spill] sm:$0xff] }
 0x2f6   :  { %11899 = vmatmul.mubr.msk.bf16.gmra.mxu1 %vm5016_vm4, %v15072_v17 }
 0x2f7   :  { %6903 = vmatprep.mubr.bf16.mxu1 %v20167_v39 }
 0x2f9   :  { %11909 = vmatmul.mubr.msk.bf16.vlgmr.msra.gmra.mxu0 %vm5016_vm4, %v15014_v31 }
 0x2fa   :  { %7102 = vmatprep.mubr.bf16.mxu0 %v20167_v39  ;;  %7217 = vmatpush1.bf16.msra.mxu0 %v20411_v36  ;;  %v15222_v36 = vpop.f32.mrf.mxu1 }
 0x2fb   :  { %7218 = vmatprep.subr.bf16.mxu0 %v20412_v9  ;;  %20417 = vst [vmem:[#allocation18_spill] sm:$0xff] %v15222_v36  ;;  %v15224_v9 = vpop.f32.mrf.mxu0  ;;  %v15245_v36 = vpop.permute.xlu1 %5898 }
 0x2fc   :  { %20418 = vst [vmem:[#allocation22_spill] sm:$0xff] %v15224_v9  ;;  %v15228_v53 = vpop.f32.mrf.mxu1 }
 0x2fd   :  { %20420 = vst [vmem:[#allocation21_spill] sm:$0xff] %v15228_v53 }
 0x2fe   :  { %11900 = vmatmul.mubr.msk.bf16.gmra.mxu1 %vm5016_vm4, %v15099_v59  ;;  %7219 = vmatpush1.bf16.msra.mxu0 %v20415_v52  ;;  %v15230_v52 = vpop.f32.mrf.mxu0  ;;  %v15239_v32 = vpop.f32.mrf.mxu1 }
 0x2ff   :  { %7019 = vmatprep.mubr.bf16.mxu1 %v20167_v39  ;;  %7220 = vmatprep.subr.bf16.mxu0 %v20416_v22  ;;  %20421 = vst [vmem:[#allocation20_spill] sm:$0xff] %v15230_v52  ;;  %v20423_v22 = vld [vmem:[#allocation35_spill] sm:$0xff]  ;;  %20424 = vst [vmem:[#allocation29_spill] sm:$0xff] %v15239_v32  ;;  %v20430_v32 = vld [vmem:[#allocation40_spill] sm:$0xff]  ;;  %v15269_v52 = vpop.permute.xlu1 %5888 }
 0x300   :  { %v15248_v53 = vpop.f32.mrf.mxu1 }
 0x301   :  { %11910 = vmatmul.mubr.msk.bf16.gmra.mxu0 %vm5016_vm4, %v15047_v8  ;;  %20428 = vst [vmem:[#allocation13_spill] sm:$0xff] %v15248_v53 }
 0x302   :  { %7112 = vmatprep.mubr.bf16.mxu0 %v20167_v39  ;;  %7221 = vmatpush1.bf16.msra.mxu0 %v20419_v38  ;;  %v15241_v38 = vpop.f32.mrf.mxu0  ;;  %v15265_v53 = vpop.f32.mrf.mxu1 }
 0x303   :  { %7392 = vmatprep.subr.bf16.mxu0 %v6713_v6  ;;  %20425 = vst [vmem:[#allocation11_spill] sm:$0xff] %v15241_v38  ;;  %v20426_v6 = vld [vmem:[#allocation38_spill] sm:$0xff]  ;;  %20431 = vst [vmem:[#allocation14_spill] sm:$0xff] %v15265_v53  ;;  %v5995_v53 = vadd.f32 %v15002_v13, %v15269_v52  ;;  %v15293_v42 = vpop.permute.xlu1 %5878  ;;  %v5993_v13 = vadd.f32 %v14993_v12, %v15269_v52 }
 0x304   :  { %v15282_v38 = vpop.f32.mrf.mxu1 }
 0x305   :  { %20433 = vst [vmem:[#allocation16_spill] sm:$0xff] %v15282_v38  ;;  %v6577_v3 = vmax.f32 %v5995_v53, 0.0  ;;  %v5983_v53 = vadd.f32 %v14976_v10, %v15293_v42  ;;  %v6157_v10 = vadd.f32 %v15184_v30, %v15198_v58 }
 0x306   :  { %11905 = vmatmul.mubr.msk.bf16.vlgmr.msra.gmra.mxu1 %vm5016_vm4, %v15014_v31 }
 0x307   :  { %7029 = vmatprep.mubr.bf16.mxu1 %v20167_v39  ;;  %7144 = vmatpush1.bf16.msra.mxu1 %v20422_v23  ;;  %v15250_v23 = vpop.f32.mrf.mxu0  ;;  %v6629_v30 = vmax.f32 %v6157_v10, 0.0 }
 0x308   :  { %7145 = vmatprep.subr.bf16.mxu1 %v20423_v22  ;;  %20429 = vst [vmem:[#allocation12_spill] sm:$0xff] %v15250_v23  ;;  %v15252_v22 = vpop.permute.xlu0 %5893 }
 0x309   :  { %11911 = vmatmul.mubr.msk.bf16.gmra.mxu0 %vm5016_vm4, %v15072_v17  ;;  %v15267_v34 = vpop.f32.mrf.mxu0 }
 0x30a   :  { %7122 = vmatprep.mubr.bf16.mxu0 %v20167_v39  ;;  %20432 = vst [vmem:[#allocation15_spill] sm:$0xff] %v15267_v34 }
 0x30b   :  { %7146 = vmatpush1.bf16.msra.mxu1 %v20426_v6  ;;  %v6013_v6 = vadd.f32 %v15055_v19, %v15191_v0  ;;  %v15284_v34 = vpop.f32.mrf.mxu0 }
 0x30c   :  { %7147 = vmatprep.subr.bf16.mxu1 %v20427_v21  ;;  %v6005_v21 = vadd.f32 %v15037_v48, %v15245_v36  ;;  %v15276_v19 = vpop.permute.xlu0 %5883  ;;  %v6003_v48 = vadd.f32 %v15027_v7, %v15245_v36  ;;  %20434 = vst [vmem:[#allocation24_spill] sm:$0xff] %v15284_v34  ;;  %v5985_v34 = vadd.f32 %v14981_v45, %v15293_v42 }
 0x30d   :  { %v6640_v9 = vmax.f32 %v6013_v6, 0.0  ;;  %v5991_v7 = vadd.f32 %v14988_v49, %v15276_v19  ;;  %v15303_v47 = vpop.f32.mrf.mxu0 }
 0x30e   :  { %11906 = vmatmul.mubr.msk.bf16.gmra.mxu1 %vm5016_vm4, %v15047_v8  ;;  %v6609_v23 = vmax.f32 %v6005_v21, 0.0  ;;  %v6608_v21 = vmax.f32 %v6003_v48, 0.0 }
 0x30f   :  { %7039 = vmatprep.mubr.bf16.mxu1 %v20167_v39  ;;  %7148 = vmatpush1.bf16.msra.mxu1 %v20430_v32  ;;  %v6009_v32 = vadd.f32 %v15042_v44, %v15198_v58 }
 0x310   :  { %7289 = vmatprep.subr.bf16.mxu1 %v14667_v50  ;;  %v6001_v50 = vadd.f32 %v15019_v41, %v15252_v22  ;;  %v5999_v41 = vadd.f32 %v15008_v16, %v15252_v22  ;;  %v15305_v49 = vpop.permute.xlu0 %5873 }
 0x311   :  { %11912 = vmatmul.mubr.msk.bf16.gmra.mxu0 %vm5016_vm4, %v15099_v59  ;;  %v6624_v44 = vmax.f32 %v6009_v32, 0.0  ;;  %v15301_v32 = vpop.f32.mrf.mxu1  ;;  %v5981_v45 = vadd.f32 %v14974_v14, %v15305_v49  ;;  %v5979_v14 = vadd.f32 %v14971_v29, %v15305_v49 }
 0x312   :  { %7238 = vmatprep.mubr.bf16.mxu0 %v20167_v39  ;;  %v6593_v6 = vmax.f32 %v6001_v50, 0.0  ;;  %20435 = vst [vmem:[#allocation31_spill] sm:$0xff] %v15301_v32  ;;  %v5989_v50 = vadd.f32 %v14983_v24, %v15276_v19  ;;  %v6592_v12 = vmax.f32 %v5999_v41, 0.0 }
 0x313   :  { %v6712_v38 = vpack.c.bf16 %v6640_v9, %v6624_v44  ;;  %v6561_v9 = vmax.f32 %v5991_v7, 0.0  ;;  %v6161_v44 = vadd.f32 %v15206_v11, %v15191_v0  ;;  %v15316_v24 = vpop.f32.mrf.mxu1  ;;  %v6529_v11 = vmax.f32 %v5981_v45, 0.0 }
 0x314   :  { %v6697_v16 = vpack.c.bf16 %v6609_v23, %v6593_v6  ;;  %v6576_v23 = vmax.f32 %v5993_v13, 0.0  ;;  %v6696_v48 = vpack.c.bf16 %v6608_v21, %v6592_v12  ;;  %v6545_v6 = vmax.f32 %v5985_v34, 0.0 }
 0x315   :  { %v6681_v32 = vpack.c.bf16 %v6577_v3, %v6561_v9  ;;  %v6560_v41 = vmax.f32 %v5989_v50, 0.0  ;;  %v6544_v34 = vmax.f32 %v5983_v53, 0.0  ;;  %v6645_v7 = vmax.f32 %v6161_v44, 0.0  ;;  %v15329_v21 = vpop.f32.mrf.mxu1 }
 0x316   :  { %11907 = vmatmul.mubr.msk.bf16.gmra.mxu1 %vm5016_vm4, %v15072_v17  ;;  %v6665_v13 = vpack.c.bf16 %v6545_v6, %v6529_v11  ;;  %v6528_v29 = vmax.f32 %v5979_v14, 0.0  ;;  %v6084_v53 = vadd.f32 %v15135_v37, %v15198_v58  ;;  %v6159_v6 = vadd.f32 %v15189_v56, %v15191_v0 }
 0x317   :  { %7049 = vmatprep.mubr.bf16.mxu1 %v20167_v39  ;;  %v6680_v3 = vpack.c.bf16 %v6576_v23, %v6560_v41  ;;  %v6717_v12 = vpack.c.bf16 %v6645_v7, %v6629_v30  ;;  %v15336_v45 = vpop.f32.mrf.mxu1  ;;  %v6155_v41 = vadd.f32 %v15173_v20, %v15198_v58  ;;  %v6149_v56 = vadd.f32 %v15155_v62, %v15245_v36 }
 0x318   :  { %v6664_v50 = vpack.c.bf16 %v6544_v34, %v6528_v29  ;;  %v6627_v44 = vmax.f32 %v6084_v53, 0.0  ;;  %v6644_v10 = vmax.f32 %v6159_v6, 0.0  ;;  %v15384_v34 = vld [vmem:[%s19974_s6] sm:$0xff]  }
 0x319   :  { %11917 = vmatmul.mubr.msk.bf16.vlgmr.msra.gmra.mxu0 %vm5016_vm4, %v15014_v31  ;;  %v6628_v62 = vmax.f32 %v6155_v41, 0.0  ;;  %v6612_v29 = vmax.f32 %v6149_v56, 0.0  ;;  %v6086_v41 = vadd.f32 %v15146_v55, %v15191_v0 }
 0x31a   :  { %7393 = vmatpush1.bf16.msra.mxu0 %v6712_v38  ;;  %7248 = vmatprep.mubr.bf16.mxu0 %v20167_v39  ;;  %v15318_v38 = vpop.f32.mrf.mxu0 }
 0x31b   :  { %7394 = vmatprep.subr.bf16.mxu0 %v6697_v16  ;;  %v6716_v30 = vpack.c.bf16 %v6644_v10, %v6628_v62  ;;  %v6078_v10 = vadd.f32 %v15119_v33, %v15245_v36  ;;  %v6074_v33 = vadd.f32 %v15101_v2, %v15252_v22 }
 0x31c   :  { %v15331_v16 = vpop.f32.mrf.mxu0 }
 0x31e   :  { %11908 = vmatmul.mubr.msk.bf16.gmra.mxu1 %vm5016_vm4, %v15099_v59  ;;  %7395 = vmatpush1.bf16.msra.mxu0 %v6696_v48  ;;  %v15338_v9 = vpop.f32.mrf.mxu0 }
 0x31f   :  { %7165 = vmatprep.mubr.bf16.mxu1 %v20167_v39  ;;  %7396 = vmatprep.subr.bf16.mxu0 %v6681_v32  ;;  %v6088_v32 = vadd.f32 %v15153_v43, %v15191_v0 }
 0x320   :  { %v15351_v48 = vpop.f32.mrf.mxu0 }
 0x321   :  { %11918 = vmatmul.mubr.msk.bf16.gmra.mxu0 %vm5016_vm4, %v15047_v8  ;;  %v6643_v23 = vmax.f32 %v6088_v32, 0.0 }
 0x322   :  { %7397 = vmatpush1.bf16.msra.mxu0 %v6680_v3  ;;  %7258 = vmatprep.mubr.bf16.mxu0 %v20167_v39 }
 0x323   :  { %7398 = vmatprep.subr.bf16.mxu0 %v6665_v13  ;;  %v15349_v43 = vpop.f32.mrf.mxu1  ;;  %v6715_v37 = vpack.c.bf16 %v6643_v23, %v6627_v44  ;;  %v6139_v13 = vadd.f32 %v15121_v25, %v15269_v52  ;;  %v6127_v25 = vadd.f32 %v15080_v63, %v15305_v49 }
 0x326   :  { %11913 = vmatmul.mubr.msk.bf16.vlgmr.msra.gmra.mxu1 %vm5016_vm4, %v15014_v31  ;;  %7399 = vmatpush1.bf16.msra.mxu0 %v6664_v50  ;;  %v6131_v50 = vadd.f32 %v15092_v28, %v15293_v42  ;;  %v6129_v28 = vadd.f32 %v15085_v15, %v15293_v42  ;;  %v6125_v15 = vadd.f32 %v15067_v26, %v15305_v49 }
 0x327   :  { %7175 = vmatprep.mubr.bf16.mxu1 %v20167_v39  ;;  %7290 = vmatpush1.bf16.msra.mxu1 %v14674_v60  ;;  %v15356_v60 = vpop.f32.mrf.mxu1  ;;  %v6076_v26 = vadd.f32 %v15114_v5, %v15245_v36 }
 0x328   :  { %7291 = vmatprep.subr.bf16.mxu1 %v14669_v61  ;;  %7538 = vmatprep.subr.bf16.mxu0 %v6717_v12  ;;  %v15358_v61 = vpop.f32.mrf.mxu0  ;;  %v6548_v62 = vmax.f32 %v6129_v28, 0.0 }
 0x329   :  { %11919 = vmatmul.mubr.msk.bf16.gmra.mxu0 %vm5016_vm4, %v15072_v17 }
 0x32a   :  { %7268 = vmatprep.mubr.bf16.mxu0 %v20167_v39  ;;  %v6302_v14 = vpop.f32.mrf.mxu0 }
 0x32b   :  { %7292 = vmatpush1.bf16.msra.mxu1 %v14688_v57  ;;  %v6151_v57 = vadd.f32 %v15166_v46, %v15245_v36  ;;  %v6141_v46 = vadd.f32 %v15130_v40, %v15269_v52  ;;  %v6137_v40 = vadd.f32 %v15116_v35, %v15276_v19  ;;  %v6135_v35 = vadd.f32 %v15103_v18, %v15276_v19 }
 0x32c   :  { %7293 = vmatprep.subr.bf16.mxu1 %v14691_v54  ;;  %v15370_v54 = vpop.f32.mrf.mxu1  ;;  %v15388_v20 = vpop.f32.mrf.mxu0  ;;  %v6549_v18 = vmax.f32 %v6131_v50, 0.0  ;;  %v6303_v55 = vadd.f32 %v6302_v14, %v15198_v58  ;;  %v6611_v50 = vmax.f32 %v6078_v10, 0.0  ;;  %v20440_v10 = vld [vmem:[#allocation51_spill] sm:$0xff] }
 0x32d   :  { %v6613_v11 = vmax.f32 %v6151_v57, 0.0  ;;  %v6581_v32 = vmax.f32 %v6141_v46, 0.0  ;;  %v6565_v44 = vmax.f32 %v6137_v40, 0.0  ;;  %v6564_v46 = vmax.f32 %v6135_v35, 0.0  ;;  %v20438_v35 = vld [vmem:[#allocation49_spill] sm:$0xff] }
 0x32e   :  { %11914 = vmatmul.mubr.msk.bf16.gmra.mxu1 %vm5016_vm4, %v15047_v8  ;;  %v15386_v3 = vpop.f32.mrf.mxu1  ;;  %v6306_v53 = vpop.f32.mrf.mxu0  ;;  %v6633_v2 = vmax.f32 %v6303_v55, 0.0 }
 0x32f   :  { %7185 = vmatprep.mubr.bf16.mxu1 %v20167_v39  ;;  %7294 = vmatpush1.bf16.msra.mxu1 %v14722_v1  ;;  %v6147_v1 = vadd.f32 %v15148_v51, %v15252_v22  ;;  %v6145_v51 = vadd.f32 %v15137_v27, %v15252_v22  ;;  %v6307_v57 = vadd.f32 %v6306_v53, %v15191_v0 }
 0x330   :  { %7465 = vmatprep.subr.bf16.mxu1 %v6715_v37  ;;  %v15403_v12 = vpop.f32.mrf.mxu1  ;;  %v6580_v37 = vmax.f32 %v6139_v13, 0.0  ;;  %v6685_v63 = vpack.c.bf16 %v6581_v32, %v6565_v44  ;;  %v6642_v13 = vmax.f32 %v6086_v41, 0.0  ;;  %v6532_v32 = vmax.f32 %v6125_v15, 0.0 }
 0x331   :  { %11920 = vmatmul.mubr.msk.bf16.gmra.mxu0 %vm5016_vm4, %v15099_v59  ;;  %v6597_v7 = vmax.f32 %v6147_v1, 0.0  ;;  %v6596_v23 = vmax.f32 %v6145_v51, 0.0  ;;  %v15418_v1 = vld [vmem:[%s19974_s6 + $0x8] sm:$0xff]   ;;  %v6533_v51 = vmax.f32 %v6127_v25, 0.0  ;;  %v6595_v25 = vmax.f32 %v6074_v33, 0.0 }
 0x332   :  { %7416 = vmatprep.mubr.bf16.mxu0 %v20167_v39  ;;  %v15420_v56 = vpop.f32.mrf.mxu1  ;;  %v6684_v40 = vpack.c.bf16 %v6580_v37, %v6564_v46  ;;  %v6668_v44 = vpack.c.bf16 %v6548_v62, %v6532_v32  ;;  %v20439_v37 = vld [vmem:[#allocation52_spill] sm:$0xff]  ;;  %v6058_v15 = vadd.f32 %v20440_v10, %v15293_v42  ;;  %v20442_v62 = vld [vmem:[#allocation41_spill] sm:$0xff] }
 0x333   :  { %v6701_v27 = vpack.c.bf16 %v6613_v11, %v6597_v7  ;;  %v6700_v6 = vpack.c.bf16 %v6612_v29, %v6596_v23  ;;  %v6082_v11 = vadd.f32 %v15128_v4, %v15198_v58  ;;  %v6649_v7 = vmax.f32 %v6307_v57, 0.0  ;;  %v20436_v29 = vld [vmem:[#allocation54_spill] sm:$0xff] }
 0x334   :  { %v15438_v14 = vpop.f32.mrf.mxu1  ;;  %v6669_v4 = vpack.c.bf16 %v6549_v18, %v6533_v51  ;;  %v6064_v23 = vadd.f32 %v20438_v35, %v15276_v19  ;;  %v6610_v57 = vmax.f32 %v6076_v26, 0.0  ;;  %v6699_v55 = vpack.c.bf16 %v6611_v50, %v6595_v25 }
 0x335   :  { %v6626_v5 = vmax.f32 %v6082_v11, 0.0  ;;  %v6721_v28 = vpack.c.bf16 %v6649_v7, %v6633_v2  ;;  %v20441_v11 = vld [vmem:[#allocation48_spill] sm:$0xff]  ;;  %v6234_v26 = vadd.f32 %v15336_v45, %v15191_v0  ;;  %v6547_v50 = vmax.f32 %v6058_v15, 0.0  ;;  %v20444_v45 = vld [vmem:[#allocation53_spill] sm:$0xff] }
 0x336   :  { %11915 = vmatmul.mubr.msk.bf16.gmra.mxu1 %vm5016_vm4, %v15072_v17  ;;  %v15449_v18 = vpop.f32.mrf.mxu1  ;;  %v6062_v51 = vadd.f32 %v20441_v11, %v15276_v19  ;;  %v6563_v7 = vmax.f32 %v6064_v23, 0.0  ;;  %v6230_v2 = vadd.f32 %v15316_v24, %v15198_v58 }
 0x337   :  { %7195 = vmatprep.mubr.bf16.mxu1 %v20167_v39  ;;  %v6714_v41 = vpack.c.bf16 %v6642_v13, %v6626_v5  ;;  %v6647_v35 = vmax.f32 %v6234_v26, 0.0 }
 0x339   :  { %11929 = vmatmul.mubr.msk.bf16.vlgmr.msra.gmra.mxu0 %vm20095_vm15, %v15384_v34 }
 0x33a   :  { %7539 = vmatpush1.bf16.msra.mxu0 %v6716_v30  ;;  %7426 = vmatprep.mubr.bf16.mxu0 %v20167_v39  ;;  %v6068_v30 = vadd.f32 %v20436_v29, %v15269_v52 }
 0x33b   :  { %7540 = vmatprep.subr.bf16.mxu0 %v6701_v27  ;;  %v20437_v27 = vld [vmem:[#allocation7_spill] sm:$0xff] }
 0x33c   :  { %v6072_v53 = vadd.f32 %v20437_v27, %v15252_v22  ;;  %v6579_v46 = vmax.f32 %v6068_v30, 0.0  ;;  %v15469_v30 = vpop.f32.mrf.mxu1  ;;  %v6052_v27 = vadd.f32 %v20444_v45, %v15305_v49 }
 0x33e   :  { %11916 = vmatmul.mubr.msk.bf16.gmra.mxu1 %vm5016_vm4, %v15099_v59  ;;  %7541 = vmatpush1.bf16.msra.mxu0 %v6700_v6  ;;  %v6066_v6 = vadd.f32 %v20439_v37, %v15269_v52  ;;  %v6594_v33 = vmax.f32 %v6072_v53, 0.0  ;;  %v6683_v32 = vpack.c.bf16 %v6579_v46, %v6563_v7  ;;  %v6562_v53 = vmax.f32 %v6062_v51, 0.0  ;;  %v20446_v7 = vld [vmem:[#allocation24_spill] sm:$0xff] }
 0x33f   :  { %7311 = vmatprep.mubr.bf16.mxu1 %v20167_v39  ;;  %7542 = vmatprep.subr.bf16.mxu0 %v6685_v63  ;;  %v15454_v63 = vld [vmem:[%s19974_s6 + $0x10] sm:$0xff]   ;;  %v6631_v37 = vmax.f32 %v6230_v2, 0.0  ;;  %v6297_v46 = vadd.f32 %v15351_v48, %v15245_v36  ;;  %v6287_v48 = vadd.f32 %v15303_v47, %v15269_v52  ;;  %v6285_v26 = vadd.f32 %v20446_v7, %v15269_v52 }
 0x340   :  { %v6698_v29 = vpack.c.bf16 %v6610_v57, %v6594_v33 }
 0x341   :  { %11930 = vmatmul.mubr.msk.bf16.gmra.mxu0 %vm20095_vm15, %v15418_v1  ;;  %v6719_v57 = vpack.c.bf16 %v6647_v35, %v6631_v37  ;;  %v6617_v51 = vmax.f32 %v6297_v46, 0.0 }
 0x342   :  { %7543 = vmatpush1.bf16.msra.mxu0 %v6684_v40  ;;  %7436 = vmatprep.mubr.bf16.mxu0 %v20167_v39  ;;  %v6054_v40 = vadd.f32 %v20442_v62, %v15305_v49 }
 0x343   :  { %7544 = vmatprep.subr.bf16.mxu0 %v6669_v4  ;;  %v6578_v4 = vmax.f32 %v6066_v6, 0.0  ;;  %v6530_v6 = vmax.f32 %v6052_v27, 0.0  ;;  %v20449_v27 = vld [vmem:[#allocation22_spill] sm:$0xff] }
 0x344   :  { %v6531_v5 = vmax.f32 %v6054_v40, 0.0 }
 0x345   :  { %v6682_v25 = vpack.c.bf16 %v6578_v4, %v6562_v53  ;;  %v6273_v53 = vadd.f32 %v20449_v27, %v15305_v49 }
 0x346   :  { %11921 = vmatmul.mubr.msk.bf16.vlgmr.msra.gmra.mxu1 %vm5016_vm4, %v15014_v31  ;;  %7545 = vmatpush1.bf16.msra.mxu0 %v6668_v44  ;;  %v20443_v31 = vld [vmem:[#allocation50_spill] sm:$0xff]  ;;  %v15478_v44 = vpop.f32.mrf.mxu1  ;;  %v6667_v24 = vpack.c.bf16 %v6547_v50, %v6531_v5 }
 0x347   :  { %7466 = vmatpush1.bf16.msra.mxu1 %v6714_v41  ;;  %7321 = vmatprep.mubr.bf16.mxu1 %v20167_v39  ;;  %v6056_v13 = vadd.f32 %v20443_v31, %v15293_v42  ;;  %v6305_v41 = vadd.f32 %v15388_v20, %v15191_v0  ;;  %v6295_v20 = vadd.f32 %v15338_v9, %v15245_v36 }
 0x348   :  { %7467 = vmatprep.subr.bf16.mxu1 %v6699_v55  ;;  %7684 = vmatprep.subr.bf16.mxu0 %v6721_v28  ;;  %v15483_v28 = vld [vmem:[%s19974_s6 + $0x18] sm:$0xff]   ;;  %v15490_v15 = vpop.f32.mrf.mxu1  ;;  %v6293_v55 = vadd.f32 %v15331_v16, %v15252_v22  ;;  %v20445_v16 = vld [vmem:[#allocation15_spill] sm:$0xff] }
 0x349   :  { %11931 = vmatmul.mubr.msk.bf16.gmra.mxu0 %vm20095_vm15, %v15454_v63  ;;  %v6546_v23 = vmax.f32 %v6056_v13, 0.0  ;;  %v6648_v11 = vmax.f32 %v6305_v41, 0.0  ;;  %v6283_v40 = vadd.f32 %v20445_v16, %v15276_v19  ;;  %v6616_v47 = vmax.f32 %v6295_v20, 0.0  ;;  %v20447_v13 = vld [vmem:[#allocation11_spill] sm:$0xff]  ;;  %v20454_v16 = vld [vmem:[#allocation13_spill] sm:$0xff] }
 0x34a   :  { %7446 = vmatprep.mubr.bf16.mxu0 %v20167_v39  ;;  %v15505_v33 = vpop.f32.mrf.mxu1  ;;  %v6601_v9 = vmax.f32 %v6293_v55, 0.0  ;;  %v6277_v4 = vadd.f32 %v20447_v13, %v15293_v42  ;;  %v20452_v20 = vld [vmem:[#allocation19_spill] sm:$0xff] }
 0x34b   :  { %7468 = vmatpush1.bf16.msra.mxu1 %v6698_v29  ;;  %v6666_v10 = vpack.c.bf16 %v6546_v23, %v6530_v6  ;;  %v6585_v29 = vmax.f32 %v6287_v48, 0.0  ;;  %v6569_v5 = vmax.f32 %v6283_v40, 0.0  ;;  %v20450_v23 = vld [vmem:[#allocation20_spill] sm:$0xff]  ;;  %v6232_v6 = vadd.f32 %v15329_v21, %v15191_v0 }
 0x34c   :  { %7469 = vmatprep.subr.bf16.mxu1 %v6683_v32  ;;  %v20448_v32 = vld [vmem:[#allocation12_spill] sm:$0xff]  ;;  %v6537_v21 = vmax.f32 %v6273_v53, 0.0  ;;  %v6220_v40 = vadd.f32 %v20454_v16, %v15252_v22 }
 0x34d   :  { %v6281_v2 = vadd.f32 %v20448_v32, %v15276_v19  ;;  %v6689_v46 = vpack.c.bf16 %v6585_v29, %v6569_v5  ;;  %v20456_v29 = vld [vmem:[#allocation21_spill] sm:$0xff] }
 0x34e   :  { %11922 = vmatmul.mubr.msk.bf16.gmra.mxu1 %vm5016_vm4, %v15047_v8  ;;  %v6301_v8 = vadd.f32 %v15358_v61, %v15198_v58  ;;  %v6291_v61 = vadd.f32 %v15318_v38, %v15252_v22  ;;  %v6705_v38 = vpack.c.bf16 %v6617_v51, %v6601_v9  ;;  %v20453_v51 = vld [vmem:[#allocation31_spill] sm:$0xff] }
 0x34f   :  { %7470 = vmatpush1.bf16.msra.mxu1 %v6682_v25  ;;  %7331 = vmatprep.mubr.bf16.mxu1 %v20167_v39  ;;  %v6275_v25 = vadd.f32 %v20450_v23, %v15293_v42  ;;  %v6568_v48 = vmax.f32 %v6281_v2, 0.0  ;;  %v20458_v23 = vld [vmem:[#allocation17_spill] sm:$0xff] }
 0x350   :  { %7471 = vmatprep.subr.bf16.mxu1 %v6667_v24  ;;  %v6632_v62 = vmax.f32 %v6301_v8, 0.0  ;;  %v6600_v45 = vmax.f32 %v6291_v61, 0.0  ;;  %v6584_v24 = vmax.f32 %v6285_v26, 0.0  ;;  %v20451_v8 = vld [vmem:[#allocation16_spill] sm:$0xff]  ;;  %v6228_v61 = vadd.f32 %v20453_v51, %v15198_v58 }
 0x351   :  { %11932 = vmatmul.mubr.msk.bf16.gmra.mxu0 %vm20095_vm15, %v15483_v28  ;;  %v6224_v55 = vadd.f32 %v20451_v8, %v15245_v36  ;;  %v6552_v9 = vmax.f32 %v6275_v25, 0.0  ;;  %v6210_v25 = vadd.f32 %v20458_v23, %v15276_v19  ;;  %v20464_v23 = vld [vmem:[#allocation8_spill] sm:$0xff] }
 0x352   :  { %7562 = vmatprep.mubr.bf16.mxu0 %v20167_v39  ;;  %v6720_v31 = vpack.c.bf16 %v6648_v11, %v6632_v62  ;;  %v6704_v37 = vpack.c.bf16 %v6616_v47, %v6600_v45  ;;  %v6271_v11 = vadd.f32 %v20452_v20, %v15305_v49  ;;  %v6688_v7 = vpack.c.bf16 %v6584_v24, %v6568_v48  ;;  %v20457_v45 = vld [vmem:[#allocation29_spill] sm:$0xff] }
 0x353   :  { %7472 = vmatpush1.bf16.msra.mxu1 %v6666_v10  ;;  %v6646_v47 = vmax.f32 %v6232_v6, 0.0  ;;  %v6615_v32 = vmax.f32 %v6224_v55, 0.0  ;;  %v6218_v27 = vadd.f32 %v20457_v45, %v15252_v22  ;;  %v6630_v53 = vmax.f32 %v6228_v61, 0.0  ;;  %v20459_v6 = vld [vmem:[#allocation18_spill] sm:$0xff] }
 0x354   :  { %7611 = vmatprep.subr.bf16.mxu1 %v6719_v57  ;;  %v6553_v57 = vmax.f32 %v6277_v4, 0.0  ;;  %v6536_v2 = vmax.f32 %v6271_v11, 0.0  ;;  %v6599_v24 = vmax.f32 %v6220_v40, 0.0  ;;  %v20460_v11 = vld [vmem:[#allocation9_spill] sm:$0xff] }
 0x355   :  { %v6718_v8 = vpack.c.bf16 %v6646_v47, %v6630_v53  ;;  %v6204_v48 = vadd.f32 %v20460_v11, %v15293_v42  ;;  %v6598_v40 = vmax.f32 %v6218_v27, 0.0 }
 0x356   :  { %11923 = vmatmul.mubr.msk.bf16.gmra.mxu1 %vm5016_vm4, %v15072_v17  ;;  %v15518_v17 = vpop.f32.mrf.mxu1  ;;  %v6673_v4 = vpack.c.bf16 %v6553_v57, %v6537_v21  ;;  %v6212_v57 = vadd.f32 %v20459_v6, %v15269_v52  ;;  %v6703_v61 = vpack.c.bf16 %v6615_v32, %v6599_v24  ;;  %v20461_v21 = vld [vmem:[#allocation10_spill] sm:$0xff] }
 0x357   :  { %7341 = vmatprep.mubr.bf16.mxu1 %v20167_v39  ;;  %v6208_v16 = vadd.f32 %v20461_v21, %v15276_v19  ;;  %v6551_v45 = vmax.f32 %v6204_v48, 0.0 }
 0x358   :  { %v6375_v41 = vpop.f32.mrf.mxu1 }
 0x359   :  { %v15520_v50 = vpop.f32.mrf.mxu0  ;;  %11937 = vmatmul.mubr.msk.bf16.vlgmr.msra.gmra.mxu0 %vm20095_vm15, %v15384_v34  ;;  %v6376_v53 = vadd.f32 %v6375_v41, %v15198_v58  ;;  %v6566_v24 = vmax.f32 %v6208_v16, 0.0 }
 0x35a   :  { %7685 = vmatpush1.bf16.msra.mxu0 %v6720_v31  ;;  %7572 = vmatprep.mubr.bf16.mxu0 %v20167_v39  ;;  %v15552_v31 = vpop.f32.mrf.mxu1 }
 0x35b   :  { %v15529_v35 = vpop.f32.mrf.mxu0  ;;  %7686 = vmatprep.subr.bf16.mxu0 %v6705_v38  ;;  %v6214_v38 = vadd.f32 %v20456_v29, %v15269_v52  ;;  %v6635_v48 = vmax.f32 %v6376_v53, 0.0 }
 0x35c   :  { %v6379_v55 = vpop.f32.mrf.mxu1 }
 0x35d   :  { %v15535_v10 = vpop.f32.mrf.mxu0  ;;  %v6583_v51 = vmax.f32 %v6214_v38, 0.0  ;;  %v6380_v47 = vadd.f32 %v6379_v55, %v15191_v0  ;;  %v6582_v38 = vmax.f32 %v6212_v57, 0.0 }
 0x35e   :  { %11924 = vmatmul.mubr.msk.bf16.gmra.mxu1 %vm5016_vm4, %v15099_v59  ;;  %7687 = vmatpush1.bf16.msra.mxu0 %v6704_v37  ;;  %v20455_v59 = vld [vmem:[#allocation14_spill] sm:$0xff]  ;;  %v6672_v37 = vpack.c.bf16 %v6552_v9, %v6536_v2 }
 0x35f   :  { %7489 = vmatprep.mubr.bf16.mxu1 %v20167_v39  ;;  %v15546_v62 = vpop.f32.mrf.mxu0  ;;  %7688 = vmatprep.subr.bf16.mxu0 %v6689_v46  ;;  %v6222_v26 = vadd.f32 %v20455_v59, %v15245_v36  ;;  %v6651_v57 = vmax.f32 %v6380_v47, 0.0 }
 0x361   :  { %v15554_v13 = vpop.f32.mrf.mxu0  ;;  %11938 = vmatmul.mubr.msk.bf16.gmra.mxu0 %vm20095_vm15, %v15418_v1  ;;  %v6614_v46 = vmax.f32 %v6222_v26, 0.0  ;;  %v6567_v26 = vmax.f32 %v6210_v25, 0.0  ;;  %v6198_v25 = vadd.f32 %v20464_v23, %v15305_v49 }
 0x362   :  { %7689 = vmatpush1.bf16.msra.mxu0 %v6688_v7  ;;  %7582 = vmatprep.mubr.bf16.mxu0 %v20167_v39  ;;  %v20462_v7 = vld [vmem:[#allocation5_spill] sm:$0xff] }
 0x363   :  { %v15563_v5 = vpop.f32.mrf.mxu0  ;;  %7690 = vmatprep.subr.bf16.mxu0 %v6673_v4  ;;  %v6200_v59 = vadd.f32 %v20462_v7, %v15305_v49  ;;  %v20463_v4 = vld [vmem:[#allocation6_spill] sm:$0xff]  ;;  %v6702_v32 = vpack.c.bf16 %v6614_v46, %v6598_v40  ;;  %v6687_v27 = vpack.c.bf16 %v6583_v51, %v6567_v26  ;;  %v6534_v41 = vmax.f32 %v6198_v25, 0.0 }
 0x364   :  { %v6202_v29 = vadd.f32 %v20463_v4, %v15293_v42 }
 0x365   :  { %v15569_v20 = vpop.f32.mrf.mxu0  ;;  %v6535_v6 = vmax.f32 %v6200_v59, 0.0 }
 0x366   :  { %11933 = vmatmul.mubr.msk.bf16.vlgmr.msra.gmra.mxu1 %vm20095_vm15, %v15384_v34  ;;  %7691 = vmatpush1.bf16.msra.mxu0 %v6672_v37  ;;  %v6550_v46 = vmax.f32 %v6202_v29, 0.0 }
 0x367   :  { %7612 = vmatpush1.bf16.msra.mxu1 %v6718_v8  ;;  %7499 = vmatprep.mubr.bf16.mxu1 %v20167_v39  ;;  %v6432_v9 = vpop.f32.mrf.mxu0  ;;  %v6686_v8 = vpack.c.bf16 %v6582_v38, %v6566_v24  ;;  %v6671_v11 = vpack.c.bf16 %v6551_v45, %v6535_v6 }
 0x368   :  { %7613 = vmatprep.subr.bf16.mxu1 %v6703_v61  ;;  %v6723_v61 = vpack.c.bf16 %v6651_v57, %v6635_v48  ;;  %v6670_v21 = vpack.c.bf16 %v6550_v46, %v6534_v41  ;;  %v6433_v23 = vadd.f32 %v6432_v9, %v15269_v52  ;;  %v6378_v48 = vadd.f32 %v15552_v31, %v15191_v0 }
 0x369   :  { %v6436_v2 = vpop.f32.mrf.mxu0  ;;  %11939 = vmatmul.mubr.msk.bf16.gmra.mxu0 %vm20095_vm15, %v15454_v63  ;;  %v6423_v31 = vadd.f32 %v15546_v62, %v15293_v42  ;;  %v6419_v62 = vadd.f32 %v15529_v35, %v15305_v49  ;;  %v6364_v35 = vadd.f32 %v15469_v30, %v15252_v22 }
 0x36a   :  { %7592 = vmatprep.mubr.bf16.mxu0 %v20167_v39  ;;  %v6437_v57 = vadd.f32 %v6436_v2, %v15252_v22  ;;  %v6431_v2 = vadd.f32 %v15569_v20, %v15269_v52  ;;  %v6366_v20 = vadd.f32 %v15478_v44, %v15252_v22  ;;  %v6421_v44 = vadd.f32 %v15535_v10, %v15293_v42 }
 0x36b   :  { %7614 = vmatpush1.bf16.msra.mxu1 %v6702_v32  ;;  %v6438_v37 = vpop.f32.mrf.mxu0  ;;  %v6417_v10 = vadd.f32 %v15520_v50, %v15305_v49  ;;  %v6541_v30 = vmax.f32 %v6419_v62, 0.0  ;;  %v6354_v50 = vadd.f32 %v15403_v12, %v15276_v19 }
 0x36c   :  { %7615 = vmatprep.subr.bf16.mxu1 %v6687_v27  ;;  %v6439_v38 = vadd.f32 %v6438_v37, %v15252_v22 }
 0x36d   :  { %v6440_v55 = vpop.f32.mrf.mxu0 }
 0x36e   :  { %11934 = vmatmul.mubr.msk.bf16.gmra.mxu1 %vm20095_vm15, %v15418_v1  ;;  %v6441_v45 = vadd.f32 %v6440_v55, %v15245_v36  ;;  %v6605_v55 = vmax.f32 %v6439_v38, 0.0 }
 0x36f   :  { %7616 = vmatpush1.bf16.msra.mxu1 %v6686_v8  ;;  %7509 = vmatprep.mubr.bf16.mxu1 %v20167_v39  ;;  %v6442_v51 = vpop.f32.mrf.mxu0  ;;  %v6429_v8 = vadd.f32 %v15563_v5, %v15276_v19 }
 0x370   :  { %7617 = vmatprep.subr.bf16.mxu1 %v6671_v11  ;;  %v6443_v59 = vadd.f32 %v6442_v51, %v15245_v36  ;;  %v6620_v41 = vmax.f32 %v6441_v45, 0.0  ;;  %v6557_v45 = vmax.f32 %v6423_v31, 0.0 }
 0x371   :  { %v6446_v16 = vpop.f32.mrf.mxu0  ;;  %11940 = vmatmul.mubr.msk.bf16.gmra.mxu0 %vm20095_vm15, %v15483_v28 }
 0x372   :  { %7708 = vmatprep.mubr.bf16.mxu0 %v20167_v39  ;;  %v6447_v4 = vadd.f32 %v6446_v16, %v15198_v58  ;;  %v6621_v25 = vmax.f32 %v6443_v59, 0.0  ;;  %v6374_v16 = vadd.f32 %v15518_v17, %v15198_v58  ;;  %v6427_v59 = vadd.f32 %v15554_v13, %v15276_v19 }
 0x373   :  { %7618 = vmatpush1.bf16.msra.mxu1 %v6670_v21  ;;  %v6448_v40 = vpop.f32.mrf.mxu0  ;;  %v6589_v21 = vmax.f32 %v6433_v23, 0.0  ;;  %v6368_v17 = vadd.f32 %v15490_v15, %v15245_v36  ;;  %v6588_v13 = vmax.f32 %v6431_v2, 0.0  ;;  %v6350_v15 = vadd.f32 %v15386_v3, %v15293_v42 }
 0x374   :  { %7757 = vmatprep.subr.bf16.mxu1 %v6723_v61  ;;  %v6449_v26 = vadd.f32 %v6448_v40, %v15198_v58  ;;  %v6636_v37 = vmax.f32 %v6447_v4, 0.0  ;;  %v6370_v61 = vadd.f32 %v15505_v33, %v15245_v36  ;;  %v6709_v5 = vpack.c.bf16 %v6621_v25, %v6605_v55 }
 0x375   :  { %v6450_v7 = vpop.f32.mrf.mxu0  ;;  %v6604_v40 = vmax.f32 %v6437_v57, 0.0  ;;  %v6360_v33 = vadd.f32 %v15449_v18, %v15269_v52  ;;  %v6356_v23 = vadd.f32 %v15420_v56, %v15276_v19  ;;  %v6603_v25 = vmax.f32 %v6366_v20, 0.0 }
 0x376   :  { %11935 = vmatmul.mubr.msk.bf16.gmra.mxu1 %vm20095_vm15, %v15454_v63  ;;  %v6451_v47 = vadd.f32 %v6450_v7, %v15191_v0  ;;  %v6637_v24 = vmax.f32 %v6449_v26, 0.0  ;;  %v6573_v26 = vmax.f32 %v6429_v8, 0.0  ;;  %v6619_v18 = vmax.f32 %v6370_v61, 0.0 }
 0x377   :  { %7519 = vmatprep.mubr.bf16.mxu1 %v20167_v39  ;;  %v6452_v29 = vpop.f32.mrf.mxu0  ;;  %v6708_v4 = vpack.c.bf16 %v6620_v41, %v6604_v40  ;;  %v6358_v3 = vadd.f32 %v15438_v14, %v15269_v52  ;;  %v6587_v8 = vmax.f32 %v6360_v33, 0.0  ;;  %v6556_v56 = vmax.f32 %v6421_v44, 0.0 }
 0x378   :  { %v6453_v32 = vadd.f32 %v6452_v29, %v15191_v0  ;;  %v6652_v27 = vmax.f32 %v6451_v47, 0.0  ;;  %v6650_v47 = vmax.f32 %v6378_v48, 0.0  ;;  %v6693_v38 = vpack.c.bf16 %v6589_v21, %v6573_v26 }
 0x379   :  { %v15605_v53 = vpop.f32.mrf.mxu0  ;;  %11945 = vmatmul.mubr.msk.bf16.vlgmr.msra.gmra.mxu0 %vm20095_vm15, %v15384_v34  ;;  %v6602_v41 = vmax.f32 %v6364_v35, 0.0  ;;  %v6346_v61 = vadd.f32 %v15356_v60, %v15305_v49  ;;  %v6571_v2 = vmax.f32 %v6356_v23, 0.0  ;;  %v6540_v21 = vmax.f32 %v6417_v10, 0.0 }
 0x37a   :  { %v6653_v6 = vmax.f32 %v6453_v32, 0.0  ;;  %7718 = vmatprep.mubr.bf16.mxu0 %v20167_v39  ;;  %v6724_v9 = vpack.c.bf16 %v6652_v27, %v6636_v37  ;;  %v6634_v32 = vmax.f32 %v6374_v16, 0.0  ;;  %v6348_v16 = vadd.f32 %v15370_v54, %v15293_v42 }
 0x37b   :  { %v15612_v46 = vpop.f32.mrf.mxu0  ;;  %v6586_v12 = vmax.f32 %v6358_v3, 0.0  ;;  %v6555_v33 = vmax.f32 %v6350_v15, 0.0  ;;  %v6676_v20 = vpack.c.bf16 %v6556_v56, %v6540_v21  ;;  %v6344_v26 = vadd.f32 %v15349_v43, %v15305_v49 }
 0x37c   :  { %v6725_v11 = vpack.c.bf16 %v6653_v6, %v6637_v24  ;;  %v6572_v24 = vmax.f32 %v6427_v59, 0.0  ;;  %v6618_v6 = vmax.f32 %v6368_v17, 0.0  ;;  %v6722_v57 = vpack.c.bf16 %v6650_v47, %v6634_v32 }
 0x37d   :  { %v15618_v51 = vpop.f32.mrf.mxu0  ;;  %v6691_v59 = vpack.c.bf16 %v6587_v8, %v6571_v2  ;;  %v6570_v17 = vmax.f32 %v6354_v50, 0.0  ;;  %v6539_v47 = vmax.f32 %v6346_v61, 0.0  ;;  %v6538_v43 = vmax.f32 %v6344_v26, 0.0 }
 0x37e   :  { %11936 = vmatmul.mubr.msk.bf16.gmra.mxu1 %vm20095_vm15, %v15483_v28  ;;  %7830 = vmatprep.subr.bf16.mxu0 %v6725_v11  ;;  %v6707_v11 = vpack.c.bf16 %v6619_v18, %v6603_v25  ;;  %v6692_v48 = vpack.c.bf16 %v6588_v13, %v6572_v24  ;;  %v6706_v31 = vpack.c.bf16 %v6618_v6, %v6602_v41 }
 0x37f   :  { %7635 = vmatprep.mubr.bf16.mxu1 %v20167_v39  ;;  %v15631_v7 = vpop.f32.mrf.mxu0  ;;  %7831 = vmatpush1.bf16.msra.mxu0 %v6724_v9  ;;  %v6677_v9 = vpack.c.bf16 %v6557_v45, %v6541_v30  ;;  %v6690_v18 = vpack.c.bf16 %v6586_v12, %v6570_v17 }
 0x380   :  { %7832 = vmatprep.subr.bf16.mxu0 %v6709_v5 }
 0x381   :  { %v15643_v29 = vpop.f32.mrf.mxu0  ;;  %11946 = vmatmul.mubr.msk.bf16.gmra.mxu0 %vm20095_vm15, %v15418_v1 }
 0x382   :  { %7728 = vmatprep.mubr.bf16.mxu0 %v20167_v39 }
 0x383   :  { %v15654_v27 = vpop.f32.mrf.mxu0  ;;  %7833 = vmatpush1.bf16.msra.mxu0 %v6708_v4  ;;  %v6554_v4 = vmax.f32 %v6348_v16, 0.0 }
 0x384   :  { %7834 = vmatprep.subr.bf16.mxu0 %v6693_v38  ;;  %v6675_v38 = vpack.c.bf16 %v6555_v33, %v6539_v47 }
 0x385   :  { %v15662_v37 = vpop.f32.mrf.mxu0  ;;  %v6674_v32 = vpack.c.bf16 %v6554_v4, %v6538_v43 }
 0x386   :  { %v15664_v55 = vpop.f32.mrf.mxu1  ;;  %11941 = vmatmul.mubr.msk.bf16.vlgmr.msra.gmra.mxu1 %vm20095_vm15, %v15384_v34 }
 0x387   :  { %7758 = vmatpush1.bf16.msra.mxu1 %v6722_v57  ;;  %7645 = vmatprep.mubr.bf16.mxu1 %v20167_v39  ;;  %v15671_v14 = vpop.f32.mrf.mxu0 }
 0x388   :  { %v15675_v5 = vpop.f32.mrf.mxu1  ;;  %7759 = vmatprep.subr.bf16.mxu1 %v6707_v11  ;;  %7835 = vmatpush1.bf16.msra.mxu0 %v6692_v48 }
 0x389   :  { %7836 = vmatprep.subr.bf16.mxu0 %v6677_v9  ;;  %v15679_v40 = vpop.f32.mrf.mxu0  ;;  %11947 = vmatmul.mubr.msk.bf16.gmra.mxu0 %vm20095_vm15, %v15454_v63 }
 0x38a   :  { %v15683_v60 = vpop.f32.mrf.mxu1  ;;  %7738 = vmatprep.mubr.bf16.mxu0 %v20167_v39 }
 0x38b   :  { %7760 = vmatpush1.bf16.msra.mxu1 %v6706_v31  ;;  %v15688_v54 = vpop.f32.mrf.mxu0 }
 0x38c   :  { %v15690_v62 = vpop.f32.mrf.mxu1  ;;  %7761 = vmatprep.subr.bf16.mxu1 %v6691_v59  ;;  %7837 = vmatpush1.bf16.msra.mxu0 %v6676_v20 }
 0x38d   :  { %v15692_v44 = vpop.f32.mrf.mxu0 }
 0x38e   :  { %v15694_v13 = vpop.f32.mrf.mxu1  ;;  %11942 = vmatmul.mubr.msk.bf16.gmra.mxu1 %vm20095_vm15, %v15418_v1 }
 0x38f   :  { %7762 = vmatpush1.bf16.msra.mxu1 %v6690_v18  ;;  %7655 = vmatprep.mubr.bf16.mxu1 %v20167_v39  ;;  %v15699_v15 = vpop.f32.mrf.mxu0 }
 0x390   :  { %v6501_v35 = vpop.f32.mrf.mxu1  ;;  %7763 = vmatprep.subr.bf16.mxu1 %v6675_v38 }
 0x391   :  { %v15701_v45 = vpop.f32.mrf.mxu0  ;;  %11948 = vmatmul.mubr.msk.bf16.gmra.mxu0 %vm20095_vm15, %v15483_v28 }
 0x392   :  { %v6503_v23 = vpop.f32.mrf.mxu1  ;;  %7854 = vmatprep.mubr.bf16.mxu0 %v20167_v39 }
 0x393   :  { %7764 = vmatpush1.bf16.msra.mxu1 %v6674_v32  ;;  %v15706_v25 = vpop.f32.mrf.mxu0 }
 0x394   :  { %v6505_v10 = vpop.f32.mrf.mxu1 }
 0x395   :  { %v15708_v24 = vpop.f32.mrf.mxu0  ;;  %v6506_v38 = vadd.f32 %v6505_v10, %v15269_v52  ;;  %v6504_v10 = vadd.f32 %v6503_v23, %v15269_v52  ;;  %v6492_v52 = vadd.f32 %v15675_v5, %v15305_v49  ;;  %v6490_v5 = vadd.f32 %v15664_v55, %v15305_v49 }
 0x396   :  { %v6509_v3 = vpop.f32.mrf.mxu1  ;;  %11943 = vmatmul.mubr.msk.bf16.gmra.mxu1 %vm20095_vm15, %v15454_v63 }
 0x397   :  { %7665 = vmatprep.mubr.bf16.mxu1 %v20167_v39  ;;  %v15713_v6 = vpop.f32.mrf.mxu0  ;;  %v6542_v49 = vmax.f32 %v6490_v5, 0.0 }
 0x398   :  { %v6511_v57 = vpop.f32.mrf.mxu1 }
 0x399   :  { %v15715_v30 = vpop.f32.mrf.mxu0  ;;  %11953 = vmatmul.mubr.msk.bf16.vlgmr.msra.gmra.mxu0 %vm20095_vm15, %v15384_v34  ;;  %v6512_v59 = vadd.f32 %v6511_v57, %v15252_v22 }
 0x39a   :  { %v6513_v8 = vpop.f32.mrf.mxu1  ;;  %7864 = vmatprep.mubr.bf16.mxu0 %v20167_v39 }
 0x39b   :  { %v15720_v56 = vpop.f32.mrf.mxu0  ;;  %v6514_v47 = vadd.f32 %v6513_v8, %v15245_v36  ;;  %v6607_v8 = vmax.f32 %v6512_v59, 0.0 }
 0x39c   :  { %v6515_v11 = vpop.f32.mrf.mxu1 }
 0x39d   :  { %v15722_v48 = vpop.f32.mrf.mxu0  ;;  %v6516_v21 = vadd.f32 %v6515_v11, %v15245_v36  ;;  %v6502_v36 = vadd.f32 %v6501_v35, %v15276_v19 }
 0x39e   :  { %v6519_v50 = vpop.f32.mrf.mxu1  ;;  %11944 = vmatmul.mubr.msk.bf16.gmra.mxu1 %vm20095_vm15, %v15483_v28 }
 0x39f   :  { %7781 = vmatprep.mubr.bf16.mxu1 %v20167_v39  ;;  %v15727_v41 = vpop.f32.mrf.mxu0  ;;  %v6520_v33 = vadd.f32 %v6519_v50, %v15198_v58  ;;  %v6623_v43 = vmax.f32 %v6516_v21, 0.0  ;;  %v6622_v21 = vmax.f32 %v6514_v47, 0.0  ;;  %v6575_v23 = vmax.f32 %v6502_v36, 0.0 }
 0x3a0   :  { %v6521_v9 = vpop.f32.mrf.mxu1 }
 0x3a1   :  { %v15729_v61 = vpop.f32.mrf.mxu0  ;;  %11954 = vmatmul.mubr.msk.bf16.gmra.mxu0 %vm20095_vm15, %v15418_v1  ;;  %v6522_v16 = vadd.f32 %v6521_v9, %v15198_v58  ;;  %v6638_v11 = vmax.f32 %v6520_v33, 0.0  ;;  %v6711_v35 = vpack.c.bf16 %v6623_v43, %v6607_v8 }
 0x3a2   :  { %v6523_v2 = vpop.f32.mrf.mxu1  ;;  %7874 = vmatprep.mubr.bf16.mxu0 %v20167_v39 }
 0x3a3   :  { %v6524_v12 = vadd.f32 %v6523_v2, %v15191_v0  ;;  %v15737_v31 = vpop.f32.mrf.mxu0  ;;  %v6639_v32 = vmax.f32 %v6522_v16, 0.0 }
 0x3a4   :  { %v6525_v20 = vpop.f32.mrf.mxu1 }
 0x3a5   :  { %v6526_v26 = vadd.f32 %v6525_v20, %v15191_v0  ;;  %v15742_v17 = vpop.f32.mrf.mxu0  ;;  %v6654_v4 = vmax.f32 %v6524_v12, 0.0  ;;  %v6510_v0 = vadd.f32 %v6509_v3, %v15252_v22  ;;  %v6496_v22 = vadd.f32 %v15690_v62, %v15293_v42 }
 0x3a6   :  { %v15745_v18 = vpop.f32.mrf.mxu1  ;;  %11949 = vmatmul.mubr.msk.bf16.vlgmr.msra.gmra.mxu1 %vm20095_vm15, %v15384_v34  ;;  %v6591_v3 = vmax.f32 %v6506_v38, 0.0  ;;  %v6500_v20 = vadd.f32 %v15694_v13, %v15276_v19  ;;  %v6494_v62 = vadd.f32 %v15683_v60, %v15293_v42  ;;  %v6543_v42 = vmax.f32 %v6492_v52, 0.0 }
 0x3a7   :  { %20465 = vst [vmem:[#allocation30_spill] sm:$0xff] %v15745_v18  ;;  %v6655_v58 = vmax.f32 %v6526_v26, 0.0  ;;  %7791 = vmatprep.mubr.bf16.mxu1 %v20167_v39  ;;  %v15751_v57 = vpop.f32.mrf.mxu0  ;;  %v6726_v16 = vpack.c.bf16 %v6654_v4, %v6638_v11  ;;  %v6606_v59 = vmax.f32 %v6510_v0, 0.0  ;;  %v6590_v4 = vmax.f32 %v6504_v10, 0.0 }
 0x3a8   :  { %v15754_v50 = vpop.f32.mrf.mxu1  ;;  %v6559_v19 = vmax.f32 %v6496_v22, 0.0  ;;  %v6695_v13 = vpack.c.bf16 %v6591_v3, %v6575_v23  ;;  %v6558_v11 = vmax.f32 %v6494_v62, 0.0 }
 0x3a9   :  { %20466 = vst [vmem:[#allocation32_spill] sm:$0xff] %v15754_v50  ;;  %v6727_v9 = vpack.c.bf16 %v6655_v58, %v6639_v32  ;;  %v15757_v2 = vpop.f32.mrf.mxu0  ;;  %11955 = vmatmul.mubr.msk.bf16.gmra.mxu0 %vm20095_vm15, %v15454_v63  ;;  %v6710_v38 = vpack.c.bf16 %v6622_v21, %v6606_v59  ;;  %v6574_v58 = vmax.f32 %v6500_v20, 0.0 }
 0x3aa   :  { %v15762_v12 = vpop.f32.mrf.mxu1  ;;  %7884 = vmatprep.mubr.bf16.mxu0 %v20167_v39 }
 0x3ab   :  { %20467 = vst [vmem:[#allocation33_spill] sm:$0xff] %v15762_v12  ;;  %7903 = vmatprep.subr.bf16.mxu1 %v6727_v9  ;;  %v15767_v33 = vpop.f32.mrf.mxu0  ;;  %v6694_v36 = vpack.c.bf16 %v6590_v4, %v6574_v58  ;;  %v6679_v9 = vpack.c.bf16 %v6559_v19, %v6543_v42 }
 0x3ac   :  { %v15771_v26 = vpop.f32.mrf.mxu1  ;;  %7904 = vmatpush1.bf16.msra.mxu1 %v6726_v16  ;;  %v6678_v16 = vpack.c.bf16 %v6558_v11, %v6542_v49 }
 0x3ad   :  { %20468 = vst [vmem:[#allocation34_spill] sm:$0xff] %v15771_v26  ;;  %7905 = vmatprep.subr.bf16.mxu1 %v6711_v35  ;;  %v15775_v47 = vpop.f32.mrf.mxu0 }
 0x3ae   :  { %v15779_v43 = vpop.f32.mrf.mxu1  ;;  %11950 = vmatmul.mubr.msk.bf16.gmra.mxu1 %vm20095_vm15, %v15418_v1 }
 0x3af   :  { %20469 = vst [vmem:[#allocation42_spill] sm:$0xff] %v15779_v43  ;;  %7801 = vmatprep.mubr.bf16.mxu1 %v20167_v39  ;;  %v15784_v32 = vpop.f32.mrf.mxu0  ;;  %v15981_v43 = vpop.permute.xlu1 %8013 }
 0x3b0   :  { %v15788_v0 = vpop.f32.mrf.mxu1  ;;  %7906 = vmatpush1.bf16.msra.mxu1 %v6710_v38 }
 0x3b1   :  { %20470 = vst [vmem:[#allocation25_spill] sm:$0xff] %v15788_v0  ;;  %7907 = vmatprep.subr.bf16.mxu1 %v6695_v13  ;;  %v15790_v60 = vpop.f32.mrf.mxu0  ;;  %11956 = vmatmul.mubr.msk.bf16.gmra.mxu0 %vm20095_vm15, %v15483_v28 }
 0x3b2   :  { %v15794_v8 = vpop.f32.mrf.mxu1  ;;  %8456 = vmatprep.mubr.bf16.mxu0 %v20167_v39 }
 0x3b3   :  { %20471 = vst [vmem:[#allocation23_spill] sm:$0xff] %v15794_v8  ;;  %v15797_v10 = vpop.f32.mrf.mxu0 }
 0x3b4   :  { %v15799_v55 = vpop.f32.mrf.mxu1  ;;  %7908 = vmatpush1.bf16.msra.mxu1 %v6694_v36 }
 0x3b5   :  { %20472 = vst [vmem:[#allocation26_spill] sm:$0xff] %v15799_v55  ;;  %7909 = vmatprep.subr.bf16.mxu1 %v6679_v9  ;;  %v15801_v21 = vpop.f32.mrf.mxu0 }
 0x3b6   :  { %v15803_v22 = vpop.f32.mrf.mxu1  ;;  %11951 = vmatmul.mubr.msk.bf16.gmra.mxu1 %vm20095_vm15, %v15454_v63 }
 0x3b7   :  { %20473 = vst [vmem:[#allocation27_spill] sm:$0xff] %v15803_v22  ;;  %7811 = vmatprep.mubr.bf16.mxu1 %v20167_v39  ;;  %v15808_v3 = vpop.f32.mrf.mxu0 }
 0x3b8   :  { %v15810_v35 = vpop.f32.mrf.mxu1  ;;  %7910 = vmatpush1.bf16.msra.mxu1 %v6678_v16 }
 0x3b9   :  { %20474 = vst [vmem:[#allocation28_spill] sm:$0xff] %v15810_v35  ;;  %v15812_v20 = vpop.f32.mrf.mxu0 }
 0x3ba   :  { %20475 = vst [vmem:[#allocation36_spill] sm:$0xff] %v15812_v20  ;;  %v15814_v59 = vpop.f32.mrf.mxu1 }
 0x3bb   :  { %20476 = vst [vmem:[#allocation44_spill] sm:$0xff] %v15814_v59  ;;  %v15816_v52 = vpop.f32.mrf.mxu0 }
 0x3bc   :  { %20477 = vst [vmem:[#allocation43_spill] sm:$0xff] %v15816_v52  ;;  %v15818_v23 = vpop.f32.mrf.mxu1 }
 0x3bd   :  { %v15820_v62 = vpop.f32.mrf.mxu0 }
 0x3be   :  { %20478 = vst [vmem:[#allocation45_spill] sm:$0xff] %v15820_v62  ;;  %v15822_v4 = vpop.f32.mrf.mxu1  ;;  %11952 = vmatmul.mubr.msk.bf16.gmra.mxu1 %vm20095_vm15, %v15483_v28 }
 0x3bf   :  { %20479 = vst [vmem:[#allocation46_spill] sm:$0xff] %v15822_v4  ;;  %7927 = vmatprep.mubr.bf16.mxu1 %v20167_v39  ;;  %v15827_v38 = vpop.f32.mrf.mxu0 }
 0x3c0   :  { %20480 = vst [vmem:[#allocation47_spill] sm:$0xff] %v15827_v38  ;;  %v15829_v19 = vpop.f32.mrf.mxu1 }
 0x3c1   :  { %v15831_v13 = vpop.f32.mrf.mxu0 }
 0x3c2   :  { %20481 = vst [vmem:[#allocation37_spill] sm:$0xff] %v15831_v13  ;;  %v15833_v5 = vpop.f32.mrf.mxu1 }
 0x3c3   :  { %20482 = vst [vmem:[#allocation35_spill] sm:$0xff] %v15833_v5  ;;  %v15835_v58 = vpop.f32.mrf.mxu0 }
 0x3c4   :  { %20483 = vst [vmem:[#allocation38_spill] sm:$0xff] %v15835_v58  ;;  %v15837_v42 = vpop.f32.mrf.mxu1 }
 0x3c5   :  { %20484 = vst [vmem:[#allocation39_spill] sm:$0xff] %v15837_v42  ;;  %v15839_v11 = vpop.f32.mrf.mxu0 }
 0x3c6   :  { %20485 = vst [vmem:[#allocation40_spill] sm:$0xff] %v15839_v11  ;;  %v15841_v36 = vpop.f32.mrf.mxu1  ;;  %11957 = vmatmul.mubr.msk.bf16.vlgmr.msra.gmra.mxu1 %vm20095_vm15, %v15384_v34 }
 0x3c7   :  { %20486 = vst [vmem:[#allocation54_spill] sm:$0xff] %v15841_v36  ;;  %7937 = vmatprep.mubr.bf16.mxu1 %v20167_v39  ;;  %v15846_v9 = vpop.f32.mrf.mxu0 }
 0x3c8   :  { %20487 = vst [vmem:[#allocation7_spill] sm:$0xff] %v15846_v9  ;;  %v15848_v49 = vpop.f32.mrf.mxu1 }
 0x3c9   :  { %20488 = vst [vmem:[#allocation49_spill] sm:$0xff] %v15848_v49  ;;  %v15850_v16 = vpop.f32.mrf.mxu0 }
 0x3ca   :  { %20489 = vst [vmem:[#allocation52_spill] sm:$0xff] %v15850_v16  ;;  %v15852_v13 = vpop.f32.mrf.mxu1 }
 0x3cb   :  { %20490 = vst [vmem:[#allocation51_spill] sm:$0xff] %v15852_v13  ;;  %v15854_v62 = vpop.f32.mrf.mxu0 }
 0x3cc   :  { %20491 = vst [vmem:[#allocation48_spill] sm:$0xff] %v15854_v62  ;;  %v15856_v58 = vpop.f32.mrf.mxu1 }
 0x3cd   :  { %20492 = vst [vmem:[#allocation41_spill] sm:$0xff] %v15856_v58  ;;  %v15858_v11 = vpop.f32.mrf.mxu0 }
 0x3ce   :  { %20493 = vst [vmem:[#allocation50_spill] sm:$0xff] %v15858_v11  ;;  %v15860_v36 = vpop.f32.mrf.mxu1  ;;  %11958 = vmatmul.mubr.msk.bf16.gmra.mxu1 %vm20095_vm15, %v15418_v1 }
 0x3cf   :  { %20494 = vst [vmem:[#allocation53_spill] sm:$0xff] %v15860_v36  ;;  %7947 = vmatprep.mubr.bf16.mxu1 %v20167_v39  ;;  %v15865_v34 = vpop.f32.mrf.mxu0 }
 0x3d0   :  { %20495 = vst [vmem:[#allocation15_spill] sm:$0xff] %v15865_v34  ;;  %v15867_v49 = vpop.f32.mrf.mxu1 }
 0x3d1   :  { %20496 = vst [vmem:[#allocation24_spill] sm:$0xff] %v15867_v49  ;;  %v15869_v38 = vpop.f32.mrf.mxu0 }
 0x3d2   :  { %20497 = vst [vmem:[#allocation11_spill] sm:$0xff] %v15869_v38  ;;  %v15871_v13 = vpop.f32.mrf.mxu1 }
 0x3d3   :  { %20498 = vst [vmem:[#allocation12_spill] sm:$0xff] %v15871_v13  ;;  %v15873_v16 = vpop.f32.mrf.mxu0 }
 0x3d4   :  { %20499 = vst [vmem:[#allocation22_spill] sm:$0xff] %v15873_v16  ;;  %v15875_v58 = vpop.f32.mrf.mxu1 }
 0x3d5   :  { %20500 = vst [vmem:[#allocation20_spill] sm:$0xff] %v15875_v58  ;;  %v15877_v11 = vpop.f32.mrf.mxu0 }
 0x3d6   :  { %20501 = vst [vmem:[#allocation16_spill] sm:$0xff] %v15877_v11  ;;  %v15879_v36 = vpop.f32.mrf.mxu1  ;;  %11959 = vmatmul.mubr.msk.bf16.gmra.mxu1 %vm20095_vm15, %v15454_v63 }
 0x3d7   :  { %20502 = vst [vmem:[#allocation19_spill] sm:$0xff] %v15879_v36  ;;  %7957 = vmatprep.mubr.bf16.mxu1 %v20167_v39  ;;  %v15884_v1 = vpop.f32.mrf.mxu0 }
 0x3d8   :  { %20503 = vst [vmem:[#allocation31_spill] sm:$0xff] %v15884_v1  ;;  %v15886_v49 = vpop.f32.mrf.mxu1 }
 0x3d9   :  { %20504 = vst [vmem:[#allocation13_spill] sm:$0xff] %v15886_v49  ;;  %v15888_v9 = vpop.f32.mrf.mxu0 }
 0x3da   :  { %20505 = vst [vmem:[#allocation14_spill] sm:$0xff] %v15888_v9  ;;  %v15890_v13 = vpop.f32.mrf.mxu1 }
 0x3db   :  { %20506 = vst [vmem:[#allocation21_spill] sm:$0xff] %v15890_v13  ;;  %v15892_v52 = vpop.f32.mrf.mxu0 }
 0x3dc   :  { %20507 = vst [vmem:[#allocation29_spill] sm:$0xff] %v15892_v52  ;;  %v15894_v58 = vpop.f32.mrf.mxu1 }
 0x3dd   :  { %20508 = vst [vmem:[#allocation17_spill] sm:$0xff] %v15894_v58  ;;  %v15896_v11 = vpop.f32.mrf.mxu0 }
 0x3de   :  { %20509 = vst [vmem:[#allocation18_spill] sm:$0xff] %v15896_v11  ;;  %v15898_v36 = vpop.f32.mrf.mxu1  ;;  %11960 = vmatmul.mubr.msk.bf16.gmra.mxu1 %vm20095_vm15, %v15483_v28 }
 0x3df   :  { %20510 = vst [vmem:[#allocation9_spill] sm:$0xff] %v15898_v36  ;;  %v15902_v63 = vpop.f32.mrf.mxu0  ;;  %8529 = vmatprep.mubr.bf16.mxu1 %v20167_v39 }
 0x3e0   :  { %20511 = vst [vmem:[#allocation10_spill] sm:$0xff] %v15902_v63  ;;  %v15905_v49 = vpop.f32.mrf.mxu1 }
 0x3e1   :  { %20512 = vst [vmem:[#allocation5_spill] sm:$0xff] %v15905_v49  ;;  %v15907_v9 = vpop.f32.mrf.mxu0 }
 0x3e2   :  { %20513 = vst [vmem:[#allocation6_spill] sm:$0xff] %v15907_v9  ;;  %v15909_v13 = vpop.f32.mrf.mxu1 }
 0x3e3   :  { %20514 = vst [vmem:[#allocation8_spill] sm:$0xff] %v15909_v13  ;;  %v15911_v52 = vpop.f32.mrf.mxu0 }
 0x3e4   :  { %20515 = vst [vmem:[#allocation55_spill] sm:$0xff] %v15911_v52  ;;  %v15913_v58 = vpop.f32.mrf.mxu1 }
 0x3e5   :  { %20516 = vst [vmem:[#allocation56_spill] sm:$0xff] %v15913_v58  ;;  %v15915_v11 = vpop.f32.mrf.mxu0 }
 0x3e6   :  { %20517 = vst [vmem:[#allocation57_spill] sm:$0xff] %v15915_v11  ;;  %v15917_v36 = vpop.f32.mrf.mxu1 }
 0x3e7   :  { %20518 = vst [vmem:[#allocation58_spill] sm:$0xff] %v15917_v36  ;;  %v15919_v1 = vpop.f32.mrf.mxu0 }
 0x3e8   :  { %20519 = vst [vmem:[#allocation59_spill] sm:$0xff] %v15919_v1  ;;  %v15921_v28 = vpop.f32.mrf.mxu1 }
 0x3e9   :  { %20520 = vst [vmem:[#allocation60_spill] sm:$0xff] %v15921_v28  ;;  %v15923_v63 = vpop.f32.mrf.mxu0 }
 0x3ea   :  { %20521 = vst [vmem:[#allocation61_spill] sm:$0xff] %v15923_v63  ;;  %v15925_v62 = vpop.f32.mrf.mxu1 }
 0x3eb   :  { %20522 = vst [vmem:[#allocation62_spill] sm:$0xff] %v15925_v62  ;;  %v15927_v49 = vpop.f32.mrf.mxu0 }
 0x3ec   :  { %20523 = vst [vmem:[#allocation63_spill] sm:$0xff] %v15927_v49  ;;  %v15929_v9 = vpop.f32.mrf.mxu1 }
 0x3ed   :  { %20524 = vst [vmem:[#allocation64_spill] sm:$0xff] %v15929_v9  ;;  %v15931_v13 = vpop.f32.mrf.mxu0 }
 0x3ee   :  { %20525 = vst [vmem:[#allocation65_spill] sm:$0xff] %v15931_v13  ;;  %v15933_v52 = vpop.f32.mrf.mxu1 }
 0x3ef   :  { %20526 = vst [vmem:[#allocation66_spill] sm:$0xff] %v15933_v52  ;;  %v15935_v58 = vpop.f32.mrf.mxu0 }
 0x3f0   :  { %20527 = vst [vmem:[#allocation67_spill] sm:$0xff] %v15935_v58  ;;  %v15937_v11 = vpop.f32.mrf.mxu1 }
 0x3f1   :  { %20528 = vst [vmem:[#allocation68_spill] sm:$0xff] %v15937_v11  ;;  %v15939_v36 = vpop.f32.mrf.mxu0 }
 0x3f2   :  { %20529 = vst [vmem:[#allocation69_spill] sm:$0xff] %v15939_v36  ;;  %v15941_v1 = vpop.f32.mrf.mxu1 }
 0x3f3   :  { %20530 = vst [vmem:[#allocation70_spill] sm:$0xff] %v15941_v1  ;;  %v15943_v28 = vpop.f32.mrf.mxu0 }
 0x3f4   :  { %20531 = vst [vmem:[#allocation71_spill] sm:$0xff] %v15943_v28  ;;  %v15945_v63 = vpop.f32.mrf.mxu1 }
 0x3f5   :  { %20532 = vst [vmem:[#allocation72_spill] sm:$0xff] %v15945_v63  ;;  %v15947_v62 = vpop.f32.mrf.mxu0 }
 0x3f6   :  { %20533 = vst [vmem:[#allocation73_spill] sm:$0xff] %v15947_v62  ;;  %v15949_v49 = vpop.f32.mrf.mxu1 }
 0x3f7   :  { %20534 = vst [vmem:[#allocation74_spill] sm:$0xff] %v15949_v49  ;;  %v15951_v9 = vpop.f32.mrf.mxu0 }
 0x3f8   :  { %20535 = vst [vmem:[#allocation75_spill] sm:$0xff] %v15951_v9  ;;  %v15953_v13 = vpop.f32.mrf.mxu1 }
 0x3f9   :  { %20536 = vst [vmem:[#allocation76_spill] sm:$0xff] %v15953_v13  ;;  %v15955_v52 = vpop.f32.mrf.mxu0 }
 0x3fa   :  { %v15957_v58 = vpop.f32.mrf.mxu1 }
 0x3fb   :  { %20537 = vst [vmem:[#allocation77_spill] sm:$0xff] %v15957_v58  ;;  %v15959_v11 = vpop.f32.mrf.mxu0 }
 0x3fc   :  { %v15961_v36 = vpop.f32.mrf.mxu1 }
 0x3fd   :  { %20538 = vst [vmem:[#allocation78_spill] sm:$0xff] %v15961_v36  ;;  %v15963_v1 = vpop.f32.mrf.mxu0 }
 0x3fe   :  { %v15965_v28 = vpop.f32.mrf.mxu1 }
 0x3ff   :  { %20539 = vst [vmem:[#allocation79_spill] sm:$0xff] %v15965_v28  ;;  %v7424_v63 = vpop.f32.mrf.mxu0 }
 0x400   :  { %v15967_v62 = vpop.f32.mrf.mxu1 }
 0x401   :  { %20540 = vst [vmem:[#allocation80_spill] sm:$0xff] %v15967_v62  ;;  %v7428_v49 = vpop.f32.mrf.mxu0 }
 0x402   :  { %v15969_v38 = vpop.f32.mrf.mxu1 }
 0x403   :  { %20541 = vst [vmem:[#allocation81_spill] sm:$0xff] %v15969_v38  ;;  %v7430_v9 = vpop.f32.mrf.mxu0  ;;  %v15985_v38 = vpop.permute.xlu0 %8008 }
 0x404   :  { %v15971_v13 = vpop.f32.mrf.mxu1 }
 0x405   :  { %20542 = vst [vmem:[#allocation82_spill] sm:$0xff] %v15971_v13  ;;  %v7432_v20 = vpop.f32.mrf.mxu0 }
 0x406   :  { %v15973_v16 = vpop.f32.mrf.mxu1 }
 0x407   :  { %20543 = vst [vmem:[#allocation83_spill] sm:$0xff] %v15973_v16  ;;  %v7434_v58 = vpop.f32.mrf.mxu0  ;;  %v15997_v42 = vpop.permute.xlu0 %7998 }
 0x408   :  { %v15975_v34 = vpop.f32.mrf.mxu1  ;;  %v7435_v5 = vadd.f32 %v7434_v58, %v15671_v14 }
 0x409   :  { %20544 = vst [vmem:[#allocation84_spill] sm:$0xff] %v15975_v34  ;;  %v7438_v36 = vpop.f32.mrf.mxu0  ;;  %v15991_v34 = vpop.permute.xlu1 %8003 }
 0x40a   :  { %v15977_v18 = vpop.f32.mrf.mxu1 }
 0x40b   :  { %20545 = vst [vmem:[#allocation85_spill] sm:$0xff] %v15977_v18  ;;  %v7440_v12 = vpop.f32.mrf.mxu0 }
 0x40c   :  { %v15979_v28 = vpop.f32.mrf.mxu1 }
 0x40d   :  { %20546 = vst [vmem:[#allocation86_spill] sm:$0xff] %v15979_v28  ;;  %v7442_v62 = vpop.f32.mrf.mxu0 }
 0x40e   :  { %v15983_v50 = vpop.f32.mrf.mxu1  ;;  %v7443_v35 = vadd.f32 %v7442_v62, %v15692_v44  ;;  %v16023_v62 = vpop.permute.xlu0 %7988 }
 0x40f   :  { %20547 = vst [vmem:[#allocation87_spill] sm:$0xff] %v15983_v50  ;;  %v7444_v13 = vpop.f32.mrf.mxu0 }
 0x410   :  { %v15987_v8 = vpop.f32.mrf.mxu1  ;;  %v7445_v28 = vadd.f32 %v7444_v13, %v15699_v15  ;;  %v16012_v13 = vpop.permute.xlu1 %7993 }
 0x411   :  { %20548 = vst [vmem:[#allocation88_spill] sm:$0xff] %v15987_v8  ;;  %v7448_v16 = vpop.f32.mrf.mxu0  ;;  %v7441_v8 = vadd.f32 %v7440_v12, %v15688_v54  ;;  %v7439_v54 = vadd.f32 %v7438_v36, %v15679_v40  ;;  %v7431_v12 = vadd.f32 %v7430_v9, %v15654_v27  ;;  %v8096_v40 = vadd.f32 %v15991_v34, %v7443_v35 }
 0x412   :  { %v15989_v26 = vpop.f32.mrf.mxu1  ;;  %v7449_v50 = vadd.f32 %v7448_v16, %v15701_v45  ;;  %v8097_v15 = vadd.f32 %v15991_v34, %v7445_v28  ;;  %v8065_v36 = vadd.f32 %v16012_v13, %v7435_v5  ;;  %v7429_v16 = vadd.f32 %v7428_v49, %v15643_v29 }
 0x413   :  { %20549 = vst [vmem:[#allocation89_spill] sm:$0xff] %v15989_v26  ;;  %v7450_v0 = vpop.f32.mrf.mxu0  ;;  %v8080_v28 = vadd.f32 %v15997_v42, %v7439_v54  ;;  %v7421_v35 = vadd.f32 %v15959_v11, %v15612_v46  ;;  %v8224_v49 = vmax.f32 %v8096_v40, 0.0 }
 0x414   :  { %v15993_v18 = vpop.f32.mrf.mxu1  ;;  %v7451_v22 = vadd.f32 %v7450_v0, %v15706_v25  ;;  %v8225_v27 = vmax.f32 %v8097_v15, 0.0  ;;  %v16042_v5 = vpop.permute.xlu1 %7983  ;;  %v7423_v15 = vadd.f32 %v15963_v1, %v15618_v51  ;;  %v8193_v46 = vmax.f32 %v8065_v36, 0.0 }
 0x415   :  { %20550 = vst [vmem:[#allocation90_spill] sm:$0xff] %v15993_v18  ;;  %v7452_v59 = vpop.f32.mrf.mxu0  ;;  %v8048_v51 = vadd.f32 %v16023_v62, %v7429_v16  ;;  %v8208_v1 = vmax.f32 %v8080_v28, 0.0 }
 0x416   :  { %v16000_v55 = vpop.f32.mrf.mxu1  ;;  %v7453_v26 = vadd.f32 %v7452_v59, %v15708_v24  ;;  %v8113_v25 = vadd.f32 %v15985_v38, %v7451_v22  ;;  %v8112_v24 = vadd.f32 %v15985_v38, %v7449_v50  ;;  %v8081_v59 = vadd.f32 %v15997_v42, %v7441_v8 }
 0x417   :  { %20551 = vst [vmem:[#allocation91_spill] sm:$0xff] %v16000_v55  ;;  %v7454_v18 = vpop.f32.mrf.mxu0  ;;  %v8176_v28 = vmax.f32 %v8048_v51, 0.0 }
 0x418   :  { %v16006_v4 = vpop.f32.mrf.mxu1  ;;  %v8128_v45 = vadd.f32 %v15981_v43, %v7453_v26  ;;  %v7455_v0 = vadd.f32 %v7454_v18, %v15713_v6  ;;  %v7425_v6 = vadd.f32 %v7424_v63, %v15631_v7  ;;  %v7433_v18 = vadd.f32 %v7432_v20, %v15662_v37 }
 0x419   :  { %v16016_v14 = vpop.f32.mrf.mxu0  ;;  %v8241_v9 = vmax.f32 %v8113_v25, 0.0  ;;  %v8049_v20 = vadd.f32 %v16023_v62, %v7431_v12  ;;  %v8209_v63 = vmax.f32 %v8081_v59, 0.0  ;;  %v16052_v12 = vpop.permute.xlu0 %7978  ;;  %v7419_v59 = vadd.f32 %v15955_v52, %v15605_v53 }
 0x41a   :  { %v16018_v44 = vpop.f32.mrf.mxu1  ;;  %v8129_v22 = vadd.f32 %v15981_v43, %v7455_v0  ;;  %v8256_v26 = vmax.f32 %v8128_v45, 0.0  ;;  %v8240_v0 = vmax.f32 %v8112_v24, 0.0  ;;  %v8064_v29 = vadd.f32 %v16012_v13, %v7433_v18 }
 0x41b   :  { %20552 = vst [vmem:[#allocation92_spill] sm:$0xff] %v16018_v44  ;;  %v16028_v50 = vpop.f32.mrf.mxu0  ;;  %v8313_v11 = vpack.c.bf16 %v8225_v27, %v8209_v63  ;;  %v8312_v27 = vpack.c.bf16 %v8224_v49, %v8208_v1  ;;  %v8016_v16 = vadd.f32 %v16052_v12, %v7419_v59 }
 0x41c   :  { %v16030_v58 = vpop.f32.mrf.mxu1  ;;  %v8257_v8 = vmax.f32 %v8129_v22, 0.0  ;;  %v8328_v25 = vpack.c.bf16 %v8256_v26, %v8240_v0  ;;  %v8033_v22 = vadd.f32 %v16042_v5, %v7425_v6  ;;  %v8017_v26 = vadd.f32 %v16052_v12, %v7421_v35 }
 0x41d   :  { %v16035_v7 = vpop.f32.mrf.mxu0  ;;  %v8032_v6 = vadd.f32 %v16042_v5, %v7423_v15  ;;  %v8192_v36 = vmax.f32 %v8064_v29, 0.0 }
 0x41e   :  { %v16037_v37 = vpop.f32.mrf.mxu1  ;;  %v8329_v45 = vpack.c.bf16 %v8257_v8, %v8241_v9  ;;  %v8177_v9 = vmax.f32 %v8049_v20, 0.0  ;;  %v8161_v53 = vmax.f32 %v8033_v22, 0.0  ;;  %v8145_v35 = vmax.f32 %v8017_v26, 0.0  ;;  %v16079_v26 = vld [vmem:[%s19977_s9] sm:$0xff]  }
 0x41f   :  { %v16047_v54 = vpop.f32.mrf.mxu0  ;;  %v8160_v20 = vmax.f32 %v8032_v6, 0.0 }
 0x420   :  { %v16049_v24 = vpop.f32.mrf.mxu1  ;;  %8432 = vmatprep.subr.bf16.mxu0 %v8329_v45  ;;  %v8297_v52 = vpack.c.bf16 %v8193_v46, %v8177_v9  ;;  %v8281_v49 = vpack.c.bf16 %v8161_v53, %v8145_v35 }
 0x421   :  { %v16057_v18 = vpop.f32.mrf.mxu0  ;;  %8433 = vmatpush1.bf16.msra.mxu0 %v8328_v25  ;;  %v8296_v25 = vpack.c.bf16 %v8192_v36, %v8176_v28 }
 0x422   :  { %v16059_v40 = vpop.f32.mrf.mxu1  ;;  %8434 = vmatprep.subr.bf16.mxu0 %v8313_v11  ;;  %v8144_v11 = vmax.f32 %v8016_v16, 0.0  ;;  %v7565_v16 = vadd.f32 %v16016_v14, %v15715_v30 }
 0x423   :  { %20553 = vst [vmem:[#allocation93_spill] sm:$0xff] %v16059_v40  ;;  %v16063_v8 = vpop.f32.mrf.mxu0 }
 0x424   :  { %v16065_v0 = vpop.f32.mrf.mxu1  ;;  %v8280_v46 = vpack.c.bf16 %v8160_v20, %v8144_v11  ;;  %v16107_v14 = vadd.f32 %v16052_v12, %v7565_v16 }
 0x425   :  { %20554 = vst [vmem:[#allocation94_spill] sm:$0xff] %v16065_v0  ;;  %v7578_v63 = vpop.f32.mrf.mxu0  ;;  %8435 = vmatpush1.bf16.msra.mxu0 %v8312_v27 }
 0x426   :  { %v16068_v45 = vpop.f32.mrf.mxu1  ;;  %8436 = vmatprep.subr.bf16.mxu0 %v8297_v52 }
 0x427   :  { %v7580_v15 = vpop.f32.mrf.mxu0 }
 0x428   :  { %v16070_v29 = vpop.f32.mrf.mxu1 }
 0x429   :  { %v7584_v1 = vpop.f32.mrf.mxu0  ;;  %8437 = vmatpush1.bf16.msra.mxu0 %v8296_v25 }
 0x42a   :  { %v16072_v22 = vpop.f32.mrf.mxu1  ;;  %8438 = vmatprep.subr.bf16.mxu0 %v8281_v49  ;;  %v16099_v49 = vld [vmem:[%s19977_s9 + $0x8] sm:$0xff]  }
 0x42b   :  { %v7586_v59 = vpop.f32.mrf.mxu0 }
 0x42c   :  { %v16074_v51 = vpop.f32.mrf.mxu1  ;;  %v7587_v0 = vadd.f32 %v7586_v59, %v15767_v33  ;;  %v7567_v33 = vadd.f32 %v16028_v50, %v15720_v56 }
 0x42d   :  { %v7588_v9 = vpop.f32.mrf.mxu0  ;;  %8439 = vmatpush1.bf16.msra.mxu0 %v8280_v46 }
 0x42e   :  { %v16081_v6 = vpop.f32.mrf.mxu1  ;;  %v8085_v56 = vadd.f32 %v15997_v42, %v7587_v0 }
 0x42f   :  { %v7590_v36 = vpop.f32.mrf.mxu0 }
 0x430   :  { %v16083_v27 = vpop.f32.mrf.mxu1  ;;  %11965 = vmatmul.mubr.msk.bf16.vlgmr.msra.gmra.mxu0 %vm20095_vm15, %v16079_v26  ;;  %v7591_v20 = vadd.f32 %v7590_v36, %v15784_v32  ;;  %v7581_v32 = vadd.f32 %v7580_v15, %v15751_v57  ;;  %v7569_v57 = vadd.f32 %v16035_v7, %v15722_v48  ;;  %v7575_v48 = vadd.f32 %v16057_v18, %v15729_v61 }
 0x431   :  { %v7594_v53 = vpop.f32.mrf.mxu0  ;;  %8466 = vmatprep.mubr.bf16.mxu0 %v20167_v39  ;;  %v8021_v61 = vadd.f32 %v16052_v12, %v7567_v33  ;;  %v8148_v33 = vmax.f32 %v16107_v14, 0.0  ;;  %v20555_v14 = vld [vmem:[#allocation46_spill] sm:$0xff] }
 0x432   :  { %v16088_v52 = vpop.f32.mrf.mxu1  ;;  %v7595_v11 = vadd.f32 %v7594_v53, %v15790_v60  ;;  %v8101_v44 = vadd.f32 %v15991_v34, %v7591_v20 }
 0x433   :  { %v7596_v28 = vpop.f32.mrf.mxu0 }
 0x434   :  { %v16092_v35 = vpop.f32.mrf.mxu1  ;;  %v7597_v25 = vadd.f32 %v7596_v28, %v15797_v10  ;;  %v7589_v10 = vadd.f32 %v7588_v9, %v15775_v47  ;;  %v7585_v47 = vadd.f32 %v7584_v1, %v15757_v2  ;;  %v7577_v9 = vadd.f32 %v16063_v8, %v15737_v31 }
 0x435   :  { %v7598_v46 = vpop.f32.mrf.mxu0  ;;  %v7579_v2 = vadd.f32 %v7578_v63, %v15742_v17  ;;  %v8036_v17 = vadd.f32 %v16042_v5, %v7569_v57  ;;  %v8052_v57 = vadd.f32 %v16023_v62, %v7575_v48 }
 0x436   :  { %v16102_v55 = vpop.f32.mrf.mxu1  ;;  %v7599_v30 = vadd.f32 %v7598_v46, %v15801_v21  ;;  %v8117_v60 = vadd.f32 %v15985_v38, %v7597_v25  ;;  %v8116_v21 = vadd.f32 %v15985_v38, %v7595_v11  ;;  %v8100_v7 = vadd.f32 %v15991_v34, %v7589_v10 }
 0x437   :  { %v7600_v36 = vpop.f32.mrf.mxu0  ;;  %v8084_v18 = vadd.f32 %v15997_v42, %v7585_v47  ;;  %v8213_v46 = vmax.f32 %v8085_v56, 0.0  ;;  %v8149_v56 = vmax.f32 %v8021_v61, 0.0 }
 0x438   :  { %v7513_v28 = vpop.f32.mrf.mxu1  ;;  %v8132_v53 = vadd.f32 %v15981_v43, %v7599_v30  ;;  %v7601_v40 = vadd.f32 %v7600_v36, %v15808_v3  ;;  %11966 = vmatmul.mubr.msk.bf16.gmra.mxu0 %vm20095_vm15, %v16099_v49  ;;  %v7571_v3 = vadd.f32 %v16047_v54, %v15727_v41  ;;  %v8069_v41 = vadd.f32 %v16012_v13, %v7581_v32 }
 0x439   :  { %v16123_v15 = vpop.f32.mrf.mxu0  ;;  %8476 = vmatprep.mubr.bf16.mxu0 %v20167_v39  ;;  %v8229_v54 = vmax.f32 %v8101_v44, 0.0  ;;  %v8245_v25 = vmax.f32 %v8117_v60, 0.0  ;;  %v8244_v8 = vmax.f32 %v8116_v21, 0.0  ;;  %v8053_v44 = vadd.f32 %v16023_v62, %v7577_v9 }
 0x43a   :  { %v7515_v59 = vpop.f32.mrf.mxu1  ;;  %v8133_v50 = vadd.f32 %v15981_v43, %v7601_v40  ;;  %v8260_v1 = vmax.f32 %v8132_v53, 0.0  ;;  %v16142_v40 = vld [vmem:[%s19977_s9 + $0x10] sm:$0xff]   ;;  %v8037_v11 = vadd.f32 %v16042_v5, %v7571_v3  ;;  %v8068_v32 = vadd.f32 %v16012_v13, %v7579_v2 }
 0x43b   :  { %v16136_v16 = vpop.f32.mrf.mxu0  ;;  %v8228_v10 = vmax.f32 %v8100_v7, 0.0  ;;  %v8197_v47 = vmax.f32 %v8069_v41, 0.0  ;;  %v8317_v21 = vpack.c.bf16 %v8229_v54, %v8213_v46 }
 0x43c   :  { %v7517_v20 = vpop.f32.mrf.mxu1  ;;  %v8261_v31 = vmax.f32 %v8133_v50, 0.0  ;;  %v8332_v36 = vpack.c.bf16 %v8260_v1, %v8244_v8  ;;  %v8212_v50 = vmax.f32 %v8084_v18, 0.0  ;;  %v8164_v1 = vmax.f32 %v8036_v17, 0.0  ;;  %v20557_v8 = vld [vmem:[#allocation35_spill] sm:$0xff]  ;;  %v20558_v18 = vld [vmem:[#allocation26_spill] sm:$0xff]  ;;  %v16174_v17 = vld [vmem:[%s19977_s9 + $0x18] sm:$0xff]  }
 0x43d   :  { %v16147_v0 = vpop.f32.mrf.mxu0  ;;  %v7518_v3 = vadd.f32 %v7517_v20, %v15818_v23  ;;  %v8165_v41 = vmax.f32 %v8037_v11, 0.0  ;;  %v8196_v20 = vmax.f32 %v8068_v32, 0.0  ;;  %v7508_v46 = vadd.f32 %v16092_v35, %v20558_v18  ;;  %v20560_v32 = vld [vmem:[#allocation39_spill] sm:$0xff] }
 0x43e   :  { %v7521_v63 = vpop.f32.mrf.mxu1  ;;  %v8333_v30 = vpack.c.bf16 %v8261_v31, %v8245_v25  ;;  %v8181_v25 = vmax.f32 %v8053_v44, 0.0  ;;  %v20556_v31 = vld [vmem:[#allocation28_spill] sm:$0xff]  ;;  %v20561_v35 = vld [vmem:[#allocation27_spill] sm:$0xff] }
 0x43f   :  { %v16152_v60 = vpop.f32.mrf.mxu0  ;;  %v7522_v7 = vadd.f32 %v7521_v63, %v20555_v14  ;;  %v7514_v54 = vadd.f32 %v7513_v28, %v20556_v31  ;;  %v8180_v63 = vmax.f32 %v8052_v57, 0.0  ;;  %v8099_v28 = vadd.f32 %v15991_v34, %v7518_v3  ;;  %v20562_v3 = vld [vmem:[#allocation25_spill] sm:$0xff]  ;;  %v20564_v18 = vld [vmem:[#allocation23_spill] sm:$0xff] }
 0x440   :  { %v7523_v53 = vpop.f32.mrf.mxu1  ;;  %11967 = vmatmul.mubr.msk.bf16.gmra.mxu0 %vm20095_vm15, %v16142_v40  ;;  %8578 = vmatprep.subr.bf16.mxu0 %v8333_v30  ;;  %v20559_v30 = vld [vmem:[#allocation44_spill] sm:$0xff]  ;;  %v8301_v14 = vpack.c.bf16 %v8197_v47, %v8181_v25 }
 0x441   :  { %v7524_v9 = vadd.f32 %v7523_v53, %v15829_v19  ;;  %v16160_v2 = vpop.f32.mrf.mxu0  ;;  %8579 = vmatpush1.bf16.msra.mxu0 %v8332_v36  ;;  %8486 = vmatprep.mubr.bf16.mxu0 %v20167_v39  ;;  %v8316_v19 = vpack.c.bf16 %v8228_v10, %v8212_v50  ;;  %v7516_v36 = vadd.f32 %v7515_v59, %v20559_v30 }
 0x442   :  { %v7525_v48 = vpop.f32.mrf.mxu1  ;;  %8580 = vmatprep.subr.bf16.mxu0 %v8317_v21  ;;  %v7512_v59 = vadd.f32 %v16102_v55, %v20561_v35  ;;  %v8114_v57 = vadd.f32 %v15985_v38, %v7522_v7  ;;  %v8284_v50 = vpack.c.bf16 %v8164_v1, %v8148_v33  ;;  %v8083_v25 = vadd.f32 %v15997_v42, %v7514_v54 }
 0x443   :  { %v7526_v23 = vadd.f32 %v7525_v48, %v20557_v8  ;;  %v16166_v61 = vpop.f32.mrf.mxu0  ;;  %v8115_v11 = vadd.f32 %v15985_v38, %v7524_v9  ;;  %v8285_v48 = vpack.c.bf16 %v8165_v41, %v8149_v56  ;;  %v7504_v9 = vadd.f32 %v16083_v27, %v20562_v3 }
 0x444   :  { %v7527_v53 = vpop.f32.mrf.mxu1  ;;  %v8300_v8 = vpack.c.bf16 %v8196_v20, %v8180_v63  ;;  %v7506_v7 = vadd.f32 %v16088_v52, %v20564_v18  ;;  %v8098_v33 = vadd.f32 %v15991_v34, %v7516_v36  ;;  %v8067_v27 = vadd.f32 %v16012_v13, %v7508_v46  ;;  %v20566_v36 = vld [vmem:[#allocation42_spill] sm:$0xff]  ;;  %v20567_v46 = vld [vmem:[#allocation33_spill] sm:$0xff] }
 0x445   :  { %v8130_v44 = vadd.f32 %v15981_v43, %v7526_v23  ;;  %v7528_v10 = vadd.f32 %v7527_v53, %v20560_v32  ;;  %v16180_v21 = vpop.f32.mrf.mxu0  ;;  %8581 = vmatpush1.bf16.msra.mxu0 %v8316_v19  ;;  %v20563_v19 = vld [vmem:[#allocation34_spill] sm:$0xff]  ;;  %v8227_v41 = vmax.f32 %v8099_v28, 0.0  ;;  %v8243_v54 = vmax.f32 %v8115_v11, 0.0 }
 0x446   :  { %v16185_v47 = vpop.f32.mrf.mxu1  ;;  %8582 = vmatprep.subr.bf16.mxu0 %v8301_v14  ;;  %v7498_v55 = vadd.f32 %v16074_v51, %v20563_v19  ;;  %v20565_v51 = vld [vmem:[#allocation32_spill] sm:$0xff]  ;;  %v7502_v53 = vadd.f32 %v16081_v6, %v20566_v36  ;;  %v8082_v63 = vadd.f32 %v15997_v42, %v7512_v59  ;;  %v8242_v14 = vmax.f32 %v8114_v57, 0.0  ;;  %v20568_v6 = vld [vmem:[#allocation30_spill] sm:$0xff] }
 0x447   :  { %v8131_v31 = vadd.f32 %v15981_v43, %v7528_v10  ;;  %v16191_v23 = vpop.f32.mrf.mxu0  ;;  %v8258_v1 = vmax.f32 %v8130_v44, 0.0  ;;  %v7494_v52 = vadd.f32 %v16070_v29, %v20565_v51  ;;  %v7496_v28 = vadd.f32 %v16072_v22, %v20567_v46 }
 0x448   :  { %v16198_v56 = vpop.f32.mrf.mxu1  ;;  %11968 = vmatmul.mubr.msk.bf16.gmra.mxu0 %vm20095_vm15, %v16174_v17  ;;  %v8051_v11 = vadd.f32 %v16023_v62, %v7504_v9  ;;  %v8211_v32 = vmax.f32 %v8083_v25, 0.0  ;;  %v8066_v3 = vadd.f32 %v16012_v13, %v7506_v7  ;;  %v8226_v29 = vmax.f32 %v8098_v33, 0.0 }
 0x449   :  { %v8259_v20 = vmax.f32 %v8131_v31, 0.0  ;;  %v16203_v30 = vpop.f32.mrf.mxu0  ;;  %8583 = vmatpush1.bf16.msra.mxu0 %v8300_v8  ;;  %8602 = vmatprep.mubr.bf16.mxu0 %v20167_v39  ;;  %v8330_v31 = vpack.c.bf16 %v8258_v1, %v8242_v14  ;;  %v7492_v59 = vadd.f32 %v16068_v45, %v20568_v6  ;;  %v8035_v57 = vadd.f32 %v16042_v5, %v7498_v55  ;;  %v20571_v6 = vld [vmem:[#allocation36_spill] sm:$0xff] }
 0x44a   :  { %v16211_v44 = vpop.f32.mrf.mxu1  ;;  %8584 = vmatprep.subr.bf16.mxu0 %v8285_v48  ;;  %v8195_v48 = vmax.f32 %v8067_v27, 0.0  ;;  %v8315_v19 = vpack.c.bf16 %v8227_v41, %v8211_v32  ;;  %v8050_v9 = vadd.f32 %v16023_v62, %v7502_v53  ;;  %v8210_v25 = vmax.f32 %v8082_v63, 0.0 }
 0x44b   :  { %v8331_v10 = vpack.c.bf16 %v8259_v20, %v8243_v54  ;;  %v7732_v35 = vpop.f32.mrf.mxu0  ;;  %v8019_v7 = vadd.f32 %v16052_v12, %v7494_v52  ;;  %v8034_v33 = vadd.f32 %v16042_v5, %v7496_v28  ;;  %v8179_v1 = vmax.f32 %v8051_v11, 0.0  ;;  %v20569_v11 = vld [vmem:[#allocation15_spill] sm:$0xff] }
 0x44c   :  { %v16217_v8 = vpop.f32.mrf.mxu1  ;;  %v8194_v54 = vmax.f32 %v8066_v3, 0.0  ;;  %v8314_v55 = vpack.c.bf16 %v8226_v29, %v8210_v25  ;;  %v8163_v41 = vmax.f32 %v8035_v57, 0.0  ;;  %v8178_v52 = vmax.f32 %v8050_v9, 0.0  ;;  %v20572_v57 = vld [vmem:[#allocation11_spill] sm:$0xff]  ;;  %v20573_v25 = vld [vmem:[#allocation48_spill] sm:$0xff] }
 0x44d   :  { %8505 = vmatprep.subr.bf16.mxu1 %v8331_v10  ;;  %v7734_v22 = vpop.f32.mrf.mxu0  ;;  %8585 = vmatpush1.bf16.msra.mxu0 %v8284_v50  ;;  %v8018_v50 = vadd.f32 %v16052_v12, %v7492_v59  ;;  %v8299_v20 = vpack.c.bf16 %v8195_v48, %v8179_v1  ;;  %v8147_v53 = vmax.f32 %v8019_v7, 0.0  ;;  %v8162_v63 = vmax.f32 %v8034_v33, 0.0  ;;  %v20570_v10 = vld [vmem:[#allocation22_spill] sm:$0xff]  ;;  %v20574_v33 = vld [vmem:[#allocation16_spill] sm:$0xff] }
 0x44e   :  { %v16223_v18 = vpop.f32.mrf.mxu1  ;;  %8506 = vmatpush1.bf16.msra.mxu1 %v8330_v31  ;;  %v8298_v46 = vpack.c.bf16 %v8194_v54, %v8178_v52  ;;  %v7711_v59 = vadd.f32 %v16123_v15, %v20571_v6  ;;  %v7733_v7 = vadd.f32 %v7732_v35, %v20573_v25 }
 0x44f   :  { %8507 = vmatprep.subr.bf16.mxu1 %v8315_v19  ;;  %v7736_v45 = vpop.f32.mrf.mxu0  ;;  %v8146_v29 = vmax.f32 %v8018_v50, 0.0  ;;  %v8283_v31 = vpack.c.bf16 %v8163_v41, %v8147_v53  ;;  %v20576_v50 = vld [vmem:[#allocation7_spill] sm:$0xff] }
 0x450   :  { %v16227_v27 = vpop.f32.mrf.mxu1  ;;  %11973 = vmatmul.mubr.msk.bf16.vlgmr.msra.gmra.mxu0 %vm20095_vm15, %v16079_v26  ;;  %v7737_v32 = vadd.f32 %v7736_v45, %v20569_v11  ;;  %v20575_v45 = vld [vmem:[#allocation43_spill] sm:$0xff]  ;;  %v7727_v41 = vadd.f32 %v16191_v23, %v20576_v50  ;;  %v20579_v23 = vld [vmem:[#allocation52_spill] sm:$0xff] }
 0x451   :  { %v7740_v51 = vpop.f32.mrf.mxu0  ;;  %8612 = vmatprep.mubr.bf16.mxu0 %v20167_v39  ;;  %v8282_v54 = vpack.c.bf16 %v8162_v63, %v8146_v29 }
 0x452   :  { %v16233_v36 = vpop.f32.mrf.mxu1  ;;  %8508 = vmatpush1.bf16.msra.mxu1 %v8314_v55  ;;  %v7741_v48 = vadd.f32 %v7740_v51, %v20572_v57  ;;  %v7713_v55 = vadd.f32 %v16136_v16, %v20575_v45  ;;  %v8105_v53 = vadd.f32 %v15991_v34, %v7737_v32  ;;  %v16260_v16 = vadd.f32 %v16052_v12, %v7711_v59 }
 0x453   :  { %8509 = vmatprep.subr.bf16.mxu1 %v8299_v20  ;;  %v7742_v14 = vpop.f32.mrf.mxu0  ;;  %v20577_v20 = vld [vmem:[#allocation50_spill] sm:$0xff]  ;;  %v8089_v59 = vadd.f32 %v15997_v42, %v7733_v7  ;;  %v20583_v7 = vld [vmem:[#allocation45_spill] sm:$0xff] }
 0x454   :  { %v16235_v28 = vpop.f32.mrf.mxu1  ;;  %v7743_v3 = vadd.f32 %v7742_v14, %v20570_v10  ;;  %v7735_v15 = vadd.f32 %v7734_v22, %v20577_v20  ;;  %v7731_v22 = vadd.f32 %v16203_v30, %v20579_v23  ;;  %v8120_v11 = vadd.f32 %v15985_v38, %v7741_v48  ;;  %v20582_v48 = vld [vmem:[#allocation40_spill] sm:$0xff]  ;;  %v20584_v20 = vld [vmem:[#allocation37_spill] sm:$0xff] }
 0x455   :  { %v7744_v19 = vpop.f32.mrf.mxu0  ;;  %v16275_v30 = vadd.f32 %v16052_v12, %v7713_v55  ;;  %v8233_v45 = vmax.f32 %v8105_v53, 0.0  ;;  %v7715_v55 = vadd.f32 %v16147_v0, %v20583_v7 }
 0x456   :  { %v16242_v9 = vpop.f32.mrf.mxu1  ;;  %8510 = vmatpush1.bf16.msra.mxu1 %v8298_v46  ;;  %v7745_v1 = vadd.f32 %v7744_v19, %v20574_v33  ;;  %v8121_v14 = vadd.f32 %v15985_v38, %v7743_v3  ;;  %v20578_v46 = vld [vmem:[#allocation31_spill] sm:$0xff]  ;;  %v7725_v19 = vadd.f32 %v16180_v21, %v20582_v48  ;;  %v8104_v25 = vadd.f32 %v15991_v34, %v7735_v15 }
 0x457   :  { %8511 = vmatprep.subr.bf16.mxu1 %v8283_v31  ;;  %v7746_v52 = vpop.f32.mrf.mxu0  ;;  %v20580_v3 = vld [vmem:[#allocation47_spill] sm:$0xff]  ;;  %v20581_v31 = vld [vmem:[#allocation38_spill] sm:$0xff]  ;;  %v7721_v21 = vadd.f32 %v16160_v2, %v20584_v20  ;;  %v8088_v15 = vadd.f32 %v15997_v42, %v7731_v22  ;;  %v20585_v2 = vld [vmem:[#allocation17_spill] sm:$0xff]  ;;  %v8040_v7 = vadd.f32 %v16042_v5, %v7715_v55 }
 0x458   :  { %v16251_v51 = vpop.f32.mrf.mxu1  ;;  %v8136_v35 = vadd.f32 %v15981_v43, %v7745_v1  ;;  %v7747_v63 = vadd.f32 %v7746_v52, %v20578_v46  ;;  %11974 = vmatmul.mubr.msk.bf16.gmra.mxu0 %vm20095_vm15, %v16099_v49  ;;  %v7717_v29 = vadd.f32 %v16152_v60, %v20580_v3  ;;  %v7723_v6 = vadd.f32 %v16166_v61, %v20581_v31 }
 0x459   :  { %v16265_v10 = vpop.f32.mrf.mxu0  ;;  %8622 = vmatprep.mubr.bf16.mxu0 %v20167_v39  ;;  %v8073_v60 = vadd.f32 %v16012_v13, %v7727_v41  ;;  %v8249_v61 = vmax.f32 %v8121_v14, 0.0  ;;  %v8248_v52 = vmax.f32 %v8120_v11, 0.0  ;;  %v8217_v14 = vmax.f32 %v8089_v59, 0.0 }
 0x45a   :  { %v7661_v32 = vpop.f32.mrf.mxu1  ;;  %8512 = vmatpush1.bf16.msra.mxu1 %v8282_v54  ;;  %v8137_v57 = vadd.f32 %v15981_v43, %v7747_v63  ;;  %v8264_v33 = vmax.f32 %v8136_v35, 0.0  ;;  %v8041_v41 = vadd.f32 %v16042_v5, %v7717_v29  ;;  %v8057_v53 = vadd.f32 %v16023_v62, %v7723_v6  ;;  %v20586_v6 = vld [vmem:[#allocation5_spill] sm:$0xff] }
 0x45b   :  { %v16280_v1 = vpop.f32.mrf.mxu0  ;;  %v8072_v23 = vadd.f32 %v16012_v13, %v7725_v19  ;;  %v8232_v0 = vmax.f32 %v8104_v25, 0.0  ;;  %v8201_v48 = vmax.f32 %v8073_v60, 0.0  ;;  %v8321_v29 = vpack.c.bf16 %v8233_v45, %v8217_v14  ;;  %v20588_v45 = vld [vmem:[#allocation13_spill] sm:$0xff] }
 0x45c   :  { %v7663_v54 = vpop.f32.mrf.mxu1  ;;  %v8265_v50 = vmax.f32 %v8137_v57, 0.0  ;;  %v8336_v3 = vpack.c.bf16 %v8264_v33, %v8248_v52  ;;  %v8152_v57 = vmax.f32 %v16260_v16, 0.0  ;;  %v8056_v19 = vadd.f32 %v16023_v62, %v7721_v21 }
 0x45d   :  { %11969 = vmatmul.mubr.msk.bf16.vlgmr.msra.gmra.mxu1 %vm20095_vm15, %v16079_v26  ;;  %v16290_v35 = vpop.f32.mrf.mxu0  ;;  %v7664_v22 = vadd.f32 %v7663_v54, %v20585_v2  ;;  %v8216_v25 = vmax.f32 %v8088_v15, 0.0  ;;  %v20587_v54 = vld [vmem:[#allocation9_spill] sm:$0xff]  ;;  %v8169_v20 = vmax.f32 %v8041_v41, 0.0  ;;  %v8185_v52 = vmax.f32 %v8057_v53, 0.0 }
 0x45e   :  { %v7667_v46 = vpop.f32.mrf.mxu1  ;;  %8539 = vmatprep.mubr.bf16.mxu1 %v20167_v39  ;;  %v8337_v63 = vpack.c.bf16 %v8265_v50, %v8249_v61  ;;  %v8153_v61 = vmax.f32 %v16275_v30, 0.0  ;;  %v7660_v14 = vadd.f32 %v16251_v51, %v20588_v45  ;;  %v20589_v30 = vld [vmem:[#allocation8_spill] sm:$0xff]  ;;  %v8200_v21 = vmax.f32 %v8072_v23, 0.0 }
 0x45f   :  { %v16296_v31 = vpop.f32.mrf.mxu0  ;;  %v7668_v50 = vadd.f32 %v7667_v46, %v20587_v54  ;;  %v8320_v15 = vpack.c.bf16 %v8232_v0, %v8216_v25  ;;  %v8103_v54 = vadd.f32 %v15991_v34, %v7664_v22  ;;  %v8305_v41 = vpack.c.bf16 %v8201_v48, %v8185_v52  ;;  %v20592_v51 = vld [vmem:[#allocation56_spill] sm:$0xff] }
 0x460   :  { %v7669_v11 = vpop.f32.mrf.mxu1  ;;  %11975 = vmatmul.mubr.msk.bf16.gmra.mxu0 %vm20095_vm15, %v16142_v40  ;;  %8724 = vmatprep.subr.bf16.mxu0 %v8337_v63  ;;  %v8184_v23 = vmax.f32 %v8056_v19, 0.0  ;;  %v8168_v48 = vmax.f32 %v8040_v7, 0.0  ;;  %v8087_v19 = vadd.f32 %v15997_v42, %v7660_v14 }
 0x461   :  { %v7670_v59 = vadd.f32 %v7669_v11, %v20586_v6  ;;  %v16305_v33 = vpop.f32.mrf.mxu0  ;;  %8725 = vmatpush1.bf16.msra.mxu0 %v8336_v3  ;;  %8632 = vmatprep.mubr.bf16.mxu0 %v20167_v39  ;;  %v20590_v3 = vld [vmem:[#allocation20_spill] sm:$0xff]  ;;  %v20591_v6 = vld [vmem:[#allocation21_spill] sm:$0xff]  ;;  %v8118_v22 = vadd.f32 %v15985_v38, %v7668_v50 }
 0x462   :  { %v7671_v60 = vpop.f32.mrf.mxu1  ;;  %8726 = vmatprep.subr.bf16.mxu0 %v8321_v29  ;;  %v7654_v11 = vadd.f32 %v16235_v28, %v20590_v3  ;;  %v7662_v46 = vadd.f32 %v7661_v32, %v20591_v6  ;;  %v20593_v28 = vld [vmem:[#allocation19_spill] sm:$0xff]  ;;  %v20596_v3 = vld [vmem:[#allocation12_spill] sm:$0xff] }
 0x463   :  { %v7672_v63 = vadd.f32 %v7671_v60, %v20589_v30  ;;  %v16313_v2 = vpop.f32.mrf.mxu0  ;;  %v8119_v53 = vadd.f32 %v15985_v38, %v7670_v59  ;;  %v7658_v32 = vadd.f32 %v16242_v9, %v20593_v28  ;;  %v8289_v59 = vpack.c.bf16 %v8169_v20, %v8153_v61  ;;  %v20594_v60 = vld [vmem:[#allocation24_spill] sm:$0xff]  ;;  %v20595_v9 = vld [vmem:[#allocation41_spill] sm:$0xff] }
 0x464   :  { %v7673_v55 = vpop.f32.mrf.mxu1  ;;  %v7650_v52 = vadd.f32 %v16227_v27, %v20594_v60  ;;  %v7644_v50 = vadd.f32 %v16217_v8, %v20595_v9  ;;  %v7652_v7 = vadd.f32 %v16233_v36, %v20596_v3  ;;  %v8102_v6 = vadd.f32 %v15991_v34, %v7662_v46  ;;  %v20597_v8 = vld [vmem:[#allocation49_spill] sm:$0xff] }
 0x465   :  { %v8134_v29 = vadd.f32 %v15981_v43, %v7672_v63  ;;  %v7674_v45 = vadd.f32 %v7673_v55, %v20592_v51  ;;  %11970 = vmatmul.mubr.msk.bf16.gmra.mxu1 %vm20095_vm15, %v16099_v49  ;;  %v16324_v0 = vpop.f32.mrf.mxu0  ;;  %8727 = vmatpush1.bf16.msra.mxu0 %v8320_v15  ;;  %v8304_v63 = vpack.c.bf16 %v8200_v21, %v8184_v23  ;;  %v8231_v20 = vmax.f32 %v8103_v54, 0.0  ;;  %v20598_v46 = vld [vmem:[#allocation53_spill] sm:$0xff] }
 0x466   :  { %v16329_v25 = vpop.f32.mrf.mxu1  ;;  %8549 = vmatprep.mubr.bf16.mxu1 %v20167_v39  ;;  %8728 = vmatprep.subr.bf16.mxu0 %v8305_v41  ;;  %v8071_v27 = vadd.f32 %v16012_v13, %v7654_v11  ;;  %v8247_v14 = vmax.f32 %v8119_v53, 0.0  ;;  %v7640_v36 = vadd.f32 %v16198_v56, %v20597_v8  ;;  %v8086_v51 = vadd.f32 %v15997_v42, %v7658_v32  ;;  %v20599_v11 = vld [vmem:[#allocation51_spill] sm:$0xff] }
 0x467   :  { %v8135_v30 = vadd.f32 %v15981_v43, %v7674_v45  ;;  %v16336_v15 = vpop.f32.mrf.mxu0  ;;  %v8262_v55 = vmax.f32 %v8134_v29, 0.0  ;;  %v7648_v29 = vadd.f32 %v16223_v18, %v20598_v46  ;;  %v8246_v45 = vmax.f32 %v8118_v22, 0.0  ;;  %v20600_v22 = vld [vmem:[#allocation54_spill] sm:$0xff] }
 0x468   :  { %v16343_v61 = vpop.f32.mrf.mxu1  ;;  %11976 = vmatmul.mubr.msk.bf16.gmra.mxu0 %vm20095_vm15, %v16174_v17  ;;  %v7642_v54 = vadd.f32 %v16211_v44, %v20599_v11  ;;  %v8055_v53 = vadd.f32 %v16023_v62, %v7650_v52  ;;  %v8215_v28 = vmax.f32 %v8087_v19, 0.0  ;;  %v8230_v56 = vmax.f32 %v8102_v6, 0.0 }
 0x469   :  { %v8263_v21 = vmax.f32 %v8135_v30, 0.0  ;;  %v16348_v41 = vpop.f32.mrf.mxu0  ;;  %8729 = vmatpush1.bf16.msra.mxu0 %v8304_v63  ;;  %8748 = vmatprep.mubr.bf16.mxu0 %v20167_v39  ;;  %v8070_v63 = vadd.f32 %v16012_v13, %v7652_v7  ;;  %v8334_v9 = vpack.c.bf16 %v8262_v55, %v8246_v45  ;;  %v8288_v18 = vpack.c.bf16 %v8168_v48, %v8152_v57 }
 0x46a   :  { %v16356_v23 = vpop.f32.mrf.mxu1  ;;  %8730 = vmatprep.subr.bf16.mxu0 %v8289_v59  ;;  %v7638_v59 = vadd.f32 %v16185_v47, %v20600_v22  ;;  %v8039_v3 = vadd.f32 %v16042_v5, %v7644_v50  ;;  %v8199_v44 = vmax.f32 %v8071_v27, 0.0  ;;  %v8319_v52 = vpack.c.bf16 %v8231_v20, %v8215_v28  ;;  %v20601_v28 = vld [vmem:[#allocation67_spill] sm:$0xff]  ;;  %v20603_v22 = vld [vmem:[#allocation69_spill] sm:$0xff] }
 0x46b   :  { %v8335_v60 = vpack.c.bf16 %v8263_v21, %v8247_v14  ;;  %v7878_v30 = vpop.f32.mrf.mxu0  ;;  %v8054_v7 = vadd.f32 %v16023_v62, %v7648_v29  ;;  %v8214_v6 = vmax.f32 %v8086_v51, 0.0  ;;  %v8023_v16 = vadd.f32 %v16052_v12, %v7640_v36 }
 0x46c   :  { %v16364_v32 = vpop.f32.mrf.mxu1  ;;  %v8038_v47 = vadd.f32 %v16042_v5, %v7642_v54  ;;  %v8183_v57 = vmax.f32 %v8055_v53, 0.0  ;;  %v8198_v50 = vmax.f32 %v8070_v63, 0.0  ;;  %v8022_v14 = vadd.f32 %v16052_v12, %v7638_v59  ;;  %v20602_v63 = vld [vmem:[#allocation71_spill] sm:$0xff] }
 0x46d   :  { %11971 = vmatmul.mubr.msk.bf16.gmra.mxu1 %vm20095_vm15, %v16142_v40  ;;  %8651 = vmatprep.subr.bf16.mxu1 %v8335_v60  ;;  %v7880_v19 = vpop.f32.mrf.mxu0  ;;  %v8318_v27 = vpack.c.bf16 %v8230_v56, %v8214_v6  ;;  %v8167_v21 = vmax.f32 %v8039_v3, 0.0  ;;  %v8182_v29 = vmax.f32 %v8054_v7, 0.0  ;;  %v8151_v36 = vmax.f32 %v8023_v16, 0.0  ;;  %v20605_v6 = vld [vmem:[#allocation73_spill] sm:$0xff] }
 0x46e   :  { %v16372_v55 = vpop.f32.mrf.mxu1  ;;  %8652 = vmatpush1.bf16.msra.mxu1 %v8334_v9  ;;  %8559 = vmatprep.mubr.bf16.mxu1 %v20167_v39  ;;  %v8303_v8 = vpack.c.bf16 %v8199_v44, %v8183_v57  ;;  %v8166_v45 = vmax.f32 %v8038_v47, 0.0  ;;  %v8150_v9 = vmax.f32 %v8022_v14, 0.0  ;;  %v20606_v57 = vld [vmem:[#allocation29_spill] sm:$0xff] }
 0x46f   :  { %8653 = vmatprep.subr.bf16.mxu1 %v8319_v52  ;;  %8731 = vmatpush1.bf16.msra.mxu0 %v8288_v18  ;;  %v7882_v48 = vpop.f32.mrf.mxu0  ;;  %v8302_v54 = vpack.c.bf16 %v8198_v50, %v8182_v29  ;;  %v8287_v18 = vpack.c.bf16 %v8167_v21, %v8151_v36  ;;  %v20604_v52 = vld [vmem:[#allocation63_spill] sm:$0xff]  ;;  %v20608_v14 = vld [vmem:[#allocation65_spill] sm:$0xff] }
 0x470   :  { %v16377_v20 = vpop.f32.mrf.mxu1  ;;  %v7883_v60 = vadd.f32 %v7882_v48, %v20601_v28  ;;  %v7879_v7 = vadd.f32 %v7878_v30, %v20604_v52  ;;  %v8286_v47 = vpack.c.bf16 %v8166_v45, %v8150_v9  ;;  %v7859_v48 = vadd.f32 %v16280_v1, %v20606_v57  ;;  %v20607_v50 = vld [vmem:[#allocation59_spill] sm:$0xff]  ;;  %v20610_v45 = vld [vmem:[#allocation14_spill] sm:$0xff]  ;;  %v20612_v9 = vld [vmem:[#allocation61_spill] sm:$0xff] }
 0x471   :  { %v7886_v46 = vpop.f32.mrf.mxu0  ;;  %v7881_v21 = vadd.f32 %v7880_v19, %v20608_v14  ;;  %v7857_v28 = vadd.f32 %v16265_v10, %v20610_v45  ;;  %v20615_v57 = vld [vmem:[#allocation18_spill] sm:$0xff] }
 0x472   :  { %v16380_v51 = vpop.f32.mrf.mxu1  ;;  %8654 = vmatpush1.bf16.msra.mxu1 %v8318_v27  ;;  %11981 = vmatmul.mubr.msk.bf16.vlgmr.msra.gmra.mxu0 %vm20095_vm15, %v16079_v26  ;;  %v7887_v59 = vadd.f32 %v7886_v46, %v20603_v22  ;;  %v7873_v27 = vadd.f32 %v16336_v15, %v20607_v50  ;;  %v8109_v29 = vadd.f32 %v15991_v34, %v7883_v60  ;;  %v20613_v60 = vld [vmem:[#allocation55_spill] sm:$0xff]  ;;  %v20616_v50 = vld [vmem:[#allocation6_spill] sm:$0xff] }
 0x473   :  { %8655 = vmatprep.subr.bf16.mxu1 %v8303_v8  ;;  %v7888_v11 = vpop.f32.mrf.mxu0  ;;  %8758 = vmatprep.mubr.bf16.mxu0 %v20167_v39  ;;  %v7877_v15 = vadd.f32 %v16348_v41, %v20612_v9  ;;  %v8093_v22 = vadd.f32 %v15997_v42, %v7879_v7  ;;  %v16420_v10 = vadd.f32 %v16052_v12, %v7859_v48 }
 0x474   :  { %v16385_v53 = vpop.f32.mrf.mxu1  ;;  %v7889_v56 = vadd.f32 %v7888_v11, %v20602_v63  ;;  %v20609_v11 = vld [vmem:[#allocation75_spill] sm:$0xff]  ;;  %v20611_v63 = vld [vmem:[#allocation10_spill] sm:$0xff]  ;;  %v8124_v19 = vadd.f32 %v15985_v38, %v7887_v59  ;;  %v8108_v59 = vadd.f32 %v15991_v34, %v7881_v21  ;;  %v8237_v7 = vmax.f32 %v8109_v29, 0.0 }
 0x475   :  { %11972 = vmatmul.mubr.msk.bf16.gmra.mxu1 %vm20095_vm15, %v16174_v17  ;;  %v7890_v3 = vpop.f32.mrf.mxu0  ;;  %v7863_v1 = vadd.f32 %v16296_v31, %v20611_v63  ;;  %v20614_v31 = vld [vmem:[#allocation57_spill] sm:$0xff]  ;;  %v7861_v48 = vadd.f32 %v16290_v35, %v20615_v57  ;;  %v8092_v14 = vadd.f32 %v15997_v42, %v7877_v15  ;;  %v20617_v35 = vld [vmem:[#allocation78_spill] sm:$0xff] }
 0x476   :  { %v16392_v44 = vpop.f32.mrf.mxu1  ;;  %8656 = vmatpush1.bf16.msra.mxu1 %v8302_v54  ;;  %8675 = vmatprep.mubr.bf16.mxu1 %v20167_v39  ;;  %v7891_v16 = vadd.f32 %v7890_v3, %v20605_v6  ;;  %v8125_v36 = vadd.f32 %v15985_v38, %v7889_v56  ;;  %v7869_v56 = vadd.f32 %v16313_v2, %v20613_v60  ;;  %v8252_v21 = vmax.f32 %v8124_v19, 0.0  ;;  %v20618_v60 = vld [vmem:[#allocation80_spill] sm:$0xff] }
 0x477   :  { %8657 = vmatprep.subr.bf16.mxu1 %v8287_v18  ;;  %v7892_v8 = vpop.f32.mrf.mxu0  ;;  %v7871_v41 = vadd.f32 %v16324_v0, %v20614_v31  ;;  %v8077_v2 = vadd.f32 %v16012_v13, %v7873_v27  ;;  %v7867_v0 = vadd.f32 %v16305_v33, %v20616_v50  ;;  %v8045_v27 = vadd.f32 %v16042_v5, %v7863_v1  ;;  %v20619_v31 = vld [vmem:[#allocation79_spill] sm:$0xff]  ;;  %v20622_v50 = vld [vmem:[#allocation72_spill] sm:$0xff] }
 0x478   :  { %v7805_v46 = vpop.f32.mrf.mxu1  ;;  %v8140_v30 = vadd.f32 %v15981_v43, %v7891_v16  ;;  %v7893_v54 = vadd.f32 %v7892_v8, %v20609_v11  ;;  %v8253_v16 = vmax.f32 %v8125_v36, 0.0  ;;  %v8061_v29 = vadd.f32 %v16023_v62, %v7869_v56 }
 0x479   :  { %v8221_v36 = vmax.f32 %v8093_v22, 0.0  ;;  %v8076_v11 = vadd.f32 %v16012_v13, %v7871_v41  ;;  %v16440_v33 = vadd.f32 %v16052_v12, %v7857_v28  ;;  %v8205_v15 = vmax.f32 %v8077_v2, 0.0  ;;  %v20620_v28 = vld [vmem:[#allocation76_spill] sm:$0xff] }
 0x47a   :  { %v7807_v18 = vpop.f32.mrf.mxu1  ;;  %8658 = vmatpush1.bf16.msra.mxu1 %v8286_v47  ;;  %v8141_v3 = vadd.f32 %v15981_v43, %v7893_v54  ;;  %11982 = vmatmul.mubr.msk.bf16.gmra.mxu0 %vm20095_vm15, %v16099_v49  ;;  %v8268_v52 = vmax.f32 %v8140_v30, 0.0  ;;  %v8236_v54 = vmax.f32 %v8108_v59, 0.0  ;;  %v8157_v1 = vmax.f32 %v16420_v10, 0.0 }
 0x47b   :  { %8768 = vmatprep.mubr.bf16.mxu0 %v20167_v39  ;;  %v8325_v19 = vpack.c.bf16 %v8237_v7, %v8221_v36  ;;  %v8060_v56 = vadd.f32 %v16023_v62, %v7867_v0  ;;  %v8220_v22 = vmax.f32 %v8092_v14, 0.0  ;;  %v7806_v2 = vadd.f32 %v7805_v46, %v20620_v28  ;;  %v20621_v7 = vld [vmem:[#allocation81_spill] sm:$0xff]  ;;  %v20624_v46 = vld [vmem:[#allocation82_spill] sm:$0xff] }
 0x47c   :  { %v7809_v6 = vpop.f32.mrf.mxu1  ;;  %v8269_v47 = vmax.f32 %v8141_v3, 0.0  ;;  %v8340_v45 = vpack.c.bf16 %v8268_v52, %v8252_v21  ;;  %v8044_v52 = vadd.f32 %v16042_v5, %v7861_v48  ;;  %v8204_v10 = vmax.f32 %v8076_v11, 0.0  ;;  %v20623_v14 = vld [vmem:[#allocation77_spill] sm:$0xff]  ;;  %v20629_v28 = vld [vmem:[#allocation66_spill] sm:$0xff] }
 0x47d   :  { %11977 = vmatmul.mubr.msk.bf16.vlgmr.msra.gmra.mxu1 %vm20095_vm15, %v16079_v26  ;;  %v7810_v63 = vadd.f32 %v7809_v6, %v20617_v35  ;;  %v8173_v6 = vmax.f32 %v8045_v27, 0.0  ;;  %v8324_v57 = vpack.c.bf16 %v8236_v54, %v8220_v22  ;;  %v7800_v0 = vadd.f32 %v16385_v53, %v20622_v50  ;;  %v20625_v54 = vld [vmem:[#allocation74_spill] sm:$0xff] }
 0x47e   :  { %v7813_v8 = vpop.f32.mrf.mxu1  ;;  %8685 = vmatprep.mubr.bf16.mxu1 %v20167_v39  ;;  %v8341_v30 = vpack.c.bf16 %v8269_v47, %v8253_v16  ;;  %v8189_v16 = vmax.f32 %v8061_v29, 0.0  ;;  %v7808_v21 = vadd.f32 %v7807_v18, %v20623_v14  ;;  %v8188_v11 = vmax.f32 %v8060_v56, 0.0  ;;  %v20627_v56 = vld [vmem:[#allocation64_spill] sm:$0xff]  ;;  %v20628_v22 = vld [vmem:[#allocation70_spill] sm:$0xff] }
 0x47f   :  { %v7814_v41 = vadd.f32 %v7813_v8, %v20619_v31  ;;  %v8107_v48 = vadd.f32 %v15991_v34, %v7810_v63  ;;  %v7804_v53 = vadd.f32 %v16392_v44, %v20625_v54  ;;  %v8172_v35 = vmax.f32 %v8044_v52, 0.0 }
 0x480   :  { %v7815_v9 = vpop.f32.mrf.mxu1  ;;  %8870 = vmatprep.subr.bf16.mxu0 %v8341_v30  ;;  %v8309_v27 = vpack.c.bf16 %v8205_v15, %v8189_v16  ;;  %v8293_v63 = vpack.c.bf16 %v8173_v6, %v8157_v1  ;;  %v7790_v44 = vadd.f32 %v16364_v32, %v20627_v56  ;;  %v7798_v31 = vadd.f32 %v16380_v51, %v20628_v22 }
 0x481   :  { %v7816_v3 = vadd.f32 %v7815_v9, %v20618_v60  ;;  %8871 = vmatpush1.bf16.msra.mxu0 %v8340_v45  ;;  %v8122_v18 = vadd.f32 %v15985_v38, %v7814_v41  ;;  %v20626_v9 = vld [vmem:[#allocation68_spill] sm:$0xff]  ;;  %v8106_v41 = vadd.f32 %v15991_v34, %v7808_v21  ;;  %v8075_v1 = vadd.f32 %v16012_v13, %v7800_v0 }
 0x482   :  { %v7817_v59 = vpop.f32.mrf.mxu1  ;;  %11983 = vmatmul.mubr.msk.bf16.gmra.mxu0 %vm20095_vm15, %v16142_v40  ;;  %8872 = vmatprep.subr.bf16.mxu0 %v8325_v19  ;;  %v7796_v15 = vadd.f32 %v16377_v20, %v20626_v9  ;;  %v8091_v19 = vadd.f32 %v15997_v42, %v7806_v2  ;;  %v8235_v6 = vmax.f32 %v8107_v48, 0.0  ;;  %v7794_v2 = vadd.f32 %v16372_v55, %v20629_v28  ;;  %v20631_v55 = vld [vmem:[#allocation62_spill] sm:$0xff] }
 0x483   :  { %v7818_v47 = vadd.f32 %v7817_v59, %v20621_v7  ;;  %8778 = vmatprep.mubr.bf16.mxu0 %v20167_v39  ;;  %v8123_v29 = vadd.f32 %v15985_v38, %v7816_v3  ;;  %v8308_v3 = vpack.c.bf16 %v8204_v10, %v8188_v11  ;;  %v8090_v7 = vadd.f32 %v15997_v42, %v7804_v53  ;;  %v20630_v10 = vld [vmem:[#allocation60_spill] sm:$0xff] }
 0x484   :  { %v7819_v8 = vpop.f32.mrf.mxu1  ;;  %v8250_v32 = vmax.f32 %v8122_v18, 0.0  ;;  %v8059_v50 = vadd.f32 %v16023_v62, %v7796_v15  ;;  %v8219_v0 = vmax.f32 %v8091_v19, 0.0  ;;  %v7788_v21 = vadd.f32 %v16356_v23, %v20631_v55 }
 0x485   :  { %v8138_v36 = vadd.f32 %v15981_v43, %v7818_v47  ;;  %v7820_v30 = vadd.f32 %v7819_v8, %v20624_v46  ;;  %11978 = vmatmul.mubr.msk.bf16.gmra.mxu1 %vm20095_vm15, %v16099_v49  ;;  %8873 = vmatpush1.bf16.msra.mxu0 %v8324_v57  ;;  %v8251_v20 = vmax.f32 %v8123_v29, 0.0  ;;  %v8156_v47 = vmax.f32 %v16440_v33, 0.0 }
 0x486   :  { %v16464_v45 = vpop.f32.mrf.mxu1  ;;  %8695 = vmatprep.mubr.bf16.mxu1 %v20167_v39  ;;  %8874 = vmatprep.subr.bf16.mxu0 %v8309_v27  ;;  %v7786_v57 = vadd.f32 %v16343_v61, %v20630_v10  ;;  %v8074_v33 = vadd.f32 %v16012_v13, %v7798_v31  ;;  %v8234_v48 = vmax.f32 %v8106_v41, 0.0  ;;  %v8043_v29 = vadd.f32 %v16042_v5, %v7790_v44 }
 0x487   :  { %v8139_v60 = vadd.f32 %v15981_v43, %v7820_v30  ;;  %v8266_v59 = vmax.f32 %v8138_v36, 0.0  ;;  %v8203_v36 = vmax.f32 %v8075_v1, 0.0  ;;  %v8292_v46 = vpack.c.bf16 %v8172_v35, %v8156_v47  ;;  %v20632_v30 = vld [vmem:[#allocation58_spill] sm:$0xff] }
 0x488   :  { %v16476_v52 = vpop.f32.mrf.mxu1  ;;  %v8323_v61 = vpack.c.bf16 %v8235_v6, %v8219_v0  ;;  %v7784_v11 = vadd.f32 %v16329_v25, %v20632_v30  ;;  %v8058_v23 = vadd.f32 %v16023_v62, %v7794_v2  ;;  %v8218_v54 = vmax.f32 %v8090_v7, 0.0  ;;  %v16520_v7 = vld [vmem:[%s19977_s9] sm:$0xff]  }
 0x489   :  { %v8267_v16 = vmax.f32 %v8139_v60, 0.0  ;;  %8875 = vmatpush1.bf16.msra.mxu0 %v8308_v3  ;;  %v8338_v8 = vpack.c.bf16 %v8266_v59, %v8250_v32  ;;  %v8027_v18 = vadd.f32 %v16052_v12, %v7786_v57  ;;  %v8042_v35 = vadd.f32 %v16042_v5, %v7788_v21  ;;  %v20634_v21 = vld [vmem:[#allocation90_spill] sm:$0xff] }
 0x48a   :  { %v16483_v51 = vpop.f32.mrf.mxu1  ;;  %11984 = vmatmul.mubr.msk.bf16.gmra.mxu0 %vm20095_vm15, %v16174_v17  ;;  %8876 = vmatprep.subr.bf16.mxu0 %v8293_v63  ;;  %v8187_v63 = vmax.f32 %v8059_v50, 0.0  ;;  %v8202_v9 = vmax.f32 %v8074_v33, 0.0  ;;  %v8322_v15 = vpack.c.bf16 %v8234_v48, %v8218_v54  ;;  %v8171_v60 = vmax.f32 %v8043_v29, 0.0  ;;  %v20635_v48 = vld [vmem:[#allocation92_spill] sm:$0xff] }
 0x48b   :  { %v8339_v14 = vpack.c.bf16 %v8267_v16, %v8251_v20  ;;  %8894 = vmatprep.mubr.bf16.mxu0 %v20167_v39  ;;  %v8026_v3 = vadd.f32 %v16052_v12, %v7784_v11  ;;  %v8186_v56 = vmax.f32 %v8058_v23, 0.0  ;;  %v8155_v22 = vmax.f32 %v8027_v18, 0.0  ;;  %v20638_v11 = vld [vmem:[#allocation88_spill] sm:$0xff] }
 0x48c   :  { %v16494_v27 = vpop.f32.mrf.mxu1  ;;  %v8307_v25 = vpack.c.bf16 %v8203_v36, %v8187_v63  ;;  %v8170_v31 = vmax.f32 %v8042_v35, 0.0  ;;  %v20636_v36 = vld [vmem:[#allocation94_spill] sm:$0xff] }
 0x48d   :  { %11979 = vmatmul.mubr.msk.bf16.gmra.mxu1 %vm20095_vm15, %v16142_v40  ;;  %8797 = vmatprep.subr.bf16.mxu1 %v8339_v14  ;;  %v8306_v41 = vpack.c.bf16 %v8202_v9, %v8186_v56  ;;  %v8291_v1 = vpack.c.bf16 %v8171_v60, %v8155_v22  ;;  %v8154_v6 = vmax.f32 %v8026_v3, 0.0  ;;  %v20633_v14 = vld [vmem:[#allocation93_spill] sm:$0xff]  ;;  %v20639_v63 = vld [vmem:[#allocation86_spill] sm:$0xff] }
 0x48e   :  { %v16502_v53 = vpop.f32.mrf.mxu1  ;;  %8798 = vmatpush1.bf16.msra.mxu1 %v8338_v8  ;;  %8705 = vmatprep.mubr.bf16.mxu1 %v20167_v39  ;;  %v7936_v35 = vadd.f32 %v16494_v27, %v20639_v63  ;;  %v20640_v9 = vld [vmem:[#allocation89_spill] sm:$0xff] }
 0x48f   :  { %8799 = vmatprep.subr.bf16.mxu1 %v8323_v61  ;;  %8877 = vmatpush1.bf16.msra.mxu0 %v8292_v46  ;;  %v8290_v16 = vpack.c.bf16 %v8170_v31, %v8154_v6  ;;  %v20641_v31 = vld [vmem:[#allocation87_spill] sm:$0xff]  ;;  %v20643_v6 = vld [vmem:[#allocation85_spill] sm:$0xff] }
 0x490   :  { %v7941_v19 = vpop.f32.mrf.mxu1 }
 0x491   :  { %v7942_v23 = vadd.f32 %v7941_v19, %v20638_v11  ;;  %v7940_v19 = vadd.f32 %v16502_v53, %v20641_v31  ;;  %v16603_v11 = vpop.permute.xlu0 %8384 }
 0x492   :  { %v7943_v44 = vpop.f32.mrf.mxu1  ;;  %8800 = vmatpush1.bf16.msra.mxu1 %v8322_v15  ;;  %11989 = vmatmul.mubr.msk.bf16.vlgmr.msra.gmra.mxu0 %vm20095_vm15, %v16079_v26 }
 0x493   :  { %8801 = vmatprep.subr.bf16.mxu1 %v8307_v25  ;;  %8904 = vmatprep.mubr.bf16.mxu0 %v20167_v39  ;;  %v7944_v15 = vadd.f32 %v7943_v44, %v20640_v9 }
 0x494   :  { %v7945_v59 = vpop.f32.mrf.mxu1 }
 0x495   :  { %11980 = vmatmul.mubr.msk.bf16.gmra.mxu1 %vm20095_vm15, %v16174_v17  ;;  %v7946_v33 = vadd.f32 %v7945_v59, %v20634_v21  ;;  %v8078_v53 = vadd.f32 %v16012_v13, %v7944_v15 }
 0x496   :  { %v7949_v20 = vpop.f32.mrf.mxu1  ;;  %8802 = vmatpush1.bf16.msra.mxu1 %v8306_v41  ;;  %8821 = vmatprep.mubr.bf16.mxu1 %v20167_v39 }
 0x497   :  { %8803 = vmatprep.subr.bf16.mxu1 %v8291_v1  ;;  %v8079_v3 = vadd.f32 %v16012_v13, %v7946_v33 }
 0x498   :  { %v7951_v28 = vpop.f32.mrf.mxu1 }
 0x499   :  { %v7952_v0 = vadd.f32 %v7951_v28, %v16006_v4  ;;  %v16542_v4 = vld [vmem:[%s19977_s9 + $0x8] sm:$0xff]   ;;  %v8047_v28 = vadd.f32 %v16042_v5, %v7936_v35  ;;  %v16607_v35 = vpop.permute.xlu0 %8374 }
 0x49a   :  { %v7953_v26 = vpop.f32.mrf.mxu1  ;;  %8804 = vmatpush1.bf16.msra.mxu1 %v8290_v16  ;;  %11990 = vmatmul.mubr.msk.bf16.gmra.mxu0 %vm20095_vm15, %v16099_v49 }
 0x49b   :  { %8914 = vmatprep.mubr.bf16.mxu0 %v20167_v39  ;;  %v7954_v8 = vadd.f32 %v7953_v26, %v20635_v48  ;;  %v8095_v54 = vadd.f32 %v15997_v42, %v7952_v0  ;;  %v8207_v26 = vmax.f32 %v8079_v3, 0.0 }
 0x49c   :  { %v7955_v2 = vpop.f32.mrf.mxu1 }
 0x49d   :  { %11985 = vmatmul.mubr.msk.bf16.vlgmr.msra.gmra.mxu1 %vm20095_vm15, %v16520_v7  ;;  %v7956_v10 = vadd.f32 %v7955_v2, %v16030_v58  ;;  %v8110_v60 = vadd.f32 %v15991_v34, %v7954_v8  ;;  %v8223_v44 = vmax.f32 %v8095_v54, 0.0 }
 0x49e   :  { %v7959_v32 = vpop.f32.mrf.mxu1  ;;  %8831 = vmatprep.mubr.bf16.mxu1 %v20167_v39 }
 0x49f   :  { %v7960_v49 = vadd.f32 %v7959_v32, %v16037_v37  ;;  %v8111_v58 = vadd.f32 %v15991_v34, %v7956_v10  ;;  %v8063_v34 = vadd.f32 %v16023_v62, %v7942_v23  ;;  %v8238_v16 = vmax.f32 %v8110_v60, 0.0  ;;  %v20644_v32 = vld [vmem:[#allocation83_spill] sm:$0xff] }
 0x4a0   :  { %v7961_v47 = vpop.f32.mrf.mxu1 }
 0x4a1   :  { %v7962_v57 = vadd.f32 %v7961_v47, %v16049_v24  ;;  %v8126_v30 = vadd.f32 %v15985_v38, %v7960_v49  ;;  %v8239_v56 = vmax.f32 %v8111_v58, 0.0  ;;  %v7930_v47 = vadd.f32 %v16464_v45, %v20644_v32 }
 0x4a2   :  { %v7963_v50 = vpop.f32.mrf.mxu1  ;;  %11991 = vmatmul.mubr.msk.bf16.gmra.mxu0 %vm20095_vm15, %v16142_v40  ;;  %v20637_v40 = vld [vmem:[#allocation91_spill] sm:$0xff] }
 0x4a3   :  { %v7964_v55 = vadd.f32 %v7963_v50, %v20633_v14  ;;  %8924 = vmatprep.mubr.bf16.mxu0 %v20167_v39  ;;  %v8127_v24 = vadd.f32 %v15985_v38, %v7962_v57  ;;  %v7950_v61 = vadd.f32 %v7949_v20, %v20637_v40  ;;  %v8254_v59 = vmax.f32 %v8126_v30, 0.0 }
 0x4a4   :  { %v7965_v29 = vpop.f32.mrf.mxu1  ;;  %v7934_v20 = vadd.f32 %v16483_v51, %v20643_v6  ;;  %v8327_v2 = vpack.c.bf16 %v8239_v56, %v8223_v44  ;;  %v8062_v51 = vadd.f32 %v16023_v62, %v7940_v19  ;;  %v8191_v57 = vmax.f32 %v8063_v34, 0.0 }
 0x4a5   :  { %v8142_v37 = vadd.f32 %v15981_v43, %v7964_v55  ;;  %v7966_v46 = vadd.f32 %v7965_v29, %v20636_v36  ;;  %11986 = vmatmul.mubr.msk.bf16.gmra.mxu1 %vm20095_vm15, %v16542_v4  ;;  %v8255_v38 = vmax.f32 %v8127_v24, 0.0  ;;  %v8094_v41 = vadd.f32 %v15997_v42, %v7950_v61  ;;  %v16601_v61 = vpop.permute.xlu1 %8389 }
 0x4a6   :  { %8841 = vmatprep.mubr.bf16.mxu1 %v20167_v39  ;;  %v8046_v49 = vadd.f32 %v16042_v5, %v7934_v20  ;;  %v8206_v50 = vmax.f32 %v8078_v53, 0.0  ;;  %v8175_v14 = vmax.f32 %v8047_v28, 0.0  ;;  %v8311_v55 = vpack.c.bf16 %v8207_v26, %v8191_v57  ;;  %v16626_v20 = vld [vmem:[%s20645_s4] sm:$0x77]  ;;  %v16631_v53 = vld [vmem:[%s20645_s4 + $0x8] sm:$0x77] }
 0x4a7   :  { %v8143_v18 = vadd.f32 %v15981_v43, %v7966_v46  ;;  %v8270_v25 = vmax.f32 %v8142_v37, 0.0  ;;  %v20642_v43 = vld [vmem:[#allocation84_spill] sm:$0xff]  ;;  %v8222_v10 = vmax.f32 %v8094_v41, 0.0  ;;  %v8030_v21 = vadd.f32 %v16052_v12, %v7930_v47  ;;  %v16617_v41 = vpop.permute.xlu0 %8364  ;;  %20646 = vst [vmem:[#allocation46_spill] sm:$0xff] %v16626_v20  ;;  %20647 = vst [vmem:[#allocation28_spill] sm:$0xff] %v16631_v53 }
 0x4a8   :  { %v7932_v27 = vadd.f32 %v16476_v52, %v20642_v43  ;;  %v12289_v52 = vld [vmem:[%s19977_s9 + $0x10] sm:$0xff]   ;;  %v8190_v33 = vmax.f32 %v8062_v51, 0.0  ;;  %v8174_v62 = vmax.f32 %v8046_v49, 0.0  ;;  %v2647_v26 = vand.u32 2139095040, %v16626_v20 }
 0x4a9   :  { %v8271_v22 = vmax.f32 %v8143_v18, 0.0  ;;  %v8342_v42 = vpack.c.bf16 %v8270_v25, %v8254_v59  ;;  %v8326_v0 = vpack.c.bf16 %v8238_v16, %v8222_v10  ;;  %v8158_v29 = vmax.f32 %v8030_v21, 0.0  ;;  %v16605_v18 = vpop.permute.xlu1 %8379 }
 0x4aa   :  { %11992 = vmatmul.mubr.msk.bf16.gmra.mxu0 %vm20095_vm15, %v16174_v17  ;;  %v8031_v13 = vadd.f32 %v16052_v12, %v7932_v27  ;;  %v8310_v48 = vpack.c.bf16 %v8206_v50, %v8190_v33  ;;  %v12290_v12 = vld [vmem:[%s19977_s9 + $0x18] sm:$0xff]   ;;  %v2648_v50 = vshrl.u32 %v2647_v26, 23 }
 0x4ab   :  { %v8343_v1 = vpack.c.bf16 %v8271_v22, %v8255_v38  ;;  %9333 = vmatprep.mubr.bf16.mxu0 %v20167_v39  ;;  %v8294_v5 = vpack.c.bf16 %v8174_v62, %v8158_v29  ;;  %v16641_v33 = vpop.permute.xlu0 %8354 }
 0x4ac   :  { %v8159_v45 = vmax.f32 %v8031_v13, 0.0 }
 0x4ad   :  { %11987 = vmatmul.mubr.msk.bf16.gmra.mxu1 %vm20095_vm15, %v12289_v52  ;;  %8943 = vmatprep.subr.bf16.mxu1 %v8343_v1  ;;  %v16612_v56 = vpop.permute.xlu1 %8369 }
 0x4ae   :  { %8944 = vmatpush1.bf16.msra.mxu1 %v8342_v42  ;;  %8851 = vmatprep.mubr.bf16.mxu1 %v20167_v39  ;;  %v8295_v8 = vpack.c.bf16 %v8175_v14, %v8159_v45 }
 0x4af   :  { %8945 = vmatprep.subr.bf16.mxu1 %v8327_v2 }
 0x4b1   :  { %v16637_v51 = vpop.permute.xlu1 %8359 }
 0x4b2   :  { %8946 = vmatpush1.bf16.msra.mxu1 %v8326_v0 }
 0x4b3   :  { %8947 = vmatprep.subr.bf16.mxu1 %v8311_v55 }
 0x4b5   :  { %11988 = vmatmul.mubr.msk.bf16.gmra.mxu1 %vm20095_vm15, %v16174_v17 }
 0x4b6   :  { %8948 = vmatpush1.bf16.msra.mxu1 %v8310_v48  ;;  %8967 = vmatprep.mubr.bf16.mxu1 %v20167_v39 }
 0x4b7   :  { %8949 = vmatprep.subr.bf16.mxu1 %v8295_v8  ;;  %v11729_v8 = vadd.s32 4294967169, %v2648_v50 }
 0x4ba   :  { %8950 = vmatpush1.bf16.msra.mxu1 %v8294_v5 }
 0x4bd   :  { %11993 = vmatmul.mubr.msk.bf16.vlgmr.msra.gmra.mxu1 %vm20095_vm15, %v16520_v7 }
 0x4be   :  { %8977 = vmatprep.mubr.bf16.mxu1 %v20167_v39 }
 0x4c5   :  { %11994 = vmatmul.mubr.msk.bf16.gmra.mxu1 %vm20095_vm15, %v16542_v4 }
 0x4c6   :  { %8987 = vmatprep.mubr.bf16.mxu1 %v20167_v39 }
 0x4cd   :  { %11995 = vmatmul.mubr.msk.bf16.gmra.mxu1 %vm20095_vm15, %v12289_v52  ;;  %v2751_v52 = vand.u32 2139095040, %v16631_v53 }
 0x4ce   :  { %8997 = vmatprep.mubr.bf16.mxu1 %v20167_v39 }
 0x4cf   :  { %v2752_v21 = vshrl.u32 %v2751_v52, 23 }
 0x4d5   :  { %11996 = vmatmul.mubr.msk.bf16.gmra.mxu1 %vm20095_vm15, %v12290_v12 }
 0x4d6   :  { %9414 = vmatprep.mubr.bf16.mxu1 %v20167_v39 }
 0x4f0   :  { %v16597_v17 = vpop.f32.mrf.mxu0 }
 0x4f2   :  { %v8460_v7 = vpop.f32.mrf.mxu0 }
 0x4f3   :  { %v8461_v29 = vadd.f32 %v8460_v7, %v16641_v33 }
 0x4f4   :  { %v16599_v58 = vpop.f32.mrf.mxu0 }
 0x4f5   :  { %v8463_v12 = vadd.f32 %v16599_v58, %v16637_v51 }
 0x4f6   :  { %v8464_v24 = vpop.f32.mrf.mxu0 }
 0x4f7   :  { %v8465_v0 = vadd.f32 %v8464_v24, %v16637_v51  ;;  %v9024_v7 = vmax.f32 %v8463_v12, 0.0 }
 0x4f8   :  { %v8468_v37 = vpop.f32.mrf.mxu0 }
 0x4f9   :  { %v8469_v45 = vadd.f32 %v8468_v37, %v16617_v41  ;;  %v8459_v37 = vadd.f32 %v16597_v17, %v16641_v33 }
 0x4fa   :  { %v8470_v36 = vpop.f32.mrf.mxu0 }
 0x4fb   :  { %v8471_v2 = vadd.f32 %v8470_v36, %v16617_v41 }
 0x4fc   :  { %v8472_v46 = vpop.f32.mrf.mxu0 }
 0x4fd   :  { %v8473_v10 = vadd.f32 %v8472_v46, %v16612_v56  ;;  %v9041_v5 = vmax.f32 %v8471_v2, 0.0 }
 0x4fe   :  { %v8474_v4 = vpop.f32.mrf.mxu0 }
 0x4ff   :  { %v8475_v44 = vadd.f32 %v8474_v4, %v16612_v56  ;;  %v9056_v24 = vmax.f32 %v8473_v10, 0.0  ;;  %v2654_v4 = vadd.s32 1, %v11729_v8 }
 0x500   :  { %v8478_v40 = vpop.f32.mrf.mxu0 }
 0x501   :  { %v8479_v16 = vadd.f32 %v8478_v40, %v16607_v35  ;;  %v9057_v14 = vmax.f32 %v8475_v44, 0.0  ;;  %v9025_v40 = vmax.f32 %v8465_v0, 0.0  ;;  %vm2655_vm4 = vcmp.gt.s32.totalorder %v2654_v4, 0 }
 0x502   :  { %v8480_v30 = vpop.f32.mrf.mxu0 }
 0x503   :  { %v8481_v31 = vadd.f32 %v8480_v30, %v16607_v35  ;;  %v9072_v62 = vmax.f32 %v8479_v16, 0.0  ;;  %v9162_v30 = vpack.c.bf16 %v9057_v14, %v9041_v5  ;;  %v16657_v16 = vld [vmem:[%s19979_s11] sm:$0xff]  }
 0x504   :  { %v8482_v23 = vpop.f32.mrf.mxu0  ;;  %20648 = vst [vmem:[#allocation35_spill] sm:$0xff] %v16657_v16 }
 0x505   :  { %v8483_v59 = vadd.f32 %v8482_v23, %v16605_v18  ;;  %v9073_v32 = vmax.f32 %v8481_v31, 0.0  ;;  %v11733_v23 = vadd.s32 4294967169, %v2752_v21 }
 0x506   :  { %v8484_v54 = vpop.f32.mrf.mxu0 }
 0x507   :  { %v8485_v15 = vadd.f32 %v8484_v54, %v16605_v18  ;;  %v9088_v13 = vmax.f32 %v8483_v59, 0.0  ;;  %v9040_v54 = vmax.f32 %v8469_v45, 0.0 }
 0x508   :  { %v8488_v63 = vpop.f32.mrf.mxu0 }
 0x509   :  { %v8489_v38 = vadd.f32 %v8488_v63, %v16603_v11  ;;  %v9089_v43 = vmax.f32 %v8485_v15, 0.0  ;;  %v9177_v36 = vpack.c.bf16 %v9088_v13, %v9072_v62  ;;  %v9161_v15 = vpack.c.bf16 %v9056_v24, %v9040_v54 }
 0x50a   :  { %v8490_v9 = vpop.f32.mrf.mxu0  ;;  %v20653_v54 = vmov 683565275  }
 0x50b   :  { %v8491_v25 = vadd.f32 %v8490_v9, %v16603_v11  ;;  %v9104_v42 = vmax.f32 %v8489_v38, 0.0  ;;  %v9178_v55 = vpack.c.bf16 %v9089_v43, %v9073_v32  ;;  %v9009_v9 = vmax.f32 %v8461_v29, 0.0 }
 0x50c   :  { %v8492_v60 = vpop.f32.mrf.mxu0  ;;  %v9008_v38 = vmax.f32 %v8459_v37, 0.0  ;;  %v16712_v37 = vld [vmem:[%s19979_s11 + $0x8] sm:$0xff]  }
 0x50d   :  { %v8493_v3 = vadd.f32 %v8492_v60, %v16601_v61  ;;  %v9105_v1 = vmax.f32 %v8491_v25, 0.0  ;;  %v9146_v25 = vpack.c.bf16 %v9025_v40, %v9009_v9  ;;  %20652 = vst [vmem:[#allocation44_spill] sm:$0xff] %v16712_v37  ;;  %v20654_v9 = vmov 2475754826  }
 0x50e   :  { %v8494_v22 = vpop.f32.mrf.mxu0  ;;  %v9145_v43 = vpack.c.bf16 %v9024_v7, %v9008_v38 }
 0x50f   :  { %v8495_v19 = vadd.f32 %v8494_v22, %v16601_v61  ;;  %v9120_v27 = vmax.f32 %v8493_v3, 0.0  ;;  %v2758_v3 = vadd.s32 1, %v11733_v23 }
 0x510   :  { %v16620_v34 = vpop.f32.mrf.mxu0 }
 0x511   :  { %v9121_v6 = vmax.f32 %v8495_v19, 0.0  ;;  %v9193_v57 = vpack.c.bf16 %v9120_v27, %v9104_v42  ;;  %v2656_v19 = vsel %vm2655_vm4, %v2654_v4, 0  ;;  %v8605_v27 = vadd.f32 %v16620_v34, %v16641_v33 }
 0x512   :  { %v8606_v28 = vpop.f32.mrf.mxu0  ;;  %v2658_v42 = vand.u32 31, %v2656_v19  ;;  %vm2759_vm6 = vcmp.gt.s32.totalorder %v2758_v3, 0 }
 0x513   :  { %v9194_v47 = vpack.c.bf16 %v9121_v6, %v9105_v1  ;;  %v8607_v6 = vadd.f32 %v8606_v28, %v16641_v33  ;;  %v9012_v28 = vmax.f32 %v8605_v27, 0.0 }
 0x514   :  { %v8608_v49 = vpop.f32.mrf.mxu0  ;;  %v2659_v14 = vsub.s32 32, %v2658_v42  ;;  %v2664_v38 = vshll.u32 %v20654_v9, %v2658_v42 }
 0x515   :  { %9309 = vmatprep.subr.bf16.mxu0 %v9194_v47  ;;  %v8609_v22 = vadd.f32 %v8608_v49, %v16637_v51  ;;  %v16671_v49 = vsel %vm2759_vm6, %v2758_v3, 0  ;;  %v9013_v0 = vmax.f32 %v8607_v6, 0.0 }
 0x516   :  { %v8610_v48 = vpop.f32.mrf.mxu0  ;;  %9310 = vmatpush1.bf16.msra.mxu0 %v9193_v57  ;;  %v20071_v57 = vand.u32 2147483647, %v16626_v20  ;;  %v16694_v24 = vand.u32 31, %v16671_v49  ;;  %v2662_v7 = vshrl.u32 %v20654_v9, %v2659_v14 }
 0x517   :  { %9311 = vmatprep.subr.bf16.mxu0 %v9178_v55  ;;  %v8611_v17 = vadd.f32 %v8610_v48, %v16637_v51  ;;  %v9028_v26 = vmax.f32 %v8609_v22, 0.0  ;;  %v20649_v55 = vmov 65535   ;;  %v20657_v22 = vmov 2131351028  }
 0x518   :  { %v8614_v46 = vpop.f32.mrf.mxu0  ;;  %v16679_v21 = vsel %vm20650_vm14, 4294967295, %v20649_v55 }
 0x519   :  { %v16660_v52 = vadd.f32 %v8614_v46, %v16617_v41  ;;  %v9029_v34 = vmax.f32 %v8611_v17, 0.0  ;;  %20651 = vst [vmem:[#allocation26_spill] sm:$0xff] %v16679_v21  ;;  %v16681_v45 = vpack.c.bf16 %v9028_v26, %v9012_v28  ;;  %v2667_v17 = vshll.u32 %v20657_v22, %v2658_v42 }
 0x51a   :  { %v8616_v63 = vpop.f32.mrf.mxu0  ;;  %9312 = vmatpush1.bf16.msra.mxu0 %v9177_v36  ;;  %v16727_v26 = vshrl.u32 %v2656_v19, 5 }
 0x51b   :  { %9313 = vmatprep.subr.bf16.mxu0 %v9162_v30  ;;  %v16665_v47 = vadd.f32 %v8616_v63, %v16617_v41  ;;  %v16691_v12 = vpack.c.bf16 %v9029_v34, %v9013_v0  ;;  %v16705_v30 = vand.u32 8388607, %v20071_v57  ;;  %v2661_v63 = vshll.u32 %v20653_v54, %v2658_v42 }
 0x51c   :  { %v8618_v60 = vpop.f32.mrf.mxu0  ;;  %v20658_v34 = vmov 1326507024   ;;  %vm2676_vm7 = vcmp.lt.s32.totalorder %v16727_v26, 1  ;;  %vm2679_vm10 = vcmp.lt.s32.totalorder %v16727_v26, 4  ;;  %vm2678_vm5 = vcmp.lt.s32.totalorder %v16727_v26, 3 }
 0x51d   :  { %v8531_v58 = vpop.f32.mrf.mxu1  ;;  %v16668_v10 = vadd.f32 %v8618_v60, %v16612_v56  ;;  %v2674_v28 = vshrl.u32 %v20658_v34, %v2659_v14  ;;  %vm2677_vm3 = vcmp.lt.s32.totalorder %v16727_v26, 2 }
 0x51e   :  { %v8620_v31 = vpop.f32.mrf.mxu0  ;;  %9314 = vmatpush1.bf16.msra.mxu0 %v9161_v15  ;;  %v16686_v8 = vadd.f32 %v8531_v58, %v16641_v33  ;;  %v20655_v15 = vmov 2102212464   ;;  %v20656_v58 = vmov 920167782  }
 0x51f   :  { %v8533_v59 = vpop.f32.mrf.mxu1  ;;  %9315 = vmatprep.subr.bf16.mxu0 %v9146_v25  ;;  %v16698_v46 = vadd.f32 %v8620_v31, %v16612_v56  ;;  %v2670_v60 = vshll.u32 %v20655_v15, %v2658_v42  ;;  %v2671_v25 = vshrl.u32 %v20656_v58, %v2659_v14  ;;  %v2665_v31 = vshrl.u32 %v20657_v22, %v2659_v14 }
 0x520   :  { %v8624_v44 = vpop.f32.mrf.mxu0  ;;  %v16723_v27 = vadd.f32 %v8533_v59, %v16641_v33  ;;  %v2652_v59 = vor.u32 8388608, %v16705_v30 }
 0x521   :  { %v8535_v1 = vpop.f32.mrf.mxu1  ;;  %v16735_v55 = vadd.f32 %v8624_v44, %v16607_v35  ;;  %v2672_v30 = vor.u32 %v2671_v25, %v2670_v60 }
 0x522   :  { %v8626_v2 = vpop.f32.mrf.mxu0  ;;  %9316 = vmatpush1.bf16.msra.mxu0 %v9145_v43  ;;  %v2668_v43 = vshrl.u32 %v20655_v15, %v2659_v14  ;;  %v16732_v0 = vadd.f32 %v8535_v1, %v16637_v51  ;;  %v2663_v1 = vor.u32 %v2662_v7, %v2661_v63 }
 0x523   :  { %v16662_v32 = vpop.f32.mrf.mxu1  ;;  %v16701_v4 = vadd.f32 %v8626_v2, %v16607_v35  ;;  %v2673_v2 = vshll.u32 %v20656_v58, %v2658_v42 }
 0x524   :  { %v8628_v13 = vpop.f32.mrf.mxu0  ;;  %v2669_v20 = vor.u32 %v2668_v43, %v2667_v17 }
 0x525   :  { %v16673_v50 = vpop.f32.mrf.mxu1  ;;  %12002 = vmatmul.mubr.msk.bf16.vlgmr.msra.gmra.mxu0 %vm20095_vm15, %v16657_v16  ;;  %v9077_v57 = vmax.f32 %v16701_v4, 0.0  ;;  %v2666_v4 = vor.u32 %v2665_v31, %v2664_v38  ;;  %v2675_v58 = vor.u32 %v2674_v28, %v2673_v2  ;;  %v16761_v31 = vld [vmem:[%s19979_s11 + $0x10] sm:$0xff]  }
 0x526   :  { %v8630_v48 = vpop.f32.mrf.mxu0  ;;  %9343 = vmatprep.mubr.bf16.mxu0 %v20167_v39  ;;  %v8542_v26 = vadd.f32 %v16673_v50, %v16617_v41 }
 0x527   :  { %v16688_v29 = vpop.f32.mrf.mxu1  ;;  %v8631_v19 = vadd.f32 %v8630_v48, %v16605_v18  ;;  %v2684_v2 = vsel %vm2676_vm7, %v2663_v1, %v2666_v4 }
 0x528   :  { %v8634_v40 = vpop.f32.mrf.mxu0 }
 0x529   :  { %v16707_v23 = vpop.f32.mrf.mxu1  ;;  %v8635_v62 = vadd.f32 %v8634_v40, %v16603_v11  ;;  %v9093_v7 = vmax.f32 %v8631_v19, 0.0  ;;  %v2689_v19 = vsel %vm2679_vm10, %v2675_v58, 1326507024 }
 0x52a   :  { %v8636_v3 = vpop.f32.mrf.mxu0  ;;  %v2690_v15 = vsel %vm2678_vm5, %v2672_v30, %v2689_v19 }
 0x52b   :  { %v16725_v6 = vpop.f32.mrf.mxu1  ;;  %v8637_v42 = vadd.f32 %v8636_v3, %v16603_v11  ;;  %v2660_v3 = vshrl.u32 %v20653_v54, %v2659_v14  ;;  %v9108_v60 = vmax.f32 %v8635_v62, 0.0  ;;  %v2685_v14 = vsel %vm2679_vm10, %v2672_v30, 920167782 }
 0x52c   :  { %v8638_v5 = vpop.f32.mrf.mxu0  ;;  %v2686_v28 = vsel %vm2678_vm5, %v2669_v20, %v2685_v14  ;;  %v8548_v50 = vadd.f32 %v16725_v6, %v16612_v56 }
 0x52d   :  { %v16739_v36 = vpop.f32.mrf.mxu1  ;;  %v8639_v21 = vadd.f32 %v8638_v5, %v16601_v61  ;;  %12003 = vmatmul.mubr.msk.bf16.gmra.mxu0 %vm20095_vm15, %v16712_v37  ;;  %v8629_v5 = vadd.f32 %v8628_v13, %v16605_v18  ;;  %v9109_v25 = vmax.f32 %v8637_v42, 0.0  ;;  %v2681_v13 = vsel %vm2679_vm10, %v2669_v20, 2102212464 }
 0x52e   :  { %v8640_v44 = vpop.f32.mrf.mxu0  ;;  %9353 = vmatprep.mubr.bf16.mxu0 %v20167_v39  ;;  %v9061_v42 = vmax.f32 %v16698_v46, 0.0  ;;  %v9026_v46 = vmax.f32 %v16732_v0, 0.0  ;;  %v2680_v30 = vsel %vm2676_vm7, %v2660_v3, %v2663_v1  ;;  %v9010_v1 = vmax.f32 %v16686_v8, 0.0 }
 0x52f   :  { %v16748_v34 = vpop.f32.mrf.mxu1  ;;  %v8641_v48 = vadd.f32 %v8640_v44, %v16601_v61  ;;  %v9124_v40 = vmax.f32 %v8639_v21, 0.0  ;;  %v2688_v21 = vsel %vm2676_vm7, %v2666_v4, %v2669_v20  ;;  %v9092_v44 = vmax.f32 %v8629_v5, 0.0 }
 0x530   :  { %v9182_v20 = vpack.c.bf16 %v9093_v7, %v9077_v57  ;;  %v2691_v58 = vsel %vm2677_vm3, %v2688_v21, %v2690_v15  ;;  %v2687_v57 = vsel %vm2677_vm3, %v2684_v2, %v2686_v28  ;;  %v16800_v15 = vadd.f32 %v16662_v32, %v16637_v51  ;;  %v16818_v28 = vld [vmem:[%s19979_s11 + $0x18] sm:$0xff]  }
 0x531   :  { %v16756_v63 = vpop.f32.mrf.mxu1  ;;  %v9125_v38 = vmax.f32 %v8641_v48, 0.0  ;;  %v9197_v48 = vpack.c.bf16 %v9124_v40, %v9108_v60  ;;  %v20080_v7 = vand.u32 2147483647, %v16631_v53  ;;  %v9011_v3 = vmax.f32 %v16723_v27, 0.0 }
 0x532   :  { %v16763_v17 = vpop.f32.mrf.mxu0  ;;  %v20660_v60 = vmax.f32 %v16668_v10, 0.0  ;;  %v16827_v10 = vpack.c.bf16 %v9026_v46, %v9010_v1 }
 0x533   :  { %v8557_v62 = vpop.f32.mrf.mxu1  ;;  %v9198_v43 = vpack.c.bf16 %v9125_v38, %v9109_v25  ;;  %v9076_v25 = vmax.f32 %v16735_v55, 0.0  ;;  %v16788_v38 = vshll.u32 %v2652_v59, 8  ;;  %v2682_v55 = vsel %vm2678_vm5, %v2666_v4, %v2681_v13 }
 0x534   :  { %v16779_v37 = vpop.f32.mrf.mxu0  ;;  %v20659_v4 = vmax.f32 %v16660_v52, 0.0  ;;  %v2683_v8 = vsel %vm2677_vm3, %v2680_v30, %v2682_v55 }
 0x535   :  { %v8561_v16 = vpop.f32.mrf.mxu1  ;;  %12004 = vmatmul.mubr.msk.bf16.gmra.mxu0 %vm20095_vm15, %v16761_v31  ;;  %9471 = vmatprep.subr.bf16.mxu0 %v9198_v43  ;;  %v16803_v0 = vmul.u32.u64.low %v16788_v38, %v2691_v58  ;;  %v16804_v40 = vmul.u32.u64.high %v16788_v38, %v2691_v58, %v16803_v0  ;;  %v9181_v14 = vpack.c.bf16 %v9092_v44, %v9076_v25  ;;  %v20661_v43 = vmax.f32 %v16665_v47, 0.0 }
 0x536   :  { %v8754_v5 = vpop.f32.mrf.mxu0  ;;  %9472 = vmatpush1.bf16.msra.mxu0 %v9197_v48  ;;  %9363 = vmatprep.mubr.bf16.mxu0 %v20167_v39  ;;  %v9165_v13 = vpack.c.bf16 %v20660_v60, %v20659_v4  ;;  %v16823_v19 = vmul.u32.u64.low %v16788_v38, %v2687_v57  ;;  %v16824_v52 = vmul.u32.u64.high %v16788_v38, %v2687_v57, %v16823_v19  ;;  %v8558_v44 = vadd.f32 %v8557_v62, %v16605_v18 }
 0x537   :  { %v8563_v59 = vpop.f32.mrf.mxu1  ;;  %9473 = vmatprep.subr.bf16.mxu0 %v9182_v20  ;;  %v9166_v2 = vpack.c.bf16 %v9061_v42, %v20661_v43  ;;  %v9027_v25 = vmax.f32 %v16800_v15, 0.0  ;;  %v8546_v20 = vadd.f32 %v16707_v23, %v16612_v56  ;;  %v8562_v58 = vadd.f32 %v8561_v16, %v16603_v11 }
 0x538   :  { %v8756_v32 = vpop.f32.mrf.mxu0  ;;  %v8564_v47 = vadd.f32 %v8563_v59, %v16603_v11  ;;  %v8554_v62 = vadd.f32 %v16748_v34, %v16607_v35  ;;  %v2699_v57 = vmul.u32 %v16788_v38, %v2683_v8  ;;  %vm2701_vm9 = vc.u32 %v16804_v40, %v16823_v19 }
 0x539   :  { %v8565_v21 = vpop.f32.mrf.mxu1  ;;  %v8556_v16 = vadd.f32 %v16756_v63, %v16605_v18  ;;  %v2702_v34 = vadd.s32 1, %v16824_v52  ;;  %v8544_v59 = vadd.f32 %v16688_v29, %v16617_v41  ;;  %v9091_v38 = vmax.f32 %v8558_v44, 0.0 }
 0x53a   :  { %v8566_v42 = vadd.f32 %v8565_v21, %v16601_v61  ;;  %v16832_v48 = vpop.f32.mrf.mxu0  ;;  %9474 = vmatpush1.bf16.msra.mxu0 %v9181_v14  ;;  %v9107_v0 = vmax.f32 %v8564_v47, 0.0  ;;  %v9058_v6 = vmax.f32 %v8546_v20, 0.0  ;;  %v8552_v63 = vadd.f32 %v16739_v36, %v16607_v35 }
 0x53b   :  { %v8567_v46 = vpop.f32.mrf.mxu1  ;;  %9475 = vmatprep.subr.bf16.mxu0 %v9166_v2  ;;  %v9106_v60 = vmax.f32 %v8562_v58, 0.0  ;;  %v2703_v29 = vsel %vm2701_vm9, %v2702_v34, %v16824_v52  ;;  %v9075_v21 = vmax.f32 %v8554_v62, 0.0  ;;  %v8755_v2 = vadd.f32 %v8754_v5, %v16637_v51 }
 0x53c   :  { %v8568_v30 = vadd.f32 %v8567_v46, %v16601_v61  ;;  %v16843_v55 = vpop.f32.mrf.mxu0  ;;  %v9122_v23 = vmax.f32 %v8566_v42, 0.0  ;;  %v2704_v8 = vadd.s32 %v2703_v29, %v2699_v57  ;;  %v9042_v44 = vmax.f32 %v8542_v26, 0.0 }
 0x53d   :  { %v8677_v15 = vpop.f32.mrf.mxu1  ;;  %12005 = vmatmul.mubr.msk.bf16.gmra.mxu0 %vm20095_vm15, %v16818_v28  ;;  %v9059_v47 = vmax.f32 %v8548_v50, 0.0  ;;  %v9090_v42 = vmax.f32 %v8556_v16, 0.0  ;;  %v9180_v58 = vpack.c.bf16 %v9091_v38, %v9075_v21  ;;  %v8751_v52 = vadd.f32 %v16763_v17, %v16641_v33 }
 0x53e   :  { %v9123_v1 = vmax.f32 %v8568_v30, 0.0  ;;  %v8764_v4 = vpop.f32.mrf.mxu0  ;;  %9476 = vmatpush1.bf16.msra.mxu0 %v9165_v13  ;;  %9373 = vmatprep.mubr.bf16.mxu0 %v20167_v39  ;;  %v9195_v20 = vpack.c.bf16 %v9122_v23, %v9106_v60  ;;  %v8757_v46 = vadd.f32 %v8756_v32, %v16637_v51  ;;  %v2705_v26 = vadd.s32 536870912, %v2704_v8 }
 0x53f   :  { %v8679_v14 = vpop.f32.mrf.mxu1  ;;  %9477 = vmatprep.subr.bf16.mxu0 %v16691_v12  ;;  %v16869_v12 = vld [vmem:[%s19979_s11 + $0x20] ss:$0 sps:$4 sm:$0x11]   ;;  %v9043_v62 = vmax.f32 %v8544_v59, 0.0  ;;  %v9074_v30 = vmax.f32 %v8552_v63, 0.0  ;;  %v8753_v50 = vadd.f32 %v16779_v37, %v16641_v33  ;;  %v9163_v23 = vpack.c.bf16 %v9058_v6, %v9042_v44 }
 0x540   :  { %v9196_v43 = vpack.c.bf16 %v9123_v1, %v9107_v0  ;;  %v8766_v13 = vpop.f32.mrf.mxu0  ;;  %20662 = vst [vmem:[#allocation39_spill] sm:$0xff] %v16869_v12  ;;  %v16879_v16 = vand.u32 8388607, %v20080_v7  ;;  %v9148_v17 = vpack.c.bf16 %v9027_v25, %v9011_v3  ;;  %v9032_v32 = vmax.f32 %v8755_v2, 0.0 }
 0x541   :  { %v8681_v36 = vpop.f32.mrf.mxu1  ;;  %v9179_v59 = vpack.c.bf16 %v9090_v42, %v9074_v30  ;;  %v9164_v0 = vpack.c.bf16 %v9059_v47, %v9043_v62  ;;  %v8765_v1 = vadd.f32 %v8764_v4, %v16612_v56  ;;  %v16891_v37 = vsub.s32 32, %v16694_v24 }
 0x542   :  { %9390 = vmatprep.subr.bf16.mxu1 %v9196_v43  ;;  %v8770_v5 = vpop.f32.mrf.mxu0  ;;  %9478 = vmatpush1.bf16.msra.mxu0 %v16681_v45  ;;  %20663 = vst [vmem:[#allocation27_spill] sm:$0xff] %v16879_v16  ;;  %v16883_v45 = vshrl.u32 %v2705_v26, 30  ;;  %v9016_v6 = vmax.f32 %v8751_v52, 0.0  ;;  %v9033_v63 = vmax.f32 %v8757_v46, 0.0  ;;  %v8761_v27 = vadd.f32 %v16832_v48, %v16617_v41 }
 0x543   :  { %v8683_v57 = vpop.f32.mrf.mxu1  ;;  %9391 = vmatpush1.bf16.msra.mxu1 %v9195_v20  ;;  %v16898_v60 = vadd.f32 %v8677_v15, %v16641_v33  ;;  %v9017_v29 = vmax.f32 %v8753_v50, 0.0  ;;  %v8763_v21 = vadd.f32 %v16843_v55, %v16617_v41  ;;  %v8767_v48 = vadd.f32 %v8766_v13, %v16612_v56 }
 0x544   :  { %9392 = vmatprep.subr.bf16.mxu1 %v9180_v58  ;;  %v8772_v34 = vpop.f32.mrf.mxu0  ;;  %v2707_v25 = vshll.u32 %v16883_v45, 30  ;;  %v16905_v2 = vpack.c.bf16 %v9032_v32, %v9016_v6  ;;  %v16911_v15 = vshrl.u32 %v16671_v49, 5  ;;  %v16914_v42 = vadd.f32 %v8679_v14, %v16641_v33 }
 0x545   :  { %v16885_v38 = vpop.f32.mrf.mxu1  ;;  %12006 = vmatmul.mubr.msk.bf16.gmra.mxu0 %vm20095_vm15, %v16869_v12  ;;  %v9064_v58 = vmax.f32 %v8765_v1, 0.0  ;;  %v2765_v55 = vshll.u32 %v20653_v54, %v16694_v24  ;;  %v2766_v52 = vshrl.u32 %v20654_v9, %v16891_v37  ;;  %v16923_v13 = vadd.f32 %v8681_v36, %v16637_v51 }
 0x546   :  { %v8774_v3 = vpop.f32.mrf.mxu0  ;;  %9495 = vmatprep.mubr.bf16.mxu0 %v20167_v39  ;;  %v16908_v47 = vsub.s32 %v2704_v8, %v2707_v25  ;;  %v9048_v8 = vmax.f32 %v8761_v27, 0.0  ;;  %v16925_v26 = vpack.c.bf16 %v9033_v63, %v9017_v29  ;;  %v9049_v30 = vmax.f32 %v8763_v21, 0.0 }
 0x547   :  { %v16900_v4 = vpop.f32.mrf.mxu1  ;;  %9393 = vmatpush1.bf16.msra.mxu1 %v9179_v59  ;;  %v16933_v50 = vshrl.u32 %v20653_v54, %v16891_v37  ;;  %v2768_v36 = vshll.u32 %v20654_v9, %v16694_v24  ;;  %v9065_v32 = vmax.f32 %v8767_v48, 0.0  ;;  %v16938_v59 = vadd.f32 %v8770_v5, %v16607_v35  ;;  %v20666_v54 = vld [vmem:[#allocation44_spill] sm:$0xff] }
 0x548   :  { %9394 = vmatprep.subr.bf16.mxu1 %v9164_v0  ;;  %v8776_v44 = vpop.f32.mrf.mxu0  ;;  %v2710_v49 = vsub.s32 0, %v16908_v47  ;;  %v2769_v6 = vshrl.u32 %v20657_v22, %v16891_v37  ;;  %v16945_v63 = vadd.f32 %v8683_v57, %v16637_v51  ;;  %v16949_v25 = vpack.c.bf16 %v9064_v58, %v9048_v8 }
 0x549   :  { %v16916_v20 = vpop.f32.mrf.mxu1  ;;  %v16953_v5 = vor.u32 %v2766_v52, %v2765_v55  ;;  %v9030_v29 = vmax.f32 %v16923_v13, 0.0  ;;  %v8773_v21 = vadd.f32 %v8772_v34, %v16607_v35  ;;  %v2771_v57 = vshll.u32 %v20657_v22, %v16694_v24 }
 0x54a   :  { %v8780_v46 = vpop.f32.mrf.mxu0  ;;  %v11730_v1 = vmin.u32 %v2710_v49, %v16908_v47  ;;  %v8777_v58 = vadd.f32 %v8776_v44, %v16605_v18  ;;  %v2700_v34 = vadd.s32 %v16823_v19, %v16804_v40  ;;  %v9080_v13 = vmax.f32 %v16938_v59, 0.0 }
 0x54b   :  { %v16929_v62 = vpop.f32.mrf.mxu1  ;;  %9395 = vmatpush1.bf16.msra.mxu1 %v9163_v23  ;;  %v8781_v8 = vadd.f32 %v8780_v46, %v16603_v11  ;;  %v16970_v43 = vpack.c.bf16 %v9065_v32, %v9049_v30  ;;  %v16972_v23 = vor.u32 %v2769_v6, %v2768_v36  ;;  %v8775_v44 = vadd.f32 %v8774_v3, %v16605_v18 }
 0x54c   :  { %9396 = vmatprep.subr.bf16.mxu1 %v9148_v17  ;;  %v8782_v0 = vpop.f32.mrf.mxu0  ;;  %v20664_v17 = vld [vmem:[#allocation35_spill] sm:$0xff]  ;;  %v2712_v49 = vclz %v11730_v1  ;;  %v16981_v40 = vadd.f32 %v16885_v38, %v16617_v41  ;;  %v9081_v19 = vmax.f32 %v8773_v21, 0.0  ;;  %v20665_v36 = vmov 2102212464  }
 0x54d   :  { %v16947_v27 = vpop.f32.mrf.mxu1  ;;  %12012 = vmatmul.mubr.msk.bf16.vlgmr.msra.gmra.mxu0 %vm20095_vm15, %v20664_v17  ;;  %v8783_v55 = vadd.f32 %v8782_v0, %v16603_v11  ;;  %v2772_v32 = vshrl.u32 %v20665_v36, %v16891_v37  ;;  %v9097_v3 = vmax.f32 %v8777_v58, 0.0  ;;  %v16992_v38 = vadd.f32 %v16900_v4, %v16617_v41 }
 0x54e   :  { %v8784_v48 = vpop.f32.mrf.mxu0  ;;  %9505 = vmatprep.mubr.bf16.mxu0 %v20167_v39  ;;  %v9096_v9 = vmax.f32 %v8775_v44, 0.0  ;;  %v20668_v4 = vmax.f32 %v16898_v60, 0.0  ;;  %vm2780_vm12 = vcmp.lt.s32.totalorder %v16911_v15, 1  ;;  %vm2782_vm8 = vcmp.lt.s32.totalorder %v16911_v15, 3 }
 0x54f   :  { %v16960_v7 = vpop.f32.mrf.mxu1  ;;  %9397 = vmatpush1.bf16.msra.mxu1 %v16827_v10  ;;  %v8785_v52 = vadd.f32 %v8784_v48, %v16601_v61  ;;  %v9031_v10 = vmax.f32 %v16945_v63, 0.0  ;;  %v11731_v48 = vadd.s32 4294967294, %v2712_v49  ;;  %v9113_v6 = vmax.f32 %v8783_v55, 0.0 }
 0x550   :  { %v8786_v1 = vpop.f32.mrf.mxu0  ;;  %v9112_v49 = vmax.f32 %v8781_v8, 0.0  ;;  %v17008_v8 = vadd.f32 %v16916_v20, %v16612_v56  ;;  %v9186_v16 = vpack.c.bf16 %v9097_v3, %v9081_v19  ;;  %vm2781_vm0 = vcmp.lt.s32.totalorder %v16911_v15, 2 }
 0x551   :  { %v16975_v14 = vpop.f32.mrf.mxu1  ;;  %v8787_v0 = vadd.f32 %v8786_v1, %v16601_v61  ;;  %v9128_v46 = vmax.f32 %v8785_v52, 0.0  ;;  %vm11732_vm1 = vcmp.lt.s32.totalorder %v11731_v48, 0  ;;  %v2774_v52 = vshll.u32 %v20665_v36, %v16694_v24 }
 0x552   :  { %12007 = vmatmul.mubr.msk.bf16.vlgmr.msra.gmra.mxu1 %vm20095_vm15, %v20664_v17  ;;  %v16985_v30 = vpop.f32.mrf.mxu0  ;;  %v2715_v21 = vsel %vm11732_vm1, 0, %v11731_v48  ;;  %v17004_v17 = vpack.c.bf16 %v9030_v29, %v20668_v4  ;;  %v9047_v29 = vmax.f32 %v16992_v38, 0.0  ;;  %v20670_v4 = vmax.f32 %v16914_v42, 0.0 }
 0x553   :  { %v8703_v59 = vpop.f32.mrf.mxu1  ;;  %9424 = vmatprep.mubr.bf16.mxu1 %v20167_v39  ;;  %v9129_v63 = vmax.f32 %v8787_v0, 0.0  ;;  %v2716_v55 = vsub.s32 32, %v2715_v21  ;;  %v20667_v0 = vmov 920167782   ;;  %v9201_v48 = vpack.c.bf16 %v9128_v46, %v9112_v49 }
 0x554   :  { %v16994_v1 = vpop.f32.mrf.mxu0  ;;  %v2775_v53 = vshrl.u32 %v20667_v0, %v16891_v37  ;;  %20669 = vst [vmem:[#allocation25_spill] sm:$0xff] %v17004_v17  ;;  %v2717_v44 = vshll.u32 %v16908_v47, %v2715_v21  ;;  %v2720_v60 = vsub.s32 4294967266, %v2715_v21  ;;  %v17018_v20 = vpack.c.bf16 %v9031_v10, %v20670_v4 }
 0x555   :  { %v8707_v22 = vpop.f32.mrf.mxu1  ;;  %12013 = vmatmul.mubr.msk.bf16.gmra.mxu0 %vm20095_vm15, %v20666_v54  ;;  %v9202_v58 = vpack.c.bf16 %v9129_v63, %v9113_v6  ;;  %v2718_v12 = vshrl.u32 %v2700_v34, %v2716_v55  ;;  %v17020_v49 = vor.u32 %v2772_v32, %v2771_v57  ;;  %v17024_v47 = vshll.u32 %v20667_v0, %v16694_v24 }
 0x556   :  { %v17010_v36 = vpop.f32.mrf.mxu0  ;;  %9515 = vmatprep.mubr.bf16.mxu0 %v20167_v39  ;;  %v9185_v17 = vpack.c.bf16 %v9096_v9, %v9080_v13  ;;  %v2721_v34 = vadd.s32 127, %v2720_v60  ;;  %v17026_v3 = vor.u32 %v2775_v53, %v2774_v52  ;;  %v9062_v21 = vmax.f32 %v17008_v8, 0.0 }
 0x557   :  { %v8709_v63 = vpop.f32.mrf.mxu1  ;;  %9633 = vmatprep.subr.bf16.mxu0 %v9202_v58  ;;  %v2719_v19 = vor.u32 %v2718_v12, %v2717_v44  ;;  %v8704_v42 = vadd.f32 %v8703_v59, %v16605_v18  ;;  %v8694_v9 = vadd.f32 %v16929_v62, %v16612_v56  ;;  %v8708_v12 = vadd.f32 %v8707_v22, %v16603_v11 }
 0x558   :  { %v8902_v46 = vpop.f32.mrf.mxu0  ;;  %9634 = vmatpush1.bf16.msra.mxu0 %v9201_v48  ;;  %v8710_v10 = vadd.f32 %v8709_v63, %v16603_v11  ;;  %v20671_v13 = vmov 1326507024   ;;  %v8700_v59 = vadd.f32 %v16960_v7, %v16607_v35  ;;  %v8702_v52 = vadd.f32 %v16975_v14, %v16605_v18 }
 0x559   :  { %v8711_v6 = vpop.f32.mrf.mxu1  ;;  %9635 = vmatprep.subr.bf16.mxu0 %v9186_v16  ;;  %v2722_v16 = vshll.u32 %v2721_v34, 23  ;;  %v17042_v32 = vshrl.u32 %v20671_v13, %v16891_v37  ;;  %v2730_v22 = vsub.s32 4, %v16883_v45  ;;  %v8698_v62 = vadd.f32 %v16947_v27, %v16607_v35 }
 0x55a   :  { %v8712_v57 = vadd.f32 %v8711_v6, %v16601_v61  ;;  %12008 = vmatmul.mubr.msk.bf16.gmra.mxu1 %vm20095_vm15, %v20666_v54  ;;  %v17034_v24 = vpop.f32.mrf.mxu0  ;;  %v2726_v37 = vcvt.s32.f32 %v2719_v19  ;;  %v9095_v44 = vmax.f32 %v8704_v42, 0.0  ;;  %v9111_v14 = vmax.f32 %v8710_v10, 0.0 }
 0x55b   :  { %v8713_v53 = vpop.f32.mrf.mxu1  ;;  %9434 = vmatprep.mubr.bf16.mxu1 %v20167_v39  ;;  %v2723_v7 = vor.u32 4788187, %v2722_v16  ;;  %v9063_v60 = vmax.f32 %v8694_v9, 0.0  ;;  %v9110_v4 = vmax.f32 %v8708_v12, 0.0  ;;  %v8901_v9 = vadd.f32 %v17010_v36, %v16637_v51 }
 0x55c   :  { %v8714_v58 = vadd.f32 %v8713_v53, %v16601_v61  ;;  %v8908_v55 = vpop.f32.mrf.mxu0  ;;  %9636 = vmatpush1.bf16.msra.mxu0 %v9185_v17  ;;  %v9126_v8 = vmax.f32 %v8712_v57, 0.0  ;;  %v20672_v17 = vld [vmem:[#allocation46_spill] sm:$0xff]  ;;  %v9079_v57 = vmax.f32 %v8700_v59, 0.0  ;;  %v9094_v53 = vmax.f32 %v8702_v52, 0.0 }
 0x55d   :  { %v8823_v48 = vpop.f32.mrf.mxu1  ;;  %9637 = vmatprep.subr.bf16.mxu0 %v16970_v43  ;;  %12014 = vmatmul.mubr.msk.bf16.gmra.mxu0 %vm20095_vm15, %v16761_v31  ;;  %vm2646_vm11 = vcmp.lt.s32.totalorder %v20672_v17, 0  ;;  %v2724_v34 = vand.u32 2147483647, %v2723_v7  ;;  %v20673_v12 = vand.u32 2147483647, %v20672_v17  ;;  %v9078_v52 = vmax.f32 %v8698_v62, 0.0 }
 0x55e   :  { %v9127_v6 = vmax.f32 %v8714_v58, 0.0  ;;  %v8910_v63 = vpop.f32.mrf.mxu0  ;;  %9525 = vmatprep.mubr.bf16.mxu0 %v20167_v39  ;;  %v2731_v43 = vsel %vm2646_vm11, %v2730_v22, %v16883_v45  ;;  %v9199_v10 = vpack.c.bf16 %v9126_v8, %v9110_v4  ;;  %v8903_v58 = vadd.f32 %v8902_v46, %v16637_v51 }
 0x55f   :  { %v17057_v27 = vpop.f32.mrf.mxu1  ;;  %vm17071_vm2 = vcmp.le.f32.partialorder %v20673_v12, 0.7853982  ;;  %v2727_v59 = vmul.f32 %v2726_v37, %v2724_v34  ;;  %v9168_v62 = vpack.c.bf16 %v9063_v60, %v9047_v29  ;;  %v8897_v37 = vadd.f32 %v16985_v30, %v16641_v33 }
 0x560   :  { %v9200_v19 = vpack.c.bf16 %v9127_v6, %v9111_v14  ;;  %v8912_v42 = vpop.f32.mrf.mxu0  ;;  %9638 = vmatpush1.bf16.msra.mxu0 %v16949_v25  ;;  %v9184_v25 = vpack.c.bf16 %v9095_v44, %v9079_v57  ;;  %v2733_v36 = vsel %vm17071_vm2, 0, %v2731_v43  ;;  %v9183_v46 = vpack.c.bf16 %v9094_v53, %v9078_v52 }
 0x561   :  { %v17064_v16 = vpop.f32.mrf.mxu1  ;;  %9639 = vmatprep.subr.bf16.mxu0 %v16925_v26  ;;  %v20676_v26 = vmax.f32 %v16981_v40, 0.0  ;;  %v2728_v44 = vxor.u32 2147483648, %v2727_v59  ;;  %v8899_v14 = vadd.f32 %v16994_v1, %v16641_v33  ;;  %v2779_v40 = vor.u32 %v17042_v32, %v17024_v47 }
 0x562   :  { %12009 = vmatmul.mubr.msk.bf16.gmra.mxu1 %vm20095_vm15, %v16761_v31  ;;  %9552 = vmatprep.subr.bf16.mxu1 %v9200_v19  ;;  %v8916_v22 = vpop.f32.mrf.mxu0  ;;  %v9036_v29 = vmax.f32 %v8901_v9, 0.0  ;;  %v2737_v1 = vadd.s32 3, %v2733_v36  ;;  %v9037_v60 = vmax.f32 %v8903_v58, 0.0  ;;  %v8909_v4 = vadd.f32 %v8908_v55, %v16617_v41 }
 0x563   :  { %v9167_v8 = vpack.c.bf16 %v9062_v21, %v20676_v26  ;;  %v17082_v7 = vpop.f32.mrf.mxu1  ;;  %9553 = vmatpush1.bf16.msra.mxu1 %v9199_v10  ;;  %9444 = vmatprep.mubr.bf16.mxu1 %v20167_v39  ;;  %v8911_v21 = vadd.f32 %v8910_v63, %v16612_v56  ;;  %v2729_v30 = vsel %vm2646_vm11, %v2728_v44, %v2727_v59  ;;  %v9020_v53 = vmax.f32 %v8897_v37, 0.0 }
 0x564   :  { %9554 = vmatprep.subr.bf16.mxu1 %v9184_v25  ;;  %v8918_v6 = vpop.f32.mrf.mxu0  ;;  %9640 = vmatpush1.bf16.msra.mxu0 %v16905_v2  ;;  %v8907_v2 = vadd.f32 %v17034_v24, %v16617_v41  ;;  %v2732_v63 = vsel %vm17071_vm2, %v20672_v17, %v2729_v30  ;;  %v17111_v43 = vadd.f32 %v8823_v48, %v16641_v33  ;;  %v9021_v55 = vmax.f32 %v8899_v14, 0.0 }
 0x565   :  { %v17095_v38 = vpop.f32.mrf.mxu1  ;;  %12015 = vmatmul.mubr.msk.bf16.gmra.mxu0 %vm20095_vm15, %v16818_v28  ;;  %v8913_v24 = vadd.f32 %v8912_v42, %v16612_v56  ;;  %12238 = vcosq.f32 %v2732_v63  ;;  %vm2783_vm4 = vcmp.lt.s32.totalorder %v16911_v15, 4  ;;  %v17121_v17 = vsel %vm2780_vm12, %v16933_v50, %v16953_v5 }
 0x566   :  { %v8920_v34 = vpop.f32.mrf.mxu0  ;;  %9535 = vmatprep.mubr.bf16.mxu0 %v20167_v39  ;;  %12240 = vsinq.f32 %v2732_v63  ;;  %v17125_v10 = vpack.c.bf16 %v9036_v29, %v9020_v53  ;;  %v9068_v9 = vmax.f32 %v8911_v21, 0.0  ;;  %v17127_v12 = vand.u32 3, %v2737_v1 }
 0x567   :  { %v17113_v57 = vpop.f32.mrf.mxu1  ;;  %9555 = vmatpush1.bf16.msra.mxu1 %v9183_v46  ;;  %v2785_v42 = vsel %vm2783_vm4, %v17020_v49, 2102212464  ;;  %v9052_v45 = vmax.f32 %v8907_v2, 0.0  ;;  %v9053_v59 = vmax.f32 %v8909_v4, 0.0  ;;  %v17135_v52 = vadd.f32 %v8916_v22, %v16607_v35  ;;  %v20678_v4 = vld [vmem:[#allocation25_spill] sm:$0xff] }
 0x568   :  { %9556 = vmatprep.subr.bf16.mxu1 %v9168_v62  ;;  %v8922_v19 = vpop.f32.mrf.mxu0  ;;  %v17137_v25 = vpack.c.bf16 %v9037_v60, %v9021_v55  ;;  %v9018_v58 = vmax.f32 %v17111_v43, 0.0  ;;  %v17142_v26 = vadd.f32 %v17057_v27, %v16641_v33  ;;  %v9069_v37 = vmax.f32 %v8913_v24, 0.0 }
 0x569   :  { %v17123_v48 = vpop.f32.mrf.mxu1  ;;  %v17147_v44 = vand.u32 3, %v2733_v36  ;;  %v17151_v22 = vadd.f32 %v17064_v16, %v16637_v51  ;;  %v17155_v46 = vadd.f32 %v8918_v6, %v16607_v35  ;;  %v17158_v27 = vadd.f32 %v8920_v34, %v16605_v18 }
 0x56a   :  { %12010 = vmatmul.mubr.msk.bf16.gmra.mxu1 %vm20095_vm15, %v16818_v28  ;;  %v8926_v50 = vpop.f32.mrf.mxu0  ;;  %v17165_v36 = vadd.f32 %v17082_v7, %v16637_v51  ;;  %v17169_v16 = vpack.c.bf16 %v9068_v9, %v9052_v45  ;;  %vm2740_vm6 = vcmp.eq.s32.totalorder %v17127_v12, 0  ;;  %v2789_v6 = vsel %vm2783_vm4, %v17026_v3, 920167782 }
 0x56b   :  { %v17144_v62 = vpop.f32.mrf.mxu1  ;;  %9557 = vmatpush1.bf16.msra.mxu1 %v9167_v8  ;;  %9454 = vmatprep.mubr.bf16.mxu1 %v20167_v39  ;;  %v2786_v8 = vsel %vm2782_vm8, %v16972_v23, %v2785_v42  ;;  %v9084_v21 = vmax.f32 %v17135_v52, 0.0  ;;  %v8923_v30 = vadd.f32 %v8922_v19, %v16605_v18  ;;  %v2788_v7 = vsel %vm2780_vm12, %v16953_v5, %v16972_v23  ;;  %v17204_v42 = vld [vmem:[%s20645_s4] sm:$0x77] }
 0x56c   :  { %9558 = vmatprep.subr.bf16.mxu1 %v17018_v20  ;;  %v8928_v14 = vpop.f32.mrf.mxu0  ;;  %v20677_v20 = vld [vmem:[#allocation39_spill] sm:$0xff]  ;;  %v2790_v60 = vsel %vm2782_vm8, %v17020_v49, %v2789_v6  ;;  %v17192_v53 = vpack.c.bf16 %v9069_v37, %v9053_v59  ;;  %v2792_v24 = vsel %vm2780_vm12, %v16972_v23, %v17020_v49  ;;  %v9085_v5 = vmax.f32 %v17155_v46, 0.0 }
 0x56d   :  { %v17167_v29 = vpop.f32.mrf.mxu1  ;;  %12016 = vmatmul.mubr.msk.bf16.gmra.mxu0 %vm20095_vm15, %v20677_v20  ;;  %v8929_v34 = vadd.f32 %v8928_v14, %v16603_v11  ;;  %v9100_v55 = vmax.f32 %v17158_v27, 0.0  ;;  %v8927_v19 = vadd.f32 %v8926_v50, %v16603_v11  ;;  %vm2736_vm14 = vweird.f32 %v17204_v42  ;;  %v20679_v50 = vld [vmem:[#allocation27_spill] sm:$0xff] }
 0x56e   :  { %v8930_v1 = vpop.f32.mrf.mxu0  ;;  %9657 = vmatprep.mubr.bf16.mxu0 %v20167_v39  ;;  %v2793_v23 = vsel %vm2783_vm4, %v2779_v40, 1326507024  ;;  %v2791_v59 = vsel %vm2781_vm0, %v2788_v7, %v2790_v60  ;;  %v20680_v37 = vor.u32 8388608, %v20679_v50  ;;  %v9101_v47 = vmax.f32 %v8923_v30, 0.0 }
 0x56f   :  { %v17187_v2 = vpop.f32.mrf.mxu1  ;;  %9559 = vmatpush1.bf16.msra.mxu1 %v20678_v4  ;;  %v8931_v63 = vadd.f32 %v8930_v1, %v16601_v61  ;;  %v2794_v52 = vsel %vm2782_vm8, %v17026_v3, %v2793_v23  ;;  %vm2743_vm7 = vcmp.eq.s32.totalorder %v17127_v12, 2  ;;  %v9117_v14 = vmax.f32 %v8929_v34, 0.0  ;;  %v20681_v23 = vld [vmem:[#allocation35_spill] sm:$0xff] }
 0x570   :  { %v8932_v9 = vpop.f32.mrf.mxu0  ;;  %v2796_v46 = vshll.u32 %v20680_v37, 8  ;;  %v2795_v40 = vsel %vm2781_vm0, %v2792_v24, %v2794_v52  ;;  %v9116_v60 = vmax.f32 %v8927_v19, 0.0  ;;  %vm3574_vm10 = vcmp.eq.s32.totalorder %v17147_v44, 2 }
 0x571   :  { %v17212_v49 = vpop.f32.mrf.mxu1  ;;  %v8933_v45 = vadd.f32 %v8932_v9, %v16601_v61  ;;  %v9132_v32 = vmax.f32 %v8931_v63, 0.0  ;;  %vm2739_vm5 = vcmp.lt.s32.totalorder %v17127_v12, 2  ;;  %v17244_v19 = vadd.f32 %v17113_v57, %v16617_v41 }
 0x572   :  { %12011 = vmatmul.mubr.msk.bf16.gmra.mxu1 %vm20095_vm15, %v20677_v20  ;;  %v17228_v1 = vmul.u32.u64.low %v2796_v46, %v2795_v40  ;;  %v17229_v3 = vmul.u32.u64.high %v2796_v46, %v2795_v40, %v17228_v1  ;;  %v12239_v7 = vpop.eup %12238  ;;  %v17232_v4 = vmul.u32.u64.low %v2796_v46, %v2791_v59  ;;  %v17233_v30 = vmul.u32.u64.high %v2796_v46, %v2791_v59, %v17232_v4 }
 0x573   :  { %v8849_v27 = vpop.f32.mrf.mxu1  ;;  %9576 = vmatprep.mubr.bf16.mxu1 %v20167_v39  ;;  %v9133_v6 = vmax.f32 %v8933_v45, 0.0  ;;  %v12241_v63 = vpop.eup %12240  ;;  %v2744_v34 = vxor.u32 2147483648, %v12239_v7  ;;  %v2787_v45 = vsel %vm2781_vm0, %v17121_v17, %v2786_v8  ;;  %v9205_v59 = vpack.c.bf16 %v9132_v32, %v9116_v60 }
 0x574   :  { %v2741_v52 = vxor.u32 2147483648, %v12241_v63  ;;  %vm3571_vm3 = vcmp.eq.s32.totalorder %v17147_v44, 0  ;;  %v9190_v37 = vpack.c.bf16 %v9101_v47, %v9085_v5  ;;  %vm3570_vm9 = vcmp.lt.s32.totalorder %v17147_v44, 2 }
 0x575   :  { %v8853_v9 = vpop.f32.mrf.mxu1  ;;  %12022 = vmatmul.mubr.msk.bf16.vlgmr.msra.gmra.mxu0 %vm20095_vm15, %v20681_v23  ;;  %v9206_v24 = vpack.c.bf16 %v9133_v6, %v9117_v14  ;;  %v2745_v40 = vsel %vm2743_vm7, %v2744_v34, %v12241_v63  ;;  %v3576_v15 = vsel %vm3574_vm10, %v2744_v34, %v12241_v63  ;;  %v9189_v17 = vpack.c.bf16 %v9100_v55, %v9084_v21 }
 0x576   :  { %9667 = vmatprep.mubr.bf16.mxu0 %v20167_v39  ;;  %v2742_v57 = vsel %vm2740_vm6, %v12239_v7, %v2741_v52  ;;  %v2803_v8 = vmul.u32 %v2796_v46, %v2787_v45  ;;  %vm2805_vm1 = vc.u32 %v17229_v3, %v17232_v4  ;;  %v8850_v32 = vadd.f32 %v8849_v27, %v16605_v18 }
 0x577   :  { %v8855_v50 = vpop.f32.mrf.mxu1  ;;  %9795 = vmatprep.subr.bf16.mxu0 %v9206_v24  ;;  %v2746_v47 = vsel %vm2739_vm5, %v2742_v57, %v2745_v40  ;;  %v3573_v14 = vsel %vm3571_vm3, %v12239_v7, %v2741_v52  ;;  %v2806_v21 = vadd.s32 1, %v17233_v30  ;;  %v8854_v27 = vadd.f32 %v8853_v9, %v16603_v11 }
 0x578   :  { %9796 = vmatpush1.bf16.msra.mxu0 %v9205_v59  ;;  %v8856_v55 = vadd.f32 %v8855_v50, %v16603_v11  ;;  %v17269_v46 = vsel %vm2736_vm14, nan, %v2746_v47  ;;  %v3577_v12 = vsel %vm3570_vm9, %v3573_v14, %v3576_v15  ;;  %v8846_v44 = vadd.f32 %v17187_v2, %v16607_v35 }
 0x579   :  { %v8857_v5 = vpop.f32.mrf.mxu1  ;;  %9797 = vmatprep.subr.bf16.mxu0 %v9190_v37  ;;  %v17277_v7 = vsel %vm2736_vm14, nan, %v3577_v12  ;;  %v4300_v60 = vmul.f32 2.0, %v17269_v46  ;;  %v2807_v63 = vsel %vm2805_vm1, %v2806_v21, %v17233_v30  ;;  %v8840_v34 = vadd.f32 %v17144_v62, %v16612_v56 }
 0x57a   :  { %v8858_v6 = vadd.f32 %v8857_v5, %v16601_v61  ;;  %12017 = vmatmul.mubr.msk.bf16.vlgmr.msra.gmra.mxu1 %vm20095_vm15, %v20681_v23  ;;  %v4316_v9 = vmul.f32 2.0, %v17277_v7  ;;  %v2808_v24 = vadd.s32 %v2807_v63, %v2803_v8  ;;  %v8848_v45 = vadd.f32 %v17212_v49, %v16605_v18 }
 0x57b   :  { %v8859_v1 = vpop.f32.mrf.mxu1  ;;  %9586 = vmatprep.mubr.bf16.mxu1 %v20167_v39  ;;  %v17298_v2 = vmul.f32 %v4300_v60, %v17277_v7  ;;  %v9099_v30 = vmax.f32 %v8850_v32, 0.0  ;;  %v9115_v50 = vmax.f32 %v8856_v55, 0.0  ;;  %v8844_v49 = vadd.f32 %v17167_v29, %v16607_v35 }
 0x57c   :  { %v8860_v23 = vadd.f32 %v8859_v1, %v16601_v61  ;;  %9798 = vmatpush1.bf16.msra.mxu0 %v9189_v17  ;;  %v9130_v59 = vmax.f32 %v8858_v6, 0.0  ;;  %v4324_v62 = vmul.f32 %v4316_v9, %v17277_v7  ;;  %v9114_v40 = vmax.f32 %v8854_v27, 0.0 }
 0x57d   :  { %v17292_v52 = vpop.f32.mrf.mxu1  ;;  %9799 = vmatprep.subr.bf16.mxu0 %v17192_v53  ;;  %12023 = vmatmul.mubr.msk.bf16.gmra.mxu0 %vm20095_vm15, %v20666_v54  ;;  %v4340_v53 = vmul.f32 2.0, %v17298_v2  ;;  %v2809_v17 = vadd.s32 536870912, %v2808_v24  ;;  %v8838_v54 = vadd.f32 %v17123_v48, %v16612_v56  ;;  %v9083_v57 = vmax.f32 %v8846_v44, 0.0  ;;  %v17322_v48 = vld [vmem:[%s19979_s11 + $0x8] sm:$0xff]  }
 0x57e   :  { %v9131_v37 = vmax.f32 %v8860_v23, 0.0  ;;  %9677 = vmatprep.mubr.bf16.mxu0 %v20167_v39  ;;  %v17310_v32 = vadd.f32 -1.0, %v4324_v62  ;;  %v8834_v5 = vadd.f32 %v17095_v38, %v16617_v41  ;;  %v9098_v47 = vmax.f32 %v8848_v45, 0.0  ;;  %v20682_v62 = vld [vmem:[#allocation26_spill] sm:$0xff] }
 0x57f   :  { %v17304_v15 = vpop.f32.mrf.mxu1  ;;  %v9203_v29 = vpack.c.bf16 %v9130_v59, %v9114_v40  ;;  %v17317_v21 = vshrl.u32 %v2809_v17, 30  ;;  %v9067_v55 = vmax.f32 %v8840_v34, 0.0  ;;  %v9035_v12 = vmax.f32 %v17165_v36, 0.0 }
 0x580   :  { %v9204_v8 = vpack.c.bf16 %v9131_v37, %v9115_v50  ;;  %9800 = vmatpush1.bf16.msra.mxu0 %v17169_v16  ;;  %v9188_v16 = vpack.c.bf16 %v9099_v30, %v9083_v57  ;;  %v17327_v38 = vmul.f32 %v17310_v32, %v4340_v53  ;;  %v4356_v6 = vmul.f32 2.0, %v17310_v32 }
 0x581   :  { %v17314_v14 = vpop.f32.mrf.mxu1  ;;  %9801 = vmatprep.subr.bf16.mxu0 %v17137_v25  ;;  %v9034_v25 = vmax.f32 %v17151_v22, 0.0  ;;  %v9082_v27 = vmax.f32 %v8844_v49, 0.0  ;;  %v2811_v60 = vshll.u32 %v17317_v21, 30  ;;  %v9051_v63 = vmax.f32 %v17244_v19, 0.0 }
 0x582   :  { %12018 = vmatmul.mubr.msk.bf16.gmra.mxu1 %vm20095_vm15, %v17322_v48  ;;  %9714 = vmatprep.subr.bf16.mxu1 %v9204_v8  ;;  %v9066_v44 = vmax.f32 %v8838_v54, 0.0  ;;  %v4364_v23 = vmul.f32 %v17310_v32, %v4356_v6  ;;  %v4380_v22 = vmul.f32 2.0, %v17327_v38  ;;  %v9019_v36 = vmax.f32 %v17142_v26, 0.0  ;;  %v17355_v26 = vld [vmem:[%s20645_s4 + $0x8] sm:$0x77] }
 0x583   :  { %v17332_v1 = vpop.f32.mrf.mxu1  ;;  %9715 = vmatpush1.bf16.msra.mxu1 %v9203_v29  ;;  %9596 = vmatprep.mubr.bf16.mxu1 %v20167_v39  ;;  %v9187_v9 = vpack.c.bf16 %v9098_v47, %v9082_v27  ;;  %v4620_v45 = vcombine.high %v17327_v38, %v17327_v38  ;;  %v17347_v19 = vsub.s32 %v2808_v24, %v2811_v60  ;;  %v9050_v59 = vmax.f32 %v8834_v5, 0.0  ;;  %v20684_v47 = vld [vmem:[#allocation28_spill] sm:$0xff] }
 0x584   :  { %9716 = vmatprep.subr.bf16.mxu1 %v9188_v16  ;;  %9802 = vmatpush1.bf16.msra.mxu0 %v17125_v10  ;;  %v9172_v30 = vpack.c.bf16 %v9067_v55, %v9051_v63  ;;  %v17350_v10 = vadd.f32 -1.0, %v4364_v23  ;;  %vm2750_vm11 = vcmp.lt.s32.totalorder %v17355_v26, 0  ;;  %v9155_v24 = vpack.c.bf16 %v9034_v25, %v9018_v58  ;;  %v17397_v25 = vld [vmem:[%s19979_s11 + $0x10] sm:$0xff]  }
 0x585   :  { %v17341_v34 = vpop.f32.mrf.mxu1  ;;  %12024 = vmatmul.mubr.msk.bf16.gmra.mxu0 %vm20095_vm15, %v16761_v31  ;;  %v4452_v31 = vcombine.high %v17269_v46, %v17269_v46  ;;  %v9156_v37 = vpack.c.bf16 %v9035_v12, %v9019_v36  ;;  %vm20683_vm12 = vcmask 1045504   ;;  %v2814_v40 = vsub.s32 0, %v17347_v19 }
 0x586   :  { %9687 = vmatprep.mubr.bf16.mxu0 %v20167_v39  ;;  %v17366_v49 = vsel %vm20683_vm12, %v20682_v62, 0  ;;  %v9171_v53 = vpack.c.bf16 %v9066_v44, %v9050_v59  ;;  %v17370_v17 = vmul.f32 %v17350_v10, %v4380_v22  ;;  %v4428_v54 = vcombine.high %v17204_v42, %v17204_v42  ;;  %vm20690_vm6 = vmmov %vm20683_vm12 }
 0x587   :  { %v17362_v50 = vpop.f32.mrf.mxu1  ;;  %9717 = vmatpush1.bf16.msra.mxu1 %v9187_v9  ;;  %v4500_v43 = vcombine.high %v17277_v7, %v17277_v7  ;;  %v4396_v57 = vmul.f32 2.0, %v17350_v10  ;;  %v17379_v8 = vrot.slane %v4620_v45, 1  ;;  %v4668_v5 = vcombine.high %v17350_v10, %v17350_v10  ;;  %vm20698_vm12 = vmmov %vm20690_vm6 }
 0x588   :  { %9718 = vmatprep.subr.bf16.mxu1 %v9172_v30  ;;  %v20685_v29 = vand.u32 2147483647, %v20684_v47  ;;  %v11734_v16 = vmin.u32 %v2814_v40, %v17347_v19  ;;  %v17392_v6 = vadd.f32 %v17292_v52, %v16641_v33  ;;  %v4716_v12 = vcombine.high %v17370_v17, %v17370_v17 }
 0x589   :  { %v17376_v58 = vpop.f32.mrf.mxu1  ;;  %v4461_v27 = vrot.slane %v4452_v31, 5  ;;  %v4548_v60 = vcombine.high %v17298_v2, %v17298_v2  ;;  %v4404_v52 = vmul.f32 %v17350_v10, %v4396_v57  ;;  %v4677_v44 = vrot.slane %v4668_v5, 6 }
 0x58a   :  { %vm17385_vm2 = vcmp.le.f32.partialorder %v20685_v29, 0.7853982  ;;  %12019 = vmatmul.mubr.msk.bf16.gmra.mxu1 %vm20095_vm15, %v17397_v25  ;;  %v2816_v23 = vclz %v11734_v16  ;;  %v2834_v22 = vsub.s32 4, %v17317_v21  ;;  %v4725_v36 = vrot.slane %v4716_v12, 3 }
 0x58b   :  { %v8985_v63 = vpop.f32.mrf.mxu1  ;;  %9719 = vmatpush1.bf16.msra.mxu1 %v9171_v53  ;;  %9606 = vmatprep.mubr.bf16.mxu1 %v20167_v39  ;;  %v2804_v9 = vadd.s32 %v17232_v4, %v17229_v3  ;;  %v4429_v45 = vcombine.high %v17355_v26, %v17355_v26  ;;  %v4460_v59 = vrot.slane %v17269_v46, 5  ;;  %v17417_v31 = vadd.f32 -1.0, %v4404_v52  ;;  %v17515_v46 = vld [vmem:[%s20645_s4 + $0x10] sm:$0x77] }
 0x58c   :  { %9720 = vmatprep.subr.bf16.mxu1 %v9156_v37  ;;  %vm20688_vm8 = vcmask 1041408   ;;  %v11735_v37 = vadd.s32 4294967294, %v2816_v23  ;;  %v4509_v40 = vrot.slane %v4500_v43, 2  ;;  %v9022_v53 = vmax.f32 %v17392_v6, 0.0 }
 0x58d   :  { %v17413_v30 = vpop.f32.mrf.mxu1  ;;  %12025 = vmatmul.mubr.msk.bf16.gmra.mxu0 %vm20095_vm15, %v16818_v28  ;;  %v4861_v62 = vsel %vm20688_vm8, %v17379_v8, %v4677_v44  ;;  %v17424_v3 = vadd.f32 %v17304_v15, %v16641_v33  ;;  %vm20689_vm0 = vcmask 1044480   ;;  %v4557_v57 = vrot.slane %v4548_v60, 7  ;;  %vm20692_vm7 = vmmov %vm20688_vm8 }
 0x58e   :  { %9697 = vmatprep.mubr.bf16.mxu0 %v20167_v39  ;;  %v4877_v4 = vsel %vm20689_vm0, %v4861_v62, %v4725_v36  ;;  %v4764_v28 = vcombine.high %v17417_v31, %v17417_v31  ;;  %vm11736_vm4 = vcmp.lt.s32.totalorder %v11735_v37, 0  ;;  %v2835_v43 = vsel %vm2750_vm11, %v2834_v22, %v17317_v21  ;;  %v17447_v21 = vld [vmem:[%s19979_s11 + $0x18] sm:$0xff]   ;;  %vm20694_vm5 = vmmov %vm20689_vm0 }
 0x58f   :  { %v8991_v5 = vpop.f32.mrf.mxu1  ;;  %9721 = vmatpush1.bf16.msra.mxu1 %v9155_v24  ;;  %v4781_v47 = vsel %vm2453_vm13, %v4428_v54, %v4461_v27  ;;  %v17436_v33 = vadd.f32 %v17314_v14, %v16637_v51  ;;  %v17440_v15 = vadd.f32 %v17332_v1, %v16637_v51  ;;  %v2819_v29 = vsel %vm11736_vm4, 0, %v11735_v37 }
 0x590   :  { %v4628_v24 = vrot.slane %v17327_v38, 1  ;;  %v10038_v12 = vpack.c.bf16 %v4764_v28, %v4877_v4  ;;  %v2820_v60 = vsub.s32 32, %v2819_v29  ;;  %v2821_v52 = vshll.u32 %v17347_v19, %v2819_v29 }
 0x591   :  { %v8993_v16 = vpop.f32.mrf.mxu1  ;;  %v2824_v44 = vsub.s32 4294967266, %v2819_v29  ;;  %v17453_v51 = vsel %vm17385_vm2, 0, %v2835_v43  ;;  %v17456_v14 = vsel %vm20690_vm6, %v4781_v47, %v4509_v40  ;;  %vm20691_vm14 = vcmask 1040384  }
 0x592   :  { %12020 = vmatmul.mubr.msk.bf16.gmra.mxu1 %vm20095_vm15, %v17447_v21  ;;  %v4813_v1 = vsel %vm20691_vm14, %v4509_v40, %v4557_v57  ;;  %v4508_v19 = vrot.slane %v17277_v7, 2  ;;  %v10076_v27 = vand.u32 %v17366_v49, %v10038_v12  ;;  %v2822_v23 = vshrl.u32 %v2804_v9, %v2820_v60  ;;  %vm20696_vm9 = vmmov %vm20691_vm14 }
 0x593   :  { %v8995_v54 = vpop.f32.mrf.mxu1  ;;  %9616 = vmatprep.mubr.bf16.mxu1 %v20167_v39  ;;  %v2825_v22 = vadd.s32 127, %v2824_v44  ;;  %v4676_v36 = vrot.slane %v17350_v10, 6  ;;  %v9038_v62 = vmax.f32 %v17436_v33, 0.0  ;;  %v9039_v37 = vmax.f32 %v17440_v15, 0.0 }
 0x594   :  { %v17467_v4 = vadd.f32 %v17341_v34, %v16617_v41  ;;  %v4724_v40 = vrot.slane %v17370_v17, 3  ;;  %10132 = vmatprep.subr.bf16.mxu0 %v10076_v27  ;;  %v2823_v57 = vor.u32 %v2822_v23, %v2821_v52  ;;  %vm20693_vm10 = vcmask 1043456  }
 0x595   :  { %v8999_v7 = vpop.f32.mrf.mxu1  ;;  %12026 = vmatmul.mubr.msk.bf16.gmra.mxu0 %vm20095_vm15, %v20677_v20  ;;  %v2826_v9 = vshll.u32 %v2825_v22, 23  ;;  %v4860_v10 = vsel %vm20692_vm7, %v4628_v24, %v4676_v36  ;;  %v4829_v28 = vsel %vm20693_vm10, %v4813_v1, %v17310_v32  ;;  %v17479_v34 = vadd.f32 %v17362_v50, %v16617_v41  ;;  %vm20697_vm1 = vmmov %vm20693_vm10 }
 0x596   :  { %v17482_v17 = vadd.f32 %v8985_v63, %v16612_v56  ;;  %9819 = vmatprep.mubr.bf16.mxu0 %v20167_v39  ;;  %v17486_v43 = vadd.s32 3, %v17453_v51  ;;  %v4876_v47 = vsel %vm20694_vm5, %v4860_v10, %v4724_v40  ;;  %v2830_v60 = vcvt.s32.f32 %v2823_v57 }
 0x597   :  { %v9001_v29 = vpop.f32.mrf.mxu1  ;;  %v2827_v12 = vor.u32 4788187, %v2826_v9  ;;  %v10037_v52 = vpack.c.bf16 %v17417_v31, %v4876_v47  ;;  %v4556_v44 = vrot.slane %v17298_v2, 7  ;;  %v17493_v41 = vadd.f32 %v17376_v58, %v16612_v56 }
 0x598   :  { %v8992_v50 = vadd.f32 %v8991_v5, %v16607_v35  ;;  %vm20695_vm3 = vcmask 1046528   ;;  %v4596_v1 = vcombine.low %v17310_v32, %v17310_v32  ;;  %v8996_v27 = vadd.f32 %v8995_v54, %v16605_v18 }
 0x599   :  { %v4845_v63 = vsel %vm20695_vm3, %v4829_v28, %v17379_v8  ;;  %v9003_v23 = vpop.f32.mrf.mxu1  ;;  %v2828_v22 = vand.u32 2147483647, %v2827_v12  ;;  %v4780_v2 = vsel %vm2453_vm13, %v17204_v42, %v4460_v59  ;;  %v4812_v56 = vsel %vm20696_vm9, %v4508_v19, %v4556_v44  ;;  %vm20699_vm8 = vmmov %vm20695_vm3 }
 0x59a   :  { %v9002_v58 = vadd.f32 %v9001_v29, %v16603_v11  ;;  %v9004_v31 = vadd.f32 %v9003_v23, %v16601_v61  ;;  %12021 = vmatmul.mubr.msk.bf16.gmra.mxu1 %vm20095_vm15, %v20677_v20  ;;  %v10073_v32 = vand.u32 %v17366_v49, %v10037_v52  ;;  %v4828_v8 = vsel %vm20697_vm1, %v4812_v56, %v4596_v1 }
 0x59b   :  { %v9071_v42 = vmax.f32 %v17482_v17, 0.0  ;;  %v9000_v59 = vadd.f32 %v8999_v7, %v16603_v11  ;;  %v9005_v5 = vpop.f32.mrf.mxu1  ;;  %9738 = vmatprep.mubr.bf16.mxu1 %v20167_v39  ;;  %v2831_v54 = vmul.f32 %v2830_v60, %v2828_v22  ;;  %v10022_v36 = vpack.c.bf16 %v4845_v63, %v17456_v14  ;;  %v17529_v11 = vld [vmem:[%s19979_s11] sm:$0xff]  }
 0x59c   :  { %v8990_v20 = vadd.f32 %v17413_v30, %v16607_v35  ;;  %v8994_v40 = vadd.f32 %v8993_v16, %v16605_v18  ;;  %v9006_v57 = vadd.f32 %v9005_v5, %v16601_v61  ;;  %v4796_v9 = vsel %vm20698_vm12, %v4780_v2, %v4508_v19  ;;  %v17540_v61 = vld [vmem:[%s20645_s4 + $0x18] sm:$0x77] }
 0x59d   :  { %v9134_v10 = vmax.f32 %v9004_v31, 0.0  ;;  %12032 = vmatmul.mubr.msk.bf16.vlgmr.msra.gmra.mxu0 %vm20095_vm15, %v17529_v11  ;;  %v2832_v7 = vxor.u32 2147483648, %v2831_v54  ;;  %v4844_v35 = vsel %vm20699_vm8, %v4828_v8, %v4628_v24  ;;  %v2855_v18 = vand.u32 2139095040, %v17515_v46 }
 0x59e   :  { %v9087_v30 = vmax.f32 %v8992_v50, 0.0  ;;  %v9103_v16 = vmax.f32 %v8996_v27, 0.0  ;;  %v9119_v14 = vmax.f32 %v9002_v58, 0.0  ;;  %v9135_v19 = vmax.f32 %v9006_v57, 0.0  ;;  %9829 = vmatprep.mubr.bf16.mxu0 %v20167_v39  ;;  %10133 = vmatpush1.bf16.msra.mxu0 %v10073_v32 }
 0x59f   :  { %v9118_v28 = vmax.f32 %v9000_v59, 0.0  ;;  %v2833_v38 = vsel %vm2750_vm11, %v2832_v7, %v2831_v54  ;;  %10134 = vmatprep.subr.bf16.mxu0 %v10022_v36  ;;  %v2852_v24 = vand.u32 2147483647, %v17515_v46  ;;  %v2856_v17 = vshrl.u32 %v2855_v18, 23 }
 0x5a0   :  { %v9208_v47 = vpack.c.bf16 %v9135_v19, %v9119_v14  ;;  %v2836_v29 = vsel %vm17385_vm2, %v17355_v26, %v2833_v38  ;;  %v10021_v12 = vpack.c.bf16 %v4844_v35, %v4796_v9  ;;  %v2959_v60 = vand.u32 2139095040, %v17540_v61 }
 0x5a1   :  { %v9102_v52 = vmax.f32 %v8994_v40, 0.0  ;;  %v9207_v44 = vpack.c.bf16 %v9134_v10, %v9118_v28  ;;  %12242 = vcosq.f32 %v2836_v29  ;;  %v11737_v50 = vadd.s32 4294967169, %v2856_v17 }
 0x5a2   :  { %12027 = vmatmul.mubr.msk.bf16.vlgmr.msra.gmra.mxu1 %vm20095_vm15, %v17529_v11  ;;  %9876 = vmatprep.subr.bf16.mxu1 %v9208_v47  ;;  %v9192_v63 = vpack.c.bf16 %v9103_v16, %v9087_v30  ;;  %12244 = vsinq.f32 %v2836_v29  ;;  %v2956_v1 = vand.u32 2147483647, %v17540_v61  ;;  %v2960_v27 = vshrl.u32 %v2959_v60, 23 }
 0x5a3   :  { %v9070_v23 = vmax.f32 %v17493_v41, 0.0  ;;  %v9086_v55 = vmax.f32 %v8990_v20, 0.0  ;;  %9877 = vmatpush1.bf16.msra.mxu1 %v9207_v44  ;;  %9748 = vmatprep.mubr.bf16.mxu1 %v20167_v39  ;;  %v2859_v22 = vand.u32 8388607, %v2852_v24  ;;  %v2862_v2 = vadd.s32 1, %v11737_v50 }
 0x5a4   :  { %v9023_v56 = vmax.f32 %v17424_v3, 0.0  ;;  %v9055_v58 = vmax.f32 %v17479_v34, 0.0  ;;  %9878 = vmatprep.subr.bf16.mxu1 %v9192_v63  ;;  %v17560_v31 = vand.u32 3, %v17486_v43  ;;  %v17563_v32 = vand.u32 3, %v17453_v51  ;;  %10135 = vmatpush1.bf16.msra.mxu0 %v10021_v12 }
 0x5a5   :  { %v9054_v41 = vmax.f32 %v17467_v4, 0.0  ;;  %v9191_v8 = vpack.c.bf16 %v9102_v52, %v9086_v55  ;;  %12033 = vmatmul.mubr.msk.bf16.gmra.mxu0 %vm20095_vm15, %v17322_v48  ;;  %vm2863_vm11 = vcmp.gt.s32.totalorder %v2862_v2, 0  ;;  %v11741_v59 = vadd.s32 4294967169, %v2960_v27 }
 0x5a6   :  { %v9159_v3 = vpack.c.bf16 %v9038_v62, %v9022_v53  ;;  %v9176_v34 = vpack.c.bf16 %v9071_v42, %v9055_v58  ;;  %9839 = vmatprep.mubr.bf16.mxu0 %v20167_v39  ;;  %v2864_v43 = vsel %vm2863_vm11, %v2862_v2, 0  ;;  %v2963_v51 = vand.u32 8388607, %v2956_v1  ;;  %v17589_v42 = vld [vmem:[%s20645_s4 + $0x20] sm:$0x77] }
 0x5a7   :  { %v9175_v5 = vpack.c.bf16 %v9070_v23, %v9054_v41  ;;  %9879 = vmatpush1.bf16.msra.mxu1 %v9191_v8  ;;  %v9160_v4 = vpack.c.bf16 %v9039_v37, %v9023_v56  ;;  %v2860_v54 = vor.u32 8388608, %v2859_v22  ;;  %v2866_v36 = vand.u32 31, %v2864_v43 }
 0x5a8   :  { %9880 = vmatprep.subr.bf16.mxu1 %v9176_v34  ;;  %vm2843_vm2 = vcmp.lt.s32.totalorder %v17560_v31, 2  ;;  %vm2844_vm0 = vcmp.eq.s32.totalorder %v17560_v31, 0  ;;  %vm2847_vm4 = vcmp.eq.s32.totalorder %v17560_v31, 2  ;;  %vm3673_vm6 = vcmp.lt.s32.totalorder %v17563_v32, 2 }
 0x5a9   :  { %vm3674_vm14 = vcmp.eq.s32.totalorder %v17563_v32, 0  ;;  %vm3677_vm7 = vcmp.eq.s32.totalorder %v17563_v32, 2  ;;  %vm2840_vm10 = vweird.f32 %v17355_v26  ;;  %v2867_v6 = vsub.s32 32, %v2866_v36 }
 0x5aa   :  { %v20700_v53 = vmov 683565275   ;;  %v20701_v15 = vmov 2475754826   ;;  %v2966_v37 = vadd.s32 1, %v11741_v59  ;;  %12028 = vmatmul.mubr.msk.bf16.gmra.mxu1 %vm20095_vm15, %v17322_v48  ;;  %v17593_v20 = vshrl.u32 %v2864_v43, 5 }
 0x5ab   :  { %v2869_v33 = vshll.u32 %v20700_v53, %v2866_v36  ;;  %v2872_v62 = vshll.u32 %v20701_v15, %v2866_v36  ;;  %v20702_v40 = vmov 2131351028   ;;  %v20703_v9 = vmov 2102212464   ;;  %9881 = vmatpush1.bf16.msra.mxu1 %v9175_v5  ;;  %9758 = vmatprep.mubr.bf16.mxu1 %v20167_v39 }
 0x5ac   :  { %v2875_v57 = vshll.u32 %v20702_v40, %v2866_v36  ;;  %v2878_v10 = vshll.u32 %v20703_v9, %v2866_v36  ;;  %v2964_v7 = vor.u32 8388608, %v2963_v51  ;;  %v2870_v35 = vshrl.u32 %v20701_v15, %v2867_v6  ;;  %9882 = vmatprep.subr.bf16.mxu1 %v9160_v4 }
 0x5ad   :  { %v2873_v18 = vshrl.u32 %v20702_v40, %v2867_v6  ;;  %v2881_v30 = vshll.u32 %v20667_v0, %v2866_v36  ;;  %v17601_v16 = vshll.u32 %v2860_v54, 8  ;;  %v2876_v14 = vshrl.u32 %v20703_v9, %v2867_v6  ;;  %12034 = vmatmul.mubr.msk.bf16.gmra.mxu0 %vm20095_vm15, %v17397_v25 }
 0x5ae   :  { %v2879_v19 = vshrl.u32 %v20667_v0, %v2867_v6  ;;  %v2882_v28 = vshrl.u32 %v20671_v13, %v2867_v6  ;;  %v3063_v38 = vand.u32 2139095040, %v17589_v42  ;;  %v2868_v17 = vshrl.u32 %v20700_v53, %v2867_v6  ;;  %v12243_v12 = vpop.eup %12242  ;;  %9849 = vmatprep.mubr.bf16.mxu0 %v20167_v39 }
 0x5af   :  { %v2871_v47 = vor.u32 %v2870_v35, %v2869_v33  ;;  %v2874_v29 = vor.u32 %v2873_v18, %v2872_v62  ;;  %vm2967_vm5 = vcmp.gt.s32.totalorder %v2966_v37, 0  ;;  %v2877_v60 = vor.u32 %v2876_v14, %v2875_v57  ;;  %v12245_v50 = vpop.eup %12244  ;;  %9883 = vmatpush1.bf16.msra.mxu1 %v9159_v3 }
 0x5b0   :  { %v2880_v52 = vor.u32 %v2879_v19, %v2878_v10  ;;  %vm2884_vm3 = vcmp.lt.s32.totalorder %v17593_v20, 1  ;;  %v17612_v44 = vshll.u32 %v2964_v7, 8  ;;  %v2848_v63 = vxor.u32 2147483648, %v12243_v12 }
 0x5b1   :  { %v2883_v27 = vor.u32 %v2882_v28, %v2881_v30  ;;  %vm2885_vm9 = vcmp.lt.s32.totalorder %v17593_v20, 2  ;;  %vm2887_vm1 = vcmp.lt.s32.totalorder %v17593_v20, 4  ;;  %v2845_v23 = vxor.u32 2147483648, %v12245_v50 }
 0x5b2   :  { %vm2886_vm12 = vcmp.lt.s32.totalorder %v17593_v20, 3  ;;  %v2889_v55 = vsel %vm2887_vm1, %v2877_v60, 2102212464  ;;  %v2968_v22 = vsel %vm2967_vm5, %v2966_v37, 0  ;;  %v2849_v2 = vsel %vm2847_vm4, %v2848_v63, %v12245_v50  ;;  %12029 = vmatmul.mubr.msk.bf16.gmra.mxu1 %vm20095_vm15, %v17397_v25 }
 0x5b3   :  { %v3679_v56 = vsel %vm3677_vm7, %v2848_v63, %v12245_v50  ;;  %v2888_v58 = vsel %vm2884_vm3, %v2868_v17, %v2871_v47  ;;  %v2892_v41 = vsel %vm2884_vm3, %v2871_v47, %v2874_v29  ;;  %v2846_v8 = vsel %vm2844_vm0, %v12243_v12, %v2845_v23  ;;  %9768 = vmatprep.mubr.bf16.mxu1 %v20167_v39 }
 0x5b4   :  { %v3676_v59 = vsel %vm3674_vm14, %v12243_v12, %v2845_v23  ;;  %v2893_v3 = vsel %vm2887_vm1, %v2880_v52, 920167782  ;;  %v2896_v34 = vsel %vm2884_vm3, %v2874_v29, %v2877_v60  ;;  %v2850_v43 = vsel %vm2843_vm2, %v2846_v8, %v2849_v2  ;;  %v17714_v8 = vld [vmem:[%s19979_s11 + $0x20] ss:$0 sps:$4 sm:$0x11]  }
 0x5b5   :  { %v3680_v51 = vsel %vm3673_vm6, %v3676_v59, %v3679_v56  ;;  %v2890_v5 = vsel %vm2886_vm12, %v2874_v29, %v2889_v55  ;;  %v2897_v4 = vsel %vm2887_vm1, %v2883_v27, 1326507024  ;;  %v2851_v54 = vsel %vm2840_vm10, nan, %v2850_v43  ;;  %12035 = vmatmul.mubr.msk.bf16.gmra.mxu0 %vm20095_vm15, %v17447_v21 }
 0x5b6   :  { %v17651_v36 = vsel %vm2840_vm10, nan, %v3680_v51  ;;  %v2898_v31 = vsel %vm2886_vm12, %v2880_v52, %v2897_v4  ;;  %v17655_v6 = vand.u32 31, %v2968_v22  ;;  %v4301_v32 = vmul.f32 2.0, %v2851_v54  ;;  %9859 = vmatprep.mubr.bf16.mxu0 %v20167_v39 }
 0x5b7   :  { %v4317_v33 = vmul.f32 2.0, %v17651_v36  ;;  %v4453_v62 = vcombine.high %v2851_v54, %v2851_v54  ;;  %v2894_v37 = vsel %vm2886_vm12, %v2877_v60, %v2893_v3  ;;  %v4501_v57 = vcombine.high %v17651_v36, %v17651_v36 }
 0x5b8   :  { %v17667_v10 = vsel %vm2885_vm9, %v2888_v58, %v2890_v5  ;;  %v2899_v7 = vsel %vm2885_vm9, %v2896_v34, %v2898_v31  ;;  %v17671_v35 = vshrl.u32 %v3063_v38, 23  ;;  %v4309_v18 = vmul.f32 %v4301_v32, %v17651_v36 }
 0x5b9   :  { %v4325_v30 = vmul.f32 %v4317_v33, %v17651_v36  ;;  %v4463_v14 = vrot.slane %v4453_v62, 5  ;;  %v17675_v19 = vshrl.u32 %v2968_v22, 5  ;;  %v2895_v28 = vsel %vm2885_vm9, %v2892_v41, %v2894_v37 }
 0x5ba   :  { %v17680_v17 = vmul.u32.u64.low %v17601_v16, %v2899_v7  ;;  %v17681_v47 = vmul.u32.u64.high %v17601_v16, %v2899_v7, %v17680_v17  ;;  %v17684_v29 = vsub.s32 32, %v17655_v6  ;;  %v4341_v38 = vmul.f32 2.0, %v4309_v18  ;;  %12030 = vmatmul.mubr.msk.bf16.gmra.mxu1 %vm20095_vm15, %v17447_v21 }
 0x5bb   :  { %v17686_v12 = vadd.f32 -1.0, %v4325_v30  ;;  %v4549_v60 = vcombine.high %v4309_v18, %v4309_v18  ;;  %v2907_v52 = vmul.u32 %v17601_v16, %v17667_v10  ;;  %v4511_v50 = vrot.slane %v4501_v57, 2  ;;  %9778 = vmatprep.mubr.bf16.mxu1 %v20167_v39  ;;  %v17751_v30 = vld [vmem:[%s19982_s14] sm:$0xff]  }
 0x5bc   :  { %v4783_v20 = vsel %vm2453_vm13, %v4429_v45, %v4463_v14  ;;  %v4462_v63 = vrot.slane %v2851_v54, 5  ;;  %v4510_v27 = vrot.slane %v17651_v36, 2  ;;  %vm10063_vm8 = vcmask 220160  }
 0x5bd   :  { %v17699_v23 = vmul.f32 %v17686_v12, %v4341_v38  ;;  %v4357_v55 = vmul.f32 2.0, %v17686_v12  ;;  %v4559_v22 = vrot.slane %v4549_v60, 7  ;;  %v4558_v2 = vrot.slane %v4309_v18, 7  ;;  %12036 = vmatmul.mubr.msk.bf16.gmra.mxu0 %vm20095_vm15, %v17714_v8 }
 0x5be   :  { %v17703_v56 = vmul.u32.u64.low %v17601_v16, %v2895_v28  ;;  %v17704_v58 = vmul.u32.u64.high %v17601_v16, %v2895_v28, %v17703_v56  ;;  %v2973_v45 = vshll.u32 %v20700_v53, %v17655_v6  ;;  %v2974_v41 = vshrl.u32 %v20701_v15, %v17684_v29  ;;  %10152 = vmatprep.mubr.bf16.mxu0 %v20167_v39 }
 0x5bf   :  { %v4365_v59 = vmul.f32 %v17686_v12, %v4357_v55  ;;  %v4381_v16 = vmul.f32 2.0, %v17699_v23  ;;  %v4621_v3 = vcombine.high %v17699_v23, %v17699_v23  ;;  %v17724_v34 = vshrl.u32 %v20700_v53, %v17684_v29 }
 0x5c0   :  { %vm20704_vm11 = vcmask 1045504   ;;  %vm20705_vm2 = vcmask 1040384   ;;  %v4597_v5 = vcombine.low %v17686_v12, %v17686_v12  ;;  %v17734_v4 = vsel %vm2453_vm13, %v17355_v26, %v4462_v63 }
 0x5c1   :  { %v17727_v43 = vsel %vm20704_vm11, %v4783_v20, %v4511_v50  ;;  %v4815_v51 = vsel %vm20705_vm2, %v4511_v50, %v4559_v22  ;;  %v11802_v54 = vadd.f32 -1.0, %v4365_v59  ;;  %vm20706_vm0 = vcmask 1043456   ;;  %vm20707_vm4 = vmmov %vm20705_vm2 }
 0x5c2   :  { %v4831_v31 = vsel %vm20706_vm0, %v4815_v51, %v17686_v12  ;;  %v4814_v32 = vsel %vm20707_vm4, %v4510_v27, %v4558_v2  ;;  %vm2909_vm6 = vc.u32 %v17681_v47, %v17703_v56  ;;  %v4631_v33 = vrot.slane %v4621_v3, 1  ;;  %12031 = vmatmul.mubr.msk.bf16.gmra.mxu1 %vm20095_vm15, %v17714_v8  ;;  %vm20713_vm1 = vmmov %vm20706_vm0 }
 0x5c3   :  { %v4630_v62 = vrot.slane %v17699_v23, 1  ;;  %v2910_v37 = vadd.s32 1, %v17704_v58  ;;  %v17746_v26 = vor.u32 %v2974_v41, %v2973_v45  ;;  %v4389_v57 = vmul.f32 %v11802_v54, %v4381_v16  ;;  %9900 = vmatprep.mubr.bf16.mxu1 %v20167_v39 }
 0x5c4   :  { %v4397_v10 = vmul.f32 2.0, %v11802_v54  ;;  %v4669_v7 = vcombine.high %v11802_v54, %v11802_v54  ;;  %v4678_v18 = vrot.slane %v11802_v54, 6  ;;  %vm20708_vm14 = vcmask 1046528  }
 0x5c5   :  { %v4847_v14 = vsel %vm20708_vm14, %v4831_v31, %v4631_v33  ;;  %v2911_v28 = vsel %vm2909_vm6, %v2910_v37, %v17704_v58  ;;  %v2976_v17 = vshll.u32 %v20701_v15, %v17655_v6  ;;  %v2977_v12 = vshrl.u32 %v20702_v40, %v17684_v29  ;;  %12044 = vmatmul.mubr.msk.bf16.vlgmr.msra.gmra.mxu0 %vm10063_vm8, %v17751_v30  ;;  %vm20715_vm4 = vmmov %vm20708_vm14 }
 0x5c6   :  { %v4405_v38 = vmul.f32 %v11802_v54, %v4397_v10  ;;  %v4679_v60 = vrot.slane %v4669_v7, 6  ;;  %v4717_v50 = vcombine.high %v4389_v57, %v4389_v57  ;;  %v4726_v20 = vrot.slane %v4389_v57, 3  ;;  %10162 = vmatprep.mubr.bf16.mxu0 %v20167_v39 }
 0x5c7   :  { %vm20709_vm7 = vcmask 1041408   ;;  %v2912_v23 = vadd.s32 %v2911_v28, %v2907_v52  ;;  %v2979_v55 = vshll.u32 %v20702_v40, %v17655_v6  ;;  %v2980_v22 = vshrl.u32 %v20703_v9, %v17684_v29 }
 0x5c8   :  { %v4862_v63 = vsel %vm20709_vm7, %v4630_v62, %v4678_v18  ;;  %v11810_v2 = vadd.f32 -1.0, %v4405_v38  ;;  %v4727_v58 = vrot.slane %v4717_v50, 3  ;;  %vm20710_vm10 = vmmov %vm20709_vm7  ;;  %vm20711_vm5 = vcmask 1044480  }
 0x5c9   :  { %v4863_v45 = vsel %vm20710_vm10, %v4631_v33, %v4679_v60  ;;  %v4878_v41 = vsel %vm20711_vm5, %v4862_v63, %v4726_v20  ;;  %v2913_v59 = vadd.s32 536870912, %v2912_v23  ;;  %v2978_v16 = vor.u32 %v2977_v12, %v2976_v17  ;;  %vm20712_vm3 = vmmov %vm20711_vm5  ;;  %v17789_v17 = vld [vmem:[%s19982_s14 + $0x8] sm:$0xff]  }
 0x5ca   :  { %v2982_v52 = vshll.u32 %v20703_v9, %v17655_v6  ;;  %v2983_v3 = vshrl.u32 %v20667_v0, %v17684_v29  ;;  %v4765_v51 = vcombine.high %v11810_v2, %v11810_v2  ;;  %v4879_v54 = vsel %vm20712_vm3, %v4863_v45, %v4727_v58  ;;  %12037 = vmatmul.mubr.msk.bf16.vlgmr.msra.gmra.mxu1 %vm20095_vm15, %v17529_v11 }
 0x5cb   :  { %v10039_v31 = vpack.c.bf16 %v11810_v2, %v4878_v41  ;;  %v2985_v33 = vshll.u32 %v20667_v0, %v17655_v6  ;;  %v17779_v37 = vshrl.u32 %v2913_v59, 30  ;;  %v2986_v10 = vshrl.u32 %v20671_v13, %v17684_v29  ;;  %9910 = vmatprep.mubr.bf16.mxu1 %v20167_v39 }
 0x5cc   :  { %v2984_v57 = vor.u32 %v2983_v3, %v2982_v52  ;;  %vm2988_vm9 = vcmp.lt.s32.totalorder %v17675_v19, 1  ;;  %v10040_v7 = vpack.c.bf16 %v4765_v51, %v4879_v54  ;;  %v10024_v18 = vpack.c.bf16 %v4847_v14, %v17727_v43 }
 0x5cd   :  { %v4830_v28 = vsel %vm20713_vm1, %v4814_v32, %v4597_v5  ;;  %v2981_v12 = vor.u32 %v2980_v22, %v2979_v55  ;;  %v10079_v6 = vand.u32 %v17366_v49, %v10039_v31  ;;  %v2915_v29 = vshll.u32 %v17779_v37, 30  ;;  %12045 = vmatmul.mubr.msk.bf16.gmra.mxu0 %vm10063_vm8, %v17789_v17 }
 0x5ce   :  { %vm2990_vm12 = vcmp.lt.s32.totalorder %v17675_v19, 3  ;;  %vm2991_vm11 = vcmp.lt.s32.totalorder %v17675_v19, 4  ;;  %v10082_v43 = vand.u32 %v17366_v49, %v10040_v7  ;;  %v2987_v5 = vor.u32 %v2986_v10, %v2985_v33  ;;  %10258 = vmatprep.mubr.bf16.mxu0 %v20167_v39  ;;  %v17859_v33 = vpop.permute.xlu0 %9250  ;;  %v17868_v7 = vpop.permute.xlu1 %9255 }
 0x5cf   :  { %vm2989_vm2 = vcmp.lt.s32.totalorder %v17675_v19, 2  ;;  %v2996_v32 = vsel %vm2988_vm9, %v17746_v26, %v2978_v16  ;;  %vm20714_vm0 = vcmask 1045504   ;;  %v4846_v14 = vsel %vm20715_vm4, %v4830_v28, %v4630_v62  ;;  %20716 = vst [vmem:[#allocation34_spill] sm:$0xff] %v17868_v7 }
 0x5d0   :  { %v4798_v11 = vsel %vm20714_vm0, %v17734_v4, %v4510_v27  ;;  %v17808_v38 = vsub.s32 %v2912_v23, %v2915_v29  ;;  %v2997_v60 = vsel %vm2991_vm11, %v2984_v57, 920167782  ;;  %10185 = vmatprep.subr.bf16.mxu1 %v10082_v43  ;;  %v2993_v50 = vsel %vm2991_vm11, %v2981_v12, 2102212464 }
 0x5d1   :  { %v2998_v36 = vsel %vm2990_vm12, %v2981_v12, %v2997_v60  ;;  %v11745_v20 = vadd.s32 4294967169, %v17671_v35  ;;  %10186 = vmatpush1.bf16.msra.mxu1 %v10079_v6  ;;  %v10023_v62 = vpack.c.bf16 %v4846_v14, %v4798_v11  ;;  %v3001_v63 = vsel %vm2991_vm11, %v2987_v5, 1326507024 }
 0x5d2   :  { %v2918_v27 = vsub.s32 0, %v17808_v38  ;;  %v2999_v4 = vsel %vm2989_vm2, %v2996_v32, %v2998_v36  ;;  %10187 = vmatprep.subr.bf16.mxu1 %v10024_v18  ;;  %v2992_v22 = vsel %vm2988_vm9, %v17724_v34, %v17746_v26  ;;  %v2994_v2 = vsel %vm2990_vm12, %v2978_v16, %v2993_v50  ;;  %12038 = vmatmul.mubr.msk.bf16.gmra.mxu1 %vm20095_vm15, %v17322_v48  ;;  %v17856_v48 = vld [vmem:[%s20645_s4 + $0x28] sm:$0x77] }
 0x5d3   :  { %v17826_v23 = vmul.u32.u64.low %v17612_v44, %v2999_v4  ;;  %v17827_v55 = vmul.u32.u64.high %v17612_v44, %v2999_v4, %v17826_v23  ;;  %v3000_v58 = vsel %vm2988_vm9, %v2978_v16, %v2981_v12  ;;  %v3002_v45 = vsel %vm2990_vm12, %v2984_v57, %v3001_v63  ;;  %9920 = vmatprep.mubr.bf16.mxu1 %v20167_v39  ;;  %v17894_v4 = vpop.permute.xlu0 %9240 }
 0x5d4   :  { %v11738_v35 = vmin.u32 %v2918_v27, %v17808_v38  ;;  %v3070_v41 = vadd.s32 1, %v11745_v20  ;;  %v20091_v52 = vand.u32 2147483647, %v17589_v42  ;;  %v2995_v34 = vsel %vm2989_vm2, %v2992_v22, %v2994_v2 }
 0x5d5   :  { %10188 = vmatpush1.bf16.msra.mxu1 %v10023_v62  ;;  %v3003_v26 = vsel %vm2989_vm2, %v3000_v58, %v3002_v45  ;;  %vm2854_vm14 = vcmp.lt.s32.totalorder %v17515_v46, 0  ;;  %v2908_v19 = vadd.s32 %v17703_v56, %v17681_v47  ;;  %v3014_v57 = vadd.s32 1, %v17827_v55 }
 0x5d6   :  { %v2920_v59 = vclz %v11738_v35  ;;  %vm3071_vm6 = vcmp.gt.s32.totalorder %v3070_v41, 0  ;;  %v17850_v3 = vmul.u32.u64.low %v17612_v44, %v3003_v26  ;;  %v17851_v51 = vmul.u32.u64.high %v17612_v44, %v3003_v26, %v17850_v3 }
 0x5d7   :  { %v3072_v54 = vsel %vm3071_vm6, %v3070_v41, 0  ;;  %v17866_v10 = vand.u32 8388607, %v20091_v52  ;;  %v3011_v28 = vmul.u32 %v17612_v44, %v2995_v34  ;;  %v3167_v6 = vand.u32 2139095040, %v17856_v48 }
 0x5d8   :  { %v11739_v16 = vadd.s32 4294967294, %v2920_v59  ;;  %v3074_v31 = vand.u32 31, %v3072_v54  ;;  %vm17874_vm10 = vcmp.le.f32.partialorder %v2852_v24, 0.7853982  ;;  %v2938_v5 = vsub.s32 4, %v17779_v37 }
 0x5d9   :  { %vm3013_vm5 = vc.u32 %v17851_v51, %v17826_v23  ;;  %v17882_v32 = vshrl.u32 %v3072_v54, 5  ;;  %v20090_v45 = vand.u32 2147483647, %v17856_v48  ;;  %vm2958_vm3 = vcmp.lt.s32.totalorder %v17540_v61, 0 }
 0x5da   :  { %vm11740_vm7 = vcmp.lt.s32.totalorder %v11739_v16, 0  ;;  %v3075_v12 = vsub.s32 32, %v3074_v31  ;;  %v3077_v44 = vshll.u32 %v20700_v53, %v3074_v31  ;;  %v3080_v11 = vshll.u32 %v20701_v15, %v3074_v31  ;;  %12039 = vmatmul.mubr.msk.bf16.gmra.mxu1 %vm20095_vm15, %v17397_v25 }
 0x5db   :  { %v2923_v18 = vsel %vm11740_vm7, 0, %v11739_v16  ;;  %v3015_v60 = vsel %vm3013_vm5, %v3014_v57, %v17827_v55  ;;  %9930 = vmatprep.mubr.bf16.mxu1 %v20167_v39  ;;  %v3083_v20 = vshll.u32 %v20702_v40, %v3074_v31  ;;  %v3086_v25 = vshll.u32 %v20703_v9, %v3074_v31  ;;  %v17898_v55 = vpop.permute.xlu1 %9245 }
 0x5dc   :  { %v2924_v47 = vsub.s32 32, %v2923_v18  ;;  %v2925_v56 = vshll.u32 %v17808_v38, %v2923_v18  ;;  %v2928_v43 = vsub.s32 4294967266, %v2923_v18  ;;  %v3078_v38 = vshrl.u32 %v20701_v15, %v3075_v12 }
 0x5dd   :  { %v3016_v50 = vadd.s32 %v3015_v60, %v3011_v28  ;;  %v3081_v36 = vshrl.u32 %v20702_v40, %v3075_v12  ;;  %v3084_v27 = vshrl.u32 %v20703_v9, %v3075_v12  ;;  %v3087_v35 = vshrl.u32 %v20667_v0, %v3075_v12 }
 0x5de   :  { %v2926_v24 = vshrl.u32 %v2908_v19, %v2924_v47  ;;  %v2929_v14 = vadd.s32 127, %v2928_v43  ;;  %v3089_v2 = vshll.u32 %v20667_v0, %v3074_v31  ;;  %v3090_v58 = vshrl.u32 %v20671_v13, %v3075_v12 }
 0x5df   :  { %v3017_v22 = vadd.s32 536870912, %v3016_v50  ;;  %v2939_v34 = vsel %vm2854_vm14, %v2938_v5, %v17779_v37  ;;  %v3088_v26 = vor.u32 %v3087_v35, %v3086_v25  ;;  %v3079_v3 = vor.u32 %v3078_v38, %v3077_v44  ;;  %v17912_v37 = vpop.permute.xlu0 %9230  ;;  %v17920_v44 = vpop.permute.xlu1 %9235 }
 0x5e0   :  { %v2927_v62 = vor.u32 %v2926_v24, %v2925_v56  ;;  %v2930_v63 = vshll.u32 %v2929_v14, 23  ;;  %v3082_v54 = vor.u32 %v3081_v36, %v3080_v11  ;;  %v3168_v19 = vshrl.u32 %v3167_v6, 23 }
 0x5e1   :  { %v3018_v16 = vshrl.u32 %v3017_v22, 30  ;;  %v3085_v18 = vor.u32 %v3084_v27, %v3083_v20  ;;  %v3091_v31 = vor.u32 %v3090_v58, %v3089_v2  ;;  %vm3095_vm9 = vcmp.lt.s32.totalorder %v17882_v32, 4 }
 0x5e2   :  { %v2931_v41 = vor.u32 4788187, %v2930_v63  ;;  %v2934_v59 = vcvt.s32.f32 %v2927_v62  ;;  %v2941_v28 = vsel %vm17874_vm10, 0, %v2939_v34  ;;  %v3068_v56 = vor.u32 8388608, %v17866_v10  ;;  %12040 = vmatmul.mubr.msk.bf16.gmra.mxu1 %vm20095_vm15, %v17447_v21 }
 0x5e3   :  { %v3019_v47 = vshll.u32 %v3018_v16, 30  ;;  %vm3092_vm1 = vcmp.lt.s32.totalorder %v17882_v32, 1  ;;  %v3076_v43 = vshrl.u32 %v20700_v53, %v3075_v12  ;;  %vm3094_vm12 = vcmp.lt.s32.totalorder %v17882_v32, 3  ;;  %9940 = vmatprep.mubr.bf16.mxu1 %v20167_v39  ;;  %v17955_v34 = vpop.permute.xlu0 %9220 }
 0x5e4   :  { %v2932_v57 = vand.u32 2147483647, %v2931_v41  ;;  %v3101_v5 = vsel %vm3095_vm9, %v3088_v26, 920167782  ;;  %vm3093_vm11 = vcmp.lt.s32.totalorder %v17882_v32, 2  ;;  %v11749_v21 = vadd.s32 4294967169, %v3168_v19  ;;  %v17961_v19 = vpop.permute.xlu1 %9225 }
 0x5e5   :  { %v17923_v10 = vsub.s32 %v3016_v50, %v3019_v47  ;;  %v3097_v11 = vsel %vm3095_vm9, %v3085_v18, 2102212464  ;;  %v3100_v12 = vsel %vm3092_vm1, %v3079_v3, %v3082_v54  ;;  %v3104_v14 = vsel %vm3092_vm1, %v3082_v54, %v3085_v18  ;;  %v9335_v36 = vpop.f32.mrf.mxu0 }
 0x5e6   :  { %v2935_v6 = vmul.f32 %v2934_v59, %v2932_v57  ;;  %v3105_v60 = vsel %vm3095_vm9, %v3091_v31, 1326507024  ;;  %v3042_v50 = vsub.s32 4, %v3018_v16  ;;  %v3102_v20 = vsel %vm3094_vm12, %v3085_v18, %v3101_v5 }
 0x5e7   :  { %v3022_v38 = vsub.s32 0, %v17923_v10  ;;  %v3106_v27 = vsel %vm3094_vm12, %v3088_v26, %v3105_v60  ;;  %v3096_v63 = vsel %vm3092_vm1, %v3076_v43, %v3079_v3  ;;  %v3098_v25 = vsel %vm3094_vm12, %v3082_v54, %v3097_v11  ;;  %v17951_v58 = vpop.f32.mrf.mxu0 }
 0x5e8   :  { %v2936_v24 = vxor.u32 2147483648, %v2935_v6  ;;  %v17945_v35 = vshll.u32 %v3068_v56, 8  ;;  %20719 = vst [vmem:[#allocation23_spill] sm:$0xff] %v17951_v58  ;;  %v3107_v41 = vsel %vm3093_vm11, %v3104_v14, %v3106_v27  ;;  %v3174_v59 = vadd.s32 1, %v11749_v21 }
 0x5e9   :  { %v11742_v2 = vmin.u32 %v3022_v38, %v17923_v10  ;;  %v2945_v26 = vadd.s32 3, %v2941_v28  ;;  %v17957_v3 = vand.u32 3, %v2941_v28  ;;  %v3103_v54 = vsel %vm3093_vm11, %v3100_v12, %v3102_v20  ;;  %v9339_v18 = vpop.f32.mrf.mxu0 }
 0x5ea   :  { %v2937_v62 = vsel %vm2854_vm14, %v2936_v24, %v2935_v6  ;;  %v3043_v57 = vsel %vm2958_vm3, %v3042_v50, %v3018_v16  ;;  %v3099_v31 = vsel %vm3093_vm11, %v3096_v63, %v3098_v25  ;;  %12041 = vmatmul.mubr.msk.bf16.gmra.mxu1 %vm20095_vm15, %v17714_v8  ;;  %v17970_v28 = vadd.f32 %v9335_v36, %v17955_v34 }
 0x5eb   :  { %v2940_v22 = vsel %vm17874_vm10, %v17515_v46, %v2937_v62  ;;  %v3024_v29 = vclz %v11742_v2  ;;  %v17973_v47 = vadd.f32 %v9339_v18, %v17961_v19  ;;  %10205 = vmatprep.mubr.bf16.mxu1 %v20167_v39  ;;  %vm3175_vm2 = vcmp.gt.s32.totalorder %v3174_v59, 0  ;;  %v18003_v27 = vpop.f32.mrf.mxu0 }
 0x5ec   :  { %12246 = vcosq.f32 %v2940_v22  ;;  %20720 = vst [vmem:[#allocation32_spill] sm:$0xff] %v17970_v28  ;;  %v17976_v56 = vmul.u32.u64.low %v17945_v35, %v3107_v41  ;;  %v17977_v6 = vmul.u32.u64.high %v17945_v35, %v3107_v41, %v17976_v56  ;;  %vm17986_vm0 = vcmp.le.f32.partialorder %v2956_v1, 0.7853982  ;;  %20724 = vst [vmem:[#allocation33_spill] sm:$0xff] %v18003_v27 }
 0x5ed   :  { %12248 = vsinq.f32 %v2940_v22  ;;  %20721 = vst [vmem:[#allocation42_spill] sm:$0xff] %v17973_v47  ;;  %v11743_v16 = vadd.s32 4294967294, %v3024_v29  ;;  %v17981_v43 = vmul.u32.u64.low %v17945_v35, %v3103_v54  ;;  %v17982_v32 = vmul.u32.u64.high %v17945_v35, %v3103_v54, %v17981_v43 }
 0x5ee   :  { %v3171_v11 = vand.u32 8388607, %v20090_v45  ;;  %v3012_v21 = vadd.s32 %v17826_v23, %v17851_v51  ;;  %v3045_v24 = vsel %vm17986_vm0, 0, %v3043_v57  ;;  %v3176_v12 = vsel %vm3175_vm2, %v3174_v59, 0  ;;  %v9345_v59 = vpop.f32.mrf.mxu0 }
 0x5ef   :  { %vm11744_vm4 = vcmp.lt.s32.totalorder %v11743_v16, 0  ;;  %v2946_v14 = vand.u32 3, %v2945_v26  ;;  %v4430_v1 = vcombine.high %v17515_v46, %v17515_v46  ;;  %v3115_v38 = vmul.u32 %v17945_v35, %v3099_v31 }
 0x5f0   :  { %v3027_v60 = vsel %vm11744_vm4, 0, %v11743_v16  ;;  %vm3776_vm6 = vcmp.lt.s32.totalorder %v17957_v3, 2  ;;  %vm3117_vm14 = vc.u32 %v17977_v6, %v17981_v43  ;;  %vm2944_vm7 = vweird.f32 %v17515_v46 }
 0x5f1   :  { %v3028_v50 = vsub.s32 32, %v3027_v60  ;;  %v3029_v36 = vshll.u32 %v17923_v10, %v3027_v60  ;;  %v3032_v20 = vsub.s32 4294967266, %v3027_v60  ;;  %v3049_v23 = vadd.s32 3, %v3045_v24 }
 0x5f2   :  { %v3118_v51 = vadd.s32 1, %v17982_v32  ;;  %v3172_v62 = vor.u32 8388608, %v3171_v11  ;;  %v18008_v63 = vand.u32 31, %v3176_v12  ;;  %vm3777_vm10 = vcmp.eq.s32.totalorder %v17957_v3, 0  ;;  %12046 = vmatmul.mubr.msk.bf16.vlgmr.msra.gmra.mxu1 %vm10063_vm8, %v17751_v30 }
 0x5f3   :  { %vm3780_vm5 = vcmp.eq.s32.totalorder %v17957_v3, 2  ;;  %v3030_v25 = vshrl.u32 %v3012_v21, %v3028_v50  ;;  %v3033_v35 = vadd.s32 127, %v3032_v20  ;;  %vm2947_vm9 = vcmp.lt.s32.totalorder %v2946_v14, 2  ;;  %10215 = vmatprep.mubr.bf16.mxu1 %v20167_v39 }
 0x5f4   :  { %vm2948_vm1 = vcmp.eq.s32.totalorder %v2946_v14, 0  ;;  %v3119_v22 = vsel %vm3117_vm14, %v3118_v51, %v17982_v32  ;;  %vm2951_vm12 = vcmp.eq.s32.totalorder %v2946_v14, 2  ;;  %v18018_v54 = vand.u32 3, %v3049_v23 }
 0x5f5   :  { %v3031_v2 = vor.u32 %v3030_v25, %v3029_v36  ;;  %v3034_v41 = vshll.u32 %v3033_v35, 23  ;;  %v3120_v26 = vadd.s32 %v3119_v22, %v3115_v38  ;;  %v18020_v29 = vand.u32 3, %v3045_v24 }
 0x5f6   :  { %v18023_v57 = vsub.s32 32, %v18008_v63  ;;  %v18025_v18 = vshll.u32 %v3172_v62, 8  ;;  %v18027_v11 = vshrl.u32 %v3176_v12, 5  ;;  %v18030_v50 = vadd.f32 %v9345_v59, %v17912_v37 }
 0x5f7   :  { %v3035_v56 = vor.u32 4788187, %v3034_v41  ;;  %v3038_v16 = vcvt.s32.f32 %v3031_v2  ;;  %v3121_v32 = vadd.s32 536870912, %v3120_v26  ;;  %v18033_v38 = vadd.s32 %v17981_v43, %v17977_v6 }
 0x5f8   :  { %20725 = vst [vmem:[#allocation30_spill] sm:$0xff] %v18030_v50  ;;  %v3181_v24 = vshll.u32 %v20700_v53, %v18008_v63  ;;  %v3184_v51 = vshll.u32 %v20701_v15, %v18008_v63  ;;  %v3182_v25 = vshrl.u32 %v20701_v15, %v18023_v57  ;;  %v3185_v6 = vshrl.u32 %v20702_v40, %v18023_v57 }
 0x5f9   :  { %v12247_v31 = vpop.eup %12246  ;;  %v3036_v20 = vand.u32 2147483647, %v3035_v56  ;;  %v18037_v23 = vshrl.u32 %v3121_v32, 30  ;;  %v18059_v56 = vshrl.u32 %v20700_v53, %v18023_v57  ;;  %v3187_v32 = vshll.u32 %v20702_v40, %v18008_v63 }
 0x5fa   :  { %v12249_v21 = vpop.eup %12248  ;;  %v2952_v60 = vxor.u32 2147483648, %v12247_v31  ;;  %12047 = vmatmul.mubr.msk.bf16.gmra.mxu1 %vm10063_vm8, %v17789_v17  ;;  %vm3062_vm11 = vcmp.lt.s32.totalorder %v17589_v42, 0  ;;  %vm3883_vm2 = vcmp.eq.s32.totalorder %v18020_v29, 2  ;;  %vm3880_vm4 = vcmp.eq.s32.totalorder %v18020_v29, 0 }
 0x5fb   :  { %v2949_v36 = vxor.u32 2147483648, %v12249_v21  ;;  %v3039_v22 = vmul.f32 %v3038_v16, %v3036_v20  ;;  %v3123_v2 = vshll.u32 %v18037_v23, 30  ;;  %10311 = vmatprep.mubr.bf16.mxu1 %v20167_v39  ;;  %v3188_v20 = vshrl.u32 %v20703_v9, %v18023_v57 }
 0x5fc   :  { %v2953_v12 = vsel %vm2951_vm12, %v2952_v60, %v12249_v21  ;;  %v3782_v62 = vsel %vm3780_vm5, %v2952_v60, %v12249_v21  ;;  %vm20738_vm15 = vcmask 1046528  }
 0x5fd   :  { %v2950_v43 = vsel %vm2948_vm1, %v12247_v31, %v2949_v36  ;;  %v3779_v35 = vsel %vm3777_vm10, %v12247_v31, %v2949_v36  ;;  %v3040_v21 = vxor.u32 2147483648, %v3039_v22  ;;  %v18068_v14 = vsub.s32 %v3120_v26, %v3123_v2 }
 0x5fe   :  { %v2954_v41 = vsel %vm2947_vm9, %v2950_v43, %v2953_v12  ;;  %v3783_v59 = vsel %vm3776_vm6, %v3779_v35, %v3782_v62  ;;  %v18076_v43 = vor.u32 %v3182_v25, %v3181_v24  ;;  %v18078_v35 = vor.u32 %v3185_v6, %v3184_v51 }
 0x5ff   :  { %v2955_v31 = vsel %vm2944_vm7, nan, %v2954_v41  ;;  %v3784_v16 = vsel %vm2944_vm7, nan, %v3783_v59  ;;  %v3041_v12 = vsel %vm2958_vm3, %v3040_v21, %v3039_v22  ;;  %v3126_v62 = vsub.s32 0, %v18068_v14 }
 0x600   :  { %v4302_v3 = vmul.f32 2.0, %v2955_v31  ;;  %v4318_v60 = vmul.f32 2.0, %v3784_v16  ;;  %v4454_v36 = vcombine.high %v2955_v31, %v2955_v31  ;;  %v3044_v2 = vsel %vm17986_vm0, %v17540_v61, %v3041_v12 }
 0x601   :  { %v4464_v59 = vrot.slane %v2955_v31, 5  ;;  %12250 = vcosq.f32 %v3044_v2  ;;  %v4502_v45 = vcombine.high %v3784_v16, %v3784_v16  ;;  %v11746_v22 = vmin.u32 %v3126_v62, %v18068_v14 }
 0x602   :  { %v4310_v41 = vmul.f32 %v4302_v3, %v3784_v16  ;;  %v4326_v26 = vmul.f32 %v4318_v60, %v3784_v16  ;;  %v4465_v5 = vrot.slane %v4454_v36, 5  ;;  %12252 = vsinq.f32 %v3044_v2 }
 0x603   :  { %v4512_v24 = vrot.slane %v3784_v16, 2  ;;  %v3128_v25 = vclz %v11746_v22  ;;  %v3146_v51 = vsub.s32 4, %v18037_v23  ;;  %v18087_v6 = vshll.u32 %v20703_v9, %v18008_v63 }
 0x604   :  { %v11795_v21 = vadd.f32 -1.0, %v4326_v26  ;;  %v4342_v10 = vmul.f32 2.0, %v4310_v41  ;;  %v4550_v52 = vcombine.high %v4310_v41, %v4310_v41  ;;  %v4560_v31 = vrot.slane %v4310_v41, 7 }
 0x605   :  { %v4784_v60 = vsel %vm2453_vm13, %v17515_v46, %v4464_v59  ;;  %v4513_v36 = vrot.slane %v4502_v45, 2  ;;  %v4785_v16 = vsel %vm2453_vm13, %v4430_v1, %v4465_v5  ;;  %v11747_v62 = vadd.s32 4294967294, %v3128_v25 }
 0x606   :  { %v4350_v8 = vmul.f32 %v11795_v21, %v4342_v10  ;;  %v4358_v3 = vmul.f32 2.0, %v11795_v21  ;;  %v4561_v12 = vrot.slane %v4550_v52, 7  ;;  %vm3055_vm3 = vcmp.eq.s32.totalorder %v18018_v54, 2 }
 0x607   :  { %v18099_v10 = vshrl.u32 %v20667_v0, %v18023_v57  ;;  %vm3052_vm0 = vcmp.eq.s32.totalorder %v18018_v54, 0  ;;  %v4598_v52 = vcombine.low %v11795_v21, %v11795_v21  ;;  %vm20726_vm6 = vcmask 1045504  }
 0x608   :  { %v4366_v26 = vmul.f32 %v11795_v21, %v4358_v3  ;;  %v4382_v2 = vmul.f32 2.0, %v4350_v8  ;;  %v4622_v22 = vcombine.high %v4350_v8, %v4350_v8  ;;  %v18104_v46 = vsel %vm20726_vm6, %v4784_v60, %v4512_v24  ;;  %vm20727_vm5 = vmmov %vm20726_vm6 }
 0x609   :  { %vm11748_vm14 = vcmp.lt.s32.totalorder %v11747_v62, 0  ;;  %v18106_v45 = vor.u32 %v3188_v20, %v3187_v32  ;;  %vm3051_vm7 = vcmp.lt.s32.totalorder %v18018_v54, 2  ;;  %vm3879_vm10 = vcmp.lt.s32.totalorder %v18020_v29, 2 }
 0x60a   :  { %v11803_v5 = vadd.f32 -1.0, %v4366_v26  ;;  %v18111_v1 = vsel %vm20727_vm5, %v4785_v16, %v4513_v36  ;;  %vm20728_vm9 = vcmask 1040384   ;;  %v3147_v59 = vsel %vm3062_vm11, %v3146_v51, %v18037_v23 }
 0x60b   :  { %v4816_v41 = vsel %vm20728_vm9, %v4512_v24, %v4560_v31  ;;  %v4633_v25 = vrot.slane %v4622_v22, 1  ;;  %vm3048_vm1 = vweird.f32 %v17540_v61  ;;  %v4632_v3 = vrot.slane %v4350_v8, 1  ;;  %vm20729_vm12 = vmmov %vm20728_vm9 }
 0x60c   :  { %v4817_v32 = vsel %vm20729_vm12, %v4513_v36, %v4561_v12  ;;  %v3131_v20 = vsel %vm11748_vm14, 0, %v11747_v62  ;;  %v4390_v60 = vmul.f32 %v11803_v5, %v4382_v2  ;;  %v4398_v26 = vmul.f32 2.0, %v11803_v5 }
 0x60d   :  { %v4670_v28 = vcombine.high %v11803_v5, %v11803_v5  ;;  %v4680_v47 = vrot.slane %v11803_v5, 6  ;;  %vm20730_vm6 = vcmask 1043456   ;;  %v3132_v58 = vsub.s32 32, %v3131_v20 }
 0x60e   :  { %v4832_v16 = vsel %vm20730_vm6, %v4816_v41, %v4598_v52  ;;  %v3133_v24 = vshll.u32 %v18068_v14, %v3131_v20  ;;  %v3136_v31 = vsub.s32 4294967266, %v3131_v20  ;;  %v4406_v27 = vmul.f32 %v11803_v5, %v4398_v26  ;;  %vm20735_vm9 = vmmov %vm20730_vm6  ;;  %v12251_v52 = vpop.eup %12250 }
 0x60f   :  { %v4681_v7 = vrot.slane %v4670_v28, 6  ;;  %v4718_v23 = vcombine.high %v4390_v60, %v4390_v60  ;;  %v4728_v51 = vrot.slane %v4390_v60, 3  ;;  %v20731_v22 = vand.u32 2147483647, %v17589_v42  ;;  %v12253_v20 = vpop.eup %12252 }
 0x610   :  { %vm20734_vm14 = vcmask 1041408   ;;  %v4833_v12 = vsel %vm20735_vm9, %v4817_v32, %v11795_v21  ;;  %v3134_v62 = vshrl.u32 %v18033_v38, %v3132_v58  ;;  %v3137_v2 = vadd.s32 127, %v3136_v31  ;;  %vm20740_vm9 = vmmov %vm20738_vm15 }
 0x611   :  { %vm18123_vm5 = vcmp.le.f32.partialorder %v20731_v22, 0.7853982  ;;  %v4864_v36 = vsel %vm20734_vm14, %v4632_v3, %v4680_v47  ;;  %v11811_v14 = vadd.f32 -1.0, %v4406_v27  ;;  %v4729_v41 = vrot.slane %v4718_v23, 3  ;;  %vm20736_vm12 = vmmov %vm20734_vm14 }
 0x612   :  { %v4865_v28 = vsel %vm20736_vm12, %v4633_v25, %v4681_v7  ;;  %vm20737_vm6 = vcmask 1044480   ;;  %v3056_v60 = vxor.u32 2147483648, %v12251_v52  ;;  %v4848_v26 = vsel %vm20738_vm15, %v4832_v16, %v4632_v3  ;;  %vm20755_vm12 = vmmov %vm20740_vm9 }
 0x613   :  { %v4880_v5 = vsel %vm20737_vm6, %v4864_v36, %v4728_v51  ;;  %v3135_v22 = vor.u32 %v3134_v62, %v3133_v24  ;;  %v3138_v9 = vshll.u32 %v3137_v2, 23  ;;  %v4766_v40 = vcombine.high %v11811_v14, %v11811_v14  ;;  %vm20739_vm14 = vmmov %vm20737_vm6  ;;  %v9416_v2 = vpop.f32.mrf.mxu1 }
 0x614   :  { %v4881_v47 = vsel %vm20739_vm14, %v4865_v28, %v4729_v41  ;;  %v3053_v21 = vxor.u32 2147483648, %v12253_v20  ;;  %v10041_v32 = vpack.c.bf16 %v11811_v14, %v4880_v5  ;;  %v3057_v58 = vsel %vm3055_vm3, %v3056_v60, %v12253_v20  ;;  %vm20758_vm6 = vmmov %vm20740_vm9 }
 0x615   :  { %v3885_v27 = vsel %vm3883_vm2, %v3056_v60, %v12253_v20  ;;  %v4849_v7 = vsel %vm20740_vm9, %v4833_v12, %v4633_v25  ;;  %v3139_v38 = vor.u32 4788187, %v3138_v9  ;;  %v10042_v31 = vpack.c.bf16 %v4766_v40, %v4881_v47  ;;  %v18165_v5 = vpop.f32.mrf.mxu1 }
 0x616   :  { %v3054_v3 = vsel %vm3052_vm0, %v12251_v52, %v3053_v21  ;;  %v3882_v16 = vsel %vm3880_vm4, %v12251_v52, %v3053_v21  ;;  %v3142_v24 = vcvt.s32.f32 %v3135_v22  ;;  %v10085_v36 = vand.u32 %v17366_v49, %v10041_v32  ;;  %20741 = vst [vmem:[#allocation15_spill] sm:$0xff] %v18165_v5 }
 0x617   :  { %v3058_v23 = vsel %vm3051_vm7, %v3054_v3, %v3057_v58  ;;  %v3886_v51 = vsel %vm3879_vm10, %v3882_v16, %v3885_v27  ;;  %v3140_v62 = vand.u32 2147483647, %v3139_v38  ;;  %v10088_v25 = vand.u32 %v17366_v49, %v10042_v31  ;;  %v18182_v38 = vpop.f32.mrf.mxu0 }
 0x618   :  { %v3059_v40 = vsel %vm3048_vm1, nan, %v3058_v23  ;;  %v18153_v9 = vsel %vm3048_vm1, nan, %v3886_v51  ;;  %v10026_v12 = vpack.c.bf16 %v4849_v7, %v18111_v1  ;;  %v3149_v29 = vsel %vm18123_vm5, 0, %v3147_v59  ;;  %20743 = vst [vmem:[#allocation36_spill] sm:$0xff] %v18182_v38 }
 0x619   :  { %v4303_v54 = vmul.f32 2.0, %v3059_v40  ;;  %v4319_v52 = vmul.f32 2.0, %v18153_v9  ;;  %v18161_v14 = vor.u32 %v18099_v10, %v18087_v6  ;;  %10238 = vmatprep.subr.bf16.mxu0 %v10088_v25  ;;  %v4455_v41 = vcombine.high %v3059_v40, %v3059_v40 }
 0x61a   :  { %v4503_v28 = vcombine.high %v18153_v9, %v18153_v9  ;;  %v3143_v20 = vmul.f32 %v3142_v24, %v3140_v62  ;;  %v18169_v1 = vshll.u32 %v20667_v0, %v18008_v63  ;;  %10239 = vmatpush1.bf16.msra.mxu0 %v10085_v36  ;;  %v10025_v6 = vpack.c.bf16 %v4848_v26, %v18104_v46  ;;  %v9420_v63 = vpop.f32.mrf.mxu1 }
 0x61b   :  { %v4311_v60 = vmul.f32 %v4303_v54, %v18153_v9  ;;  %v4327_v59 = vmul.f32 %v4319_v52, %v18153_v9  ;;  %v18176_v10 = vshrl.u32 %v20671_v13, %v18023_v57  ;;  %10240 = vmatprep.subr.bf16.mxu0 %v10026_v12  ;;  %v18179_v22 = vadd.f32 %v9416_v2, %v17955_v34 }
 0x61c   :  { %v4466_v47 = vrot.slane %v3059_v40, 5  ;;  %v4514_v21 = vrot.slane %v18153_v9, 2  ;;  %v3153_v32 = vadd.s32 3, %v3149_v29  ;;  %v3144_v31 = vxor.u32 2147483648, %v3143_v20  ;;  %v18187_v16 = vpop.f32.mrf.mxu1 }
 0x61d   :  { %20742 = vst [vmem:[#allocation22_spill] sm:$0xff] %v18179_v22  ;;  %v11796_v58 = vadd.f32 -1.0, %v4327_v59  ;;  %v4343_v27 = vmul.f32 2.0, %v4311_v60  ;;  %v4551_v7 = vcombine.high %v4311_v60, %v4311_v60  ;;  %v4467_v46 = vrot.slane %v4455_v41, 5  ;;  %20745 = vst [vmem:[#allocation48_spill] sm:$0xff] %v18187_v16  ;;  %v18199_v41 = vpop.f32.mrf.mxu0 }
 0x61e   :  { %v4515_v26 = vrot.slane %v4503_v28, 2  ;;  %v4562_v3 = vrot.slane %v4311_v60, 7  ;;  %v18185_v57 = vadd.f32 %v9420_v63, %v17961_v19  ;;  %10241 = vmatpush1.bf16.msra.mxu0 %v10025_v6  ;;  %vm20746_vm15 = vcmask 1040384   ;;  %v18192_v40 = vpop.f32.mrf.mxu1 }
 0x61f   :  { %v4351_v24 = vmul.f32 %v11796_v58, %v4343_v27  ;;  %v4359_v23 = vmul.f32 2.0, %v11796_v58  ;;  %v4563_v51 = vrot.slane %v4551_v7, 7  ;;  %v4599_v36 = vcombine.low %v11796_v58, %v11796_v58  ;;  %vm20747_vm2 = vmmov %vm20746_vm15 }
 0x620   :  { %20744 = vst [vmem:[#allocation11_spill] sm:$0xff] %v18185_v57  ;;  %v4818_v62 = vsel %vm20746_vm15, %v4514_v21, %v4562_v3  ;;  %v3195_v9 = vor.u32 %v18176_v10, %v18169_v1  ;;  %vm3196_vm3 = vcmp.lt.s32.totalorder %v18027_v11, 1  ;;  %v3145_v52 = vsel %vm3062_vm11, %v3144_v31, %v3143_v20  ;;  %v18204_v60 = vpop.f32.mrf.mxu1 }
 0x621   :  { %v4367_v12 = vmul.f32 %v11796_v58, %v4359_v23  ;;  %v4383_v2 = vmul.f32 2.0, %v4351_v24  ;;  %v4623_v54 = vcombine.high %v4351_v24, %v4351_v24  ;;  %v4819_v28 = vsel %vm20747_vm2, %v4515_v26, %v4563_v51  ;;  %12048 = vmatmul.mubr.msk.bf16.vlgmr.msra.gmra.mxu0 %vm10063_vm8, %v17751_v30  ;;  %20748 = vst [vmem:[#allocation16_spill] sm:$0xff] %v18204_v60  ;;  %v12298_v30 = vld [vmem:[%s20645_s4 + $0x18] sm:$0x77] }
 0x622   :  { %v18206_v59 = vand.u32 3, %v3153_v32  ;;  %v18208_v6 = vand.u32 3, %v3149_v29  ;;  %vm3197_vm0 = vcmp.lt.s32.totalorder %v18027_v11, 2  ;;  %vm3198_vm4 = vcmp.lt.s32.totalorder %v18027_v11, 3  ;;  %10268 = vmatprep.mubr.bf16.mxu0 %v20167_v39  ;;  %v9430_v3 = vpop.f32.mrf.mxu1 }
 0x623   :  { %v11804_v63 = vadd.f32 -1.0, %v4367_v12  ;;  %v20749_v42 = vcombine.high %v17540_v61, %v17540_v61  ;;  %v4786_v27 = vsel %vm2453_vm13, %v12298_v30, %v4466_v47  ;;  %vm20750_vm11 = vcmask 1043456   ;;  %v18226_v61 = vld [vmem:[%s20645_s4 + $0x20] sm:$0x77] }
 0x624   :  { %v4834_v32 = vsel %vm20750_vm11, %v4818_v62, %v4599_v36  ;;  %v4635_v29 = vrot.slane %v4623_v54, 1  ;;  %v4634_v7 = vrot.slane %v4351_v24, 1  ;;  %vm20751_vm7 = vmmov %vm20750_vm11  ;;  %v18231_v62 = vpop.f32.mrf.mxu0  ;;  %vm20753_vm10 = vcmask 1045504   ;;  %v18240_v54 = vpop.f32.mrf.mxu1 }
 0x625   :  { %v4787_v20 = vsel %vm2453_vm13, %v20749_v42, %v4467_v46  ;;  %v4835_v31 = vsel %vm20751_vm7, %v4819_v28, %v11796_v58  ;;  %v3148_v46 = vsel %vm18123_vm5, %v18226_v61, %v3145_v52  ;;  %v4391_v23 = vmul.f32 %v11804_v63, %v4383_v2  ;;  %20752 = vst [vmem:[#allocation43_spill] sm:$0xff] %v18231_v62  ;;  %vm20754_vm1 = vmmov %vm20753_vm10 }
 0x626   :  { %v4399_v47 = vmul.f32 2.0, %v11804_v63  ;;  %v4671_v51 = vcombine.high %v11804_v63, %v11804_v63  ;;  %v4682_v36 = vrot.slane %v11804_v63, 6  ;;  %v4803_v24 = vsel %vm20753_vm10, %v4787_v20, %v4515_v26  ;;  %20756 = vst [vmem:[#allocation7_spill] sm:$0xff] %v18240_v54  ;;  %v9436_v25 = vpop.f32.mrf.mxu1 }
 0x627   :  { %v18235_v58 = vsel %vm20754_vm1, %v4786_v27, %v4514_v21  ;;  %v18238_v12 = vsel %vm20755_vm12, %v4834_v32, %v4634_v7  ;;  %12254 = vcosq.f32 %v3148_v46  ;;  %v4719_v28 = vcombine.high %v4391_v23, %v4391_v23  ;;  %v9355_v32 = vpop.f32.mrf.mxu0 }
 0x628   :  { %v4407_v8 = vmul.f32 %v11804_v63, %v4399_v47  ;;  %v4683_v52 = vrot.slane %v4671_v51, 6  ;;  %v4730_v2 = vrot.slane %v4391_v23, 3  ;;  %vm20757_vm5 = vcmask 1041408  }
 0x629   :  { %v4866_v42 = vsel %vm20757_vm5, %v4634_v7, %v4682_v36  ;;  %v4851_v30 = vsel %vm20758_vm6, %v4835_v31, %v4635_v29  ;;  %12256 = vsinq.f32 %v3148_v46  ;;  %vm3199_vm14 = vcmp.lt.s32.totalorder %v18027_v11, 4  ;;  %vm20759_vm9 = vmmov %vm20757_vm5  ;;  %12049 = vmatmul.mubr.msk.bf16.gmra.mxu0 %vm10063_vm8, %v17789_v17 }
 0x62a   :  { %v11812_v26 = vadd.f32 -1.0, %v4407_v8  ;;  %v4731_v21 = vrot.slane %v4719_v28, 3  ;;  %v4867_v20 = vsel %vm20759_vm9, %v4635_v29, %v4683_v52  ;;  %vm20760_vm15 = vcmask 1044480   ;;  %10364 = vmatprep.mubr.bf16.mxu0 %v20167_v39 }
 0x62b   :  { %v4882_v27 = vsel %vm20760_vm15, %v4866_v42, %v4730_v2  ;;  %v3200_v63 = vsel %vm3196_vm3, %v18059_v56, %v18076_v43  ;;  %v3201_v7 = vsel %vm3199_vm14, %v18106_v45, 2102212464  ;;  %v3204_v29 = vsel %vm3196_vm3, %v18076_v43, %v18078_v35  ;;  %vm20761_vm2 = vmmov %vm20760_vm15  ;;  %v18287_v42 = vpop.f32.mrf.mxu0 }
 0x62c   :  { %v3205_v31 = vsel %vm3199_vm14, %v18161_v14, 920167782  ;;  %v4767_v46 = vcombine.high %v11812_v26, %v11812_v26  ;;  %v4883_v23 = vsel %vm20761_vm2, %v4867_v20, %v4731_v21  ;;  %v10043_v47 = vpack.c.bf16 %v11812_v26, %v4882_v27  ;;  %20762 = vst [vmem:[#allocation50_spill] sm:$0xff] %v18287_v42 }
 0x62d   :  { %v3202_v56 = vsel %vm3198_vm4, %v18078_v35, %v3201_v7  ;;  %v10028_v51 = vpack.c.bf16 %v4851_v30, %v4803_v24  ;;  %v3206_v36 = vsel %vm3198_vm4, %v18106_v45, %v3205_v31  ;;  %v3208_v43 = vsel %vm3196_vm3, %v18078_v35, %v18106_v45  ;;  %v18289_v35 = vpop.f32.mrf.mxu1  ;;  %v9359_v7 = vpop.f32.mrf.mxu0 }
 0x62e   :  { %v3209_v8 = vsel %vm3199_vm14, %v3195_v9, 1326507024  ;;  %v10044_v52 = vpack.c.bf16 %v4767_v46, %v4883_v23  ;;  %v3203_v28 = vsel %vm3197_vm0, %v3200_v63, %v3202_v56  ;;  %v3207_v24 = vsel %vm3197_vm0, %v3204_v29, %v3206_v36  ;;  %20763 = vst [vmem:[#allocation31_spill] sm:$0xff] %v18289_v35 }
 0x62f   :  { %v3210_v2 = vsel %vm3198_vm4, %v18161_v14, %v3209_v8  ;;  %v10091_v45 = vand.u32 %v17366_v49, %v10043_v47  ;;  %v18295_v10 = vmul.u32.u64.low %v18025_v18, %v3207_v24  ;;  %v18296_v9 = vmul.u32.u64.high %v18025_v18, %v3207_v24, %v18295_v10  ;;  %v9440_v29 = vpop.f32.mrf.mxu1 }
 0x630   :  { %v3211_v1 = vsel %vm3197_vm0, %v3208_v43, %v3210_v2  ;;  %v10094_v30 = vand.u32 %v17366_v49, %v10044_v52  ;;  %v18306_v14 = vadd.f32 %v18199_v41, %v17920_v44  ;;  %v18310_v20 = vadd.f32 %v18192_v40, %v17912_v37 }
 0x631   :  { %v18301_v26 = vmul.u32.u64.low %v18025_v18, %v3211_v1  ;;  %v18302_v21 = vmul.u32.u64.high %v18025_v18, %v3211_v1, %v18301_v26  ;;  %v18313_v11 = vadd.f32 %v9430_v3, %v17920_v44  ;;  %vm3155_vm3 = vcmp.lt.s32.totalorder %v18206_v59, 2 }
 0x632   :  { %20764 = vst [vmem:[#allocation52_spill] sm:$0xff] %v18306_v14  ;;  %20765 = vst [vmem:[#allocation47_spill] sm:$0xff] %v18310_v20  ;;  %10291 = vmatprep.subr.bf16.mxu1 %v10094_v30  ;;  %v3219_v27 = vmul.u32 %v18025_v18, %v3203_v28  ;;  %v10027_v41 = vpack.c.bf16 %v18238_v12, %v18235_v58  ;;  %vm3156_vm0 = vcmp.eq.s32.totalorder %v18206_v59, 0  ;;  %v3222_v40 = vadd.s32 1, %v18296_v9 }
 0x633   :  { %20766 = vst [vmem:[#allocation38_spill] sm:$0xff] %v18313_v11  ;;  %10292 = vmatpush1.bf16.msra.mxu1 %v10091_v45  ;;  %vm3159_vm4 = vcmp.eq.s32.totalorder %v18206_v59, 2  ;;  %vm3986_vm11 = vcmp.eq.s32.totalorder %v18208_v6, 2  ;;  %vm3221_vm7 = vc.u32 %v18302_v21, %v18295_v10  ;;  %v18330_v18 = vadd.f32 %v9355_v32, %v17894_v4 }
 0x634   :  { %v12255_v31 = vpop.eup %12254  ;;  %10293 = vmatprep.subr.bf16.mxu1 %v10028_v51  ;;  %v3223_v12 = vsel %vm3221_vm7, %v3222_v40, %v18296_v9  ;;  %v18334_v46 = vadd.f32 %v9359_v7, %v17898_v55  ;;  %v18337_v23 = vadd.f32 %v9440_v29, %v17898_v55  ;;  %vm3982_vm10 = vcmp.lt.s32.totalorder %v18208_v6, 2 }
 0x635   :  { %20767 = vst [vmem:[#allocation40_spill] sm:$0xff] %v18330_v18  ;;  %v3160_v58 = vxor.u32 2147483648, %v12255_v31  ;;  %vm3983_vm1 = vcmp.eq.s32.totalorder %v18208_v6, 0  ;;  %v3224_v56 = vadd.s32 %v3223_v12, %v3219_v27  ;;  %v18342_v51 = vadd.f32 %v9436_v25, %v17894_v4  ;;  %v18354_v25 = vld [vmem:[%s19982_s14] sm:$0xff]  }
 0x636   :  { %20768 = vst [vmem:[#allocation45_spill] sm:$0xff] %v18334_v46  ;;  %20769 = vst [vmem:[#allocation37_spill] sm:$0xff] %v18337_v23  ;;  %v12257_v47 = vpop.eup %12256  ;;  %vm3152_vm12 = vweird.f32 %v18226_v61  ;;  %vm20771_vm5 = vcmask 1040384   ;;  %vm20772_vm14 = vcmask 1043456   ;;  %vm3166_vm15 = vcmp.lt.s32.totalorder %v17856_v48, 0 }
 0x637   :  { %20770 = vst [vmem:[#allocation17_spill] sm:$0xff] %v18342_v51  ;;  %10294 = vmatpush1.bf16.msra.mxu1 %v10027_v41  ;;  %v3157_v32 = vxor.u32 2147483648, %v12257_v47  ;;  %v3161_v36 = vsel %vm3159_vm4, %v3160_v58, %v12257_v47  ;;  %v3988_v43 = vsel %vm3986_vm11, %v3160_v58, %v12257_v47  ;;  %v3225_v52 = vadd.s32 536870912, %v3224_v56  ;;  %vm20773_vm9 = vmmov %vm20771_vm5 }
 0x638   :  { %vm20774_vm2 = vcmask 1041408   ;;  %vm20777_vm4 = vmmov %vm20772_vm14  ;;  %vm20781_vm7 = vcmask 1045504  }
 0x639   :  { %v3158_v24 = vsel %vm3156_vm0, %v12255_v31, %v3157_v32  ;;  %v3985_v2 = vsel %vm3983_vm1, %v12255_v31, %v3157_v32  ;;  %v18362_v9 = vshrl.u32 %v3225_v52, 30  ;;  %v18381_v31 = vld [vmem:[%s20645_s4 + $0x30] sm:$0x77]  ;;  %vm20776_vm0 = vcmask 1044480   ;;  %vm20783_vm1 = vmmov %vm20781_vm7 }
 0x63a   :  { %12050 = vmatmul.mubr.msk.bf16.vlgmr.msra.gmra.mxu1 %vm10063_vm8, %v18354_v25  ;;  %v3162_v45 = vsel %vm3155_vm3, %v3158_v24, %v3161_v36  ;;  %v3989_v1 = vsel %vm3982_vm10, %v3985_v2, %v3988_v43  ;;  %v4432_v36 = vcombine.high %v18226_v61, %v18226_v61  ;;  %v3271_v43 = vand.u32 2139095040, %v18381_v31  ;;  %vm20775_vm3 = vmmov %vm20774_vm2 }
 0x63b   :  { %10321 = vmatprep.mubr.bf16.mxu1 %v20167_v39  ;;  %v18365_v30 = vsel %vm3152_vm12, nan, %v3162_v45  ;;  %v18367_v26 = vsel %vm3152_vm12, nan, %v3989_v1  ;;  %v3227_v29 = vshll.u32 %v18362_v9, 30  ;;  %v3220_v1 = vadd.s32 %v18295_v10, %v18302_v21  ;;  %vm20780_vm11 = vmmov %vm20776_vm0 }
 0x63c   :  { %v4304_v27 = vmul.f32 2.0, %v18365_v30  ;;  %v4320_v7 = vmul.f32 2.0, %v18367_v26  ;;  %v4456_v40 = vcombine.high %v18365_v30, %v18365_v30  ;;  %v4504_v58 = vcombine.high %v18367_v26, %v18367_v26 }
 0x63d   :  { %v18374_v6 = vsub.s32 %v3224_v56, %v3227_v29  ;;  %v3272_v63 = vshrl.u32 %v3271_v43, 23  ;;  %vm20782_vm10 = vcmask 1046528  }
 0x63e   :  { %v4312_v59 = vmul.f32 %v4304_v27, %v18367_v26  ;;  %v4328_v41 = vmul.f32 %v4320_v7, %v18367_v26  ;;  %v4469_v45 = vrot.slane %v4456_v40, 5  ;;  %v4517_v27 = vrot.slane %v4504_v58, 2  ;;  %vm20784_vm12 = vmmov %vm20782_vm10 }
 0x63f   :  { %v3230_v32 = vsub.s32 0, %v18374_v6  ;;  %v4516_v40 = vrot.slane %v18367_v26, 2 }
 0x640   :  { %v11797_v12 = vadd.f32 -1.0, %v4328_v41  ;;  %v4344_v47 = vmul.f32 2.0, %v4312_v59  ;;  %v4552_v56 = vcombine.high %v4312_v59, %v4312_v59  ;;  %v4789_v58 = vsel %vm2453_vm13, %v4432_v36, %v4469_v45 }
 0x641   :  { %v11750_v2 = vmin.u32 %v3230_v32, %v18374_v6  ;;  %v4564_v32 = vrot.slane %v4312_v59, 7 }
 0x642   :  { %12051 = vmatmul.mubr.msk.bf16.gmra.mxu1 %vm10063_vm8, %v17789_v17  ;;  %v18391_v52 = vmul.f32 %v11797_v12, %v4344_v47  ;;  %v4360_v24 = vmul.f32 2.0, %v11797_v12  ;;  %v4565_v7 = vrot.slane %v4552_v56, 7  ;;  %v4468_v56 = vrot.slane %v18365_v30, 5 }
 0x643   :  { %10417 = vmatprep.mubr.bf16.mxu1 %v20167_v39  ;;  %v3232_v47 = vclz %v11750_v2  ;;  %v4600_v22 = vcombine.low %v11797_v12, %v11797_v12  ;;  %v4820_v43 = vsel %vm20773_vm9, %v4516_v40, %v4564_v32 }
 0x644   :  { %v4368_v41 = vmul.f32 %v11797_v12, %v4360_v24  ;;  %v4384_v3 = vmul.f32 2.0, %v18391_v52  ;;  %v4624_v17 = vcombine.high %v18391_v52, %v18391_v52  ;;  %v4636_v24 = vrot.slane %v18391_v52, 1 }
 0x645   :  { %v11751_v21 = vadd.s32 4294967294, %v3232_v47  ;;  %v4821_v29 = vsel %vm20771_vm5, %v4517_v27, %v4565_v7  ;;  %v4836_v32 = vsel %vm20777_vm4, %v4820_v43, %v4600_v22 }
 0x646   :  { %v11805_v10 = vadd.f32 -1.0, %v4368_v41  ;;  %v4637_v8 = vrot.slane %v4624_v17, 1  ;;  %v4837_v59 = vsel %vm20772_vm14, %v4821_v29, %v11797_v12  ;;  %v4852_v43 = vsel %vm20784_vm12, %v4836_v32, %v4636_v24 }
 0x647   :  { %vm11752_vm6 = vcmp.lt.s32.totalorder %v11751_v21, 0 }
 0x648   :  { %v4392_v57 = vmul.f32 %v11805_v10, %v4384_v3  ;;  %v4400_v2 = vmul.f32 2.0, %v11805_v10  ;;  %v4672_v20 = vcombine.high %v11805_v10, %v11805_v10  ;;  %v3235_v28 = vsel %vm11752_vm6, 0, %v11751_v21 }
 0x649   :  { %v4684_v26 = vrot.slane %v11805_v10, 6  ;;  %v3236_v30 = vsub.s32 32, %v3235_v28  ;;  %v3237_v52 = vshll.u32 %v18374_v6, %v3235_v28  ;;  %v3240_v7 = vsub.s32 4294967266, %v3235_v28  ;;  %v18419_v6 = vpop.f32.mrf.mxu1 }
 0x64a   :  { %v4408_v41 = vmul.f32 %v11805_v10, %v4400_v2  ;;  %v4685_v36 = vrot.slane %v4672_v20, 6  ;;  %v4720_v45 = vcombine.high %v4392_v57, %v4392_v57  ;;  %v4732_v17 = vrot.slane %v4392_v57, 3  ;;  %v18417_v10 = vpop.f32.mrf.mxu0  ;;  %20779 = vst [vmem:[#allocation9_spill] sm:$0xff] %v18419_v6 }
 0x64b   :  { %v4868_v3 = vsel %vm20774_vm2, %v4636_v24, %v4684_v26  ;;  %v3238_v51 = vshrl.u32 %v3220_v1, %v3236_v30  ;;  %v3241_v12 = vadd.s32 127, %v3240_v7  ;;  %v4788_v20 = vsel %vm2453_vm13, %v18226_v61, %v4468_v56  ;;  %20778 = vst [vmem:[#allocation5_spill] sm:$0xff] %v18417_v10  ;;  %v18427_v61 = vld [vmem:[%s20645_s4 + $0x38] sm:$0x77] }
 0x64c   :  { %v11813_v47 = vadd.f32 -1.0, %v4408_v41  ;;  %v4733_v11 = vrot.slane %v4720_v45, 3  ;;  %v4869_v21 = vsel %vm20775_vm3, %v4637_v8, %v4685_v36  ;;  %v4884_v29 = vsel %vm20776_vm0, %v4868_v3, %v4732_v17 }
 0x64d   :  { %v3239_v2 = vor.u32 %v3238_v51, %v3237_v52  ;;  %v3242_v41 = vshll.u32 %v3241_v12, 23  ;;  %v4805_v1 = vsel %vm20781_vm7, %v4789_v58, %v4517_v27  ;;  %v4853_v36 = vsel %vm20782_vm10, %v4837_v59, %v4637_v8  ;;  %v9365_v58 = vpop.f32.mrf.mxu0  ;;  %v9446_v8 = vpop.f32.mrf.mxu1 }
 0x64e   :  { %v4768_v57 = vcombine.high %v11813_v47, %v11813_v47  ;;  %v4885_v28 = vsel %vm20780_vm11, %v4869_v21, %v4733_v11  ;;  %v10045_v26 = vpack.c.bf16 %v11813_v47, %v4884_v29  ;;  %v11753_v45 = vadd.s32 4294967169, %v3272_v63 }
 0x64f   :  { %v4804_v56 = vsel %vm20783_vm1, %v4788_v20, %v4516_v40  ;;  %v20785_v11 = vand.u32 2147483647, %v18381_v31  ;;  %v3243_v30 = vor.u32 4788187, %v3242_v41  ;;  %v3246_v52 = vcvt.s32.f32 %v3239_v2 }
 0x650   :  { %v10046_v22 = vpack.c.bf16 %v4768_v57, %v4885_v28  ;;  %v10097_v27 = vand.u32 %v17366_v49, %v10045_v26  ;;  %v3278_v63 = vadd.s32 1, %v11753_v45  ;;  %v10030_v7 = vpack.c.bf16 %v4853_v36, %v4805_v1 }
 0x651   :  { %v3275_v51 = vand.u32 8388607, %v20785_v11  ;;  %v3375_v3 = vand.u32 2139095040, %v18427_v61  ;;  %v20786_v40 = vand.u32 2147483647, %v17856_v48  ;;  %v20789_v21 = vsub.s32 4, %v18362_v9 }
 0x652   :  { %v10100_v59 = vand.u32 %v17366_v49, %v10046_v22  ;;  %v3244_v47 = vand.u32 2147483647, %v3243_v30  ;;  %vm3279_vm6 = vcmp.gt.s32.totalorder %v3278_v63, 0  ;;  %v18448_v29 = vadd.f32 %v9365_v58, %v17859_v33 }
 0x653   :  { %v3276_v17 = vor.u32 8388608, %v3275_v51  ;;  %vm18438_vm5 = vcmp.le.f32.partialorder %v20786_v40, 0.7853982  ;;  %v3251_v12 = vsel %vm3166_vm15, %v20789_v21, %v18362_v9  ;;  %v18451_v20 = vadd.f32 %v9446_v8, %v17859_v33  ;;  %v18479_v21 = vpop.f32.mrf.mxu0 }
 0x654   :  { %10344 = vmatprep.subr.bf16.mxu0 %v10100_v59  ;;  %20790 = vst [vmem:[#allocation13_spill] sm:$0xff] %v18448_v29  ;;  %v3280_v32 = vsel %vm3279_vm6, %v3278_v63, 0  ;;  %v3376_v57 = vshrl.u32 %v3375_v3, 23  ;;  %v3247_v28 = vmul.f32 %v3246_v52, %v3244_v47  ;;  %v10029_v2 = vpack.c.bf16 %v4852_v43, %v4804_v56  ;;  %20794 = vst [vmem:[#allocation20_spill] sm:$0xff] %v18479_v21 }
 0x655   :  { %20791 = vst [vmem:[#allocation8_spill] sm:$0xff] %v18451_v20  ;;  %10345 = vmatpush1.bf16.msra.mxu0 %v10097_v27  ;;  %v3281_v26 = vshrl.u32 %v3280_v32, 5  ;;  %v3282_v41 = vand.u32 31, %v3280_v32  ;;  %v3253_v1 = vsel %vm18438_vm5, 0, %v3251_v12  ;;  %v18455_v9 = vshll.u32 %v3276_v17, 8  ;;  %v18481_v12 = vpop.f32.mrf.mxu1 }
 0x656   :  { %10346 = vmatprep.subr.bf16.mxu0 %v10030_v7  ;;  %v11757_v45 = vadd.s32 4294967169, %v3376_v57  ;;  %v3248_v22 = vxor.u32 2147483648, %v3247_v28  ;;  %v20792_v52 = vmov 2131351028   ;;  %v20793_v56 = vmov 2102212464  }
 0x657   :  { %v3283_v11 = vsub.s32 32, %v3282_v41  ;;  %v3285_v51 = vshll.u32 %v20700_v53, %v3282_v41  ;;  %v3288_v30 = vshll.u32 %v20701_v15, %v3282_v41  ;;  %v3291_v27 = vshll.u32 %v20792_v52, %v3282_v41  ;;  %v18471_v17 = vld [vmem:[%s20645_s4 + $0x28] sm:$0x77]  ;;  %20795 = vst [vmem:[#allocation21_spill] sm:$0xff] %v18481_v12 }
 0x658   :  { %v3294_v43 = vshll.u32 %v20793_v56, %v3282_v41  ;;  %v3297_v58 = vshll.u32 %v20667_v0, %v3282_v41  ;;  %vm3300_vm14 = vcmp.lt.s32.totalorder %v3281_v26, 1  ;;  %v3249_v8 = vsel %vm3166_vm15, %v3248_v22, %v3247_v28 }
 0x659   :  { %10347 = vmatpush1.bf16.msra.mxu0 %v10029_v2  ;;  %v3284_v63 = vshrl.u32 %v20700_v53, %v3283_v11  ;;  %v3286_v59 = vshrl.u32 %v20701_v15, %v3283_v11  ;;  %v3289_v7 = vshrl.u32 %v20792_v52, %v3283_v11  ;;  %v3252_v3 = vsel %vm18438_vm5, %v18471_v17, %v3249_v8 }
 0x65a   :  { %v3292_v40 = vshrl.u32 %v20793_v56, %v3283_v11  ;;  %v3295_v48 = vshrl.u32 %v20667_v0, %v3283_v11  ;;  %v3298_v47 = vshrl.u32 %v20671_v13, %v3283_v11  ;;  %12258 = vcosq.f32 %v3252_v3 }
 0x65b   :  { %v3287_v32 = vor.u32 %v3286_v59, %v3285_v51  ;;  %v3290_v57 = vor.u32 %v3289_v7, %v3288_v30  ;;  %vm3301_vm9 = vcmp.lt.s32.totalorder %v3281_v26, 2  ;;  %12260 = vsinq.f32 %v3252_v3 }
 0x65c   :  { %12052 = vmatmul.mubr.msk.bf16.vlgmr.msra.gmra.mxu0 %vm10063_vm8, %v18354_v25  ;;  %v3293_v24 = vor.u32 %v3292_v40, %v3291_v27  ;;  %v3296_v28 = vor.u32 %v3295_v48, %v3294_v43  ;;  %v3299_v2 = vor.u32 %v3298_v47, %v3297_v58  ;;  %vm3302_vm15 = vcmp.lt.s32.totalorder %v3281_v26, 3  ;;  %v9369_v27 = vpop.f32.mrf.mxu0  ;;  %v9450_v43 = vpop.f32.mrf.mxu1 }
 0x65d   :  { %10374 = vmatprep.mubr.bf16.mxu0 %v20167_v39  ;;  %vm3303_vm2 = vcmp.lt.s32.totalorder %v3281_v26, 4  ;;  %v3304_v41 = vsel %vm3300_vm14, %v3284_v63, %v3287_v32  ;;  %v3308_v22 = vsel %vm3300_vm14, %v3287_v32, %v3290_v57  ;;  %v3382_v36 = vadd.s32 1, %v11757_v45 }
 0x65e   :  { %v3305_v11 = vsel %vm3303_vm2, %v3293_v24, 2102212464  ;;  %v3309_v8 = vsel %vm3303_vm2, %v3296_v28, 920167782  ;;  %v3312_v51 = vsel %vm3300_vm14, %v3290_v57, %v3293_v24  ;;  %v3313_v30 = vsel %vm3303_vm2, %v3299_v2, 1326507024  ;;  %v18502_v45 = vpop.f32.mrf.mxu1 }
 0x65f   :  { %v3306_v59 = vsel %vm3302_vm15, %v3290_v57, %v3305_v11  ;;  %v3310_v7 = vsel %vm3302_vm15, %v3293_v24, %v3309_v8  ;;  %v3314_v3 = vsel %vm3302_vm15, %v3296_v28, %v3313_v30  ;;  %v3257_v58 = vadd.s32 3, %v3253_v1  ;;  %v18500_v57 = vpop.f32.mrf.mxu0  ;;  %20796 = vst [vmem:[#allocation56_spill] sm:$0xff] %v18502_v45 }
 0x660   :  { %v3307_v40 = vsel %vm3301_vm9, %v3304_v41, %v3306_v59  ;;  %v3311_v48 = vsel %vm3301_vm9, %v3308_v22, %v3310_v7  ;;  %v3315_v63 = vsel %vm3301_vm9, %v3312_v51, %v3314_v3  ;;  %v20797_v24 = vand.u32 2147483647, %v18427_v61  ;;  %v20798_v41 = vld [vmem:[#allocation34_spill] sm:$0xff]  ;;  %v18514_v51 = vpop.f32.mrf.mxu1 }
 0x661   :  { %v18493_v47 = vmul.u32.u64.low %v18455_v9, %v3315_v63  ;;  %v18494_v32 = vmul.u32.u64.high %v18455_v9, %v3315_v63, %v18493_v47  ;;  %v18497_v23 = vmul.u32.u64.low %v18455_v9, %v3311_v48  ;;  %v18498_v2 = vmul.u32.u64.high %v18455_v9, %v3311_v48, %v18497_v23  ;;  %v18512_v8 = vpop.f32.mrf.mxu0  ;;  %20802 = vst [vmem:[#allocation12_spill] sm:$0xff] %v18514_v51  ;;  %v18519_v59 = vld [vmem:[%s19982_s14 + $0x8] sm:$0xff]  }
 0x662   :  { %v3379_v28 = vand.u32 8388607, %v20797_v24  ;;  %vm3383_vm3 = vcmp.gt.s32.totalorder %v3382_v36, 0  ;;  %v18507_v22 = vadd.f32 %v9369_v27, %v20798_v41  ;;  %v18510_v26 = vadd.f32 %v9450_v43, %v20798_v41  ;;  %20801 = vst [vmem:[#allocation41_spill] sm:$0xff] %v18512_v8  ;;  %v18533_v48 = vpop.f32.mrf.mxu1 }
 0x663   :  { %v4084_v11 = vand.u32 3, %v3253_v1  ;;  %v3258_v30 = vand.u32 3, %v3257_v58  ;;  %v3323_v7 = vmul.u32 %v18455_v9, %v3307_v40  ;;  %vm3325_vm0 = vc.u32 %v18494_v32, %v18497_v23  ;;  %v18531_v58 = vpop.f32.mrf.mxu0  ;;  %20804 = vst [vmem:[#allocation53_spill] sm:$0xff] %v18533_v48 }
 0x664   :  { %20799 = vst [vmem:[#allocation19_spill] sm:$0xff] %v18507_v22  ;;  %20800 = vst [vmem:[#allocation24_spill] sm:$0xff] %v18510_v26  ;;  %12053 = vmatmul.mubr.msk.bf16.gmra.mxu0 %vm10063_vm8, %v18519_v59  ;;  %v3326_v27 = vadd.s32 1, %v18498_v2  ;;  %v3384_v43 = vsel %vm3383_vm3, %v3382_v36, 0  ;;  %v3380_v63 = vor.u32 8388608, %v3379_v28  ;;  %vm3256_vm4 = vweird.f32 %v18471_v17  ;;  %v9460_v24 = vpop.f32.mrf.mxu1 }
 0x665   :  { %20803 = vst [vmem:[#allocation49_spill] sm:$0xff] %v18531_v58  ;;  %10470 = vmatprep.mubr.bf16.mxu0 %v20167_v39  ;;  %v9379_v47 = vpop.f32.mrf.mxu0  ;;  %vm3263_vm11 = vcmp.eq.s32.totalorder %v3258_v30, 2  ;;  %vm4089_vm7 = vcmp.eq.s32.totalorder %v4084_v11, 2  ;;  %v3386_v3 = vand.u32 31, %v3384_v43  ;;  %vm3260_vm10 = vcmp.eq.s32.totalorder %v3258_v30, 0 }
 0x666   :  { %v3327_v40 = vsel %vm3325_vm0, %v3326_v27, %v18498_v2  ;;  %vm4085_vm1 = vcmp.lt.s32.totalorder %v4084_v11, 2  ;;  %vm4086_vm12 = vcmp.eq.s32.totalorder %v4084_v11, 0  ;;  %v9461_v58 = vpop.f32.mrf.mxu1  ;;  %vm3259_vm5 = vcmp.lt.s32.totalorder %v3258_v30, 2 }
 0x667   :  { %v12259_v1 = vpop.eup %12258  ;;  %v3328_v36 = vadd.s32 %v3327_v40, %v3323_v7  ;;  %v9380_v28 = vpop.f32.mrf.mxu0  ;;  %v18540_v9 = vshll.u32 %v3380_v63, 8  ;;  %v18543_v47 = vadd.s32 %v18497_v23, %v18494_v32  ;;  %v18545_v24 = vshrl.u32 %v3384_v43, 5 }
 0x668   :  { %v12261_v51 = vpop.eup %12260  ;;  %v3264_v48 = vxor.u32 2147483648, %v12259_v1  ;;  %v18549_v40 = vpop.f32.mrf.mxu1  ;;  %v3387_v60 = vsub.s32 32, %v3386_v3  ;;  %v3392_v23 = vshll.u32 %v20701_v15, %v3386_v3  ;;  %vm20811_vm14 = vcmask 1040384  }
 0x669   :  { %v3261_v8 = vxor.u32 2147483648, %v12261_v51  ;;  %v3329_v5 = vadd.s32 536870912, %v3328_v36  ;;  %v18547_v7 = vpop.f32.mrf.mxu0  ;;  %vm3404_vm6 = vcmp.lt.s32.totalorder %v18545_v24, 1  ;;  %vm20813_vm9 = vmmov %vm20811_vm14  ;;  %vm3406_vm15 = vcmp.lt.s32.totalorder %v18545_v24, 3 }
 0x66a   :  { %v3265_v2 = vsel %vm3263_vm11, %v3264_v48, %v12261_v51  ;;  %v4091_v27 = vsel %vm4089_vm7, %v3264_v48, %v12261_v51  ;;  %v3389_v51 = vshll.u32 %v20700_v53, %v3386_v3  ;;  %v18559_v43 = vpop.f32.mrf.mxu1  ;;  %v18583_v26 = vshrl.u32 %v20700_v53, %v3387_v60 }
 0x66b   :  { %v3262_v16 = vsel %vm3260_vm10, %v12259_v1, %v3261_v8  ;;  %v4088_v28 = vsel %vm4086_vm12, %v12259_v1, %v3261_v8  ;;  %v18552_v58 = vshrl.u32 %v3329_v5, 30  ;;  %v18557_v32 = vpop.f32.mrf.mxu0  ;;  %20806 = vst [vmem:[#allocation54_spill] sm:$0xff] %v18559_v43  ;;  %v3398_v1 = vshll.u32 %v20793_v56, %v3386_v3 }
 0x66c   :  { %v3266_v20 = vsel %vm3259_vm5, %v3262_v16, %v3265_v2  ;;  %v4092_v63 = vsel %vm4085_vm1, %v4088_v28, %v4091_v27  ;;  %20805 = vst [vmem:[#allocation51_spill] sm:$0xff] %v18557_v32  ;;  %v3395_v16 = vshll.u32 %v20792_v52, %v3386_v3  ;;  %v18572_v2 = vshll.u32 %v20667_v0, %v3386_v3  ;;  %v18576_v28 = vpop.f32.mrf.mxu1 }
 0x66d   :  { %v3267_v48 = vsel %vm3256_vm4, nan, %v3266_v20  ;;  %v18565_v8 = vsel %vm3256_vm4, nan, %v4092_v63  ;;  %v3331_v5 = vshll.u32 %v18552_v58, 30  ;;  %v18574_v27 = vpop.f32.mrf.mxu0  ;;  %v3390_v3 = vshrl.u32 %v20701_v15, %v3387_v60 }
 0x66e   :  { %v4305_v11 = vmul.f32 2.0, %v3267_v48  ;;  %v4321_v30 = vmul.f32 2.0, %v18565_v8  ;;  %v4457_v20 = vcombine.high %v3267_v48, %v3267_v48  ;;  %v4505_v63 = vcombine.high %v18565_v8, %v18565_v8  ;;  %v18591_v45 = vpop.f32.mrf.mxu1 }
 0x66f   :  { %v18580_v43 = vsub.s32 %v3328_v36, %v3331_v5  ;;  %v3393_v6 = vshrl.u32 %v20792_v52, %v3387_v60  ;;  %v18589_v12 = vpop.f32.mrf.mxu0  ;;  %20808 = vst [vmem:[#allocation71_spill] sm:$0xff] %v18591_v45  ;;  %v3396_v36 = vshrl.u32 %v20793_v56, %v3387_v60  ;;  %v3399_v5 = vshrl.u32 %v20667_v0, %v3387_v60 }
 0x670   :  { %v4313_v54 = vmul.f32 %v4305_v11, %v18565_v8  ;;  %v4329_v35 = vmul.f32 %v4321_v30, %v18565_v8  ;;  %20807 = vst [vmem:[#allocation67_spill] sm:$0xff] %v18589_v12  ;;  %v18597_v53 = vshrl.u32 %v20671_v13, %v3387_v60  ;;  %v4470_v32 = vrot.slane %v3267_v48, 5  ;;  %v18601_v52 = vpop.f32.mrf.mxu1 }
 0x671   :  { %v3334_v50 = vsub.s32 0, %v18580_v43  ;;  %v18599_v15 = vpop.f32.mrf.mxu0  ;;  %v4471_v12 = vrot.slane %v4457_v20, 5  ;;  %v4519_v18 = vrot.slane %v4505_v63, 2  ;;  %v4518_v45 = vrot.slane %v18565_v8, 2 }
 0x672   :  { %v11798_v11 = vadd.f32 -1.0, %v4329_v35  ;;  %v4345_v14 = vmul.f32 2.0, %v4313_v54  ;;  %v4553_v30 = vcombine.high %v4313_v54, %v4313_v54  ;;  %v4566_v29 = vrot.slane %v4313_v54, 7  ;;  %v18607_v60 = vpop.f32.mrf.mxu1 }
 0x673   :  { %v11754_v46 = vmin.u32 %v3334_v50, %v18580_v43  ;;  %v18605_v13 = vpop.f32.mrf.mxu0  ;;  %20810 = vst [vmem:[#allocation63_spill] sm:$0xff] %v18607_v60  ;;  %v18609_v48 = vor.u32 %v3390_v3, %v3389_v51  ;;  %v18611_v22 = vor.u32 %v3393_v6, %v3392_v23  ;;  %v18613_v62 = vor.u32 %v3396_v36, %v3395_v16 }
 0x674   :  { %v4353_v56 = vmul.f32 %v11798_v11, %v4345_v14  ;;  %v4361_v38 = vmul.f32 2.0, %v11798_v11  ;;  %v4567_v0 = vrot.slane %v4553_v30, 7  ;;  %20809 = vst [vmem:[#allocation69_spill] sm:$0xff] %v18605_v13  ;;  %v18615_v10 = vor.u32 %v3399_v5, %v3398_v1  ;;  %v18620_v54 = vpop.f32.mrf.mxu1 }
 0x675   :  { %v3336_v35 = vclz %v11754_v46  ;;  %v18618_v50 = vpop.f32.mrf.mxu0  ;;  %v4601_v46 = vcombine.low %v11798_v11, %v11798_v11  ;;  %v4790_v1 = vsel %vm2453_vm13, %v18471_v17, %v4470_v32  ;;  %v4822_v3 = vsel %vm20813_vm9, %v4518_v45, %v4566_v29 }
 0x676   :  { %v4369_v20 = vmul.f32 %v11798_v11, %v4361_v38  ;;  %v4385_v63 = vmul.f32 2.0, %v4353_v56  ;;  %v4625_v8 = vcombine.high %v4353_v56, %v4353_v56  ;;  %v4823_v14 = vsel %vm20811_vm14, %v4519_v18, %v4567_v0  ;;  %v18635_v5 = vpop.f32.mrf.mxu1 }
 0x677   :  { %v11755_v51 = vadd.s32 4294967294, %v3336_v35  ;;  %v20812_v38 = vcombine.high %v18471_v17, %v18471_v17  ;;  %v18633_v36 = vpop.f32.mrf.mxu0  ;;  %20815 = vst [vmem:[#allocation29_spill] sm:$0xff] %v18635_v5  ;;  %v4638_v0 = vrot.slane %v4353_v56, 1  ;;  %vm20816_vm2 = vcmask 1043456  }
 0x678   :  { %v11806_v23 = vadd.f32 -1.0, %v4369_v20  ;;  %20814 = vst [vmem:[#allocation73_spill] sm:$0xff] %v18633_v36  ;;  %v4639_v30 = vrot.slane %v4625_v8, 1  ;;  %v4839_v35 = vsel %vm20816_vm2, %v4823_v14, %v11798_v11  ;;  %vm3405_vm0 = vcmp.lt.s32.totalorder %v18545_v24, 2  ;;  %v18641_v29 = vpop.f32.mrf.mxu1  ;;  %vm20818_vm11 = vmmov %vm20816_vm2 }
 0x679   :  { %v4791_v16 = vsel %vm2453_vm13, %v20812_v38, %v4471_v12  ;;  %vm11756_vm3 = vcmp.lt.s32.totalorder %v11755_v51, 0  ;;  %v18639_v17 = vpop.f32.mrf.mxu0  ;;  %vm20817_vm4 = vcmask 1045504   ;;  %v4838_v60 = vsel %vm20818_vm11, %v4822_v3, %v4601_v46 }
 0x67a   :  { %v4393_v20 = vmul.f32 %v11806_v23, %v4385_v63  ;;  %v4401_v12 = vmul.f32 2.0, %v11806_v23  ;;  %v4673_v38 = vcombine.high %v11806_v23, %v11806_v23  ;;  %v4686_v6 = vrot.slane %v11806_v23, 6  ;;  %v18650_v13 = vpop.f32.mrf.mxu1  ;;  %vm20824_vm14 = vmmov %vm20817_vm4 }
 0x67b   :  { %v18644_v32 = vsel %vm20817_vm4, %v4791_v16, %v4519_v18  ;;  %v3339_v8 = vsel %vm11756_vm3, 0, %v11755_v51  ;;  %vm3407_vm7 = vcmp.lt.s32.totalorder %v18545_v24, 4  ;;  %v18648_v63 = vpop.f32.mrf.mxu0  ;;  %20819 = vst [vmem:[#allocation59_spill] sm:$0xff] %v18650_v13  ;;  %vm20820_vm10 = vcmask 1041408  }
 0x67c   :  { %v4409_v11 = vmul.f32 %v11806_v23, %v4401_v12  ;;  %v4687_v56 = vrot.slane %v4673_v38, 6  ;;  %v4721_v14 = vcombine.high %v4393_v20, %v4393_v20  ;;  %v4734_v5 = vrot.slane %v4393_v20, 3  ;;  %vm20822_vm12 = vmmov %vm20820_vm10  ;;  %v18659_v20 = vpop.f32.mrf.mxu1 }
 0x67d   :  { %v4870_v36 = vsel %vm20820_vm10, %v4638_v0, %v4686_v6  ;;  %vm20821_vm1 = vcmask 1046528   ;;  %v3340_v21 = vsub.s32 32, %v3339_v8  ;;  %v3341_v18 = vshll.u32 %v18580_v43, %v3339_v8  ;;  %v18657_v3 = vpop.f32.mrf.mxu0 }
 0x67e   :  { %v4855_v42 = vsel %vm20821_vm1, %v4839_v35, %v4639_v30  ;;  %v11814_v16 = vadd.f32 -1.0, %v4409_v11  ;;  %v4735_v46 = vrot.slane %v4721_v14, 3  ;;  %v4871_v51 = vsel %vm20822_vm12, %v4639_v30, %v4687_v56  ;;  %vm20825_vm9 = vmmov %vm20821_vm1 }
 0x67f   :  { %vm20823_vm5 = vcmask 1044480   ;;  %v4806_v12 = vsel %vm20824_vm14, %v4790_v1, %v4518_v45  ;;  %v4854_v38 = vsel %vm20825_vm9, %v4838_v60, %v4638_v0  ;;  %v3342_v6 = vshrl.u32 %v18543_v47, %v3340_v21  ;;  %v18666_v30 = vpop.f32.mrf.mxu0 }
 0x680   :  { %v4886_v23 = vsel %vm20823_vm5, %v4870_v36, %v4734_v5  ;;  %v3344_v35 = vsub.s32 4294967266, %v3339_v8  ;;  %v4769_v13 = vcombine.high %v11814_v16, %v11814_v16  ;;  %vm20826_vm2 = vmmov %vm20823_vm5  ;;  %v10032_v14 = vpack.c.bf16 %v4855_v42, %v18644_v32  ;;  %v18668_v36 = vpop.f32.mrf.mxu1 }
 0x681   :  { %v4887_v43 = vsel %vm20826_vm2, %v4871_v51, %v4735_v46  ;;  %v10047_v11 = vpack.c.bf16 %v11814_v16, %v4886_v23  ;;  %20827 = vst [vmem:[#allocation65_spill] sm:$0xff] %v18668_v36  ;;  %v3343_v5 = vor.u32 %v3342_v6, %v3341_v18  ;;  %v3409_v45 = vsel %vm3407_vm7, %v18613_v62, 2102212464  ;;  %v18685_v0 = vpop.f32.mrf.mxu0 }
 0x682   :  { %v3345_v56 = vadd.s32 127, %v3344_v35  ;;  %v3412_v21 = vsel %vm3404_vm6, %v18609_v48, %v18611_v22  ;;  %v10048_v47 = vpack.c.bf16 %v4769_v13, %v4887_v43  ;;  %v3408_v42 = vsel %vm3404_vm6, %v18583_v26, %v18609_v48  ;;  %v18687_v32 = vpop.f32.mrf.mxu1 }
 0x683   :  { %v10103_v60 = vand.u32 %v17366_v49, %v10047_v11  ;;  %v3413_v1 = vsel %vm3407_vm7, %v18615_v10, 920167782  ;;  %v3350_v18 = vcvt.s32.f32 %v3343_v5  ;;  %v3410_v13 = vsel %vm3406_vm15, %v18611_v22, %v3409_v45  ;;  %v18707_v6 = vpop.f32.mrf.mxu0 }
 0x684   :  { %v3346_v8 = vshll.u32 %v3345_v56, 23  ;;  %v3414_v16 = vsel %vm3406_vm15, %v18613_v62, %v3413_v1  ;;  %v10106_v26 = vand.u32 %v17366_v49, %v10048_v47  ;;  %v3416_v46 = vsel %vm3404_vm6, %v18611_v22, %v18613_v62  ;;  %v18709_v35 = vpop.f32.mrf.mxu1 }
 0x685   :  { %v3415_v48 = vsel %vm3405_vm0, %v3412_v21, %v3414_v16  ;;  %v20828_v51 = vor.u32 %v18597_v53, %v18572_v2  ;;  %20829 = vst [vmem:[#allocation75_spill] sm:$0xff] %v18709_v35  ;;  %v3411_v62 = vsel %vm3405_vm0, %v3408_v42, %v3410_v13  ;;  %v18723_v2 = vpop.f32.mrf.mxu0  ;;  %v10031_v45 = vpack.c.bf16 %v4854_v38, %v4806_v12 }
 0x686   :  { %v3347_v43 = vor.u32 4788187, %v3346_v8  ;;  %v18715_v5 = vmul.u32.u64.low %v18540_v9, %v3415_v48  ;;  %v18716_v56 = vmul.u32.u64.high %v18540_v9, %v3415_v48, %v18715_v5  ;;  %10397 = vmatprep.subr.bf16.mxu1 %v10106_v26  ;;  %v18725_v53 = vpop.f32.mrf.mxu1  ;;  %v3354_v24 = vsub.s32 4, %v18552_v58 }
 0x687   :  { %v3417_v23 = vsel %vm3407_vm7, %v20828_v51, 1326507024  ;;  %10398 = vmatpush1.bf16.msra.mxu1 %v10103_v60  ;;  %v18731_v1 = vpop.f32.mrf.mxu0  ;;  %v3427_v13 = vmul.u32 %v18540_v9, %v3411_v62  ;;  %vm3270_vm6 = vcmp.lt.s32.totalorder %v18381_v31, 0  ;;  %v18758_v48 = vadd.f32 %v18549_v40, %v17955_v34 }
 0x688   :  { %v3418_v11 = vsel %vm3406_vm15, %v18615_v10, %v3417_v23  ;;  %v3348_v21 = vand.u32 2147483647, %v3347_v43  ;;  %10399 = vmatprep.subr.bf16.mxu1 %v10032_v14  ;;  %v18733_v8 = vpop.f32.mrf.mxu1  ;;  %v3430_v16 = vadd.s32 1, %v18716_v56  ;;  %v20833_v14 = vand.u32 2147483647, %v18381_v31 }
 0x689   :  { %v3419_v22 = vsel %vm3405_vm0, %v3416_v46, %v3418_v11  ;;  %20830 = vst [vmem:[#allocation14_spill] sm:$0xff] %v18733_v8  ;;  %v18739_v12 = vpop.f32.mrf.mxu0  ;;  %20837 = vst [vmem:[#allocation57_spill] sm:$0xff] %v18758_v48  ;;  %v18762_v46 = vadd.f32 %v18574_v27, %v17961_v19  ;;  %v18766_v51 = vadd.f32 %v18576_v28, %v17961_v19  ;;  %vm3360_vm10 = vweird.f32 %v18381_v31 }
 0x68a   :  { %v18728_v10 = vmul.u32.u64.low %v18540_v9, %v3419_v22  ;;  %v18729_v47 = vmul.u32.u64.high %v18540_v9, %v3419_v22, %v18728_v10  ;;  %v3351_v42 = vmul.f32 %v3350_v18, %v3348_v21  ;;  %20831 = vst [vmem:[#allocation10_spill] sm:$0xff] %v18739_v12  ;;  %v18741_v38 = vpop.f32.mrf.mxu1  ;;  %vm18745_vm15 = vcmp.le.f32.partialorder %v20833_v14, 0.7853982 }
 0x68b   :  { %20832 = vst [vmem:[#allocation61_spill] sm:$0xff] %v18741_v38  ;;  %10400 = vmatpush1.bf16.msra.mxu1 %v10031_v45  ;;  %v18753_v9 = vadd.f32 %v18547_v7, %v17955_v34  ;;  %20838 = vst [vmem:[#allocation18_spill] sm:$0xff] %v18762_v46  ;;  %v18768_v23 = vpop.f32.mrf.mxu0  ;;  %v3355_v11 = vsel %vm3270_vm6, %v3354_v24, %v18552_v58  ;;  %v18791_v21 = vadd.f32 %v18618_v50, %v17920_v44  ;;  %vm20871_vm2 = vcmask 1040384  }
 0x68c   :  { %v3352_v18 = vxor.u32 2147483648, %v3351_v42  ;;  %vm3429_vm3 = vc.u32 %v18729_v47, %v18715_v5  ;;  %20839 = vst [vmem:[#allocation6_spill] sm:$0xff] %v18766_v51  ;;  %20840 = vst [vmem:[#allocation78_spill] sm:$0xff] %v18768_v23  ;;  %v18770_v43 = vpop.f32.mrf.mxu1  ;;  %v3357_v45 = vsel %vm18745_vm15, 0, %v3355_v11  ;;  %v18826_v11 = vadd.f32 %v18659_v20, %v17898_v55 }
 0x68d   :  { %20836 = vst [vmem:[#allocation55_spill] sm:$0xff] %v18753_v9  ;;  %v3431_v26 = vsel %vm3429_vm3, %v3430_v16, %v18716_v56  ;;  %20841 = vst [vmem:[#allocation80_spill] sm:$0xff] %v18770_v43  ;;  %v9541_v62 = vpop.f32.mrf.mxu0  ;;  %v18801_v16 = vadd.f32 %v18620_v54, %v17920_v44  ;;  %v3361_v50 = vadd.s32 3, %v3357_v45  ;;  %v18818_v54 = vadd.f32 %v18641_v29, %v17894_v4 }
 0x68e   :  { %v3353_v7 = vsel %vm3270_vm6, %v3352_v18, %v3351_v42  ;;  %v3432_v56 = vadd.s32 %v3431_v26, %v3427_v13  ;;  %12054 = vmatmul.mubr.msk.bf16.vlgmr.msra.gmra.mxu1 %vm10063_vm8, %v18354_v25  ;;  %v9622_v22 = vpop.f32.mrf.mxu1  ;;  %v18787_v25 = vadd.f32 %v18599_v15, %v17912_v37  ;;  %20843 = vst [vmem:[#allocation76_spill] sm:$0xff] %v18791_v21  ;;  %20849 = vst [vmem:[#allocation68_spill] sm:$0xff] %v18826_v11  ;;  %vm20877_vm3 = vcmask 1043456  }
 0x68f   :  { %v3356_v40 = vsel %vm18745_vm15, %v18381_v31, %v3353_v7  ;;  %10427 = vmatprep.mubr.bf16.mxu1 %v20167_v39  ;;  %v9542_v10 = vpop.f32.mrf.mxu0  ;;  %v18797_v13 = vadd.f32 %v18601_v52, %v17912_v37  ;;  %20845 = vst [vmem:[#allocation72_spill] sm:$0xff] %v18801_v16  ;;  %v18814_v52 = vadd.f32 %v18639_v17, %v17894_v4  ;;  %20847 = vst [vmem:[#allocation82_spill] sm:$0xff] %v18818_v54  ;;  %vm20876_vm15 = vcmask 1041408  }
 0x690   :  { %12262 = vcosq.f32 %v3356_v40  ;;  %v3433_v58 = vadd.s32 536870912, %v3432_v56  ;;  %20842 = vst [vmem:[#allocation79_spill] sm:$0xff] %v18787_v25  ;;  %v9623_v42 = vpop.f32.mrf.mxu1  ;;  %v18822_v7 = vadd.f32 %v18657_v3, %v17898_v55  ;;  %v3362_v10 = vand.u32 3, %v3361_v50  ;;  %vm20872_vm6 = vmmov %vm20871_vm2 }
 0x691   :  { %12264 = vsinq.f32 %v3356_v40  ;;  %20844 = vst [vmem:[#allocation81_spill] sm:$0xff] %v18797_v13  ;;  %v18805_v14 = vpop.f32.mrf.mxu0  ;;  %20846 = vst [vmem:[#allocation77_spill] sm:$0xff] %v18814_v52  ;;  %v18853_v26 = vadd.f32 %v18685_v0, %v17859_v33  ;;  %v18857_v29 = vadd.f32 %v18687_v32, %v17859_v33  ;;  %v18861_v27 = vadd.f32 %v18723_v2, %v20798_v41 }
 0x692   :  { %v18793_v24 = vshrl.u32 %v3433_v58, 30  ;;  %v18807_v60 = vpop.f32.mrf.mxu1  ;;  %20848 = vst [vmem:[#allocation74_spill] sm:$0xff] %v18822_v7  ;;  %vm3367_vm0 = vcmp.eq.s32.totalorder %v3362_v10, 2  ;;  %vm3364_vm11 = vcmp.eq.s32.totalorder %v3362_v10, 0  ;;  %vm3363_vm1 = vcmp.lt.s32.totalorder %v3362_v10, 2 }
 0x693   :  { %v18828_v40 = vpop.f32.mrf.mxu0  ;;  %20854 = vst [vmem:[#allocation62_spill] sm:$0xff] %v18853_v26  ;;  %20855 = vst [vmem:[#allocation58_spill] sm:$0xff] %v18857_v29  ;;  %vm3374_vm14 = vcmp.lt.s32.totalorder %v18427_v61, 0 }
 0x694   :  { %v3435_v18 = vshll.u32 %v18793_v24, 30  ;;  %20850 = vst [vmem:[#allocation64_spill] sm:$0xff] %v18828_v40  ;;  %v18830_v62 = vpop.f32.mrf.mxu1 }
 0x695   :  { %20851 = vst [vmem:[#allocation70_spill] sm:$0xff] %v18830_v62  ;;  %v18840_v3 = vpop.f32.mrf.mxu0 }
 0x696   :  { %v18832_v22 = vsub.s32 %v3432_v56, %v3435_v18  ;;  %12055 = vmatmul.mubr.msk.bf16.gmra.mxu1 %vm10063_vm8, %v18519_v59  ;;  %v18842_v58 = vpop.f32.mrf.mxu1  ;;  %v4187_v56 = vand.u32 3, %v3357_v45  ;;  %v18865_v45 = vadd.f32 %v18725_v53, %v20798_v41 }
 0x697   :  { %10523 = vmatprep.mubr.bf16.mxu1 %v20167_v39  ;;  %v18846_v42 = vpop.f32.mrf.mxu0 }
 0x698   :  { %v3438_v20 = vsub.s32 0, %v18832_v22  ;;  %20852 = vst [vmem:[#allocation66_spill] sm:$0xff] %v18846_v42  ;;  %v18848_v18 = vpop.f32.mrf.mxu1  ;;  %20856 = vst [vmem:[#allocation93_spill] sm:$0xff] %v18865_v45  ;;  %vm4192_vm4 = vcmp.eq.s32.totalorder %v4187_v56, 2  ;;  %vm4189_vm7 = vcmp.eq.s32.totalorder %v4187_v56, 0  ;;  %vm4188_vm12 = vcmp.lt.s32.totalorder %v4187_v56, 2 }
 0x699   :  { %20853 = vst [vmem:[#allocation60_spill] sm:$0xff] %v18848_v18  ;;  %v18867_v50 = vpop.f32.mrf.mxu0  ;;  %v3428_v18 = vadd.s32 %v18715_v5, %v18729_v47  ;;  %v4434_v45 = vcombine.high %v18381_v31, %v18381_v31 }
 0x69a   :  { %v11758_v28 = vmin.u32 %v3438_v20, %v18832_v22  ;;  %v18869_v15 = vpop.f32.mrf.mxu1 }
 0x69b   :  { %v18875_v2 = vpop.f32.mrf.mxu0 }
 0x69c   :  { %v3440_v20 = vclz %v11758_v28  ;;  %20857 = vst [vmem:[#allocation90_spill] sm:$0xff] %v18875_v2  ;;  %v18877_v43 = vpop.f32.mrf.mxu1 }
 0x69d   :  { %v12263_v17 = vpop.eup %12262  ;;  %20858 = vst [vmem:[#allocation92_spill] sm:$0xff] %v18877_v43  ;;  %v18880_v12 = vpop.f32.mrf.mxu0 }
 0x69e   :  { %v12265_v53 = vpop.eup %12264  ;;  %v3368_v38 = vxor.u32 2147483648, %v12263_v17  ;;  %v11759_v23 = vadd.s32 4294967294, %v3440_v20  ;;  %v18882_v0 = vpop.f32.mrf.mxu1 }
 0x69f   :  { %v3365_v28 = vxor.u32 2147483648, %v12265_v53  ;;  %v18888_v51 = vpop.f32.mrf.mxu0 }
 0x6a0   :  { %v3369_v32 = vsel %vm3367_vm0, %v3368_v38, %v12265_v53  ;;  %v4194_v62 = vsel %vm4192_vm4, %v3368_v38, %v12265_v53  ;;  %vm11760_vm5 = vcmp.lt.s32.totalorder %v11759_v23, 0  ;;  %20859 = vst [vmem:[#allocation94_spill] sm:$0xff] %v18888_v51  ;;  %v18890_v13 = vpop.f32.mrf.mxu1  ;;  %vm20880_vm0 = vmmov %vm20876_vm15  ;;  %vm20881_vm4 = vcmask 1044480  }
 0x6a1   :  { %v3366_v43 = vsel %vm3364_vm11, %v12263_v17, %v3365_v28  ;;  %v4191_v48 = vsel %vm4189_vm7, %v12263_v17, %v3365_v28  ;;  %v3443_v20 = vsel %vm11760_vm5, 0, %v11759_v23  ;;  %20860 = vst [vmem:[#allocation91_spill] sm:$0xff] %v18890_v13  ;;  %v18901_v38 = vpop.f32.mrf.mxu0  ;;  %vm20884_vm11 = vmmov %vm20881_vm4  ;;  %vm20885_vm7 = vcmask 1045504  }
 0x6a2   :  { %v3370_v16 = vsel %vm3363_vm1, %v3366_v43, %v3369_v32  ;;  %v4195_v54 = vsel %vm4188_vm12, %v4191_v48, %v4194_v62  ;;  %v3444_v11 = vsub.s32 32, %v3443_v20  ;;  %v3445_v29 = vshll.u32 %v18832_v22, %v3443_v20  ;;  %20861 = vst [vmem:[#allocation88_spill] sm:$0xff] %v18901_v38  ;;  %v18903_v23 = vpop.f32.mrf.mxu1  ;;  %vm20887_vm1 = vmmov %vm20877_vm3 }
 0x6a3   :  { %v18895_v10 = vsel %vm3360_vm10, nan, %v3370_v16  ;;  %v18899_v5 = vsel %vm3360_vm10, nan, %v4195_v54  ;;  %v3448_v47 = vsub.s32 4294967266, %v3443_v20  ;;  %v18909_v16 = vpop.f32.mrf.mxu0  ;;  %vm20886_vm10 = vcmask 1046528   ;;  %vm20891_vm12 = vmmov %vm20885_vm7 }
 0x6a4   :  { %v4306_v17 = vmul.f32 2.0, %v18895_v10  ;;  %v4322_v48 = vmul.f32 2.0, %v18899_v5  ;;  %v3446_v43 = vshrl.u32 %v3428_v18, %v3444_v11  ;;  %v4458_v22 = vcombine.high %v18895_v10, %v18895_v10  ;;  %20862 = vst [vmem:[#allocation86_spill] sm:$0xff] %v18909_v16  ;;  %v18911_v56 = vpop.f32.mrf.mxu1  ;;  %vm20892_vm5 = vmmov %vm20886_vm10 }
 0x6a5   :  { %v3449_v62 = vadd.s32 127, %v3448_v47  ;;  %v4506_v20 = vcombine.high %v18899_v5, %v18899_v5  ;;  %v18917_v13 = vpop.f32.mrf.mxu0 }
 0x6a6   :  { %v4314_v54 = vmul.f32 %v4306_v17, %v18899_v5  ;;  %v4330_v32 = vmul.f32 %v4322_v48, %v18899_v5  ;;  %v3447_v53 = vor.u32 %v3446_v43, %v3445_v29  ;;  %20863 = vst [vmem:[#allocation89_spill] sm:$0xff] %v18917_v13  ;;  %v18919_v11 = vpop.f32.mrf.mxu1  ;;  %v3458_v48 = vsub.s32 4, %v18793_v24 }
 0x6a7   :  { %v3450_v28 = vshll.u32 %v3449_v62, 23  ;;  %v4473_v29 = vrot.slane %v4458_v22, 5  ;;  %v18926_v43 = vpop.f32.mrf.mxu0  ;;  %v20866_v13 = vand.u32 2147483647, %v18427_v61 }
 0x6a8   :  { %v18921_v18 = vadd.f32 -1.0, %v4330_v32  ;;  %v4346_v47 = vmul.f32 2.0, %v4314_v54  ;;  %v4554_v36 = vcombine.high %v4314_v54, %v4314_v54  ;;  %v3454_v17 = vcvt.s32.f32 %v3447_v53  ;;  %20864 = vst [vmem:[#allocation87_spill] sm:$0xff] %v18926_v43  ;;  %v18928_v62 = vpop.f32.mrf.mxu1 }
 0x6a9   :  { %v3451_v35 = vor.u32 4788187, %v3450_v28  ;;  %v4568_v42 = vrot.slane %v4314_v54, 7  ;;  %v4521_v28 = vrot.slane %v4506_v20, 2  ;;  %v18936_v2 = vpop.f32.mrf.mxu0  ;;  %vm18946_vm9 = vcmp.le.f32.partialorder %v20866_v13, 0.7853982 }
 0x6aa   :  { %v18931_v8 = vmul.f32 %v18921_v18, %v4346_v47  ;;  %v4362_v32 = vmul.f32 2.0, %v18921_v18  ;;  %v4569_v53 = vrot.slane %v4554_v36, 7  ;;  %20865 = vst [vmem:[#allocation84_spill] sm:$0xff] %v18936_v2  ;;  %v18938_v22 = vpop.f32.mrf.mxu1  ;;  %v3459_v36 = vsel %vm3374_vm14, %v3458_v48, %v18793_v24 }
 0x6ab   :  { %v3452_v31 = vand.u32 2147483647, %v3451_v35  ;;  %v4793_v20 = vsel %vm2453_vm13, %v4434_v45, %v4473_v29  ;;  %v18955_v40 = vpop.f32.mrf.mxu0  ;;  %v4602_v13 = vcombine.low %v18921_v18, %v18921_v18  ;;  %v20870_v43 = vrot.slane %v18899_v5, 2 }
 0x6ac   :  { %v4370_v38 = vmul.f32 %v18921_v18, %v4362_v32  ;;  %v4386_v51 = vmul.f32 2.0, %v18931_v8  ;;  %v4626_v47 = vcombine.high %v18931_v8, %v18931_v8  ;;  %v4472_v32 = vrot.slane %v18895_v10, 5  ;;  %20869 = vst [vmem:[#allocation85_spill] sm:$0xff] %v18955_v40  ;;  %v18957_v16 = vpop.f32.mrf.mxu1 }
 0x6ad   :  { %v3455_v35 = vmul.f32 %v3454_v17, %v3452_v31  ;;  %v4824_v17 = vsel %vm20871_vm2, %v20870_v43, %v4568_v42  ;;  %v18966_v31 = vadd.f32 %v18805_v14, %v17955_v34  ;;  %v4640_v10 = vrot.slane %v18931_v8, 1  ;;  %v18970_v29 = vpop.f32.mrf.mxu0 }
 0x6ae   :  { %v11807_v2 = vadd.f32 -1.0, %v4370_v38  ;;  %v4641_v24 = vrot.slane %v4626_v47, 1  ;;  %v4825_v48 = vsel %vm20872_vm6, %v4521_v28, %v4569_v53  ;;  %20873 = vst [vmem:[#allocation83_spill] sm:$0xff] %v18970_v29  ;;  %v18972_v38 = vpop.f32.mrf.mxu1  ;;  %v18978_v14 = vadd.f32 %v18807_v60, %v17955_v34 }
 0x6af   :  { %v3456_v45 = vxor.u32 2147483648, %v3455_v35  ;;  %v18982_v8 = vadd.f32 %v18840_v3, %v17961_v19  ;;  %v18986_v43 = vadd.f32 %v18842_v58, %v17961_v19  ;;  %v18988_v53 = vpop.f32.mrf.mxu0 }
 0x6b0   :  { %v4394_v9 = vmul.f32 %v11807_v2, %v4386_v51  ;;  %v4402_v46 = vmul.f32 2.0, %v11807_v2  ;;  %v4674_v25 = vcombine.high %v11807_v2, %v11807_v2  ;;  %v4688_v21 = vrot.slane %v11807_v2, 6  ;;  %20874 = vst [vmem:[#allocation44_spill] sm:$0xff] %v18978_v14  ;;  %v18990_v51 = vpop.f32.mrf.mxu1 }
 0x6b1   :  { %v3457_v42 = vsel %vm3374_vm14, %v3456_v45, %v3455_v35  ;;  %20875 = vst [vmem:[#allocation46_spill] sm:$0xff] %v18986_v43  ;;  %v4841_v45 = vsel %vm20877_vm3, %v4825_v48, %v18921_v18  ;;  %v18998_v58 = vpop.f32.mrf.mxu0 }
 0x6b2   :  { %v4410_v47 = vmul.f32 %v11807_v2, %v4402_v46  ;;  %v4689_v29 = vrot.slane %v4674_v25, 6  ;;  %v4722_v40 = vcombine.high %v4394_v9, %v4394_v9  ;;  %v3460_v60 = vsel %vm18946_vm9, %v18427_v61, %v3457_v42  ;;  %20878 = vst [vmem:[#allocation39_spill] sm:$0xff] %v18998_v58  ;;  %v19000_v52 = vpop.f32.mrf.mxu1  ;;  %v20915_v58 = vld [vmem:[#allocation36_spill] sm:$0xff] }
 0x6b3   :  { %12266 = vcosq.f32 %v3460_v60  ;;  %v4736_v35 = vrot.slane %v4394_v9, 3  ;;  %v4872_v3 = vsel %vm20876_vm15, %v4640_v10, %v4688_v21  ;;  %20879 = vst [vmem:[#allocation25_spill] sm:$0xff] %v19000_v52  ;;  %v3461_v25 = vsel %vm18946_vm9, 0, %v3459_v36  ;;  %v19010_v2 = vpop.f32.mrf.mxu0  ;;  %v12303_v36 = vld [vmem:[%s20645_s4 + $0x30] sm:$0x77] }
 0x6b4   :  { %v11815_v7 = vadd.f32 -1.0, %v4410_v47  ;;  %v4737_v26 = vrot.slane %v4722_v40, 3  ;;  %v4873_v46 = vsel %vm20880_vm0, %v4641_v24, %v4689_v29  ;;  %12268 = vsinq.f32 %v3460_v60  ;;  %20882 = vst [vmem:[#allocation27_spill] sm:$0xff] %v19010_v2  ;;  %v19012_v18 = vpop.f32.mrf.mxu1 }
 0x6b5   :  { %v4888_v61 = vsel %vm20881_vm4, %v4872_v3, %v4736_v35  ;;  %20883 = vst [vmem:[#allocation35_spill] sm:$0xff] %v19012_v18  ;;  %v4809_v42 = vsel %vm20885_vm7, %v4793_v20, %v4521_v28  ;;  %v4857_v54 = vsel %vm20886_vm10, %v4841_v45, %v4641_v24  ;;  %v4792_v47 = vsel %vm2453_vm13, %v12303_v36, %v4472_v32  ;;  %v9703_v35 = vpop.f32.mrf.mxu0  ;;  %v19131_v18 = vld [vmem:[%s19982_s14] sm:$0xff]  }
 0x6b6   :  { %v4770_v48 = vcombine.high %v11815_v7, %v11815_v7  ;;  %v4889_v40 = vsel %vm20884_vm11, %v4873_v46, %v4737_v26  ;;  %v10049_v29 = vpack.c.bf16 %v11815_v7, %v4888_v61  ;;  %v4840_v60 = vsel %vm20887_vm1, %v4824_v17, %v4602_v13  ;;  %v9784_v3 = vpop.f32.mrf.mxu1  ;;  %v20893_v61 = vld [vmem:[#allocation20_spill] sm:$0xff] }
 0x6b7   :  { %v3465_v9 = vadd.s32 3, %v3461_v25  ;;  %v9372_v26 = vadd.f32 %v18500_v57, %v20798_v41  ;;  %v19026_v7 = vadd.f32 %v18867_v50, %v17912_v37  ;;  %v19031_v20 = vadd.f32 %v18869_v15, %v17912_v37  ;;  %v9704_v17 = vpop.f32.mrf.mxu0  ;;  %v20901_v3 = vld [vmem:[#allocation5_spill] sm:$0xff] }
 0x6b8   :  { %v10050_v21 = vpack.c.bf16 %v4770_v48, %v4889_v40  ;;  %v10109_v28 = vand.u32 %v17366_v49, %v10049_v29  ;;  %v19035_v32 = vadd.f32 %v18880_v12, %v17920_v44  ;;  %v19039_v13 = vadd.f32 %v18882_v0, %v17920_v44  ;;  %v9785_v57 = vpop.f32.mrf.mxu1 }
 0x6b9   :  { %20888 = vst [vmem:[#allocation26_spill] sm:$0xff] %v19031_v20  ;;  %v10034_v50 = vpack.c.bf16 %v4857_v54, %v4809_v42  ;;  %v20890_v45 = vrot.slane %v18899_v5, 2  ;;  %v4856_v15 = vsel %vm20892_vm5, %v4840_v60, %v4640_v10  ;;  %v9368_v48 = vadd.f32 %v20893_v61, %v17859_v33  ;;  %v19052_v40 = vpop.f32.mrf.mxu0  ;;  %v20925_v20 = vld [vmem:[#allocation73_spill] sm:$0xff] }
 0x6ba   :  { %20889 = vst [vmem:[#allocation28_spill] sm:$0xff] %v19039_v13  ;;  %v10112_v24 = vand.u32 %v17366_v49, %v10050_v21  ;;  %20894 = vst [vmem:[#allocation34_spill] sm:$0xff] %v19052_v40  ;;  %v19054_v29 = vpop.f32.mrf.mxu1  ;;  %v3466_v21 = vand.u32 3, %v3465_v9  ;;  %v4290_v5 = vand.u32 3, %v3461_v25  ;;  %v19058_v42 = vadd.f32 %v18903_v23, %v17894_v4  ;;  %v20900_v23 = vld [vmem:[#allocation50_spill] sm:$0xff] }
 0x6bb   :  { %v4808_v46 = vsel %vm20891_vm12, %v4792_v47, %v20890_v45  ;;  %v19062_v10 = vadd.f32 %v18919_v11, %v17898_v55  ;;  %v19066_v36 = vadd.f32 %v18911_v56, %v17894_v4  ;;  %v19070_v47 = vadd.f32 %v18928_v62, %v17898_v55  ;;  %v19072_v9 = vpop.f32.mrf.mxu0 }
 0x6bc   :  { %10450 = vmatprep.subr.bf16.mxu0 %v10112_v24  ;;  %20895 = vst [vmem:[#allocation20_spill] sm:$0xff] %v19058_v42  ;;  %v10033_v54 = vpack.c.bf16 %v4856_v15, %v4808_v46  ;;  %20899 = vst [vmem:[#allocation98_spill] sm:$0xff] %v19072_v9  ;;  %v19074_v25 = vpop.f32.mrf.mxu1  ;;  %v9358_v60 = vadd.f32 %v20900_v23, %v17894_v4  ;;  %v10002_v35 = vpack.c.bf16 %v9372_v26, %v9368_v48  ;;  %v20927_v42 = vld [vmem:[#allocation52_spill] sm:$0xff]  ;;  %vm20934_vm4 = vcmask 1040384  }
 0x6bd   :  { %20896 = vst [vmem:[#allocation95_spill] sm:$0xff] %v19062_v10  ;;  %10451 = vmatpush1.bf16.msra.mxu0 %v10109_v28  ;;  %20897 = vst [vmem:[#allocation96_spill] sm:$0xff] %v19066_v36  ;;  %v9362_v56 = vadd.f32 %v20901_v3, %v17898_v55  ;;  %v19086_v62 = vadd.f32 %v18938_v22, %v17859_v33  ;;  %v19090_v17 = vadd.f32 %v18972_v38, %v20798_v41  ;;  %v19092_v57 = vpop.f32.mrf.mxu0  ;;  %v20910_v28 = vld [vmem:[#allocation43_spill] sm:$0xff]  ;;  %v20928_v10 = vld [vmem:[#allocation30_spill] sm:$0xff]  ;;  %vm20939_vm7 = vcmask 523264  }
 0x6be   :  { %20898 = vst [vmem:[#allocation97_spill] sm:$0xff] %v19070_v47  ;;  %10452 = vmatprep.subr.bf16.mxu0 %v10034_v50  ;;  %20904 = vst [vmem:[#allocation99_spill] sm:$0xff] %v19092_v57  ;;  %v9906_v26 = vpop.f32.mrf.mxu1  ;;  %vm3471_vm14 = vcmp.eq.s32.totalorder %v3466_v21, 2  ;;  %vm4295_vm9 = vcmp.eq.s32.totalorder %v4290_v5, 2  ;;  %v19096_v50 = vadd.f32 %v18957_v16, %v17859_v33  ;;  %v19100_v45 = vadd.f32 %v18990_v51, %v20798_v41  ;;  %v20908_v51 = vld [vmem:[#allocation33_spill] sm:$0xff] }
 0x6bf   :  { %20902 = vst [vmem:[#allocation50_spill] sm:$0xff] %v19086_v62  ;;  %20903 = vst [vmem:[#allocation5_spill] sm:$0xff] %v19090_v17  ;;  %vm3468_vm2 = vcmp.eq.s32.totalorder %v3466_v21, 0  ;;  %vm4292_vm6 = vcmp.eq.s32.totalorder %v4290_v5, 0  ;;  %v19104_v15 = vpop.f32.mrf.mxu0  ;;  %vm3467_vm15 = vcmp.lt.s32.totalorder %v3466_v21, 2  ;;  %vm4291_vm3 = vcmp.lt.s32.totalorder %v4290_v5, 2 }
 0x6c0   :  { %v12267_v24 = vpop.eup %12266  ;;  %20905 = vst [vmem:[#allocation100_spill] sm:$0xff] %v19096_v50  ;;  %20906 = vst [vmem:[#allocation101_spill] sm:$0xff] %v19100_v45  ;;  %v9908_v61 = vpop.f32.mrf.mxu1  ;;  %v19110_v23 = vadd.f32 %v20908_v51, %v17961_v19  ;;  %v9352_v38 = vadd.f32 %v20910_v28, %v17920_v44  ;;  %v9986_v51 = vpack.c.bf16 %v9362_v56, %v9358_v60  ;;  %v20912_v60 = vld [vmem:[#allocation19_spill] sm:$0xff]  ;;  %v20913_v56 = vld [vmem:[#allocation13_spill] sm:$0xff]  ;;  %vm20943_vm10 = vcmask 1041408  }
 0x6c1   :  { %v12269_v22 = vpop.eup %12268  ;;  %v3472_v46 = vxor.u32 2147483648, %v12267_v24  ;;  %10453 = vmatpush1.bf16.msra.mxu0 %v10033_v54  ;;  %20907 = vst [vmem:[#allocation102_spill] sm:$0xff] %v19104_v15  ;;  %v19115_v54 = vld [vmem:[%s20645_s4 + $0x38] sm:$0x77]  ;;  %v19120_v11 = vpop.f32.mrf.mxu0  ;;  %v20914_v2 = vpack.c.bf16 %v20912_v60, %v20913_v56  ;;  %v9348_v14 = vadd.f32 %v20915_v58, %v17912_v37  ;;  %v19208_v13 = vadd.f32 %v20925_v20, %v17920_v44  ;;  %vm20938_vm11 = vmmov %vm20934_vm4 }
 0x6c2   :  { %v3469_v48 = vxor.u32 2147483648, %v12269_v22  ;;  %10568 = vmatprep.subr.bf16.mxu0 %v10002_v35  ;;  %vm3464_vm0 = vweird.f32 %v19115_v54  ;;  %20909 = vst [vmem:[#allocation33_spill] sm:$0xff] %v19120_v11  ;;  %v19122_v35 = vpop.f32.mrf.mxu1  ;;  %v20920_v60 = vld [vmem:[#allocation40_spill] sm:$0xff]  ;;  %v19224_v20 = vadd.f32 %v19074_v25, %v17955_v34  ;;  %v20929_v36 = vpack.c.bf16 %v20927_v42, %v20928_v10  ;;  %vm20944_vm12 = vmmov %vm20943_vm10 }
 0x6c3   :  { %v3473_v3 = vsel %vm3471_vm14, %v3472_v46, %v12269_v22  ;;  %v4297_v0 = vsel %vm4295_vm9, %v3472_v46, %v12269_v22  ;;  %v20911_v22 = vld [vmem:[#allocation23_spill] sm:$0xff]  ;;  %v9970_v58 = vpack.c.bf16 %v9352_v38, %v9348_v14  ;;  %vm20945_vm5 = vcmask 1044480   ;;  %vm20947_vm9 = vmmov %vm20887_vm1 }
 0x6c4   :  { %v3470_v16 = vsel %vm3468_vm2, %v12267_v24, %v3469_v48  ;;  %v4294_v12 = vsel %vm4292_vm6, %v12267_v24, %v3469_v48  ;;  %12056 = vmatmul.mubr.msk.bf16.vlgmr.msra.gmra.mxu0 %vm10063_vm8, %v19131_v18  ;;  %v9338_v46 = vadd.f32 %v20911_v22, %v17955_v34  ;;  %v19143_v24 = vpop.f32.mrf.mxu0  ;;  %v19145_v48 = vpop.f32.mrf.mxu1  ;;  %v20922_v14 = vld [vmem:[#allocation51_spill] sm:$0xff]  ;;  %20926 = vst [vmem:[#allocation36_spill] sm:$0xff] %v19224_v20  ;;  %v20931_v20 = vld [vmem:[#allocation42_spill] sm:$0xff]  ;;  %vm20946_vm14 = vcmask 1045504   ;;  %vm20948_vm2 = vmmov %vm20945_vm5 }
 0x6c5   :  { %v3474_v52 = vsel %vm3467_vm15, %v3470_v16, %v3473_v3  ;;  %v4298_v28 = vsel %vm4291_vm3, %v4294_v12, %v4297_v0  ;;  %10569 = vmatpush1.bf16.msra.mxu0 %v20914_v2  ;;  %10480 = vmatprep.mubr.bf16.mxu0 %v20167_v39  ;;  %v19168_v3 = vadd.f32 %v19054_v29, %v17955_v34  ;;  %vm20949_vm6 = vcmask 1046528   ;;  %vm20958_vm15 = vmmov %vm20946_vm14 }
 0x6c6   :  { %v19151_v22 = vsel %vm3464_vm0, nan, %v3474_v52  ;;  %v19155_v12 = vsel %vm3464_vm0, nan, %v4298_v28  ;;  %10570 = vmatprep.subr.bf16.mxu0 %v9986_v51  ;;  %v9954_v2 = vpack.c.bf16 %v19110_v23, %v9338_v46  ;;  %v19160_v5 = vpop.f32.mrf.mxu0  ;;  %v19162_v16 = vpop.f32.mrf.mxu1  ;;  %v19171_v51 = vadd.f32 %v9906_v26, %v17961_v19  ;;  %v20919_v28 = vld [vmem:[#allocation45_spill] sm:$0xff]  ;;  %v20923_v52 = vld [vmem:[#allocation67_spill] sm:$0xff]  ;;  %vm20959_vm3 = vmmov %vm20939_vm7 }
 0x6c7   :  { %v4307_v0 = vmul.f32 2.0, %v19151_v22  ;;  %v4323_v21 = vmul.f32 2.0, %v19155_v12  ;;  %20916 = vst [vmem:[#allocation43_spill] sm:$0xff] %v19160_v5  ;;  %20917 = vst [vmem:[#allocation23_spill] sm:$0xff] %v19168_v3  ;;  %v20921_v56 = vpack.c.bf16 %v20919_v28, %v20920_v60  ;;  %v19182_v38 = vadd.f32 %v20922_v14, %v17955_v34 }
 0x6c8   :  { %20918 = vst [vmem:[#allocation19_spill] sm:$0xff] %v19171_v51  ;;  %v19186_v29 = vadd.f32 %v20923_v52, %v17961_v19  ;;  %v19188_v43 = vpop.f32.mrf.mxu0  ;;  %v19190_v26 = vpop.f32.mrf.mxu1  ;;  %v19199_v60 = vadd.f32 %v9908_v61, %v17961_v19  ;;  %v4459_v28 = vcombine.high %v19151_v22, %v19151_v22  ;;  %v9524_v61 = vadd.f32 %v18666_v30, %v17898_v55  ;;  %vm20961_vm0 = vmmov %vm20949_vm6 }
 0x6c9   :  { %v19174_v23 = vmul.f32 %v4307_v0, %v19155_v12  ;;  %v4331_v46 = vmul.f32 %v4323_v21, %v19155_v12  ;;  %10571 = vmatpush1.bf16.msra.mxu0 %v20921_v56  ;;  %v4507_v0 = vcombine.high %v19155_v12, %v19155_v12  ;;  %v9534_v21 = vadd.f32 %v18731_v1, %v20798_v41 }
 0x6ca   :  { %10572 = vmatprep.subr.bf16.mxu0 %v9970_v58  ;;  %20924 = vst [vmem:[#allocation13_spill] sm:$0xff] %v19199_v60  ;;  %v19210_v58 = vpop.f32.mrf.mxu0  ;;  %v19212_v1 = vpop.f32.mrf.mxu1  ;;  %v9520_v30 = vadd.f32 %v18648_v63, %v17894_v4  ;;  %v4474_v42 = vrot.slane %v19151_v22, 5 }
 0x6cb   :  { %v19201_v56 = vadd.f32 -1.0, %v4331_v46  ;;  %v4347_v52 = vmul.f32 2.0, %v19174_v23  ;;  %v4555_v14 = vcombine.high %v19174_v23, %v19174_v23  ;;  %v9530_v46 = vadd.f32 %v18707_v6, %v17859_v33 }
 0x6cc   :  { %12057 = vmatmul.mubr.msk.bf16.gmra.mxu0 %vm10063_vm8, %v18519_v59  ;;  %v20930_v59 = vld [vmem:[#allocation69_spill] sm:$0xff]  ;;  %v19240_v6 = vpop.f32.mrf.mxu0  ;;  %v19242_v25 = vpop.f32.mrf.mxu1 }
 0x6cd   :  { %v19227_v3 = vmul.f32 %v19201_v56, %v4347_v52  ;;  %v4363_v51 = vmul.f32 2.0, %v19201_v56  ;;  %10573 = vmatpush1.bf16.msra.mxu0 %v20929_v36  ;;  %v19235_v47 = vadd.f32 %v20930_v59, %v17912_v37  ;;  %10592 = vmatprep.mubr.bf16.mxu0 %v20167_v39  ;;  %v4523_v52 = vrot.slane %v4507_v0, 2 }
 0x6ce   :  { %v4571_v62 = vrot.slane %v4555_v14, 7  ;;  %10574 = vmatprep.subr.bf16.mxu0 %v9954_v2  ;;  %v10006_v17 = vpack.c.bf16 %v9534_v21, %v9530_v46  ;;  %v19252_v50 = vpop.f32.mrf.mxu0  ;;  %v19254_v45 = vpop.f32.mrf.mxu1  ;;  %v4475_v0 = vrot.slane %v4459_v28, 5  ;;  %v4570_v21 = vrot.slane %v19174_v23, 7 }
 0x6cf   :  { %v4371_v10 = vmul.f32 %v19201_v56, %v4363_v51  ;;  %v4387_v36 = vmul.f32 2.0, %v19227_v3  ;;  %v4627_v59 = vcombine.high %v19227_v3, %v19227_v3  ;;  %v9974_v63 = vpack.c.bf16 %v19208_v13, %v19235_v47  ;;  %v19261_v51 = vld [vmem:[%s19981_s13] sm:$0xff]   ;;  %v20932_v13 = vld [vmem:[#allocation32_spill] sm:$0xff] }
 0x6d0   :  { %v9990_v14 = vpack.c.bf16 %v9524_v61, %v9520_v30  ;;  %v20933_v47 = vpack.c.bf16 %v20931_v20, %v20932_v13  ;;  %v19269_v28 = vadd.f32 %v18988_v53, %v20798_v41  ;;  %v19273_v23 = vadd.f32 %v19122_v35, %v17912_v37  ;;  %v19275_v2 = vpop.f32.mrf.mxu0  ;;  %v9928_v60 = vpop.f32.mrf.mxu1 }
 0x6d1   :  { %v11808_v46 = vadd.f32 -1.0, %v4371_v10  ;;  %v4643_v40 = vrot.slane %v4627_v59, 1  ;;  %v4827_v22 = vsel %vm20934_vm4, %v4523_v52, %v4571_v62  ;;  %v19281_v20 = vadd.f32 %v19162_v16, %v17920_v44  ;;  %vm20976_vm4 = vmmov %vm20959_vm3 }
 0x6d2   :  { %10575 = vmatpush1.bf16.msra.mxu0 %v20933_v47  ;;  %v19283_v47 = vpop.f32.mrf.mxu0  ;;  %v19285_v35 = vpop.f32.mrf.mxu1  ;;  %v20936_v59 = vcombine.high %v19115_v54, %v19115_v54  ;;  %v4603_v62 = vcombine.low %v19201_v56, %v19201_v56 }
 0x6d3   :  { %10674 = vmatprep.subr.bf16.mxu0 %v10006_v17  ;;  %v4395_v30 = vmul.f32 %v11808_v46, %v4387_v36  ;;  %v4403_v53 = vmul.f32 2.0, %v11808_v46  ;;  %v4675_v10 = vcombine.high %v11808_v46, %v11808_v46  ;;  %v4690_v13 = vrot.slane %v11808_v46, 6  ;;  %20935 = vst [vmem:[#allocation45_spill] sm:$0xff] %v19285_v35 }
 0x6d4   :  { %v4795_v61 = vsel %vm2453_vm13, %v20936_v59, %v4475_v0  ;;  %v20937_v17 = vrot.slane %v19155_v12, 2  ;;  %v20940_v0 = vld [vmem:[#allocation62_spill] sm:$0xff]  ;;  %v19304_v15 = vpop.f32.mrf.mxu0  ;;  %v19306_v5 = vpop.f32.mrf.mxu1 }
 0x6d5   :  { %12062 = vmatmul.mubr.msk.bf16.vlgmr.msra.gmra.mxu0 %vm20939_vm7, %v19261_v51  ;;  %v4411_v57 = vmul.f32 %v11808_v46, %v4403_v53  ;;  %v4691_v35 = vrot.slane %v4675_v10, 6  ;;  %v4723_v9 = vcombine.high %v4395_v30, %v4395_v30  ;;  %v4738_v11 = vrot.slane %v4395_v30, 3  ;;  %vm21008_vm7 = vmmov %vm20959_vm3 }
 0x6d6   :  { %v4826_v16 = vsel %vm20938_vm11, %v20937_v17, %v4570_v21  ;;  %10602 = vmatprep.mubr.bf16.mxu0 %v20167_v39  ;;  %v20941_v59 = vpack.c.bf16 %v18861_v27, %v20940_v0  ;;  %v20942_v21 = vrot.slane %v19227_v3, 1  ;;  %v4843_v46 = vsel %vm20887_vm1, %v4827_v22, %v19201_v56  ;;  %v19323_v36 = vpop.f32.mrf.mxu0  ;;  %vm20994_vm11 = vmmov %vm20959_vm3 }
 0x6d7   :  { %v19315_v30 = vadd.f32 %v19145_v48, %v17912_v37  ;;  %v19319_v27 = vadd.f32 %v19190_v26, %v17920_v44  ;;  %v11816_v53 = vadd.f32 -1.0, %v4411_v57  ;;  %v4739_v10 = vrot.slane %v4723_v9, 3  ;;  %v19334_v57 = vld [vmem:[%s19981_s13 + $0x8] sm:$0xff]   ;;  %vm21026_vm1 = vmmov %vm20959_vm3 }
 0x6d8   :  { %10675 = vmatpush1.bf16.msra.mxu0 %v20941_v59  ;;  %v4874_v17 = vsel %vm20943_vm10, %v20942_v21, %v4690_v13  ;;  %v4875_v0 = vsel %vm20944_vm12, %v4643_v40, %v4691_v35  ;;  %v19325_v13 = vpop.f32.mrf.mxu1  ;;  %v4811_v56 = vsel %vm20946_vm14, %v4795_v61, %v4523_v52  ;;  %v4794_v48 = vsel %vm2453_vm13, %v19115_v54, %v4474_v42  ;;  %v20950_v52 = vld [vmem:[#allocation74_spill] sm:$0xff]  ;;  %v20951_v61 = vld [vmem:[#allocation77_spill] sm:$0xff]  ;;  %v19343_v54 = vpop.f32.mrf.mxu0  ;;  %vm21024_vm10 = vmmov %vm20959_vm3 }
 0x6d9   :  { %10676 = vmatprep.subr.bf16.mxu0 %v9990_v14  ;;  %v4890_v59 = vsel %vm20945_vm5, %v4874_v17, %v4738_v11  ;;  %v4842_v14 = vsel %vm20947_vm9, %v4826_v16, %v4603_v62  ;;  %v4771_v11 = vcombine.high %v11816_v53, %v11816_v53  ;;  %v4891_v26 = vsel %vm20948_vm2, %v4875_v0, %v4739_v10  ;;  %vm21036_vm12 = vmmov %vm21026_vm1 }
 0x6da   :  { %v10051_v22 = vpack.c.bf16 %v11816_v53, %v4890_v59  ;;  %v4859_v35 = vsel %vm20949_vm6, %v4843_v46, %v4643_v40  ;;  %v20952_v21 = vpack.c.bf16 %v20950_v52, %v20951_v61  ;;  %v19345_v42 = vpop.f32.mrf.mxu1  ;;  %v19349_v62 = vadd.f32 %v19212_v1, %v17894_v4  ;;  %v20953_v53 = vld [vmem:[#allocation56_spill] sm:$0xff]  ;;  %v20954_v1 = vld [vmem:[#allocation85_spill] sm:$0xff]  ;;  %v19368_v59 = vpop.f32.mrf.mxu0  ;;  %vm21037_vm5 = vmmov %vm21026_vm1 }
 0x6db   :  { %v19353_v16 = vadd.f32 %v19242_v25, %v17894_v4  ;;  %v19357_v40 = vadd.f32 %v19254_v45, %v17898_v55  ;;  %v19360_v17 = vadd.f32 %v9928_v60, %v17898_v55  ;;  %v10052_v46 = vpack.c.bf16 %v4771_v11, %v4891_v26  ;;  %20955 = vst [vmem:[#allocation40_spill] sm:$0xff] %v19368_v59  ;;  %vm21051_vm14 = vmmov %vm21026_vm1 }
 0x6dc   :  { %10677 = vmatpush1.bf16.msra.mxu0 %v20952_v21  ;;  %v9453_v10 = vadd.f32 %v20953_v53, %v20798_v41  ;;  %v9692_v0 = vadd.f32 %v20954_v1, %v17859_v33  ;;  %v19370_v25 = vpop.f32.mrf.mxu1  ;;  %v10115_v45 = vand.u32 %v17366_v49, %v10051_v22  ;;  %v20957_v52 = vrot.slane %v19155_v12, 2  ;;  %v20962_v21 = vld [vmem:[#allocation76_spill] sm:$0xff]  ;;  %v20963_v12 = vld [vmem:[#allocation79_spill] sm:$0xff]  ;;  %vm21052_vm9 = vmmov %vm21026_vm1 }
 0x6dd   :  { %10678 = vmatprep.subr.bf16.mxu0 %v9974_v63  ;;  %v9958_v63 = vpack.c.bf16 %v19186_v29, %v19182_v38  ;;  %20956 = vst [vmem:[#allocation51_spill] sm:$0xff] %v19370_v25  ;;  %12063 = vmatmul.mubr.msk.bf16.gmra.mxu0 %vm20959_vm3, %v19334_v57  ;;  %v10000_v38 = vpack.c.bf16 %v19360_v17, %v19353_v16  ;;  %v20960_v61 = vrot.slane %v19227_v3, 1  ;;  %vm21060_vm2 = vmmov %vm21026_vm1  ;;  %v21066_v16 = vld [vmem:[#allocation36_spill] sm:$0xff]  ;;  %v19714_v25 = vpop.permute.xlu0 %11000 }
 0x6de   :  { %v4810_v60 = vsel %vm20958_vm15, %v4794_v48, %v20957_v52  ;;  %v10118_v29 = vand.u32 %v17366_v49, %v10052_v46  ;;  %v10036_v26 = vpack.c.bf16 %v4859_v35, %v4811_v56  ;;  %v20964_v53 = vpack.c.bf16 %v20962_v21, %v20963_v12  ;;  %10698 = vmatprep.mubr.bf16.mxu0 %v20167_v39  ;;  %v19390_v48 = vpop.f32.mrf.mxu0  ;;  %v19392_v1 = vpop.f32.mrf.mxu1  ;;  %v20967_v49 = vld [vmem:[#allocation21_spill] sm:$0xff]  ;;  %v20968_v46 = vld [vmem:[#allocation83_spill] sm:$0xff]  ;;  %v20969_v12 = vld [vmem:[#allocation18_spill] sm:$0xff] }
 0x6df   :  { %v4858_v22 = vsel %vm20961_vm0, %v4842_v14, %v20960_v61  ;;  %20965 = vst [vmem:[#allocation67_spill] sm:$0xff] %v19390_v48  ;;  %20966 = vst [vmem:[#allocation73_spill] sm:$0xff] %v19392_v1  ;;  %v10010_v52 = vpack.c.bf16 %v19269_v28, %v9692_v0  ;;  %v9449_v56 = vadd.f32 %v20967_v49, %v17859_v33  ;;  %vm11175_vm0 = vcmask 261120  }
 0x6e0   :  { %10679 = vmatpush1.bf16.msra.mxu0 %v20964_v53  ;;  %10503 = vmatprep.subr.bf16.mxu1 %v10118_v29  ;;  %v9865_v3 = vpop.f32.mrf.mxu0  ;;  %v9946_v35 = vpop.f32.mrf.mxu1  ;;  %v10035_v14 = vpack.c.bf16 %v4858_v22, %v4810_v60  ;;  %v9694_v61 = vadd.f32 %v20968_v46, %v20798_v41  ;;  %v20970_v53 = vld [vmem:[#allocation55_spill] sm:$0xff]  ;;  %v20973_v29 = vld [vmem:[#allocation84_spill] sm:$0xff]  ;;  %v20975_v22 = vld [vmem:[#allocation86_spill] sm:$0xff] }
 0x6e1   :  { %10680 = vmatprep.subr.bf16.mxu0 %v9958_v63  ;;  %10504 = vmatpush1.bf16.msra.mxu1 %v10115_v45  ;;  %v10004_v21 = vpack.c.bf16 %v9453_v10, %v9449_v56  ;;  %v20971_v9 = vpack.c.bf16 %v20969_v12, %v20970_v53  ;;  %v20972_v63 = vld [vmem:[#allocation87_spill] sm:$0xff]  ;;  %v9690_v49 = vadd.f32 %v20973_v29, %v17859_v33  ;;  %v20974_v45 = vld [vmem:[#allocation9_spill] sm:$0xff]  ;;  %v20980_v12 = vld [vmem:[#allocation88_spill] sm:$0xff] }
 0x6e2   :  { %10505 = vmatprep.subr.bf16.mxu1 %v10036_v26  ;;  %v9686_v28 = vadd.f32 %v20972_v63, %v17898_v55  ;;  %v9866_v0 = vpop.f32.mrf.mxu0  ;;  %v9947_v11 = vpop.f32.mrf.mxu1  ;;  %v9443_v60 = vadd.f32 %v20974_v45, %v17898_v55  ;;  %v9682_v10 = vadd.f32 %v20975_v22, %v17894_v4  ;;  %v20981_v53 = vld [vmem:[#allocation7_spill] sm:$0xff]  ;;  %v20983_v29 = vld [vmem:[#allocation24_spill] sm:$0xff]  ;;  %vm21063_vm6 = vmmov %vm21026_vm1 }
 0x6e3   :  { %v10009_v56 = vpack.c.bf16 %v9694_v61, %v9690_v49  ;;  %v20978_v11 = vld [vmem:[#allocation31_spill] sm:$0xff]  ;;  %v9433_v63 = vadd.f32 %v20981_v53, %v17920_v44  ;;  %v20982_v61 = vld [vmem:[#allocation90_spill] sm:$0xff]  ;;  %v20984_v49 = vld [vmem:[#allocation8_spill] sm:$0xff] }
 0x6e4   :  { %10681 = vmatpush1.bf16.msra.mxu0 %v20971_v9  ;;  %v20977_v9 = vld [vmem:[#allocation89_spill] sm:$0xff]  ;;  %v9439_v3 = vadd.f32 %v20978_v11, %v17894_v4  ;;  %v9994_v46 = vpack.c.bf16 %v9686_v28, %v9682_v10  ;;  %v20985_v45 = vpack.c.bf16 %v20983_v29, %v20984_v49  ;;  %v20986_v22 = vld [vmem:[#allocation16_spill] sm:$0xff]  ;;  %v20996_v29 = vpack.c.bf16 %v19035_v32, %v19026_v7  ;;  %vm21071_vm15 = vmmov %vm21026_vm1 }
 0x6e5   :  { %10780 = vmatprep.subr.bf16.mxu0 %v10010_v52  ;;  %10506 = vmatpush1.bf16.msra.mxu1 %v10035_v14  ;;  %v9684_v26 = vadd.f32 %v20977_v9, %v17898_v55  ;;  %v20979_v52 = vld [vmem:[#allocation94_spill] sm:$0xff]  ;;  %v9680_v14 = vadd.f32 %v20980_v12, %v17894_v4  ;;  %v9429_v10 = vadd.f32 %v20986_v22, %v17912_v37  ;;  %v20990_v12 = vld [vmem:[#allocation15_spill] sm:$0xff]  ;;  %v20991_v53 = vld [vmem:[#allocation37_spill] sm:$0xff] }
 0x6e6   :  { %10621 = vmatprep.subr.bf16.mxu1 %v10004_v21  ;;  %v9676_v35 = vadd.f32 %v20979_v52, %v17920_v44  ;;  %v9988_v0 = vpack.c.bf16 %v9443_v60, %v9439_v3  ;;  %v9672_v21 = vadd.f32 %v20982_v61, %v17912_v37  ;;  %v20987_v60 = vld [vmem:[#allocation66_spill] sm:$0xff]  ;;  %v20989_v52 = vld [vmem:[#allocation64_spill] sm:$0xff]  ;;  %v9856_v7 = vadd.f32 %v19323_v36, %v20798_v41  ;;  %v21003_v36 = vld [vmem:[#allocation11_spill] sm:$0xff] }
 0x6e7   :  { %12066 = vmatmul.mubr.msk.bf16.vlgmr.msra.gmra.mxu0 %vm20976_vm4, %v19261_v51  ;;  %v9993_v28 = vpack.c.bf16 %v9684_v26, %v9680_v14  ;;  %v9666_v9 = vadd.f32 %v20987_v60, %v17961_v19  ;;  %v9972_v3 = vpack.c.bf16 %v9433_v63, %v9429_v10  ;;  %v9858_v26 = vadd.f32 %v19343_v54, %v20798_v41  ;;  %v20998_v60 = vld [vmem:[#allocation38_spill] sm:$0xff] }
 0x6e8   :  { %10708 = vmatprep.mubr.bf16.mxu0 %v20167_v39  ;;  %10781 = vmatpush1.bf16.msra.mxu0 %v10009_v56  ;;  %v9978_v56 = vpack.c.bf16 %v9676_v35, %v9672_v21  ;;  %v9419_v14 = vadd.f32 %v20990_v12, %v17955_v34  ;;  %v20995_v35 = vld [vmem:[#allocation14_spill] sm:$0xff]  ;;  %v9854_v54 = vadd.f32 %v19304_v15, %v17859_v33 }
 0x6e9   :  { %12058 = vmatmul.mubr.msk.bf16.vlgmr.msra.gmra.mxu1 %vm10063_vm8, %v19131_v18  ;;  %10782 = vmatprep.subr.bf16.mxu0 %v9994_v46  ;;  %v20988_v18 = vld [vmem:[#allocation48_spill] sm:$0xff]  ;;  %v9662_v46 = vadd.f32 %v20989_v52, %v17955_v34  ;;  %v9615_v63 = vadd.f32 %v20995_v35, %v20798_v41  ;;  %v9848_v15 = vadd.f32 %v19275_v2, %v17898_v55  ;;  %v21011_v35 = vld [vmem:[#allocation58_spill] sm:$0xff] }
 0x6ea   :  { %10622 = vmatpush1.bf16.msra.mxu1 %v20985_v45  ;;  %10533 = vmatprep.mubr.bf16.mxu1 %v20167_v39  ;;  %v9423_v11 = vadd.f32 %v20988_v18, %v17961_v19  ;;  %v12306_v45 = vld [vmem:[%s19982_s14 + $0x8] sm:$0xff]   ;;  %v10014_v10 = vpack.c.bf16 %v9858_v26, %v9854_v54  ;;  %v21001_v18 = vpack.c.bf16 %v18982_v8, %v18966_v31  ;;  %v21006_v31 = vld [vmem:[#allocation59_spill] sm:$0xff] }
 0x6eb   :  { %10623 = vmatprep.subr.bf16.mxu1 %v9988_v0  ;;  %v20992_v0 = vld [vmem:[#allocation17_spill] sm:$0xff]  ;;  %v9962_v21 = vpack.c.bf16 %v9666_v9, %v9662_v46  ;;  %v20999_v9 = vld [vmem:[#allocation47_spill] sm:$0xff]  ;;  %v9844_v46 = vadd.f32 %v19240_v6, %v17894_v4  ;;  %v21004_v26 = vld [vmem:[#allocation22_spill] sm:$0xff]  ;;  %v9846_v2 = vadd.f32 %v19252_v50, %v17898_v55  ;;  %v9601_v8 = vadd.f32 %v21006_v31, %v17894_v4 }
 0x6ec   :  { %10783 = vmatpush1.bf16.msra.mxu0 %v9993_v28  ;;  %v20993_v61 = vpack.c.bf16 %v20991_v53, %v20992_v0  ;;  %v9956_v49 = vpack.c.bf16 %v9423_v11, %v9419_v14  ;;  %v20997_v28 = vld [vmem:[#allocation75_spill] sm:$0xff]  ;;  %v9852_v11 = vadd.f32 %v19283_v47, %v17859_v33  ;;  %v21005_v12 = vpack.c.bf16 %v21003_v36, %v21004_v26  ;;  %v21027_v31 = vld [vmem:[#allocation72_spill] sm:$0xff] }
 0x6ed   :  { %10784 = vmatprep.subr.bf16.mxu0 %v9978_v56  ;;  %v9611_v22 = vadd.f32 %v20997_v28, %v17859_v33  ;;  %v21000_v56 = vpack.c.bf16 %v20998_v60, %v20999_v9  ;;  %v9838_v47 = vadd.f32 %v19188_v43, %v17920_v44  ;;  %v9998_v6 = vpack.c.bf16 %v9848_v15, %v9844_v46  ;;  %v21010_v43 = vld [vmem:[#allocation93_spill] sm:$0xff]  ;;  %v21014_v54 = vld [vmem:[#allocation63_spill] sm:$0xff]  ;;  %v21020_v15 = vld [vmem:[#allocation82_spill] sm:$0xff] }
 0x6ee   :  { %10624 = vmatpush1.bf16.msra.mxu1 %v20993_v61  ;;  %v10013_v14 = vpack.c.bf16 %v9856_v7, %v9852_v11  ;;  %v9842_v53 = vadd.f32 %v19210_v58, %v17894_v4  ;;  %v9834_v61 = vadd.f32 %v19143_v24, %v17912_v37  ;;  %v21013_v4 = vld [vmem:[#allocation43_spill] sm:$0xff]  ;;  %v21016_v24 = vld [vmem:[#allocation33_spill] sm:$0xff]  ;;  %v21023_v46 = vld [vmem:[#allocation54_spill] sm:$0xff] }
 0x6ef   :  { %12067 = vmatmul.mubr.msk.bf16.gmra.mxu0 %vm20994_vm11, %v19334_v57  ;;  %10625 = vmatprep.subr.bf16.mxu1 %v9972_v3  ;;  %v10008_v32 = vpack.c.bf16 %v9615_v63, %v9611_v22  ;;  %v21002_v3 = vld [vmem:[#allocation65_spill] sm:$0xff]  ;;  %v21012_v63 = vpack.c.bf16 %v21010_v43, %v21011_v35  ;;  %v9836_v58 = vadd.f32 %v21013_v4, %v17920_v44  ;;  %v21022_v11 = vld [vmem:[#allocation99_spill] sm:$0xff] }
 0x6f0   :  { %10804 = vmatprep.mubr.bf16.mxu0 %v20167_v39  ;;  %10785 = vmatpush1.bf16.msra.mxu0 %v20996_v29  ;;  %v9605_v52 = vadd.f32 %v21002_v3, %v17898_v55  ;;  %v21009_v55 = vld [vmem:[#allocation29_spill] sm:$0xff]  ;;  %v9591_v29 = vadd.f32 %v21014_v54, %v17912_v37  ;;  %v9982_v28 = vpack.c.bf16 %v9838_v47, %v9834_v61  ;;  %v21034_v61 = vld [vmem:[#allocation100_spill] sm:$0xff]  ;;  %v21038_v35 = vld [vmem:[#allocation91_spill] sm:$0xff] }
 0x6f1   :  { %12059 = vmatmul.mubr.msk.bf16.gmra.mxu1 %vm10063_vm8, %v12306_v45  ;;  %10786 = vmatprep.subr.bf16.mxu0 %v9962_v21  ;;  %vm21007_vm8 = vmmov %vm20959_vm3  ;;  %v9595_v50 = vadd.f32 %v21009_v55, %v17920_v44  ;;  %v9997_v21 = vpack.c.bf16 %v9846_v2, %v9842_v53  ;;  %v9832_v22 = vadd.f32 %v21016_v24, %v17912_v37  ;;  %v21030_v53 = vld [vmem:[#allocation6_spill] sm:$0xff]  ;;  %v21031_v55 = vld [vmem:[#allocation57_spill] sm:$0xff] }
 0x6f2   :  { %10626 = vmatpush1.bf16.msra.mxu1 %v21000_v56  ;;  %10645 = vmatprep.mubr.bf16.mxu1 %v20167_v39  ;;  %v9992_v0 = vpack.c.bf16 %v9605_v52, %v9601_v8  ;;  %v21018_v56 = vld [vmem:[#allocation98_spill] sm:$0xff]  ;;  %v9826_v3 = vadd.f32 %v21022_v11, %v17961_v19  ;;  %v9581_v36 = vadd.f32 %v21023_v46, %v17955_v34  ;;  %v21028_v8 = vld [vmem:[#allocation81_spill] sm:$0xff]  ;;  %v21042_v54 = vld [vmem:[#allocation92_spill] sm:$0xff] }
 0x6f3   :  { %10627 = vmatprep.subr.bf16.mxu1 %v9956_v49  ;;  %v21015_v49 = vld [vmem:[#allocation102_spill] sm:$0xff]  ;;  %v9976_v9 = vpack.c.bf16 %v9595_v50, %v9591_v29  ;;  %v9824_v7 = vadd.f32 %v21018_v56, %v17955_v34  ;;  %v9981_v52 = vpack.c.bf16 %v9836_v58, %v9832_v22  ;;  %v21029_v47 = vpack.c.bf16 %v21027_v31, %v21028_v8  ;;  %v21039_v4 = vld [vmem:[#allocation5_spill] sm:$0xff]  ;;  %v21046_v24 = vld [vmem:[#allocation60_spill] sm:$0xff] }
 0x6f4   :  { %10787 = vmatpush1.bf16.msra.mxu0 %v21001_v18  ;;  %v9828_v45 = vadd.f32 %v21015_v49, %v17961_v19  ;;  %v21032_v50 = vpack.c.bf16 %v21030_v53, %v21031_v55  ;;  %v21040_v58 = vld [vmem:[#allocation50_spill] sm:$0xff]  ;;  %v9753_v29 = vadd.f32 %v21042_v54, %v17912_v37  ;;  %v21043_v49 = vld [vmem:[#allocation97_spill] sm:$0xff]  ;;  %v9747_v22 = vadd.f32 %v21046_v24, %v17961_v19  ;;  %vm21072_vm3 = vmmov %vm21026_vm1 }
 0x6f5   :  { %10886 = vmatprep.subr.bf16.mxu0 %v10014_v10  ;;  %v21017_v10 = vld [vmem:[#allocation71_spill] sm:$0xff]  ;;  %v21050_v56 = vld [vmem:[#allocation70_spill] sm:$0xff] }
 0x6f6   :  { %10628 = vmatpush1.bf16.msra.mxu1 %v21005_v12  ;;  %v9585_v60 = vadd.f32 %v21017_v10, %v17961_v19  ;;  %v9966_v26 = vpack.c.bf16 %v9828_v45, %v9824_v7  ;;  %v21025_v12 = vld [vmem:[#allocation34_spill] sm:$0xff]  ;;  %v21044_v45 = vld [vmem:[#allocation96_spill] sm:$0xff]  ;;  %v9743_v7 = vadd.f32 %v21050_v56, %v17955_v34  ;;  %v9935_v19 = vadd.f32 %v19306_v5, %v17859_v33 }
 0x6f7   :  { %10727 = vmatprep.subr.bf16.mxu1 %v10008_v32  ;;  %12070 = vmatmul.mubr.msk.bf16.vlgmr.msra.gmra.mxu0 %vm21007_vm8, %v19261_v51  ;;  %v21019_v32 = vld [vmem:[#allocation68_spill] sm:$0xff]  ;;  %v9822_v2 = vadd.f32 %v21025_v12, %v17955_v34  ;;  %v21065_v12 = vld [vmem:[#allocation13_spill] sm:$0xff] }
 0x6f8   :  { %10814 = vmatprep.mubr.bf16.mxu0 %v20167_v39  ;;  %10887 = vmatpush1.bf16.msra.mxu0 %v10013_v14  ;;  %v21021_v18 = vpack.c.bf16 %v21019_v32, %v21020_v15  ;;  %v9960_v14 = vpack.c.bf16 %v9585_v60, %v9581_v36  ;;  %v21047_v60 = vld [vmem:[#allocation95_spill] sm:$0xff]  ;;  %v9939_v32 = vadd.f32 %v19345_v42, %v20798_v41  ;;  %v21053_v15 = vld [vmem:[#allocation28_spill] sm:$0xff]  ;;  %v21059_v36 = vld [vmem:[#allocation45_spill] sm:$0xff] }
 0x6f9   :  { %12064 = vmatmul.mubr.msk.bf16.vlgmr.msra.gmra.mxu1 %vm21008_vm7, %v19261_v51  ;;  %10888 = vmatprep.subr.bf16.mxu0 %v9998_v6  ;;  %v9965_v6 = vpack.c.bf16 %v9826_v3, %v9822_v2  ;;  %v9964_v37 = vpack.c.bf16 %v9747_v22, %v9743_v7  ;;  %v9937_v42 = vadd.f32 %v19325_v13, %v20798_v41  ;;  %v21056_v3 = vld [vmem:[#allocation46_spill] sm:$0xff]  ;;  %v19606_v2 = vpop.f32.mrf.mxu0 }
 0x6fa   :  { %10655 = vmatprep.mubr.bf16.mxu1 %v20167_v39  ;;  %10728 = vmatpush1.bf16.msra.mxu1 %v21012_v63  ;;  %v9757_v63 = vadd.f32 %v21038_v35, %v17920_v44  ;;  %v10016_v34 = vpack.c.bf16 %v9939_v32, %v9935_v19  ;;  %v21061_v41 = vpack.c.bf16 %v19357_v40, %v19349_v62  ;;  %v21069_v62 = vld [vmem:[#allocation23_spill] sm:$0xff] }
 0x6fb   :  { %10729 = vmatprep.subr.bf16.mxu1 %v9992_v0  ;;  %v21033_v0 = vld [vmem:[#allocation101_spill] sm:$0xff]  ;;  %v21062_v13 = vpack.c.bf16 %v19319_v27, %v19315_v30  ;;  %v21067_v17 = vpack.c.bf16 %v21065_v12, %v21066_v16  ;;  %v19611_v30 = vpop.f32.mrf.mxu0 }
 0x6fc   :  { %10889 = vmatpush1.bf16.msra.mxu0 %v9997_v21  ;;  %v21035_v43 = vpack.c.bf16 %v21033_v0, %v21034_v61  ;;  %v21041_v21 = vpack.c.bf16 %v21039_v4, %v21040_v58  ;;  %v9980_v10 = vpack.c.bf16 %v9757_v63, %v9753_v29 }
 0x6fd   :  { %10890 = vmatprep.subr.bf16.mxu0 %v9982_v28  ;;  %v21045_v28 = vpack.c.bf16 %v21043_v49, %v21044_v45 }
 0x6fe   :  { %10730 = vmatpush1.bf16.msra.mxu1 %v21021_v18  ;;  %v21054_v18 = vld [vmem:[#allocation26_spill] sm:$0xff] }
 0x6ff   :  { %10731 = vmatprep.subr.bf16.mxu1 %v9976_v9  ;;  %12071 = vmatmul.mubr.msk.bf16.gmra.mxu0 %vm21024_vm10, %v19334_v57  ;;  %v21048_v9 = vld [vmem:[#allocation20_spill] sm:$0xff]  ;;  %v21055_v11 = vpack.c.bf16 %v21053_v15, %v21054_v18 }
 0x700   :  { %10891 = vmatpush1.bf16.msra.mxu0 %v9981_v52  ;;  %10910 = vmatprep.mubr.bf16.mxu0 %v20167_v39  ;;  %v21049_v44 = vpack.c.bf16 %v21047_v60, %v21048_v9  ;;  %v21057_v52 = vld [vmem:[#allocation44_spill] sm:$0xff] }
 0x701   :  { %12065 = vmatmul.mubr.msk.bf16.gmra.mxu1 %vm21026_vm1, %v19334_v57  ;;  %10892 = vmatprep.subr.bf16.mxu0 %v9966_v26  ;;  %v21058_v46 = vpack.c.bf16 %v21056_v3, %v21057_v52  ;;  %v9933_v26 = vadd.f32 %v21059_v36, %v17859_v33  ;;  %v21064_v33 = vpack.c.bf16 %v19281_v20, %v19273_v23  ;;  %v19613_v23 = vpop.f32.mrf.mxu0 }
 0x702   :  { %10732 = vmatpush1.bf16.msra.mxu1 %v21029_v47  ;;  %10751 = vmatprep.mubr.bf16.mxu1 %v20167_v39 }
 0x703   :  { %10733 = vmatprep.subr.bf16.mxu1 %v9960_v14  ;;  %v10015_v5 = vpack.c.bf16 %v9937_v42, %v9933_v26  ;;  %v10160_v20 = vpop.f32.mrf.mxu0 }
 0x704   :  { %10893 = vmatpush1.bf16.msra.mxu0 %v9965_v6 }
 0x705   :  { %v10164_v27 = vpop.f32.mrf.mxu0 }
 0x706   :  { %10734 = vmatpush1.bf16.msra.mxu1 %v21032_v50 }
 0x707   :  { %10833 = vmatprep.subr.bf16.mxu1 %v21035_v43  ;;  %12074 = vmatmul.mubr.msk.bf16.vlgmr.msra.gmra.mxu0 %vm21036_vm12, %v19261_v51  ;;  %v10166_v14 = vpop.f32.mrf.mxu0 }
 0x708   :  { %10920 = vmatprep.mubr.bf16.mxu0 %v20167_v39 }
 0x709   :  { %12068 = vmatmul.mubr.msk.bf16.vlgmr.msra.gmra.mxu1 %vm21037_vm5, %v19261_v51  ;;  %v10168_v31 = vpop.f32.mrf.mxu0 }
 0x70a   :  { %10761 = vmatprep.mubr.bf16.mxu1 %v20167_v39  ;;  %10834 = vmatpush1.bf16.msra.mxu1 %v21041_v21 }
 0x70b   :  { %10835 = vmatprep.subr.bf16.mxu1 %v21045_v28  ;;  %v19618_v8 = vpop.f32.mrf.mxu0 }
 0x70d   :  { %v19620_v47 = vpop.f32.mrf.mxu0 }
 0x70e   :  { %10836 = vmatpush1.bf16.msra.mxu1 %v21049_v44 }
 0x70f   :  { %10837 = vmatprep.subr.bf16.mxu1 %v9980_v10  ;;  %12075 = vmatmul.mubr.msk.bf16.gmra.mxu0 %vm21051_vm14, %v19334_v57  ;;  %v19624_v6 = vpop.f32.mrf.mxu0 }
 0x710   :  { %11211 = vmatprep.mubr.bf16.mxu0 %v20167_v39 }
 0x711   :  { %12069 = vmatmul.mubr.msk.bf16.gmra.mxu1 %vm21052_vm9, %v19334_v57  ;;  %v19628_v55 = vpop.f32.mrf.mxu0 }
 0x712   :  { %10838 = vmatpush1.bf16.msra.mxu1 %v21055_v11  ;;  %10857 = vmatprep.mubr.bf16.mxu1 %v20167_v39 }
 0x713   :  { %10839 = vmatprep.subr.bf16.mxu1 %v9964_v37 }
 0x716   :  { %10840 = vmatpush1.bf16.msra.mxu1 %v21058_v46 }
 0x717   :  { %10939 = vmatprep.subr.bf16.mxu1 %v10016_v34 }
 0x719   :  { %12072 = vmatmul.mubr.msk.bf16.vlgmr.msra.gmra.mxu1 %vm21060_vm2, %v19261_v51 }
 0x71a   :  { %10867 = vmatprep.mubr.bf16.mxu1 %v20167_v39  ;;  %10940 = vmatpush1.bf16.msra.mxu1 %v10015_v5 }
 0x71b   :  { %10941 = vmatprep.subr.bf16.mxu1 %v10000_v38  ;;  %v21068_v38 = vld [vmem:[#allocation19_spill] sm:$0xff] }
 0x71c   :  { %v21070_v40 = vpack.c.bf16 %v21068_v38, %v21069_v62 }
 0x71e   :  { %10942 = vmatpush1.bf16.msra.mxu1 %v21061_v41 }
 0x71f   :  { %10943 = vmatprep.subr.bf16.mxu1 %v21062_v13 }
 0x721   :  { %12073 = vmatmul.mubr.msk.bf16.gmra.mxu1 %vm21063_vm6, %v19334_v57 }
 0x722   :  { %10944 = vmatpush1.bf16.msra.mxu1 %v21064_v33  ;;  %10963 = vmatprep.mubr.bf16.mxu1 %v20167_v39 }
 0x723   :  { %10945 = vmatprep.subr.bf16.mxu1 %v21067_v17 }
 0x726   :  { %10946 = vmatpush1.bf16.msra.mxu1 %v21070_v40  ;;  %v19712_v40 = vpop.permute.xlu1 %11005 }
 0x729   :  { %12076 = vmatmul.mubr.msk.bf16.vlgmr.msra.gmra.mxu1 %vm21071_vm15, %v19261_v51  ;;  %v19622_v51 = vpop.f32.mrf.mxu1 }
 0x72a   :  { %10973 = vmatprep.mubr.bf16.mxu1 %v20167_v39 }
 0x72b   :  { %v19626_v53 = vpop.f32.mrf.mxu1 }
 0x72d   :  { %v19630_v50 = vpop.f32.mrf.mxu1 }
 0x72f   :  { %v19634_v0 = vpop.f32.mrf.mxu1 }
 0x731   :  { %12077 = vmatmul.mubr.msk.bf16.gmra.mxu1 %vm21072_vm3, %v19334_v57  ;;  %v19632_v57 = vpop.f32.mrf.mxu0  ;;  %v19638_v43 = vpop.f32.mrf.mxu1 }
 0x732   :  { %11252 = vmatprep.mubr.bf16.mxu1 %v20167_v39 }
 0x733   :  { %v19636_v61 = vpop.f32.mrf.mxu0  ;;  %v19642_v63 = vpop.f32.mrf.mxu1 }
 0x735   :  { %v19640_v35 = vpop.f32.mrf.mxu0  ;;  %v19646_v58 = vpop.f32.mrf.mxu1 }
 0x737   :  { %v19644_v4 = vpop.f32.mrf.mxu0  ;;  %v19650_v54 = vpop.f32.mrf.mxu1 }
 0x739   :  { %v19648_v21 = vpop.f32.mrf.mxu0  ;;  %v19654_v49 = vpop.f32.mrf.mxu1 }
 0x73b   :  { %v19652_v29 = vpop.f32.mrf.mxu0  ;;  %v19658_v28 = vpop.f32.mrf.mxu1 }
 0x73d   :  { %v19656_v45 = vpop.f32.mrf.mxu0  ;;  %v19662_v22 = vpop.f32.mrf.mxu1 }
 0x73e   :  { %21073 = vst [vmem:[#allocation52_spill] sm:$0xff] %v19662_v22 }
 0x73f   :  { %v19660_v24 = vpop.f32.mrf.mxu0  ;;  %v19666_v60 = vpop.f32.mrf.mxu1 }
 0x741   :  { %v19664_v10 = vpop.f32.mrf.mxu0  ;;  %v19670_v44 = vpop.f32.mrf.mxu1 }
 0x742   :  { %21074 = vst [vmem:[#allocation30_spill] sm:$0xff] %v19670_v44 }
 0x743   :  { %v19668_v9 = vpop.f32.mrf.mxu0  ;;  %v19674_v7 = vpop.f32.mrf.mxu1 }
 0x745   :  { %v19672_v56 = vpop.f32.mrf.mxu0  ;;  %v19678_v37 = vpop.f32.mrf.mxu1 }
 0x746   :  { %21075 = vst [vmem:[#allocation69_spill] sm:$0xff] %v19678_v37 }
 0x747   :  { %v19676_v32 = vpop.f32.mrf.mxu0  ;;  %v19682_v15 = vpop.f32.mrf.mxu1 }
 0x748   :  { %21076 = vst [vmem:[#allocation42_spill] sm:$0xff] %v19682_v15 }
 0x749   :  { %v19680_v19 = vpop.f32.mrf.mxu0 }
 0x74e   :  { %v19688_v34 = vpop.f32.mrf.mxu1 }
 0x74f   :  { %21077 = vst [vmem:[#allocation32_spill] sm:$0xff] %v19688_v34 }
 0x750   :  { %v19694_v52 = vpop.f32.mrf.mxu1 }
 0x751   :  { %21079 = vst [vmem:[#allocation74_spill] sm:$0xff] %v19694_v52 }
 0x752   :  { %v19700_v26 = vpop.f32.mrf.mxu1 }
 0x753   :  { %21080 = vst [vmem:[#allocation77_spill] sm:$0xff] %v19700_v26 }
 0x754   :  { %v19706_v13 = vpop.f32.mrf.mxu1 }
 0x755   :  { %21083 = vst [vmem:[#allocation76_spill] sm:$0xff] %v19706_v13 }
 0x756   :  { %v19708_v16 = vpop.f32.mrf.mxu1 }
 0x757   :  { %21084 = vst [vmem:[#allocation79_spill] sm:$0xff] %v19708_v16  ;;  %v19719_v16 = vpop.permute.xlu1 %10995 }
 0x758   :  { %v19710_v62 = vpop.f32.mrf.mxu1 }
 0x759   :  { %21085 = vst [vmem:[#allocation21_spill] sm:$0xff] %v19710_v62 }
 0x75a   :  { %v19716_v59 = vpop.f32.mrf.mxu1 }
 0x75b   :  { %21086 = vst [vmem:[#allocation83_spill] sm:$0xff] %v19716_v59 }
 0x75c   :  { %v19722_v22 = vpop.f32.mrf.mxu1 }
 0x75d   :  { %21087 = vst [vmem:[#allocation18_spill] sm:$0xff] %v19722_v22 }
 0x784   :  { %v19684_v18 = vpop.f32.mrf.mxu0 }
 0x786   :  { %v19686_v11 = vpop.f32.mrf.mxu0 }
 0x788   :  { %v19690_v42 = vpop.f32.mrf.mxu0 }
 0x789   :  { %21078 = vst [vmem:[#allocation62_spill] sm:$0xff] %v19690_v42 }
 0x78a   :  { %v19692_v3 = vpop.f32.mrf.mxu0 }
 0x78c   :  { %v19696_v46 = vpop.f32.mrf.mxu0 }
 0x78e   :  { %v19698_v36 = vpop.f32.mrf.mxu0 }
 0x790   :  { %v19702_v5 = vpop.f32.mrf.mxu0 }
 0x791   :  { %21081 = vst [vmem:[#allocation56_spill] sm:$0xff] %v19702_v5 }
 0x792   :  { %v19704_v41 = vpop.f32.mrf.mxu0 }
 0x793   :  { %21082 = vst [vmem:[#allocation85_spill] sm:$0xff] %v19704_v41 }
 0x795   :  { %v10594_v33 = vpop.f32.mrf.mxu0 }
 0x797   :  { %v10596_v12 = vpop.f32.mrf.mxu0 }
 0x798   :  { %v10597_v15 = vadd.f32 %v10596_v12, %v19611_v30  ;;  %v10595_v30 = vadd.f32 %v10594_v33, %v19606_v2 }
 0x799   :  { %v10598_v17 = vpop.f32.mrf.mxu0 }
 0x79a   :  { %v10599_v37 = vadd.f32 %v10598_v17, %v19613_v23 }
 0x79b   :  { %v10600_v38 = vpop.f32.mrf.mxu0 }
 0x79c   :  { %v10601_v34 = vadd.f32 %v10600_v38, %v10160_v20 }
 0x79d   :  { %v10604_v1 = vpop.f32.mrf.mxu0 }
 0x79e   :  { %v10605_v52 = vadd.f32 %v10604_v1, %v10164_v27  ;;  %v11025_v5 = vadd.f32 %v19719_v16, %v10601_v34  ;;  %v19728_v1 = vpop.permute.xlu0 %10990 }
 0x79f   :  { %v10606_v48 = vpop.f32.mrf.mxu0  ;;  %v11009_v23 = vadd.f32 %v19728_v1, %v10597_v15  ;;  %v11008_v17 = vadd.f32 %v19728_v1, %v10595_v30 }
 0x7a0   :  { %v10607_v26 = vadd.f32 %v10606_v48, %v10166_v14  ;;  %v11040_v20 = vadd.f32 %v19714_v25, %v10605_v52 }
 0x7a1   :  { %v10608_v13 = vpop.f32.mrf.mxu0  ;;  %v11073_v52 = vmax.f32 %v11009_v23, 0.0 }
 0x7a2   :  { %v10609_v41 = vadd.f32 %v10608_v13, %v10168_v31  ;;  %v11041_v42 = vadd.f32 %v19714_v25, %v10607_v26  ;;  %v11024_v31 = vadd.f32 %v19719_v16, %v10599_v37  ;;  %v11104_v38 = vmax.f32 %v11040_v20, 0.0 }
 0x7a3   :  { %v10610_v62 = vpop.f32.mrf.mxu0  ;;  %v11072_v37 = vmax.f32 %v11008_v17, 0.0 }
 0x7a4   :  { %v11056_v59 = vadd.f32 %v19712_v40, %v10609_v41  ;;  %v10611_v48 = vadd.f32 %v10610_v62, %v19618_v8  ;;  %v11089_v41 = vmax.f32 %v11025_v5, 0.0  ;;  %v11105_v12 = vmax.f32 %v11041_v42, 0.0 }
 0x7a5   :  { %v11088_v15 = vmax.f32 %v11024_v31, 0.0 }
 0x7a6   :  { %v11057_v14 = vadd.f32 %v19712_v40, %v10611_v48  ;;  %v11120_v34 = vmax.f32 %v11056_v59, 0.0  ;;  %v11138_v59 = vpack.c.bf16 %v11089_v41, %v11073_v52 }
 0x7a7   :  { %v10700_v27 = vpop.f32.mrf.mxu0  ;;  %v11137_v30 = vpack.c.bf16 %v11088_v15, %v11072_v37 }
 0x7a8   :  { %v11121_v8 = vmax.f32 %v11057_v14, 0.0  ;;  %v11153_v22 = vpack.c.bf16 %v11120_v34, %v11104_v38  ;;  %v19751_v34 = vld [vmem:[%s19984_s16] sm:$0x3]  ;;  %s12337_s16 = smov [#allocation2]  }
 0x7a9   :  { %v10702_v13 = vpop.f32.mrf.mxu0  ;;  %v19735_v26 = vpop.f32.mrf.mxu1  ;;  %s11617_s1 = sshll.u32 %s12337_s16, 4  ;;  %s11618_s1 = int_to_ptr.vmem [resolvable:$true] %s11617_s1 }
 0x7aa   :  { %v11154_v62 = vpack.c.bf16 %v11121_v8, %v11105_v12  ;;  %v10703_v8 = vadd.f32 %v10702_v13, %v19624_v6  ;;  %v10701_v6 = vadd.f32 %v10700_v27, %v19620_v47  ;;  %s12307_s20 = scalar_lea.vmem %s11618_s1, 1024  ;;  %p12312_p1 = scmp.lt.s32.totalorder %s11618_s1, %s11618_s1 }
 0x7ab   :  { %v10704_v2 = vpop.f32.mrf.mxu0  ;;  %v19738_v33 = vpop.f32.mrf.mxu1  ;;  %p12308_p0 = scmp.ne.s32.totalorder %s11618_s1, %s12307_s20  ;;  %p12313_p2 = scmp.lt.s32.totalorder %s12307_s20, %s12307_s20 }
 0x7ac   :  { %11191 = vmatprep.subr.bf16.mxu0 %v11154_v62  ;;  %v11013_v13 = vadd.f32 %v19728_v1, %v10703_v8  ;;  %v11012_v47 = vadd.f32 %v19728_v1, %v10701_v6 }
 0x7ad   :  { %v10706_v48 = vpop.f32.mrf.mxu0  ;;  %v19740_v44 = vpop.f32.mrf.mxu1  ;;  %11192 = vmatpush1.bf16.msra.mxu0 %v11153_v22  ;;  %p12314_p3 = por %p12313_p2, %p12312_p1 }
 0x7ae   :  { %11193 = vmatprep.subr.bf16.mxu0 %v11138_v59  ;;  %v10707_v23 = vadd.f32 %v10706_v48, %v19632_v57  ;;  %v10705_v57 = vadd.f32 %v10704_v2, %v19628_v55 }
 0x7af   :  { %v10710_v5 = vpop.f32.mrf.mxu0  ;;  %v19742_v42 = vpop.f32.mrf.mxu1  ;;  %p12315_p4 = pnand %p12314_p3, %p12308_p0 }
 0x7b0   :  { %v10711_v22 = vadd.f32 %v10710_v5, %v19636_v61  ;;  %v11029_v52 = vadd.f32 %v19719_v16, %v10707_v23  ;;  %v11028_v59 = vadd.f32 %v19719_v16, %v10705_v57  ;;  %v11076_v57 = vmax.f32 %v11012_v47, 0.0 }
 0x7b1   :  { %v10712_v20 = vpop.f32.mrf.mxu0  ;;  %v19744_v14 = vpop.f32.mrf.mxu1  ;;  %11194 = vmatpush1.bf16.msra.mxu0 %v11137_v30 }
 0x7b2   :  { %v10713_v31 = vadd.f32 %v10712_v20, %v19640_v35  ;;  %v11093_v30 = vmax.f32 %v11029_v52, 0.0 }
 0x7b3   :  { %v10714_v41 = vpop.f32.mrf.mxu0  ;;  %v19754_v12 = vpop.f32.mrf.mxu1 }
 0x7b4   :  { %v10715_v17 = vadd.f32 %v10714_v41, %v19644_v4  ;;  %12078 = vmatmul.mubr.msk.bf16.vlgmr.msra.gmra.mxu0 %vm11175_vm0, %v19751_v34  ;;  %v11045_v62 = vadd.f32 %v19714_v25, %v10713_v31  ;;  %v11044_v4 = vadd.f32 %v19714_v25, %v10711_v22  ;;  %v11077_v22 = vmax.f32 %v11013_v13, 0.0 }
 0x7b5   :  { %v10716_v38 = vpop.f32.mrf.mxu0  ;;  %v19759_v35 = vpop.f32.mrf.mxu1  ;;  %11293 = vmatprep.mubr.bf16.mxu0 %v20167_v39 }
 0x7b6   :  { %21088 = vst [vmem:[#allocation55_spill] sm:$0xff] %v19759_v35  ;;  %v11060_v61 = vadd.f32 %v19712_v40, %v10715_v17  ;;  %v10717_v15 = vadd.f32 %v10716_v38, %v19648_v21  ;;  %v11109_v20 = vmax.f32 %v11045_v62, 0.0  ;;  %v11108_v27 = vmax.f32 %v11044_v4, 0.0 }
 0x7b7   :  { %v19770_v55 = vpop.f32.mrf.mxu1  ;;  %v10806_v48 = vpop.f32.mrf.mxu0  ;;  %v11092_v38 = vmax.f32 %v11028_v59, 0.0 }
 0x7b8   :  { %21089 = vst [vmem:[#allocation87_spill] sm:$0xff] %v19770_v55  ;;  %v11061_v2 = vadd.f32 %v19712_v40, %v10717_v15  ;;  %v11124_v37 = vmax.f32 %v11060_v61, 0.0  ;;  %v11142_v15 = vpack.c.bf16 %v11093_v30, %v11077_v22 }
 0x7b9   :  { %v10647_v5 = vpop.f32.mrf.mxu1  ;;  %v10808_v23 = vpop.f32.mrf.mxu0  ;;  %v11141_v62 = vpack.c.bf16 %v11092_v38, %v11076_v57 }
 0x7ba   :  { %v11125_v21 = vmax.f32 %v11061_v2, 0.0  ;;  %v11157_v8 = vpack.c.bf16 %v11124_v37, %v11108_v27  ;;  %v10807_v2 = vadd.f32 %v10806_v48, %v19652_v29 }
 0x7bb   :  { %v10649_v31 = vpop.f32.mrf.mxu1  ;;  %v10810_v17 = vpop.f32.mrf.mxu0 }
 0x7bc   :  { %v11158_v41 = vpack.c.bf16 %v11125_v21, %v11109_v20  ;;  %v10648_v21 = vadd.f32 %v10647_v5, %v19622_v51  ;;  %v19783_v27 = vadd.f32 %v19728_v1, %v10807_v2  ;;  %v10650_v48 = vadd.f32 %v10649_v31, %v19626_v53 }
 0x7bd   :  { %v10651_v55 = vpop.f32.mrf.mxu1  ;;  %v10812_v35 = vpop.f32.mrf.mxu0  ;;  %v10811_v5 = vadd.f32 %v10810_v17, %v19660_v24 }
 0x7be   :  { %11273 = vmatprep.subr.bf16.mxu0 %v11158_v41  ;;  %v10813_v13 = vadd.f32 %v10812_v35, %v19664_v10  ;;  %v11011_v41 = vadd.f32 %v19728_v1, %v10650_v48 }
 0x7bf   :  { %11274 = vmatpush1.bf16.msra.mxu0 %v11157_v8  ;;  %v10653_v61 = vpop.f32.mrf.mxu1  ;;  %v10816_v52 = vpop.f32.mrf.mxu0 }
 0x7c0   :  { %11275 = vmatprep.subr.bf16.mxu0 %v11142_v15  ;;  %v10654_v59 = vadd.f32 %v10653_v61, %v19634_v0  ;;  %v10817_v29 = vadd.f32 %v10816_v52, %v19668_v9  ;;  %v10809_v0 = vadd.f32 %v10808_v23, %v19656_v45  ;;  %v11033_v9 = vadd.f32 %v19719_v16, %v10813_v13 }
 0x7c1   :  { %v10657_v6 = vpop.f32.mrf.mxu1  ;;  %v10818_v4 = vpop.f32.mrf.mxu0  ;;  %v11032_v52 = vadd.f32 %v19719_v16, %v10811_v5 }
 0x7c2   :  { %v10819_v20 = vadd.f32 %v10818_v4, %v19672_v56  ;;  %v10658_v22 = vadd.f32 %v10657_v6, %v19638_v43  ;;  %v11027_v53 = vadd.f32 %v19719_v16, %v10654_v59  ;;  %v11017_v8 = vadd.f32 %v19728_v1, %v10809_v0 }
 0x7c3   :  { %11276 = vmatpush1.bf16.msra.mxu0 %v11141_v62  ;;  %v10659_v37 = vpop.f32.mrf.mxu1  ;;  %v10820_v30 = vpop.f32.mrf.mxu0  ;;  %v11097_v6 = vmax.f32 %v11033_v9, 0.0 }
 0x7c4   :  { %v10660_v47 = vadd.f32 %v10659_v37, %v19642_v63  ;;  %v10821_v56 = vadd.f32 %v10820_v30, %v19676_v32  ;;  %v10652_v63 = vadd.f32 %v10651_v55, %v19630_v50  ;;  %v11049_v31 = vadd.f32 %v19714_v25, %v10819_v20 }
 0x7c5   :  { %v10661_v10 = vpop.f32.mrf.mxu1  ;;  %v10822_v51 = vpop.f32.mrf.mxu0  ;;  %v11048_v55 = vadd.f32 %v19714_v25, %v10817_v29  ;;  %v11042_v17 = vadd.f32 %v19714_v25, %v10658_v22  ;;  %v11091_v37 = vmax.f32 %v11027_v53, 0.0  ;;  %v11010_v29 = vadd.f32 %v19728_v1, %v10648_v21 }
 0x7c6   :  { %12080 = vmatmul.mubr.msk.bf16.vlgmr.msra.gmra.mxu0 %vm11175_vm0, %v19751_v34  ;;  %v10662_v35 = vadd.f32 %v10661_v10, %v19646_v58  ;;  %v11064_v45 = vadd.f32 %v19712_v40, %v10821_v56  ;;  %v10823_v32 = vadd.f32 %v10822_v51, %v19680_v19  ;;  %v11043_v50 = vadd.f32 %v19714_v25, %v10660_v47 }
 0x7c7   :  { %11375 = vmatprep.mubr.bf16.mxu0 %v20167_v39  ;;  %v10663_v43 = vpop.f32.mrf.mxu1  ;;  %v10912_v23 = vpop.f32.mrf.mxu0  ;;  %v11026_v19 = vadd.f32 %v19719_v16, %v10652_v63  ;;  %v11113_v4 = vmax.f32 %v11049_v31, 0.0  ;;  %v11112_v47 = vmax.f32 %v11048_v55, 0.0  ;;  %v11106_v48 = vmax.f32 %v11042_v17, 0.0 }
 0x7c8   :  { %v11058_v58 = vadd.f32 %v19712_v40, %v10662_v35  ;;  %v10664_v24 = vadd.f32 %v10663_v43, %v19650_v54  ;;  %v11065_v15 = vadd.f32 %v19712_v40, %v10823_v32  ;;  %v11128_v62 = vmax.f32 %v11064_v45, 0.0 }
 0x7c9   :  { %v10753_v38 = vpop.f32.mrf.mxu1  ;;  %v10914_v57 = vpop.f32.mrf.mxu0  ;;  %v11107_v20 = vmax.f32 %v11043_v50, 0.0  ;;  %v11081_v10 = vmax.f32 %v11017_v8, 0.0  ;;  %v11075_v51 = vmax.f32 %v11011_v41, 0.0  ;;  %v11096_v35 = vmax.f32 %v11032_v52, 0.0 }
 0x7ca   :  { %v11059_v61 = vadd.f32 %v19712_v40, %v10664_v24  ;;  %v11122_v54 = vmax.f32 %v11058_v58, 0.0  ;;  %v11129_v13 = vmax.f32 %v11065_v15, 0.0  ;;  %v11161_v5 = vpack.c.bf16 %v11128_v62, %v11112_v47 }
 0x7cb   :  { %v10755_v2 = vpop.f32.mrf.mxu1  ;;  %v10916_v59 = vpop.f32.mrf.mxu0  ;;  %v11090_v43 = vmax.f32 %v11026_v19, 0.0  ;;  %v11146_v45 = vpack.c.bf16 %v11097_v6, %v11081_v10  ;;  %v11140_v32 = vpack.c.bf16 %v11091_v37, %v11075_v51  ;;  %v11080_v50 = vmax.f32 %v19783_v27, 0.0 }
 0x7cc   :  { %v11123_v30 = vmax.f32 %v11059_v61, 0.0  ;;  %v11162_v0 = vpack.c.bf16 %v11129_v13, %v11113_v4  ;;  %v11155_v9 = vpack.c.bf16 %v11122_v54, %v11106_v48  ;;  %v10913_v21 = vadd.f32 %v10912_v23, %v19684_v18  ;;  %v21090_v54 = vld [vmem:[#allocation30_spill] sm:$0xff] }
 0x7cd   :  { %v10757_v22 = vpop.f32.mrf.mxu1  ;;  %v10918_v56 = vpop.f32.mrf.mxu0  ;;  %v11074_v58 = vmax.f32 %v11010_v29, 0.0  ;;  %v11145_v17 = vpack.c.bf16 %v11096_v35, %v11080_v50  ;;  %v10754_v18 = vadd.f32 %v10753_v38, %v19654_v49  ;;  %v21093_v49 = vld [vmem:[#allocation52_spill] sm:$0xff] }
 0x7ce   :  { %v11156_v63 = vpack.c.bf16 %v11123_v30, %v11107_v20  ;;  %11355 = vmatprep.subr.bf16.mxu0 %v11162_v0  ;;  %v10919_v8 = vadd.f32 %v10918_v56, %v19692_v3  ;;  %v19822_v62 = vadd.f32 %v19728_v1, %v10913_v21  ;;  %v10756_v3 = vadd.f32 %v10755_v2, %v19658_v28  ;;  %v21094_v30 = vld [vmem:[#allocation69_spill] sm:$0xff]  ;;  %v21096_v0 = vld [vmem:[#allocation42_spill] sm:$0xff] }
 0x7cf   :  { %v10759_v31 = vpop.f32.mrf.mxu1  ;;  %v10922_v53 = vpop.f32.mrf.mxu0  ;;  %11356 = vmatpush1.bf16.msra.mxu0 %v11161_v5  ;;  %v11139_v15 = vpack.c.bf16 %v11090_v43, %v11074_v58  ;;  %v10758_v38 = vadd.f32 %v10757_v22, %v21093_v49 }
 0x7d0   :  { %11232 = vmatprep.subr.bf16.mxu1 %v11156_v63  ;;  %11357 = vmatprep.subr.bf16.mxu0 %v11146_v45  ;;  %v10760_v41 = vadd.f32 %v10759_v31, %v19666_v60  ;;  %v10923_v61 = vadd.f32 %v10922_v53, %v19696_v46  ;;  %v10915_v60 = vadd.f32 %v10914_v57, %v19686_v11  ;;  %v21091_v46 = vld [vmem:[#allocation62_spill] sm:$0xff] }
 0x7d1   :  { %11233 = vmatpush1.bf16.msra.mxu1 %v11155_v9  ;;  %v10763_v24 = vpop.f32.mrf.mxu1  ;;  %v10924_v55 = vpop.f32.mrf.mxu0  ;;  %v10917_v13 = vadd.f32 %v10916_v59, %v21091_v46  ;;  %v11037_v29 = vadd.f32 %v19719_v16, %v10919_v8  ;;  %v21095_v59 = vld [vmem:[#allocation85_spill] sm:$0xff]  ;;  %v11015_v51 = vadd.f32 %v19728_v1, %v10756_v3  ;;  %v11030_v9 = vadd.f32 %v19719_v16, %v10758_v38 }
 0x7d2   :  { %11234 = vmatprep.subr.bf16.mxu1 %v11140_v32  ;;  %v10925_v27 = vadd.f32 %v10924_v55, %v19698_v36  ;;  %v10764_v6 = vadd.f32 %v10763_v24, %v21090_v54  ;;  %v21092_v36 = vld [vmem:[#allocation56_spill] sm:$0xff]  ;;  %v11052_v28 = vadd.f32 %v19714_v25, %v10923_v61  ;;  %v11021_v5 = vadd.f32 %v19728_v1, %v10915_v60 }
 0x7d3   :  { %v10765_v19 = vpop.f32.mrf.mxu1  ;;  %v10926_v52 = vpop.f32.mrf.mxu0  ;;  %11358 = vmatpush1.bf16.msra.mxu0 %v11145_v17  ;;  %v11036_v45 = vadd.f32 %v19719_v16, %v10917_v13  ;;  %v11101_v21 = vmax.f32 %v11037_v29, 0.0  ;;  %v21098_v29 = vld [vmem:[#allocation21_spill] sm:$0xff] }
 0x7d4   :  { %v10766_v23 = vadd.f32 %v10765_v19, %v19674_v7  ;;  %v10927_v37 = vadd.f32 %v10926_v52, %v21092_v36  ;;  %v11031_v7 = vadd.f32 %v19719_v16, %v10760_v41  ;;  %v11053_v57 = vadd.f32 %v19714_v25, %v10925_v27 }
 0x7d5   :  { %11235 = vmatpush1.bf16.msra.mxu1 %v11139_v15  ;;  %v10767_v4 = vpop.f32.mrf.mxu1  ;;  %v10928_v20 = vpop.f32.mrf.mxu0  ;;  %v11046_v63 = vadd.f32 %v19714_v25, %v10764_v6  ;;  %v11116_v8 = vmax.f32 %v11052_v28, 0.0  ;;  %v11014_v15 = vadd.f32 %v19728_v1, %v10754_v18  ;;  %v11085_v27 = vmax.f32 %v11021_v5, 0.0  ;;  %v21099_v28 = vld [vmem:[#allocation79_spill] sm:$0xff] }
 0x7d6   :  { %v10768_v47 = vadd.f32 %v10767_v4, %v21094_v30  ;;  %12082 = vmatmul.mubr.msk.bf16.vlgmr.msra.gmra.mxu0 %vm11175_vm0, %v19751_v34  ;;  %v11068_v2 = vadd.f32 %v19712_v40, %v10927_v37  ;;  %v10929_v48 = vadd.f32 %v10928_v20, %v21095_v59  ;;  %v11047_v22 = vadd.f32 %v19714_v25, %v10766_v23  ;;  %v21097_v30 = vld [vmem:[#allocation76_spill] sm:$0xff]  ;;  %v21100_v59 = vld [vmem:[#allocation74_spill] sm:$0xff] }
 0x7d7   :  { %v10769_v11 = vpop.f32.mrf.mxu1  ;;  %11457 = vmatprep.mubr.bf16.mxu0 %v20167_v39  ;;  %v11117_v58 = vmax.f32 %v11053_v57, 0.0  ;;  %v11095_v55 = vmax.f32 %v11031_v7, 0.0  ;;  %v11110_v19 = vmax.f32 %v11046_v63, 0.0  ;;  %v11079_v23 = vmax.f32 %v11015_v51, 0.0 }
 0x7d8   :  { %12079 = vmatmul.mubr.msk.bf16.vlgmr.msra.gmra.mxu1 %vm11175_vm0, %v19751_v34  ;;  %v11062_v10 = vadd.f32 %v19712_v40, %v10768_v47  ;;  %v10770_v56 = vadd.f32 %v10769_v11, %v21096_v0  ;;  %v11069_v43 = vadd.f32 %v19712_v40, %v10929_v48  ;;  %v11132_v53 = vmax.f32 %v11068_v2, 0.0  ;;  %v21101_v48 = vld [vmem:[#allocation83_spill] sm:$0xff] }
 0x7d9   :  { %11334 = vmatprep.mubr.bf16.mxu1 %v20167_v39  ;;  %v10859_v35 = vpop.f32.mrf.mxu1  ;;  %v11111_v41 = vmax.f32 %v11047_v22, 0.0  ;;  %v11100_v3 = vmax.f32 %v11036_v45, 0.0  ;;  %v11094_v6 = vmax.f32 %v11030_v9, 0.0  ;;  %v11150_v13 = vpack.c.bf16 %v11101_v21, %v11085_v27 }
 0x7da   :  { %v11063_v31 = vadd.f32 %v19712_v40, %v10770_v56  ;;  %v11126_v32 = vmax.f32 %v11062_v10, 0.0  ;;  %v11133_v24 = vmax.f32 %v11069_v43, 0.0  ;;  %v11165_v54 = vpack.c.bf16 %v11132_v53, %v11116_v8  ;;  %v21102_v10 = vld [vmem:[#allocation77_spill] sm:$0xff]  ;;  %v21103_v43 = vld [vmem:[#allocation18_spill] sm:$0xff] }
 0x7db   :  { %v10861_v50 = vpop.f32.mrf.mxu1  ;;  %v11144_v36 = vpack.c.bf16 %v11095_v55, %v11079_v23  ;;  %v11084_v37 = vmax.f32 %v19822_v62, 0.0  ;;  %v11078_v20 = vmax.f32 %v11014_v15, 0.0 }
 0x7dc   :  { %v11127_v17 = vmax.f32 %v11063_v31, 0.0  ;;  %v11166_v52 = vpack.c.bf16 %v11133_v24, %v11117_v58  ;;  %v11159_v4 = vpack.c.bf16 %v11126_v32, %v11110_v19  ;;  %v10862_v62 = vadd.f32 %v10861_v50, %v21100_v59  ;;  %v21104_v31 = vld [vmem:[#allocation32_spill] sm:$0xff] }
 0x7dd   :  { %v10863_v61 = vpop.f32.mrf.mxu1  ;;  %v11149_v49 = vpack.c.bf16 %v11100_v3, %v11084_v37  ;;  %v11143_v38 = vpack.c.bf16 %v11094_v6, %v11078_v20  ;;  %v10860_v45 = vadd.f32 %v10859_v35, %v21104_v31 }
 0x7de   :  { %v11160_v60 = vpack.c.bf16 %v11127_v17, %v11111_v41  ;;  %11437 = vmatprep.subr.bf16.mxu0 %v11166_v52  ;;  %v10864_v0 = vadd.f32 %v10863_v61, %v21102_v10  ;;  %v11019_v50 = vadd.f32 %v19728_v1, %v10862_v62  ;;  %v21106_v62 = vld [vmem:[#allocation87_spill] sm:$0xff] }
 0x7df   :  { %v10865_v46 = vpop.f32.mrf.mxu1  ;;  %11438 = vmatpush1.bf16.msra.mxu0 %v11165_v54  ;;  %v11018_v19 = vadd.f32 %v19728_v1, %v10860_v45 }
 0x7e0   :  { %11314 = vmatprep.subr.bf16.mxu1 %v11160_v60  ;;  %11439 = vmatprep.subr.bf16.mxu0 %v11150_v13  ;;  %v10866_v47 = vadd.f32 %v10865_v46, %v21097_v30  ;;  %v11034_v24 = vadd.f32 %v19719_v16, %v10864_v0  ;;  %v11083_v52 = vmax.f32 %v11019_v50, 0.0 }
 0x7e1   :  { %11315 = vmatpush1.bf16.msra.mxu1 %v11159_v4  ;;  %v10869_v18 = vpop.f32.mrf.mxu1 }
 0x7e2   :  { %11316 = vmatprep.subr.bf16.mxu1 %v11144_v36  ;;  %v10870_v57 = vadd.f32 %v10869_v18, %v21099_v28  ;;  %v11035_v51 = vadd.f32 %v19719_v16, %v10866_v47  ;;  %v11082_v36 = vmax.f32 %v11018_v19, 0.0  ;;  %v21105_v28 = vld [vmem:[#allocation55_spill] sm:$0xff] }
 0x7e3   :  { %v10871_v7 = vpop.f32.mrf.mxu1  ;;  %11440 = vmatpush1.bf16.msra.mxu0 %v11149_v49 }
 0x7e4   :  { %v10872_v11 = vadd.f32 %v10871_v7, %v21098_v29  ;;  %v11050_v53 = vadd.f32 %v19714_v25, %v10870_v57  ;;  %v11099_v17 = vmax.f32 %v11035_v51, 0.0 }
 0x7e5   :  { %11317 = vmatpush1.bf16.msra.mxu1 %v11143_v38  ;;  %v10873_v2 = vpop.f32.mrf.mxu1 }
 0x7e6   :  { %v10874_v22 = vadd.f32 %v10873_v2, %v21101_v48  ;;  %12084 = vmatmul.mubr.msk.bf16.vlgmr.msra.gmra.mxu0 %vm11175_vm0, %v19751_v34  ;;  %v11051_v63 = vadd.f32 %v19714_v25, %v10872_v11  ;;  %v11114_v61 = vmax.f32 %v11050_v53, 0.0  ;;  %v11148_v4 = vpack.c.bf16 %v11099_v17, %v11083_v52  ;;  %v21109_v17 = vld [vmem:[#allocation10_spill] sm:$0xff] }
 0x7e7   :  { %v10875_v56 = vpop.f32.mrf.mxu1 }
 0x7e8   :  { %12081 = vmatmul.mubr.msk.bf16.vlgmr.msra.gmra.mxu1 %vm11175_vm0, %v19751_v34  ;;  %v11066_v5 = vadd.f32 %v19712_v40, %v10874_v22  ;;  %v10876_v9 = vadd.f32 %v10875_v56, %v21103_v43  ;;  %v11115_v8 = vmax.f32 %v11051_v63, 0.0  ;;  %v21108_v43 = vld [vmem:[#allocation49_spill] sm:$0xff] }
 0x7e9   :  { %11416 = vmatprep.mubr.bf16.mxu1 %v20167_v39  ;;  %v10965_v32 = vpop.f32.mrf.mxu1 }
 0x7ea   :  { %v11067_v21 = vadd.f32 %v19712_v40, %v10876_v9  ;;  %v10966_v58 = vadd.f32 %v10965_v32, %v19735_v26  ;;  %v11130_v55 = vmax.f32 %v11066_v5, 0.0  ;;  %v11098_v26 = vmax.f32 %v11034_v24, 0.0  ;;  %v21107_v5 = vld [vmem:[#allocation41_spill] sm:$0xff] }
 0x7eb   :  { %v10967_v41 = vpop.f32.mrf.mxu1 }
 0x7ec   :  { %v11131_v15 = vmax.f32 %v11067_v21, 0.0  ;;  %v10968_v35 = vadd.f32 %v10967_v41, %v19738_v33  ;;  %v11022_v60 = vadd.f32 %v19728_v1, %v10966_v58  ;;  %v11163_v54 = vpack.c.bf16 %v11130_v55, %v11114_v61 }
 0x7ed   :  { %v10969_v27 = vpop.f32.mrf.mxu1  ;;  %v11147_v38 = vpack.c.bf16 %v11098_v26, %v11082_v36 }
 0x7ee   :  { %v11164_v23 = vpack.c.bf16 %v11131_v15, %v11115_v8  ;;  %v10970_v3 = vadd.f32 %v10969_v27, %v19740_v44  ;;  %v11023_v46 = vadd.f32 %v19728_v1, %v10968_v35  ;;  %v11086_v20 = vmax.f32 %v11022_v60, 0.0  ;;  %v21110_v15 = vld [vmem:[#allocation78_spill] sm:$0xff] }
 0x7ef   :  { %v10971_v6 = vpop.f32.mrf.mxu1 }
 0x7f0   :  { %11396 = vmatprep.subr.bf16.mxu1 %v11164_v23  ;;  %v11038_v13 = vadd.f32 %v19719_v16, %v10970_v3  ;;  %v10972_v33 = vadd.f32 %v10971_v6, %v19742_v42  ;;  %v11087_v30 = vmax.f32 %v11023_v46, 0.0  ;;  %v21111_v46 = vld [vmem:[#allocation39_spill] sm:$0xff] }
 0x7f1   :  { %11397 = vmatpush1.bf16.msra.mxu1 %v11163_v54  ;;  %v10975_v37 = vpop.f32.mrf.mxu1 }
 0x7f2   :  { %11398 = vmatprep.subr.bf16.mxu1 %v11148_v4  ;;  %v11102_v18 = vmax.f32 %v11038_v13, 0.0  ;;  %v11039_v49 = vadd.f32 %v19719_v16, %v10972_v33  ;;  %v10976_v44 = vadd.f32 %v10975_v37, %v19744_v14  ;;  %v21112_v33 = vld [vmem:[#allocation27_spill] sm:$0xff]  ;;  %v21113_v37 = vld [vmem:[#allocation12_spill] sm:$0xff] }
 0x7f3   :  { %v10977_v7 = vpop.f32.mrf.mxu1 }
 0x7f4   :  { %v11151_v47 = vpack.c.bf16 %v11102_v18, %v11086_v20  ;;  %v11103_v29 = vmax.f32 %v11039_v49, 0.0  ;;  %v10978_v1 = vadd.f32 %v10977_v7, %v19754_v12  ;;  %v11054_v42 = vadd.f32 %v19714_v25, %v10976_v44  ;;  %v21114_v18 = vld [vmem:[#allocation53_spill] sm:$0xff] }
 0x7f5   :  { %11399 = vmatpush1.bf16.msra.mxu1 %v11147_v38  ;;  %v10979_v11 = vpop.f32.mrf.mxu1 }
 0x7f6   :  { %v10980_v57 = vadd.f32 %v10979_v11, %v21105_v28  ;;  %v11152_v2 = vpack.c.bf16 %v11103_v29, %v11087_v30  ;;  %v11055_v16 = vadd.f32 %v19714_v25, %v10978_v1  ;;  %v11118_v12 = vmax.f32 %v11054_v42, 0.0  ;;  %v19897_v25 = vpop.permute.xlu0 %9260 }
 0x7f7   :  { %v10981_v59 = vpop.f32.mrf.mxu1  ;;  %v9378_v9 = vadd.f32 %v21108_v43, %v19897_v25  ;;  %v9538_v8 = vadd.f32 %v21109_v17, %v19897_v25  ;;  %v9540_v35 = vadd.f32 %v21110_v15, %v19897_v25  ;;  %v9700_v13 = vadd.f32 %v21111_v46, %v19897_v25  ;;  %v21117_v43 = vld [vmem:[#allocation61_spill] sm:$0xff]  ;;  %v21120_v46 = vld [vmem:[#allocation35_spill] sm:$0xff] }
 0x7f8   :  { %12083 = vmatmul.mubr.msk.bf16.vlgmr.msra.gmra.mxu1 %vm11175_vm0, %v19751_v34  ;;  %v11070_v14 = vadd.f32 %v19712_v40, %v10980_v57  ;;  %v10982_v48 = vadd.f32 %v10981_v59, %v21106_v62  ;;  %v11119_v0 = vmax.f32 %v11055_v16, 0.0  ;;  %v9702_v36 = vadd.f32 %v21112_v33, %v19897_v25 }
 0x7f9   :  { %11498 = vmatprep.mubr.bf16.mxu1 %v20167_v39  ;;  %v9376_v39 = vadd.f32 %v21107_v5, %v19897_v25  ;;  %v11524_v50 = vrot.slane %v9378_v9, 5  ;;  %v11527_v52 = vrot.slane %v9538_v8, 5  ;;  %v11528_v23 = vrot.slane %v9540_v35, 5  ;;  %v21116_v5 = vld [vmem:[#allocation67_spill] sm:$0xff] }
 0x7fa   :  { %v11134_v22 = vmax.f32 %v11070_v14, 0.0  ;;  %v11071_v10 = vadd.f32 %v19712_v40, %v10982_v48  ;;  %v19903_v40 = vpop.permute.xlu1 %11172  ;;  %v9457_v20 = vadd.f32 %v21113_v37, %v19897_v25  ;;  %v9459_v49 = vadd.f32 %v21114_v18, %v19897_v25 }
 0x7fb   :  { %v11523_v32 = vrot.slane %v9376_v39, 5  ;;  %v11531_v29 = vrot.slane %v9700_v13, 5  ;;  %v11532_v1 = vrot.slane %v9702_v36, 5  ;;  %v9864_v39 = vadd.f32 %v21116_v5, %v19897_v25 }
 0x7fc   :  { %v11167_v56 = vpack.c.bf16 %v11134_v22, %v11118_v12  ;;  %v11135_v51 = vmax.f32 %v11071_v10, 0.0  ;;  %v11525_v28 = vrot.slane %v9457_v20, 5  ;;  %v11526_v57 = vrot.slane %v9459_v49, 5 }
 0x7fd   :  { %v9619_v9 = vadd.f32 %v21117_v43, %v19897_v25  ;;  %v9783_v13 = vadd.f32 %v21120_v46, %v19897_v25 }
 0x7fe   :  { %v11168_v63 = vpack.c.bf16 %v11135_v51, %v11119_v0  ;;  %v21115_v51 = vld [vmem:[#allocation40_spill] sm:$0xff] }
 0x7ff   :  { %v11529_v17 = vrot.slane %v9619_v9, 5  ;;  %v11534_v18 = vrot.slane %v9783_v13, 5 }
 0x800   :  { %11478 = vmatprep.subr.bf16.mxu1 %v11168_v63  ;;  %v9862_v63 = vadd.f32 %v21115_v51, %v19897_v25 }
 0x801   :  { %11479 = vmatpush1.bf16.msra.mxu1 %v11167_v56 }
 0x802   :  { %11480 = vmatprep.subr.bf16.mxu1 %v11152_v2 }
 0x805   :  { %11481 = vmatpush1.bf16.msra.mxu1 %v11151_v47 }
 0x808   :  { %12085 = vmatmul.mubr.msk.bf16.vlgmr.msra.gmra.mxu1 %vm11175_vm0, %v19751_v34 }
 0x874   :  { %v11213_v31 = vpop.f32.mrf.mxu0 }
 0x875   :  { %v11214_v45 = vadd.f32 %v11213_v31, %v19903_v40  ;;  %v21118_v31 = vld [vmem:[#allocation80_spill] sm:$0xff] }
 0x876   :  { %v11215_v53 = vpop.f32.mrf.mxu0 }
 0x877   :  { %v11216_v21 = vadd.f32 %v11215_v53, %v19903_v40  ;;  %v11555_v34 = vsel %vm2453_vm13, %v11214_v45, %v11523_v32  ;;  %v9621_v45 = vadd.f32 %v21118_v31, %v19897_v25 }
 0x878   :  { %v11217_v58 = vpop.f32.mrf.mxu0 }
 0x879   :  { %v11556_v24 = vsel %vm2453_vm13, %v11216_v21, %v11524_v50  ;;  %v11530_v8 = vrot.slane %v9621_v45, 5 }
 0x87a   :  { %v11587_v55 = vcombine.low %v11555_v34, %v11556_v24  ;;  %v11218_v41 = vpop.f32.mrf.mxu0  ;;  %v11535_v34 = vrot.slane %v9862_v63, 5  ;;  %v11536_v24 = vrot.slane %v9864_v39, 5 }
 0x87c   :  { %11603 = vst [vmem:[#allocation2] sm:$0xff] %v11587_v55 }
 0x886   :  { %v11295_v19 = vpop.f32.mrf.mxu0 }
 0x887   :  { %v11296_v61 = vadd.f32 %v11295_v19, %v19903_v40 }
 0x888   :  { %v11297_v27 = vpop.f32.mrf.mxu0 }
 0x889   :  { %v11298_v60 = vadd.f32 %v11297_v27, %v19903_v40  ;;  %v11559_v26 = vsel %vm2453_vm13, %v11296_v61, %v11527_v52 }
 0x88a   :  { %v11299_v3 = vpop.f32.mrf.mxu0 }
 0x88b   :  { %v11560_v54 = vsel %vm2453_vm13, %v11298_v60, %v11528_v23 }
 0x88c   :  { %v11589_v6 = vcombine.low %v11559_v26, %v11560_v54  ;;  %v11300_v4 = vpop.f32.mrf.mxu0 }
 0x88e   :  { %11605 = vst [vmem:[#allocation2 + $0x10] sm:$0xff] %v11589_v6  ;;  %v21119_v6 = vld [vmem:[#allocation25_spill] sm:$0xff] }
 0x88f   :  { %v9781_v4 = vadd.f32 %v21119_v6, %v19897_v25 }
 0x891   :  { %v11533_v20 = vrot.slane %v9781_v4, 5 }
 0x896   :  { %v11377_v44 = vpop.f32.mrf.mxu0 }
 0x897   :  { %v11378_v7 = vadd.f32 %v11377_v44, %v19903_v40 }
 0x898   :  { %v11254_v38 = vpop.f32.mrf.mxu1  ;;  %v11379_v47 = vpop.f32.mrf.mxu0 }
 0x899   :  { %v11255_v30 = vadd.f32 %v11254_v38, %v19903_v40  ;;  %v11380_v42 = vadd.f32 %v11379_v47, %v19903_v40  ;;  %v11563_v14 = vsel %vm2453_vm13, %v11378_v7, %v11531_v29  ;;  %v21121_v29 = vld [vmem:[#allocation51_spill] sm:$0xff] }
 0x89a   :  { %v11256_v11 = vpop.f32.mrf.mxu1  ;;  %v11381_v59 = vpop.f32.mrf.mxu0 }
 0x89b   :  { %v11257_v2 = vadd.f32 %v11256_v11, %v19903_v40  ;;  %v11564_v62 = vsel %vm2453_vm13, %v11380_v42, %v11532_v1  ;;  %v11557_v48 = vsel %vm2453_vm13, %v11255_v30, %v11525_v28  ;;  %v9943_v1 = vadd.f32 %v21121_v29, %v19897_v25  ;;  %v21122_v11 = vld [vmem:[#allocation73_spill] sm:$0xff] }
 0x89c   :  { %v11258_v16 = vpop.f32.mrf.mxu1  ;;  %v11591_v22 = vcombine.low %v11563_v14, %v11564_v62  ;;  %v11382_v10 = vpop.f32.mrf.mxu0  ;;  %v9945_v42 = vadd.f32 %v21122_v11, %v19897_v25 }
 0x89d   :  { %v11558_v12 = vsel %vm2453_vm13, %v11257_v2, %v11526_v57  ;;  %v11537_v59 = vrot.slane %v9943_v1, 5 }
 0x89e   :  { %v11588_v0 = vcombine.low %v11557_v48, %v11558_v12  ;;  %v11259_v56 = vpop.f32.mrf.mxu1  ;;  %11607 = vst [vmem:[#allocation2 + $0x20] sm:$0xff] %v11591_v22  ;;  %v11538_v16 = vrot.slane %v9945_v42, 5 }
 0x8a0   :  { %11604 = vst [vmem:[#allocation2 + $0x8] sm:$0xff] %v11588_v0 }
 0x8a6   :  { %v11459_v53 = vpop.f32.mrf.mxu0 }
 0x8a7   :  { %v11460_v50 = vadd.f32 %v11459_v53, %v19903_v40 }
 0x8a8   :  { %v11336_v32 = vpop.f32.mrf.mxu1  ;;  %v11461_v58 = vpop.f32.mrf.mxu0 }
 0x8a9   :  { %v11337_v21 = vadd.f32 %v11336_v32, %v19903_v40  ;;  %v11462_v41 = vadd.f32 %v11461_v58, %v19903_v40  ;;  %v11567_v61 = vsel %vm2453_vm13, %v11460_v50, %v11535_v34 }
 0x8aa   :  { %v11338_v55 = vpop.f32.mrf.mxu1  ;;  %v11463_v35 = vpop.f32.mrf.mxu0 }
 0x8ab   :  { %v11339_v15 = vadd.f32 %v11338_v55, %v19903_v40  ;;  %v11568_v27 = vsel %vm2453_vm13, %v11462_v41, %v11536_v24  ;;  %v11561_v52 = vsel %vm2453_vm13, %v11337_v21, %v11529_v17 }
 0x8ac   :  { %v11340_v19 = vpop.f32.mrf.mxu1  ;;  %v11593_v60 = vcombine.low %v11567_v61, %v11568_v27  ;;  %v11464_v3 = vpop.f32.mrf.mxu0 }
 0x8ad   :  { %v11562_v23 = vsel %vm2453_vm13, %v11339_v15, %v11530_v8 }
 0x8ae   :  { %v11590_v26 = vcombine.low %v11561_v52, %v11562_v23  ;;  %v11341_v54 = vpop.f32.mrf.mxu1  ;;  %11609 = vst [vmem:[#allocation2 + $0x30] sm:$0xff] %v11593_v60 }
 0x8b0   :  { %11606 = vst [vmem:[#allocation2 + $0x18] sm:$0xff] %v11590_v26 }
 0x8b8   :  { %v11418_v33 = vpop.f32.mrf.mxu1 }
 0x8b9   :  { %v11419_v36 = vadd.f32 %v11418_v33, %v19903_v40 }
 0x8ba   :  { %v11420_v37 = vpop.f32.mrf.mxu1 }
 0x8bb   :  { %v11421_v49 = vadd.f32 %v11420_v37, %v19903_v40  ;;  %v11565_v38 = vsel %vm2453_vm13, %v11419_v36, %v11533_v20 }
 0x8bc   :  { %v11422_v44 = vpop.f32.mrf.mxu1 }
 0x8bd   :  { %v11566_v7 = vsel %vm2453_vm13, %v11421_v49, %v11534_v18 }
 0x8be   :  { %v11592_v30 = vcombine.low %v11565_v38, %v11566_v7  ;;  %v11423_v47 = vpop.f32.mrf.mxu1 }
 0x8c0   :  { %11608 = vst [vmem:[#allocation2 + $0x28] sm:$0xff] %v11592_v30 }
 0x8c8   :  { %v11500_v28 = vpop.f32.mrf.mxu1 }
 0x8c9   :  { %v11501_v57 = vadd.f32 %v11500_v28, %v19903_v40 }
 0x8ca   :  { %v11502_v2 = vpop.f32.mrf.mxu1 }
 0x8cb   :  { %v11503_v14 = vadd.f32 %v11502_v2, %v19903_v40  ;;  %v11569_v48 = vsel %vm2453_vm13, %v11501_v57, %v11537_v59 }
 0x8cc   :  { %v11504_v62 = vpop.f32.mrf.mxu1 }
 0x8cd   :  { %v11570_v12 = vsel %vm2453_vm13, %v11503_v14, %v11538_v16 }
 0x8ce   :  { %v11594_v22 = vcombine.low %v11569_v48, %v11570_v12  ;;  %v11505_v10 = vpop.f32.mrf.mxu1 }
 0x8d0   :  { %11610 = vst [vmem:[#allocation2 + $0x38] sm:$0xff] %v11594_v22 }
 0x8d1   :  { %12318 = shalt.err (!%p12315_p4)
}
 0x8d2   :  { %11620 = dma.vmem_to_hbm [thread:$0]  %s11618_s1, 1024, %s19986_s18, [#allocation3]  }
 0x8d3   :  { %12327 = dma.done.wait [#allocation3], 1024  }
 0x8d4   :  { %12328 = vsyncadd [#allocation3], 4294966272 }
 0x8d5   :  { %11624 = vsyncpa [#allocation3], 1 }

</bundles_post_ra>
